<compile_context>
chip_gen: v7x
topology: tpu7x:2x2x1
jax: 0.10.0
libtpu: 0.0.40
codegen_flags: <defaults>
</compile_context>

<pallas_src>
import functools

import jax
import jax.numpy as jnp
from jax.experimental import pallas as pl
from jax.experimental.pallas import tpu as pltpu


def _round_up(x, m):
    return -(-x // m) * m


# ---------------------------------------------------------------------------
# Pallas kernel: the whole forward pass for one packed super-graph per grid step
# ---------------------------------------------------------------------------
def _gnn_kernel(x_ref, ahat_ref, pool_ref, p_ref, out_ref, *, dims):
    f32 = jnp.float32
    bf16 = jnp.bfloat16
    cin, hid, cout = dims["cin"], dims["hid"], dims["cout"]
    r_w1, r_w2, r_gat = dims["r_w1"], dims["r_w2"], dims["r_gat"]
    r_wfc, r_b = dims["r_wfc"], dims["r_b"]

    xb = x_ref[...]                              # [N', Cin] bf16
    ahat_b = ahat_ref[...]                       # [N', N']  bf16, block-diag D^-1/2 (A+I) D^-1/2
    # Neighborhood mask (incl. self-loops). Block-diagonal => packed graphs never mix.
    mask = (ahat_b > 0).astype(f32)

    # ---- unpack the packed bf16 parameter slab (static slices of one loaded tile) ----
    P = p_ref[...]                               # [rows_pad, 128] bf16, tiny, DMA'd once
    w1 = P[r_w1:r_w1 + cin, 0:hid]               # [Cin, H]
    w2 = P[r_w2:r_w2 + hid, 0:hid]               # [H, H]
    wgv = P[r_gat:r_gat + hid, 0:2 * hid + 4]    # [H, 2H+4]  both GAT heads + 4 score cols fused
    wfc = P[r_wfc:r_wfc + hid, 0:cout]           # [H, Cout]
    b1 = P[r_b + 0:r_b + 1, 0:hid].astype(f32)   # [1, H]
    b2 = P[r_b + 1:r_b + 2, 0:hid].astype(f32)
    bg = P[r_b + 2:r_b + 3, 0:hid].astype(f32)
    bfc = P[r_b + 3:r_b + 4, 0:cout].astype(f32)

    # ---- GCNConv 1 + ReLU :  relu( (Ahat @ x) @ W1 + b1 )   (Cin << H) ----
    z = jnp.dot(ahat_b, xb, preferred_element_type=f32)                     # [N', Cin]
    h = jnp.dot(z.astype(bf16), w1, preferred_element_type=f32) + b1
    h = jnp.maximum(h, 0.0)

    # ---- GCNConv 2 + ReLU :  relu( Ahat @ (h @ W2) + b2 ) ----
    h = jnp.dot(h.astype(bf16), w2, preferred_element_type=f32)
    h = jnp.dot(ahat_b, h.astype(bf16), preferred_element_type=f32) + b2
    h = jnp.maximum(h, 0.0)                                                 # [N', H] f32

    # ---- GATConv, heads=2, concat=False (average heads) ----
    hb = h.astype(bf16)
    proj = jnp.dot(hb, wgv, preferred_element_type=f32)                     # [N', 2H+4] one matmul
    hh_all = proj[:, 0:2 * hid].astype(bf16)                                # [N', 2H]  both heads' Wh
    scores = proj[:, 2 * hid:2 * hid + 4]                                   # (v_src0, v_dst0, v_src1, v_dst1)

    acc = jnp.zeros((h.shape[0], hid), f32)
    for head in range(2):                                                   # static unroll
        hh = hh_all[:, head * hid:(head + 1) * hid]                         # [N', H] bf16
        s_src = scores[:, 2 * head:2 * head + 1]                            # [N', 1]  a_src . Wh_j
        s_dst = scores[:, 2 * head + 1:2 * head + 2]                        # [N', 1]  a_dst . Wh_i
        # e[i, j] = LeakyReLU_{0.2}( a_dst . Wh_i + a_src . Wh_j )   (edge j -> i)
        e = s_dst + s_src.T                                                 # [N', N']
        e = jnp.where(e > 0, e, 0.2 * e)
        # Row max over the UNMASKED e: safe (only shifts the exponent); masking before the
        # sum keeps the normalization exact. Every row has a self-loop => denominator > 0.
        p = jnp.exp(e - jnp.max(e, axis=-1, keepdims=True)) * mask
        inv = pl.reciprocal(jnp.sum(p, axis=-1, keepdims=True), approx=True)
        att = p * inv                                                       # softmax over sources j
        acc = acc + jnp.dot(att.astype(bf16), hh, preferred_element_type=f32)
    h = acc * 0.5 + bg                                                      # mean over 2 heads + bias

    # ---- global_mean_pool ([GP*B, N'] @ [N', H]) + fc ----
    pooled = jnp.dot(pool_ref[...], h.astype(bf16), preferred_element_type=f32)   # [GP*B, H]
    out_ref[...] = jnp.dot(pooled.astype(bf16), wfc, preferred_element_type=f32) + bfc


# ---------------------------------------------------------------------------
# Parameter packing: one bf16 slab, GAT projection + score vectors fused
# ---------------------------------------------------------------------------
def _pack_params(params, cin, hid, cout):
    lane = 128                                   # pad lane dim to one full vreg lane width
    assert 2 * hid + 4 <= lane
    r_w1 = 0
    r_w2 = _round_up(r_w1 + cin, 8)
    r_gat = _round_up(r_w2 + hid, 8)
    r_wfc = _round_up(r_gat + hid, 8)
    r_b = _round_up(r_wfc + hid, 8)
    rows_pad = _round_up(r_b + 4, 8)

    wg0, wg1 = params["wg"][0], params["wg"][1]
    wg2 = jnp.concatenate([wg0, wg1], axis=1)                               # [H, 2H]
    # s = (h @ wg) @ a  ==  h @ (wg @ a): fold the attention vectors into the weights.
    vsc = jnp.stack([wg0 @ params["asrc"][0], wg0 @ params["adst"][0],
                     wg1 @ params["asrc"][1], wg1 @ params["adst"][1]], axis=1)  # [H, 4]
    gat = jnp.concatenate([wg2, vsc], axis=1)                               # [H, 2H+4] fused RHS

    buf = jnp.zeros((rows_pad, lane), jnp.float32)
    buf = buf.at[r_w1:r_w1 + cin, 0:hid].set(params["w1"])
    buf = buf.at[r_w2:r_w2 + hid, 0:hid].set(params["w2"])
    buf = buf.at[r_gat:r_gat + hid, 0:2 * hid + 4].set(gat)
    buf = buf.at[r_wfc:r_wfc + hid, 0:cout].set(params["wfc"])
    buf = buf.at[r_b + 0, 0:hid].set(params["b1"][0])
    buf = buf.at[r_b + 1, 0:hid].set(params["b2"][0])
    buf = buf.at[r_b + 2, 0:hid].set(params["bg"][0])
    buf = buf.at[r_b + 3, 0:cout].set(params["bfc"][0])
    offsets = dict(r_w1=r_w1, r_w2=r_w2, r_gat=r_gat, r_wfc=r_wfc, r_b=r_b)
    return buf.astype(jnp.bfloat16), offsets


# ---------------------------------------------------------------------------
# Block-diagonal graph packing (plain-JAX glue)
# ---------------------------------------------------------------------------
def _block_diag(blocks):
    """[G, R, C] -> [G*R, G*C] block-diagonal."""
    g, r, c = blocks.shape
    eye = jnp.eye(g, dtype=blocks.dtype)
    return jnp.einsum('gij,gh->gihj', blocks, eye).reshape(g * r, g * c)


def pack_graphs(x, ahat, pool, graphs_per_step):
    """Pack `graphs_per_step` dense mini-batches block-diagonally into one super-graph per
    grid step so the kernel runs at full vreg / MXU width. Padded (empty) graphs get an
    identity adjacency (self-loops) so the GAT softmax denominator is never zero."""
    gt, n, cin = x.shape
    b = pool.shape[1]
    gp = graphs_per_step
    pad = (-gt) % gp
    if pad:
        x = jnp.concatenate([x, jnp.zeros((pad, n, cin), x.dtype)], 0)
        ahat = jnp.concatenate(
            [ahat, jnp.tile(jnp.eye(n, dtype=ahat.dtype)[None], (pad, 1, 1))], 0)
        pool = jnp.concatenate([pool, jnp.zeros((pad, b, n), pool.dtype)], 0)
    steps = (gt + pad) // gp
    xs = x.reshape(steps, gp * n, cin)
    ah = jax.vmap(_block_diag)(ahat.reshape(steps, gp, n, n))
    po = jax.vmap(_block_diag)(pool.reshape(steps, gp, b, n))
    # bf16 HBM storage: halves the dominant N'^2 DMA and removes the in-kernel cast.
    return (xs.astype(jnp.bfloat16), ah.astype(jnp.bfloat16), po.astype(jnp.bfloat16),
            steps, pad)


# ---------------------------------------------------------------------------
# Wrapper: pack params + graphs, run a gridded, pipelined pallas_call
# ---------------------------------------------------------------------------
def gnn_forward(x, ahat, pool, params, *, cin, hid, cout, graphs_per_step=16):
    gt, n, _ = ahat.shape
    b = pool.shape[1]
    pbuf, offsets = _pack_params(params, cin, hid, cout)
    xs, ah, po, steps, _ = pack_graphs(x, ahat, pool, graphs_per_step)
    np_nodes = graphs_per_step * n               # packed node count N'
    nb_rows = graphs_per_step * b                # packed graph-output rows

    dims = dict(cin=cin, hid=hid, cout=cout, **offsets)
    kernel = functools.partial(_gnn_kernel, dims=dims)
    out = pl.pallas_call(
        kernel,
        out_shape=jax.ShapeDtypeStruct((steps, nb_rows, cout), jnp.float32),
        grid_spec=pltpu.PrefetchScalarGridSpec(
            num_scalar_prefetch=0,
            grid=(steps,),
            in_specs=[
                pl.BlockSpec((None, np_nodes, cin), lambda g: (g, 0, 0)),        # x    bf16
                pl.BlockSpec((None, np_nodes, np_nodes), lambda g: (g, 0, 0)),   # ahat bf16
                pl.BlockSpec((None, nb_rows, np_nodes), lambda g: (g, 0, 0)),    # pool bf16
                pl.BlockSpec(pbuf.shape, lambda g: (0, 0)),                      # params (constant)
            ],
            out_specs=pl.BlockSpec((None, nb_rows, cout), lambda g: (g, 0, 0)),
        ),
        compiler_params=pltpu.CompilerParams(
            dimension_semantics=("parallel",),   # shard packed-graph steps across TCs (v7x)
            vmem_limit_bytes=32 * 1024 * 1024,
        ),
    )(xs, ah, po, pbuf)
    out = out.reshape(steps * graphs_per_step, b, cout)
    return out[:gt]                               # drop padded graphs


# ---------------------------------------------------------------------------
# Plain-JAX glue: dense graph operators from edge_index / batch
# ---------------------------------------------------------------------------
def build_adjacency(src, dst, num_nodes):
    a = jnp.zeros((num_nodes, num_nodes), jnp.float32)
    a = a.at[dst, src].set(1.0)                                      # A[i, j] = 1 if edge j -> i
    a = jnp.maximum(a, jnp.eye(num_nodes, dtype=jnp.float32))        # add self-loops
    deg = jnp.sum(a, axis=1)
    d_inv_sqrt = jnp.where(deg > 0, 1.0 / jnp.sqrt(deg), 0.0)
    return d_inv_sqrt[:, None] * a * d_inv_sqrt[None, :]             # D^-1/2 (A+I) D^-1/2


def build_pool(batch, num_graphs):
    one_hot = (batch[None, :] == jnp.arange(num_graphs)[:, None]).astype(jnp.float32)
    counts = jnp.maximum(jnp.sum(one_hot, axis=1, keepdims=True), 1.0)
    return one_hot / counts                                          # [B, N] mean-pool matrix


def init_params(key, cin, hidden, cout):
    ks = jax.random.split(key, 8)

    def glorot(k, shape):
        fan_in = shape[0]
        return jax.random.normal(k, shape, jnp.float32) / jnp.sqrt(jnp.float32(fan_in))

    return {
        "w1": glorot(ks[0], (cin, hidden)),
        "b1": jnp.zeros((1, hidden), jnp.float32),
        "w2": glorot(ks[1], (hidden, hidden)),
        "b2": jnp.zeros((1, hidden), jnp.float32),
        "wg": jnp.stack([glorot(ks[2], (hidden, hidden)),
                         glorot(ks[3], (hidden, hidden))], axis=0),   # [2, H, H]
        "asrc": glorot(ks[4], (2, hidden)) * 0.1,                     # [2, H]
        "adst": glorot(ks[5], (2, hidden)) * 0.1,                     # [2, H]
        "bg": jnp.zeros((1, hidden), jnp.float32),
        "wfc": glorot(ks[6], (hidden, cout)),
        "bfc": jnp.zeros((1, cout), jnp.float32),
    }


if __name__ == "__main__":
    # 32 mini-batches of 16 nodes, packed 16-per-step -> N' = 256 nodes per kernel step
    # (matches the v6e/v7x 256-wide MXU; use graphs_per_step=8 -> N'=128 on v5e),
    # grid=(2,) so both v7x TensorCores get a step.
    GT, N, CIN, HID, COUT, B, E = 32, 16, 4, 32, 8, 2, 32
    GP = 16

    key = jax.random.PRNGKey(0)
    kx, ke, kp = jax.random.split(key, 3)

    x = jax.random.normal(kx, (GT, N, CIN), jnp.float32)

    # random directed edges per mini-batch, then symmetrize (undirected, no self-loops)
    src = jax.random.randint(ke, (GT, E), 0, N)
    dst = (src + 1 + jax.random.randint(kp, (GT, E), 0, N - 1)) % N
    edge_src = jnp.concatenate([src, dst], axis=1)                    # [GT, 2E]
    edge_dst = jnp.concatenate([dst, src], axis=1)                    # [GT, 2E]

    batch = jnp.concatenate([jnp.zeros((N // 2,), jnp.int32),
                             jnp.ones((N // 2,), jnp.int32)])         # 2 graphs, 8 nodes each

    ahat = jax.vmap(lambda s, d: build_adjacency(s, d, N))(edge_src, edge_dst)   # [GT, N, N]
    pool = jnp.tile(build_pool(batch, B)[None], (GT, 1, 1))                      # [GT, B, N]

    params = init_params(jax.random.PRNGKey(42), CIN, HID, COUT)

    out = gnn_forward(x, ahat, pool, params, cin=CIN, hid=HID, cout=COUT,
                      graphs_per_step=GP)
    jax.block_until_ready(out)
    assert out.shape == (GT, B, COUT)
    assert bool(jnp.all(jnp.isfinite(out)))
    print("KERNEL_OK")
</pallas_src>

<mosaic_0001>
module attributes {stable_mosaic.version = 11 : i64} {
  func.func @_gnn_kernel(%arg0: i32, %arg1: memref<1x256x4xbf16, #tpu.memory_space<vmem>>, %arg2: memref<1x256x256xbf16, #tpu.memory_space<vmem>>, %arg3: memref<1x32x256xbf16, #tpu.memory_space<vmem>>, %arg4: memref<112x128xbf16, #tpu.memory_space<vmem>>, %arg5: memref<1x32x8xf32, #tpu.memory_space<vmem>>) attributes {dimension_semantics = [#tpu.dimension_semantics<parallel>], iteration_bounds = array<i64: 2>, scalar_prefetch = 0 : i64, scratch_operands = 0 : i64, tpu.core_type = #tpu.core_type<tc>, window_params = [{transform_indices = @transform_0, window_bounds = array<i64: 1, 256, 4>}, {transform_indices = @transform_1, window_bounds = array<i64: 1, 256, 256>}, {transform_indices = @transform_2, window_bounds = array<i64: 1, 32, 256>}, {pipeline_mode = #tpu.pipeline_mode<synchronous>, transform_indices = @transform_3, window_bounds = array<i64: 112, 128>}, {transform_indices = @transform_4, window_bounds = array<i64: 1, 32, 8>}]} {
    %c0 = arith.constant 0 : index
    %c0_0 = arith.constant 0 : index
    %c0_1 = arith.constant 0 : index
    %0 = vector.load %arg1[%c0, %c0_0, %c0_1] : memref<1x256x4xbf16, #tpu.memory_space<vmem>>, vector<1x256x4xbf16>
    %1 = vector.shape_cast %0 : vector<1x256x4xbf16> to vector<256x4xbf16>
    %c0_2 = arith.constant 0 : index
    %c0_3 = arith.constant 0 : index
    %c0_4 = arith.constant 0 : index
    %2 = vector.load %arg2[%c0_2, %c0_3, %c0_4] : memref<1x256x256xbf16, #tpu.memory_space<vmem>>, vector<1x256x256xbf16>
    %3 = vector.shape_cast %2 : vector<1x256x256xbf16> to vector<256x256xbf16>
    %cst = arith.constant 0.000000e+00 : bf16
    %4 = vector.broadcast %cst : bf16 to vector<256x256xbf16>
    %5 = arith.cmpf ogt, %3, %4 : vector<256x256xbf16>
    %6 = arith.extui %5 : vector<256x256xi1> to vector<256x256xi32>
    %7 = arith.sitofp %6 : vector<256x256xi32> to vector<256x256xf32>
    %c0_5 = arith.constant 0 : index
    %c0_6 = arith.constant 0 : index
    %8 = vector.load %arg4[%c0_5, %c0_6] : memref<112x128xbf16, #tpu.memory_space<vmem>>, vector<112x128xbf16>
    %9 = vector.extract_strided_slice %8 {offsets = [0, 0], sizes = [4, 32], strides = [1, 1]} : vector<112x128xbf16> to vector<4x32xbf16>
    %10 = vector.extract_strided_slice %8 {offsets = [8, 0], sizes = [32, 32], strides = [1, 1]} : vector<112x128xbf16> to vector<32x32xbf16>
    %11 = vector.extract_strided_slice %8 {offsets = [40, 0], sizes = [32, 68], strides = [1, 1]} : vector<112x128xbf16> to vector<32x68xbf16>
    %12 = vector.extract_strided_slice %8 {offsets = [72, 0], sizes = [32, 8], strides = [1, 1]} : vector<112x128xbf16> to vector<32x8xbf16>
    %13 = vector.extract_strided_slice %8 {offsets = [104, 0], sizes = [1, 32], strides = [1, 1]} : vector<112x128xbf16> to vector<1x32xbf16>
    %14 = arith.extf %13 : vector<1x32xbf16> to vector<1x32xf32>
    %15 = vector.extract_strided_slice %8 {offsets = [105, 0], sizes = [1, 32], strides = [1, 1]} : vector<112x128xbf16> to vector<1x32xbf16>
    %16 = arith.extf %15 : vector<1x32xbf16> to vector<1x32xf32>
    %17 = vector.extract_strided_slice %8 {offsets = [106, 0], sizes = [1, 32], strides = [1, 1]} : vector<112x128xbf16> to vector<1x32xbf16>
    %18 = arith.extf %17 : vector<1x32xbf16> to vector<1x32xf32>
    %19 = vector.extract_strided_slice %8 {offsets = [107, 0], sizes = [1, 8], strides = [1, 1]} : vector<112x128xbf16> to vector<1x8xbf16>
    %20 = arith.extf %19 : vector<1x8xbf16> to vector<1x8xf32>
    %cst_7 = arith.constant dense<0.000000e+00> : vector<256x4xf32>
    %21 = tpu.matmul %3, %1, %cst_7 {dimension_numbers = #tpu.dot_dimension_numbers<[1], [0], [0], [1], [0, 0, 1, 1], [], []>} : vector<256x256xbf16>, vector<256x4xbf16>, vector<256x4xf32> -> vector<256x4xf32>
    %22 = arith.truncf %21 : vector<256x4xf32> to vector<256x4xbf16>
    %cst_8 = arith.constant dense<0.000000e+00> : vector<256x32xf32>
    %23 = tpu.matmul %22, %9, %cst_8 {dimension_numbers = #tpu.dot_dimension_numbers<[1], [0], [0], [1], [0, 0, 1, 1], [], []>} : vector<256x4xbf16>, vector<4x32xbf16>, vector<256x32xf32> -> vector<256x32xf32>
    %24 = vector.broadcast %14 : vector<1x32xf32> to vector<256x32xf32>
    %25 = arith.addf %23, %24 : vector<256x32xf32>
    %cst_9 = arith.constant 0.000000e+00 : f32
    %26 = vector.broadcast %cst_9 : f32 to vector<256x32xf32>
    %27 = arith.maximumf %25, %26 : vector<256x32xf32>
    %28 = arith.truncf %27 : vector<256x32xf32> to vector<256x32xbf16>
    %cst_10 = arith.constant dense<0.000000e+00> : vector<256x32xf32>
    %29 = tpu.matmul %28, %10, %cst_10 {dimension_numbers = #tpu.dot_dimension_numbers<[1], [0], [0], [1], [0, 0, 1, 1], [], []>} : vector<256x32xbf16>, vector<32x32xbf16>, vector<256x32xf32> -> vector<256x32xf32>
    %30 = arith.truncf %29 : vector<256x32xf32> to vector<256x32xbf16>
    %cst_11 = arith.constant dense<0.000000e+00> : vector<256x32xf32>
    %31 = tpu.matmul %3, %30, %cst_11 {dimension_numbers = #tpu.dot_dimension_numbers<[1], [0], [0], [1], [0, 0, 1, 1], [], []>} : vector<256x256xbf16>, vector<256x32xbf16>, vector<256x32xf32> -> vector<256x32xf32>
    %32 = vector.broadcast %16 : vector<1x32xf32> to vector<256x32xf32>
    %33 = arith.addf %31, %32 : vector<256x32xf32>
    %cst_12 = arith.constant 0.000000e+00 : f32
    %34 = vector.broadcast %cst_12 : f32 to vector<256x32xf32>
    %35 = arith.maximumf %33, %34 : vector<256x32xf32>
    %36 = arith.truncf %35 : vector<256x32xf32> to vector<256x32xbf16>
    %cst_13 = arith.constant dense<0.000000e+00> : vector<256x68xf32>
    %37 = tpu.matmul %36, %11, %cst_13 {dimension_numbers = #tpu.dot_dimension_numbers<[1], [0], [0], [1], [0, 0, 1, 1], [], []>} : vector<256x32xbf16>, vector<32x68xbf16>, vector<256x68xf32> -> vector<256x68xf32>
    %38 = vector.extract_strided_slice %37 {offsets = [0, 0], sizes = [256, 64], strides = [1, 1]} : vector<256x68xf32> to vector<256x64xf32>
    %39 = arith.truncf %38 : vector<256x64xf32> to vector<256x64xbf16>
    %40 = vector.extract_strided_slice %37 {offsets = [0, 64], sizes = [256, 4], strides = [1, 1]} : vector<256x68xf32> to vector<256x4xf32>
    %cst_14 = arith.constant 0.000000e+00 : f32
    %41 = vector.broadcast %cst_14 : f32 to vector<256x32xf32>
    %42 = vector.extract_strided_slice %39 {offsets = [0, 0], sizes = [256, 32], strides = [1, 1]} : vector<256x64xbf16> to vector<256x32xbf16>
    %43 = vector.extract_strided_slice %40 {offsets = [0, 0], sizes = [256, 1], strides = [1, 1]} : vector<256x4xf32> to vector<256x1xf32>
    %44 = vector.extract_strided_slice %40 {offsets = [0, 1], sizes = [256, 1], strides = [1, 1]} : vector<256x4xf32> to vector<256x1xf32>
    %45 = tpu.transpose %43, [1, 0] : vector<256x1xf32> -> vector<1x256xf32>
    %46 = vector.broadcast %44 : vector<256x1xf32> to vector<256x256xf32>
    %47 = vector.broadcast %45 : vector<1x256xf32> to vector<256x256xf32>
    %48 = arith.addf %46, %47 : vector<256x256xf32>
    %cst_15 = arith.constant 0.000000e+00 : f32
    %49 = vector.broadcast %cst_15 : f32 to vector<256x256xf32>
    %50 = arith.cmpf ogt, %48, %49 : vector<256x256xf32>
    %cst_16 = arith.constant 2.000000e-01 : f32
    %51 = vector.broadcast %cst_16 : f32 to vector<256x256xf32>
    %52 = arith.mulf %51, %48 : vector<256x256xf32>
    %53 = arith.select %50, %48, %52 : vector<256x256xi1>, vector<256x256xf32>
    %cst_17 = arith.constant dense<0xFF800000> : vector<256xf32>
    %54 = vector.multi_reduction <maximumf>, %53, %cst_17 [1] : vector<256x256xf32> to vector<256xf32>
    %55 = vector.shape_cast %54 : vector<256xf32> to vector<256x1xf32>
    %56 = vector.broadcast %55 : vector<256x1xf32> to vector<256x256xf32>
    %57 = arith.subf %53, %56 : vector<256x256xf32>
    %58 = math.exp %57 : vector<256x256xf32>
    %59 = arith.mulf %58, %7 : vector<256x256xf32>
    %cst_18 = arith.constant dense<0.000000e+00> : vector<256xf32>
    %60 = vector.multi_reduction <add>, %59, %cst_18 [1] : vector<256x256xf32> to vector<256xf32>
    %61 = vector.shape_cast %60 : vector<256xf32> to vector<256x1xf32>
    %62 = tpu.reciprocal %61 {approx = true} : vector<256x1xf32> -> vector<256x1xf32>
    %63 = vector.broadcast %62 : vector<256x1xf32> to vector<256x256xf32>
    %64 = arith.mulf %59, %63 : vector<256x256xf32>
    %65 = arith.truncf %64 : vector<256x256xf32> to vector<256x256xbf16>
    %cst_19 = arith.constant dense<0.000000e+00> : vector<256x32xf32>
    %66 = tpu.matmul %65, %42, %cst_19 {dimension_numbers = #tpu.dot_dimension_numbers<[1], [0], [0], [1], [0, 0, 1, 1], [], []>} : vector<256x256xbf16>, vector<256x32xbf16>, vector<256x32xf32> -> vector<256x32xf32>
    %67 = arith.addf %41, %66 : vector<256x32xf32>
    %68 = vector.extract_strided_slice %39 {offsets = [0, 32], sizes = [256, 32], strides = [1, 1]} : vector<256x64xbf16> to vector<256x32xbf16>
    %69 = vector.extract_strided_slice %40 {offsets = [0, 2], sizes = [256, 1], strides = [1, 1]} : vector<256x4xf32> to vector<256x1xf32>
    %70 = vector.extract_strided_slice %40 {offsets = [0, 3], sizes = [256, 1], strides = [1, 1]} : vector<256x4xf32> to vector<256x1xf32>
    %71 = tpu.transpose %69, [1, 0] : vector<256x1xf32> -> vector<1x256xf32>
    %72 = vector.broadcast %70 : vector<256x1xf32> to vector<256x256xf32>
    %73 = vector.broadcast %71 : vector<1x256xf32> to vector<256x256xf32>
    %74 = arith.addf %72, %73 : vector<256x256xf32>
    %cst_20 = arith.constant 0.000000e+00 : f32
    %75 = vector.broadcast %cst_20 : f32 to vector<256x256xf32>
    %76 = arith.cmpf ogt, %74, %75 : vector<256x256xf32>
    %cst_21 = arith.constant 2.000000e-01 : f32
    %77 = vector.broadcast %cst_21 : f32 to vector<256x256xf32>
    %78 = arith.mulf %77, %74 : vector<256x256xf32>
    %79 = arith.select %76, %74, %78 : vector<256x256xi1>, vector<256x256xf32>
    %cst_22 = arith.constant dense<0xFF800000> : vector<256xf32>
    %80 = vector.multi_reduction <maximumf>, %79, %cst_22 [1] : vector<256x256xf32> to vector<256xf32>
    %81 = vector.shape_cast %80 : vector<256xf32> to vector<256x1xf32>
    %82 = vector.broadcast %81 : vector<256x1xf32> to vector<256x256xf32>
    %83 = arith.subf %79, %82 : vector<256x256xf32>
    %84 = math.exp %83 : vector<256x256xf32>
    %85 = arith.mulf %84, %7 : vector<256x256xf32>
    %cst_23 = arith.constant dense<0.000000e+00> : vector<256xf32>
    %86 = vector.multi_reduction <add>, %85, %cst_23 [1] : vector<256x256xf32> to vector<256xf32>
    %87 = vector.shape_cast %86 : vector<256xf32> to vector<256x1xf32>
    %88 = tpu.reciprocal %87 {approx = true} : vector<256x1xf32> -> vector<256x1xf32>
    %89 = vector.broadcast %88 : vector<256x1xf32> to vector<256x256xf32>
    %90 = arith.mulf %85, %89 : vector<256x256xf32>
    %91 = arith.truncf %90 : vector<256x256xf32> to vector<256x256xbf16>
    %cst_24 = arith.constant dense<0.000000e+00> : vector<256x32xf32>
    %92 = tpu.matmul %91, %68, %cst_24 {dimension_numbers = #tpu.dot_dimension_numbers<[1], [0], [0], [1], [0, 0, 1, 1], [], []>} : vector<256x256xbf16>, vector<256x32xbf16>, vector<256x32xf32> -> vector<256x32xf32>
    %93 = arith.addf %67, %92 : vector<256x32xf32>
    %cst_25 = arith.constant 5.000000e-01 : f32
    %94 = vector.broadcast %cst_25 : f32 to vector<256x32xf32>
    %95 = arith.mulf %93, %94 : vector<256x32xf32>
    %96 = vector.broadcast %18 : vector<1x32xf32> to vector<256x32xf32>
    %97 = arith.addf %95, %96 : vector<256x32xf32>
    %c0_26 = arith.constant 0 : index
    %c0_27 = arith.constant 0 : index
    %c0_28 = arith.constant 0 : index
    %98 = vector.load %arg3[%c0_26, %c0_27, %c0_28] : memref<1x32x256xbf16, #tpu.memory_space<vmem>>, vector<1x32x256xbf16>
    %99 = vector.shape_cast %98 : vector<1x32x256xbf16> to vector<32x256xbf16>
    %100 = arith.truncf %97 : vector<256x32xf32> to vector<256x32xbf16>
    %cst_29 = arith.constant dense<0.000000e+00> : vector<32x32xf32>
    %101 = tpu.matmul %99, %100, %cst_29 {dimension_numbers = #tpu.dot_dimension_numbers<[1], [0], [0], [1], [0, 0, 1, 1], [], []>} : vector<32x256xbf16>, vector<256x32xbf16>, vector<32x32xf32> -> vector<32x32xf32>
    %102 = arith.truncf %101 : vector<32x32xf32> to vector<32x32xbf16>
    %cst_30 = arith.constant dense<0.000000e+00> : vector<32x8xf32>
    %103 = tpu.matmul %102, %12, %cst_30 {dimension_numbers = #tpu.dot_dimension_numbers<[1], [0], [0], [1], [0, 0, 1, 1], [], []>} : vector<32x32xbf16>, vector<32x8xbf16>, vector<32x8xf32> -> vector<32x8xf32>
    %104 = vector.broadcast %20 : vector<1x8xf32> to vector<32x8xf32>
    %105 = arith.addf %103, %104 : vector<32x8xf32>
    %c0_31 = arith.constant 0 : index
    %c0_32 = arith.constant 0 : index
    %c0_33 = arith.constant 0 : index
    %106 = vector.load %arg5[%c0_31, %c0_32, %c0_33] : memref<1x32x8xf32, #tpu.memory_space<vmem>>, vector<1x32x8xf32>
    %107 = vector.shape_cast %106 : vector<1x32x8xf32> to vector<32x8xf32>
    %108 = vector.shape_cast %105 : vector<32x8xf32> to vector<1x32x8xf32>
    tpu.vector_store %arg5[%c0_31, %c0_32, %c0_33], %108 {strides = array<i32>} : memref<1x32x8xf32, #tpu.memory_space<vmem>>, vector<1x32x8xf32>,
    return
  }
  func.func @transform_0(%arg0: i32) -> (i32, i32, i32) {
    %c0_i32 = arith.constant 0 : i32
    %c0_i32_0 = arith.constant 0 : i32
    %c0_i32_1 = arith.constant 0 : i32
    return %arg0, %c0_i32, %c0_i32_0 : i32, i32, i32
  }
  func.func @transform_1(%arg0: i32) -> (i32, i32, i32) {
    %c0_i32 = arith.constant 0 : i32
    %c0_i32_0 = arith.constant 0 : i32
    %c0_i32_1 = arith.constant 0 : i32
    return %arg0, %c0_i32, %c0_i32_0 : i32, i32, i32
  }
  func.func @transform_2(%arg0: i32) -> (i32, i32, i32) {
    %c0_i32 = arith.constant 0 : i32
    %c0_i32_0 = arith.constant 0 : i32
    %c0_i32_1 = arith.constant 0 : i32
    return %arg0, %c0_i32, %c0_i32_0 : i32, i32, i32
  }
  func.func @transform_3(%arg0: i32) -> (i32, i32) {
    %c0_i32 = arith.constant 0 : i32
    %c0_i32_0 = arith.constant 0 : i32
    %c0_i32_1 = arith.constant 0 : i32
    return %c0_i32, %c0_i32_0 : i32, i32
  }
  func.func @transform_4(%arg0: i32) -> (i32, i32, i32) {
    %c0_i32 = arith.constant 0 : i32
    %c0_i32_0 = arith.constant 0 : i32
    %c0_i32_1 = arith.constant 0 : i32
    return %arg0, %c0_i32, %c0_i32_0 : i32, i32, i32
  }
}

</mosaic_0001>

<bundles_post_ra>
// kernel: tpu_custom_call.1
= control target key start
LH: loop header
LB: loop body
LE: loop exit
PB: predicated region body
PF: predicated region fallthrough
CT: control target
= control target key end

     0   :  { %9 = vsyncpa [#allocation3], 0  ;;  %s10277_s0 = inlined_call_operand.vmem [shape: bf16[2,256,4], index: 0, kind: input, shape index: {}]   ;;  %s10278_s1 = inlined_call_operand.hbm [shape: bf16[2,256,256], index: 1, kind: input, shape index: {}]   ;;  %s10279_s2 = inlined_call_operand.vmem [shape: bf16[2,32,256], index: 2, kind: input, shape index: {}]   ;;  %s10280_s3 = inlined_call_operand.vmem [shape: bf16[112,128], index: 3, kind: input, shape index: {}]   ;;  %s10281_s4 = inlined_call_operand.vmem [shape: f32[2,32,8], index: 4, kind: output, shape index: {}]  }
   0x1   :  { %11 = vsyncpa [#allocation3 + $0x1], 0  ;;  %s6546_s15 = smov 0   ;;  %s6548_s16 = smov 0  }
   0x2   :  { %s6550_s17 = smov 0   ;;  %s6552_s18 = smov 0  }
   0x3 LB: > { %s6565_s19 = sadd.s32 4294967295, %s6509_s18   ;;  %s6568_s20 = sadd.s32 1, %s6509_s18   ;;  %s6509_s18 = sphi %s6552_s18, %s11275_s18   ;;  %s6505_s17 = sphi %s6550_s17, %s11274_s17   ;;  %s6501_s16 = sphi %s6548_s16, %s11273_s16   ;;  %s6497_s15 = sphi %s6546_s15, %s11272_s15  }
   0x4   : > { %s47_s21 = ssub.s32 %s6509_s18, %s6568_s20  ;;  %s50_s22 = sadd.s32 1, %s6505_s17 }
   0x5   : > { %p48_p0 = scmp.eq.s32.totalorder %s47_s21, 0  ;;  %p57_p1 = scmp.ne.s32.totalorder %s6505_s17, %s6501_s16 }
   0x6   : > { %p58_p2 = scmp.eq.s32.totalorder %s6509_s18, 0  ;;  %p63_p3 = scmp.ne.s32.totalorder %s6501_s16, %s6497_s15 }
   0x7   : > { %s6578_s23 = scalar_select %p48_p0, %s6505_s17, %s50_s22  }
   0x8   : > { %p59_p4 = por %p58_p2, %p57_p1  ;;  %p64_p5 = scmp.eq.s32.totalorder %s6565_s19, 0 }
   0x9   : > { %p5893_p6 = scmp.lt.s32.totalorder %s6509_s18, 2  ;;  %s171_s25 = sand.u32 1, %s6505_s17  }
   0xa   : > { %p6582_p7 = por %p64_p5, %p63_p3  ;;  %s5050_s26 = sshll.u32 %s171_s25, 8 }
   0xb   : > { %s5235_s27 = sshll.u32 %s6509_s18, 12  ;;  %s175_s5 = scalar_lea.vmem [#allocation2], %s5050_s26 }
   0xc   : > { %s6591_s30 = scalar_lea.hbm %s10278_s1, %s5235_s27  ;;  %s182_s6 = sshll.u32 %s175_s5, 4  ;;  %s6593_s6 = int_to_ptr.vmem [resolvable:$true] %s182_s6 }
   0xd   : > { %p6595_p8 = pnand %p5893_p6, %p59_p4  ;;  %s6600_s8 = scalar_lea.sflag [#allocation3], %s171_s25 }
   0xe   : > { %s6445_s9 = scalar_lea.hbm %s6591_s30, 4096  ;;  %s6450_s12 = scalar_lea.hbm %s10278_s1, 8192 }
   0xf   : > { %p6446_p10 = scmp.ne.s32.totalorder %s6591_s30, %s6445_s9  ;;  %p6447_p11 = pneg %p6595_p8 }
  0x10   : > { %p6451_p0 = scmp.lt.u32.totalorder %s6591_s30, %s10278_s1  ;;  %p6452_p1 = scmp.lt.u32.totalorder %s6450_s12, %s6445_s9 }
  0x11   : > { %p6448_p12 = pnand %p6447_p11, %p6446_p10  ;;  %p6454_p3 = scmp.lt.u32.totalorder %s6445_s9, %s6591_s30 }
  0x12   : > { %p6453_p2 = por %p6452_p1, %p6451_p0 }
  0x13   : > { %p6449_p13 = pneg %p6448_p12 }
  0x14   : > { %p6455_p4 = por %p6454_p3, %p6453_p2 }
  0x16   : > { %p6456_p5 = pnand %p6455_p4, %p6449_p13 }
  0x18   : > { %6459 = shalt.err (!%p6456_p5)
}
  0x19   : > { %s6460_s15 = scalar_lea.vmem %s6593_s6, 4096  ;;  %s6511_s21 = smov [#allocation2]  }
  0x1a   : > { %p6461_p6 = scmp.ne.s32.totalorder %s6593_s6, %s6460_s15  ;;  %s6465_s22 = sshll.u32 %s6511_s21, 4  ;;  %s6466_s22 = int_to_ptr.vmem [resolvable:$false] %s6465_s22 }
  0x1b   : > { %s6467_s25 = scalar_lea.vmem %s6466_s22, 8192  ;;  %p6468_p9 = scmp.lt.s32.totalorder %s6593_s6, %s6466_s22 }
  0x1c   : > { %p6463_p10 = pnand %p6461_p6, %p6447_p11  ;;  %p6469_p0 = scmp.lt.s32.totalorder %s6467_s25, %s6460_s15 }
  0x1e   : > { %p6464_p12 = pneg %p6463_p10  ;;  %p6470_p1 = por %p6469_p0, %p6468_p9 }
  0x20   : > { %p6471_p2 = pnand %p6470_p1, %p6464_p12 }
  0x22   : > { %6474 = shalt.err (!%p6471_p2)
}
  0x23   : > { %s6512_s26 = smov 128   ;;  %s6513_s27 = smov 8  }
  0x24   : > { %5892 = dma.hbm_to_vmem [thread:$0]  (!%p6595_p8), %s6591_s30, 4096, %s6593_s6, %s6600_s8, %s6512_s26, %s6512_s26, %s6513_s27  }
  0x25   : > { %p198_p11 = scmp.lt.s32.totalorder %s6509_s18, 3  ;;  %p10586_p13 = scmp.ge.s32.totalorder %s6509_s18, 1 }
  0x27   : > { %p199_p3 = pnand %p10586_p13, %p198_p11 }
  0x29   : > { %202 = sbr.rel (%p199_p3) target bundleno = 3045 (0xbe5), region = 36 }
  0x30   : > { %s204_s28 = sand.u32 1, %s6501_s16  }
  0x31   : > { %s5054_s29 = sshll.u32 %s204_s28, 8  ;;  %s205_s5 = scalar_lea.sflag [#allocation3], %s204_s28 }
  0x32   : > { %s6632_s9 = scalar_lea.vmem [#allocation2], %s5054_s29 }
  0x33   : > { %6492 = dma.done.wait (%p6582_p7), %s205_s5, 4096  }
  0x34   : > { %6494 = vsyncadd (%p6582_p7), %s205_s5, 4294963200  ;;  %p243_p9 = scmp.lt.s32.totalorder %s6565_s19, 1  ;;  %v293_v11 = vld [vmem:[%s6632_s9] sm:$0xff]  ;;  %v294_v12 = vld [vmem:[%s6632_s9 + $0x8] sm:$0xff]  ;;  %vm1146_vm0 = vcmask 1041408   ;;  %vm1097_vm1 = vcmask 31744  }
  0x35   : > { %v6661_v13 = vcombine.high %v293_v11, %v294_v12  ;;  %v295_v19 = vld [vmem:[%s6632_s9 + $0x10] sm:$0xff]  ;;  %v296_v20 = vld [vmem:[%s6632_s9 + $0x18] sm:$0xff]  ;;  %v6671_v21 = vcombine.low %v293_v11, %v294_v12  ;;  %v297_v23 = vld [vmem:[%s6632_s9 + $0x20] sm:$0xff]  ;;  %vm10473_vm2 = vcmask 261120   ;;  %s6516_s27 = smov 64   ;;  %s6517_s28 = smov 62  }
  0x36   : > { %s11277_s19 = smov (!%p243_p9, %s6565_s19), 1  ;;  %v6673_v22 = vcombine.high %v295_v19, %v296_v20  ;;  %v298_v24 = vld [vmem:[%s6632_s9 + $0x28] sm:$0xff]  ;;  %v6679_v25 = vcombine.low %v295_v19, %v296_v20  ;;  %v299_v27 = vld [vmem:[%s6632_s9 + $0x30] sm:$0xff]  ;;  %v300_v28 = vld [vmem:[%s6632_s9 + $0x38] sm:$0xff]  ;;  %s6518_s29 = smov 96  }
  0x37   : > { %s5236_s18 = sshll.u32 %s11277_s19, 7  ;;  %948 = vmatprep.mubr.bf16.mxu0 %v6661_v13  ;;  %v6681_v26 = vcombine.high %v297_v23, %v298_v24  ;;  %v6687_v29 = vcombine.low %v297_v23, %v298_v24  ;;  %v6689_v30 = vcombine.high %v299_v27, %v300_v28  ;;  %v301_v31 = vld [vmem:[%s6632_s9 + $0x40] sm:$0xff]  ;;  %v302_v32 = vld [vmem:[%s6632_s9 + $0x48] sm:$0xff]  ;;  %v6695_v33 = vcombine.low %v299_v27, %v300_v28  ;;  %v303_v35 = vld [vmem:[%s6632_s9 + $0x50] sm:$0xff]  ;;  %s5237_s5 = sshll.u32 %s11277_s19, 5 }
  0x38   : > { %s6646_s7 = scalar_lea.vmem %s10277_s0, %s5236_s18  ;;  %v6697_v34 = vcombine.high %v301_v31, %v302_v32  ;;  %v304_v36 = vld [vmem:[%s6632_s9 + $0x58] sm:$0xff]  ;;  %v6703_v37 = vcombine.low %v301_v31, %v302_v32  ;;  %v305_v39 = vld [vmem:[%s6632_s9 + $0x60] sm:$0xff]  ;;  %v306_v40 = vld [vmem:[%s6632_s9 + $0x68] sm:$0xff]  ;;  %s10163_s30 = scalar_lea.vmem %s10279_s2, %s5237_s5 }
  0x39   : > { %v5969_v0 = vld [vmem:[%s6646_s7 + $0x40] sm:$0xff]   ;;  %v5971_v2 = vld [vmem:[%s6646_s7 + $0x48] sm:$0xff]   ;;  %v5973_v4 = vld [vmem:[%s6646_s7 + $0x50] sm:$0xff]   ;;  %v6705_v38 = vcombine.high %v303_v35, %v304_v36  ;;  %v6711_v41 = vcombine.low %v303_v35, %v304_v36  ;;  %v6713_v42 = vcombine.high %v305_v39, %v306_v40  ;;  %v6719_v45 = vcombine.low %v305_v39, %v306_v40  ;;  %s257_s12 = scalar_lea.vmem %s10281_s4, %s5237_s5 }
  0x3a   : > { %v5970_v1 = vld [vmem:[%s6646_s7] sm:$0xff]   ;;  %5239 = vmatprep.subr.bf16.mxu0 %v5969_v0  ;;  %v5972_v3 = vld [vmem:[%s6646_s7 + $0x8] sm:$0xff]   ;;  %v5974_v5 = vld [vmem:[%s6646_s7 + $0x10] sm:$0xff]  }
  0x3b   : > { %5240 = vmatpush3.bf16.msra.mxu0 %v5970_v1  ;;  %v5975_v6 = vld [vmem:[%s6646_s7 + $0x58] sm:$0xff]   ;;  %v5977_v8 = vld [vmem:[%s6646_s7 + $0x60] sm:$0xff]   ;;  %v5979_v10 = vld [vmem:[%s6646_s7 + $0x68] sm:$0xff]  }
  0x3c   : > { %5241 = vmatprep.subr.bf16.mxu0 %v5971_v2  ;;  %v5976_v7 = vld [vmem:[%s6646_s7 + $0x18] sm:$0xff]   ;;  %v5978_v9 = vld [vmem:[%s6646_s7 + $0x20] sm:$0xff]   ;;  %v5980_v14 = vld [vmem:[%s6646_s7 + $0x28] sm:$0xff]  }
  0x3d   : > { %v5981_v15 = vld [vmem:[%s6646_s7 + $0x70] sm:$0xff]   ;;  %v5983_v17 = vld [vmem:[%s6646_s7 + $0x78] sm:$0xff]   ;;  %v309_v47 = vld [vmem:[%s6632_s9 + $0x80] sm:$0xff] }
  0x3e   : > { %v5982_v16 = vld [vmem:[%s6646_s7 + $0x30] sm:$0xff]   ;;  %v5984_v18 = vld [vmem:[%s6646_s7 + $0x38] sm:$0xff]   ;;  %v310_v48 = vld [vmem:[%s6632_s9 + $0x88] sm:$0xff] }
  0x3f   : > { %5242 = vmatpush3.bf16.msra.mxu0 %v5972_v3  ;;  %v307_v43 = vld [vmem:[%s6632_s9 + $0x70] sm:$0xff]  ;;  %v308_v44 = vld [vmem:[%s6632_s9 + $0x78] sm:$0xff]  ;;  %v6729_v50 = vcombine.high %v309_v47, %v310_v48  ;;  %v6735_v53 = vcombine.low %v309_v47, %v310_v48  ;;  %v313_v55 = vld [vmem:[%s6632_s9 + $0xa0] sm:$0xff] }
  0x40   : > { %5243 = vmatprep.subr.bf16.mxu0 %v5973_v4  ;;  %v6721_v46 = vcombine.high %v307_v43, %v308_v44  ;;  %v6727_v49 = vcombine.low %v307_v43, %v308_v44  ;;  %v311_v51 = vld [vmem:[%s6632_s9 + $0x90] sm:$0xff]  ;;  %v312_v52 = vld [vmem:[%s6632_s9 + $0x98] sm:$0xff]  ;;  %v314_v56 = vld [vmem:[%s6632_s9 + $0xa8] sm:$0xff] }
  0x41   : > { %v6737_v54 = vcombine.high %v311_v51, %v312_v52  ;;  %v6743_v57 = vcombine.low %v311_v51, %v312_v52  ;;  %v6745_v58 = vcombine.high %v313_v55, %v314_v56  ;;  %v315_v59 = vld [vmem:[%s6632_s9 + $0xb0] sm:$0xff]  ;;  %v316_v60 = vld [vmem:[%s6632_s9 + $0xb8] sm:$0xff]  ;;  %v6751_v61 = vcombine.low %v313_v55, %v314_v56  ;;  %v317_v63 = vld [vmem:[%s6632_s9 + $0xc0] sm:$0xff] }
  0x42   : > { %v6753_v62 = vcombine.high %v315_v59, %v316_v60  ;;  %v318_v0 = vld [vmem:[%s6632_s9 + $0xc8] sm:$0xff]  ;;  %v6759_v1 = vcombine.low %v315_v59, %v316_v60  ;;  %v319_v3 = vld [vmem:[%s6632_s9 + $0xd0] sm:$0xff]  ;;  %v320_v4 = vld [vmem:[%s6632_s9 + $0xd8] sm:$0xff] }
  0x43   : > { %5244 = vmatpush3.bf16.msra.mxu0 %v5974_v5  ;;  %v6761_v2 = vcombine.high %v317_v63, %v318_v0  ;;  %v6767_v5 = vcombine.low %v317_v63, %v318_v0  ;;  %v6778_v11 = vcombine.low %v319_v3, %v320_v4 }
  0x44   : > { %5245 = vmatprep.subr.bf16.mxu0 %v5975_v6  ;;  %v6769_v6 = vcombine.high %v319_v3, %v320_v4 }
  0x47   : > { %5246 = vmatpush3.bf16.msra.mxu0 %v5976_v7  ;;  %v645_v7 = vld [vmem:[%s10280_s3] sm:$0xf] }
  0x48   : > { %5247 = vmatprep.subr.bf16.mxu0 %v5977_v8  ;;  %5886 = vmatprep.subr.msk.bf16.mxu1 %vm1146_vm0, %v645_v7  ;;  %v1148_v8 = vsel %vm1146_vm0, %v645_v7, 0 }
  0x49   : > { %5773 = vmatpush3.bf16.msra.mxu1 %v1148_v8 }
  0x4b   : > { %5248 = vmatpush3.bf16.msra.mxu0 %v5978_v9  ;;  %v321_v9 = vld [vmem:[%s6632_s9 + $0xe0] sm:$0xff] }
  0x4c   : > { %5249 = vmatprep.subr.bf16.mxu0 %v5979_v10  ;;  %v322_v10 = vld [vmem:[%s6632_s9 + $0xe8] sm:$0xff] }
  0x4d   : > { %v6780_v12 = vcombine.high %v321_v9, %v322_v10 }
  0x4f   : > { %5250 = vmatpush3.bf16.msra.mxu0 %v5980_v14  ;;  %v323_v14 = vld [vmem:[%s6632_s9 + $0xf0] sm:$0xff] }
  0x50   : > { %5251 = vmatprep.subr.bf16.mxu0 %v5981_v15  ;;  %v324_v15 = vld [vmem:[%s6632_s9 + $0xf8] sm:$0xff] }
  0x53   : > { %5252 = vmatpush3.bf16.msra.mxu0 %v5982_v16  ;;  %v6786_v16 = vcombine.low %v321_v9, %v322_v10 }
  0x54   : > { %5253 = vmatprep.subr.bf16.mxu0 %v5983_v17  ;;  %v6788_v17 = vcombine.high %v323_v14, %v324_v15 }
  0x57   : > { %5254 = vmatpush3.bf16.msra.mxu0 %v5984_v18  ;;  %v6792_v18 = vcombine.low %v323_v14, %v324_v15 }
  0x5a   : > { %949 = vmatmul.mubr.bf16.vlgmr.msra.gmra.mrb[0].mxu0 %v6671_v21 }
  0x5b   : > { %956 = vmatprep.mubr.bf16.mxu0 %v6673_v22 }
  0x62   : > { %957 = vmatmul.mubr.bf16.gmra.mrb[4].mxu0 %v6679_v25 }
  0x63   : > { %964 = vmatprep.mubr.bf16.mxu0 %v6681_v26 }
  0x6a   : > { %965 = vmatmul.mubr.bf16.gmra.mrb[8].mxu0 %v6687_v29 }
  0x6b   : > { %972 = vmatprep.mubr.bf16.mxu0 %v6689_v30 }
  0x72   : > { %973 = vmatmul.mubr.bf16.gmra.mrb[12].mxu0 %v6695_v33 }
  0x73   : > { %980 = vmatprep.mubr.bf16.mxu0 %v6697_v34 }
  0x7a   : > { %981 = vmatmul.mubr.bf16.gmra.mrb[16].mxu0 %v6703_v37 }
  0x7b   : > { %988 = vmatprep.mubr.bf16.mxu0 %v6705_v38 }
  0x82   : > { %989 = vmatmul.mubr.bf16.gmra.mrb[20].mxu0 %v6711_v41 }
  0x83   : > { %996 = vmatprep.mubr.bf16.mxu0 %v6713_v42 }
  0x8a   : > { %997 = vmatmul.mubr.bf16.gmra.mrb[24].mxu0 %v6719_v45 }
  0x8b   : > { %1004 = vmatprep.mubr.bf16.mxu0 %v6721_v46 }
  0x92   : > { %1005 = vmatmul.mubr.bf16.gmra.mrb[28].mxu0 %v6727_v49 }
  0x93   : > { %1012 = vmatprep.mubr.bf16.mxu0 %v6729_v50 }
  0x9a   : > { %1013 = vmatmul.mubr.bf16.gmra.mrb[32].mxu0 %v6735_v53 }
  0x9b   : > { %1020 = vmatprep.mubr.bf16.mxu0 %v6737_v54 }
  0xa2   : > { %1021 = vmatmul.mubr.bf16.gmra.mrb[36].mxu0 %v6743_v57 }
  0xa3   : > { %1028 = vmatprep.mubr.bf16.mxu0 %v6745_v58 }
  0xaa   : > { %1029 = vmatmul.mubr.bf16.gmra.mrb[40].mxu0 %v6751_v61 }
  0xab   : > { %1036 = vmatprep.mubr.bf16.mxu0 %v6753_v62 }
  0xb2   : > { %1037 = vmatmul.mubr.bf16.gmra.mrb[44].mxu0 %v6759_v1 }
  0xb3   : > { %1044 = vmatprep.mubr.bf16.mxu0 %v6761_v2 }
  0xba   : > { %1045 = vmatmul.mubr.bf16.gmra.mrb[48].mxu0 %v6767_v5 }
  0xbb   : > { %1052 = vmatprep.mubr.bf16.mxu0 %v6769_v6 }
  0xc2   : > { %1053 = vmatmul.mubr.bf16.gmra.mrb[52].mxu0 %v6778_v11 }
  0xc3   : > { %1060 = vmatprep.mubr.bf16.mxu0 %v6780_v12 }
  0xca   : > { %1061 = vmatmul.mubr.bf16.gmra.mrb[56].mxu0 %v6786_v16 }
  0xcb   : > { %1068 = vmatprep.mubr.bf16.mxu0 %v6788_v17 }
  0xd2   : > { %1069 = vmatmul.mubr.bf16.gmra.mrb[60].mxu0 %v6792_v18 }
 0x12d   : > { %v5255_v19 = vpop.f32.mrb[0].mxu0 }
 0x12e   : > { %v5256_v20 = vpop.f32.mrb[1].mxu0 }
 0x12f   : > { %v5257_v23 = vadd.f32 %v5256_v20, %v5255_v19  ;;  %v5258_v24 = vpop.f32.mrb[2].mxu0 }
 0x130   : > { %v5259_v27 = vpop.f32.mrb[3].mxu0 }
 0x131   : > { %v5260_v28 = vadd.f32 %v5259_v27, %v5258_v24 }
 0x133   : > { %v1077_v31 = vpack.c.bf16 %v5260_v28, %v5257_v23 }
 0x135   : > { %v5261_v32 = vpop.f32.mrb[4].mxu0  ;;  %5774 = vmatprep.mubr.msk.bf16.mxu1 %vm1097_vm1, %v1077_v31 }
 0x136   : > { %v5262_v35 = vpop.f32.mrb[5].mxu0 }
 0x137   : > { %v5263_v36 = vadd.f32 %v5262_v35, %v5261_v32  ;;  %v5264_v39 = vpop.f32.mrb[6].mxu0 }
 0x138   : > { %v5265_v40 = vpop.f32.mrb[7].mxu0 }
 0x139   : > { %v5266_v43 = vadd.f32 %v5265_v40, %v5264_v39 }
 0x13b   : > { %v1078_v44 = vpack.c.bf16 %v5266_v43, %v5263_v36 }
 0x13d   : > { %v5267_v47 = vpop.f32.mrb[8].mxu0  ;;  %5775 = vmatmul.mubr.msk.bf16.vlgmr.msra.gmra.mrb[0].mxu1 %vm1097_vm1, %v1078_v44 }
 0x13e   : > { %v5268_v48 = vpop.f32.mrb[9].mxu0 }
 0x13f   : > { %v5269_v51 = vadd.f32 %v5268_v48, %v5267_v47  ;;  %v5270_v52 = vpop.f32.mrb[10].mxu0 }
 0x140   : > { %v5271_v55 = vpop.f32.mrb[11].mxu0 }
 0x141   : > { %v5272_v56 = vadd.f32 %v5271_v55, %v5270_v52 }
 0x143   : > { %v1079_v59 = vpack.c.bf16 %v5272_v56, %v5269_v51 }
 0x145   : > { %v5273_v60 = vpop.f32.mrb[12].mxu0  ;;  %5778 = vmatprep.mubr.msk.bf16.mxu1 %vm1097_vm1, %v1079_v59 }
 0x146   : > { %v5274_v63 = vpop.f32.mrb[13].mxu0 }
 0x147   : > { %v5275_v0 = vadd.f32 %v5274_v63, %v5273_v60  ;;  %v5276_v3 = vpop.f32.mrb[14].mxu0 }
 0x148   : > { %v5277_v4 = vpop.f32.mrb[15].mxu0 }
 0x149   : > { %v5278_v7 = vadd.f32 %v5277_v4, %v5276_v3 }
 0x14b   : > { %v1080_v8 = vpack.c.bf16 %v5278_v7, %v5275_v0 }
 0x14d   : > { %v5279_v9 = vpop.f32.mrb[16].mxu0  ;;  %5779 = vmatmul.mubr.msk.bf16.gmra.mrb[4].mxu1 %vm1097_vm1, %v1080_v8 }
 0x14e   : > { %v5280_v10 = vpop.f32.mrb[17].mxu0 }
 0x14f   : > { %v5281_v14 = vadd.f32 %v5280_v10, %v5279_v9  ;;  %v5282_v15 = vpop.f32.mrb[18].mxu0 }
 0x150   : > { %v5283_v19 = vpop.f32.mrb[19].mxu0 }
 0x151   : > { %v5284_v20 = vadd.f32 %v5283_v19, %v5282_v15 }
 0x153   : > { %v1081_v23 = vpack.c.bf16 %v5284_v20, %v5281_v14 }
 0x155   : > { %v5285_v24 = vpop.f32.mrb[20].mxu0  ;;  %5782 = vmatprep.mubr.msk.bf16.mxu1 %vm1097_vm1, %v1081_v23 }
 0x156   : > { %v5286_v27 = vpop.f32.mrb[21].mxu0 }
 0x157   : > { %v5287_v28 = vadd.f32 %v5286_v27, %v5285_v24  ;;  %v5288_v31 = vpop.f32.mrb[22].mxu0 }
 0x158   : > { %v5289_v32 = vpop.f32.mrb[23].mxu0 }
 0x159   : > { %v5290_v35 = vadd.f32 %v5289_v32, %v5288_v31 }
 0x15b   : > { %v1082_v36 = vpack.c.bf16 %v5290_v35, %v5287_v28 }
 0x15d   : > { %v5291_v39 = vpop.f32.mrb[24].mxu0  ;;  %5783 = vmatmul.mubr.msk.bf16.gmra.mrb[8].mxu1 %vm1097_vm1, %v1082_v36 }
 0x15e   : > { %v5292_v40 = vpop.f32.mrb[25].mxu0 }
 0x15f   : > { %v5293_v43 = vadd.f32 %v5292_v40, %v5291_v39  ;;  %v5294_v44 = vpop.f32.mrb[26].mxu0 }
 0x160   : > { %v5295_v47 = vpop.f32.mrb[27].mxu0 }
 0x161   : > { %v5296_v48 = vadd.f32 %v5295_v47, %v5294_v44 }
 0x163   : > { %v1083_v51 = vpack.c.bf16 %v5296_v48, %v5293_v43 }
 0x165   : > { %v5297_v52 = vpop.f32.mrb[28].mxu0  ;;  %5786 = vmatprep.mubr.msk.bf16.mxu1 %vm1097_vm1, %v1083_v51 }
 0x166   : > { %v5298_v55 = vpop.f32.mrb[29].mxu0 }
 0x167   : > { %v5299_v56 = vadd.f32 %v5298_v55, %v5297_v52  ;;  %v5300_v59 = vpop.f32.mrb[30].mxu0 }
 0x168   : > { %v5301_v60 = vpop.f32.mrb[31].mxu0 }
 0x169   : > { %v5302_v63 = vadd.f32 %v5301_v60, %v5300_v59 }
 0x16b   : > { %v1084_v0 = vpack.c.bf16 %v5302_v63, %v5299_v56 }
 0x16d   : > { %v5303_v3 = vpop.f32.mrb[32].mxu0  ;;  %5787 = vmatmul.mubr.msk.bf16.gmra.mrb[12].mxu1 %vm1097_vm1, %v1084_v0 }
 0x16e   : > { %v5304_v4 = vpop.f32.mrb[33].mxu0 }
 0x16f   : > { %v5305_v7 = vadd.f32 %v5304_v4, %v5303_v3  ;;  %v5306_v8 = vpop.f32.mrb[34].mxu0 }
 0x170   : > { %v5307_v9 = vpop.f32.mrb[35].mxu0 }
 0x171   : > { %v5308_v10 = vadd.f32 %v5307_v9, %v5306_v8 }
 0x173   : > { %v1085_v14 = vpack.c.bf16 %v5308_v10, %v5305_v7  ;;  %v6017_v7 = vld [vmem:[%s10280_s3 + $0x4] sm:$0xff]   ;;  %v6018_v10 = vld [vmem:[%s10280_s3 + $0xc] sm:$0xff]  }
 0x174   : > { %5806 = vmatprep.subr.bf16.mxu1 %v6017_v7 }
 0x175   : > { %v5309_v15 = vpop.f32.mrb[36].mxu0  ;;  %5790 = vmatprep.mubr.msk.bf16.mxu1 %vm1097_vm1, %v1085_v14  ;;  %5807 = vmatpush3.bf16.msra.mxu1 %v6017_v7 }
 0x176   : > { %v5310_v19 = vpop.f32.mrb[37].mxu0  ;;  %5808 = vmatprep.subr.bf16.mxu1 %v6018_v10 }
 0x177   : > { %v5311_v20 = vadd.f32 %v5310_v19, %v5309_v15  ;;  %v5312_v23 = vpop.f32.mrb[38].mxu0 }
 0x178   : > { %v5313_v24 = vpop.f32.mrb[39].mxu0 }
 0x179   : > { %v5314_v27 = vadd.f32 %v5313_v24, %v5312_v23  ;;  %5809 = vmatpush3.bf16.msra.mxu1 %v6018_v10 }
 0x17b   : > { %v1086_v28 = vpack.c.bf16 %v5314_v27, %v5311_v20 }
 0x17d   : > { %v5315_v31 = vpop.f32.mrb[40].mxu0  ;;  %5791 = vmatmul.mubr.msk.bf16.gmra.mrb[16].mxu1 %vm1097_vm1, %v1086_v28 }
 0x17e   : > { %v5316_v32 = vpop.f32.mrb[41].mxu0 }
 0x17f   : > { %v5317_v35 = vadd.f32 %v5316_v32, %v5315_v31  ;;  %v5318_v36 = vpop.f32.mrb[42].mxu0 }
 0x180   : > { %v5319_v39 = vpop.f32.mrb[43].mxu0 }
 0x181   : > { %v5320_v40 = vadd.f32 %v5319_v39, %v5318_v36 }
 0x183   : > { %v1087_v43 = vpack.c.bf16 %v5320_v40, %v5317_v35 }
 0x185   : > { %v5321_v44 = vpop.f32.mrb[44].mxu0  ;;  %5794 = vmatprep.mubr.msk.bf16.mxu1 %vm1097_vm1, %v1087_v43 }
 0x186   : > { %v5322_v47 = vpop.f32.mrb[45].mxu0 }
 0x187   : > { %v5323_v48 = vadd.f32 %v5322_v47, %v5321_v44  ;;  %v5324_v51 = vpop.f32.mrb[46].mxu0 }
 0x188   : > { %v5325_v52 = vpop.f32.mrb[47].mxu0 }
 0x189   : > { %v5326_v55 = vadd.f32 %v5325_v52, %v5324_v51 }
 0x18b   : > { %v1088_v56 = vpack.c.bf16 %v5326_v55, %v5323_v48  ;;  %v1093_v55 = vlaneseq }
 0x18d   : > { %v5327_v59 = vpop.f32.mrb[48].mxu0  ;;  %5795 = vmatmul.mubr.msk.bf16.gmra.mrb[20].mxu1 %vm1097_vm1, %v1088_v56  ;;  %v6817_v56 = vshrl.u32 %v1093_v55, 7 }
 0x18e   : > { %v5328_v60 = vpop.f32.mrb[49].mxu0 }
 0x18f   : > { %v5329_v63 = vadd.f32 %v5328_v60, %v5327_v59  ;;  %v5330_v0 = vpop.f32.mrb[50].mxu0  ;;  %10587 = vst [vmem:[#allocation5_spill] sm:$0xff] %v6817_v56  ;;  %v658_v59 = vld [vmem:[%s10280_s3 + $0x34] sm:$0xf] }
 0x190   : > { %v5331_v3 = vpop.f32.mrb[51].mxu0  ;;  %v6822_v60 = vunpack.c.l.bf16 %v658_v59 }
 0x191   : > { %v5332_v4 = vadd.f32 %v5331_v3, %v5330_v0 }
 0x192   : > { %10588 = vst [vmem:[#allocation6_spill] sm:$0xff] %v6822_v60 }
 0x193   : > { %v1089_v8 = vpack.c.bf16 %v5332_v4, %v5329_v63  ;;  %v6825_v63 = vsub.s32 0, %v6817_v56 }
 0x195   : > { %v5333_v9 = vpop.f32.mrb[52].mxu0  ;;  %5798 = vmatprep.mubr.msk.bf16.mxu1 %vm1097_vm1, %v1089_v8  ;;  %v6829_v0 = vrot.slane %v6822_v60, %v6825_v63 }
 0x196   : > { %v5334_v14 = vpop.f32.mrb[53].mxu0 }
 0x197   : > { %v5335_v15 = vadd.f32 %v5334_v14, %v5333_v9  ;;  %v5336_v19 = vpop.f32.mrb[54].mxu0 }
 0x198   : > { %v5337_v20 = vpop.f32.mrb[55].mxu0 }
 0x199   : > { %v5338_v23 = vadd.f32 %v5337_v20, %v5336_v19 }
 0x19b   : > { %v1090_v24 = vpack.c.bf16 %v5338_v23, %v5335_v15 }
 0x19d   : > { %v5339_v27 = vpop.f32.mrb[56].mxu0  ;;  %5799 = vmatmul.mubr.msk.bf16.gmra.mrb[24].mxu1 %vm1097_vm1, %v1090_v24 }
 0x19e   : > { %v5340_v28 = vpop.f32.mrb[57].mxu0 }
 0x19f   : > { %v5341_v31 = vadd.f32 %v5340_v28, %v5339_v27  ;;  %v5342_v32 = vpop.f32.mrb[58].mxu0 }
 0x1a0   : > { %v5343_v35 = vpop.f32.mrb[59].mxu0 }
 0x1a1   : > { %v5344_v36 = vadd.f32 %v5343_v35, %v5342_v32 }
 0x1a3   : > { %v1091_v39 = vpack.c.bf16 %v5344_v36, %v5341_v31 }
 0x1a5   : > { %v5345_v40 = vpop.f32.mrb[60].mxu0  ;;  %5802 = vmatprep.mubr.msk.bf16.mxu1 %vm1097_vm1, %v1091_v39 }
 0x1a6   : > { %v5346_v43 = vpop.f32.mrb[61].mxu0 }
 0x1a7   : > { %v5347_v44 = vadd.f32 %v5346_v43, %v5345_v40  ;;  %v5348_v47 = vpop.f32.mrb[62].mxu0 }
 0x1a8   : > { %v5349_v48 = vpop.f32.mrb[63].mxu0 }
 0x1a9   : > { %v5350_v51 = vadd.f32 %v5349_v48, %v5348_v47 }
 0x1ab   : > { %v1092_v52 = vpack.c.bf16 %v5350_v51, %v5347_v44 }
 0x1ad   : > { %5803 = vmatmul.mubr.msk.bf16.gmra.mrb[28].mxu1 %vm1097_vm1, %v1092_v52 }
 0x210   : > { %v5776_v3 = vpop.f32.mrb[0].mxu1 }
 0x211   : > { %v1193_v4 = vadd.f32 %v5776_v3, %v6829_v0  ;;  %v1184_v7 = vpop.f32.mrb[1].mxu1 }
 0x212   : > { %v1185_v8 = vadd.f32 %v1184_v7, %v6829_v0  ;;  %v5777_v9 = vpop.f32.mrb[2].mxu1 }
 0x213   : > { %v1196_v10 = vadd.f32 %v5777_v9, %v6829_v0  ;;  %v1187_v14 = vpop.f32.mrb[3].mxu1  ;;  %v1313_v19 = vmax.f32 %v1193_v4, 0.0 }
 0x214   : > { %v1188_v15 = vadd.f32 %v1187_v14, %v6829_v0  ;;  %v1311_v23 = vmax.f32 %v1185_v8, 0.0 }
 0x215   : > { %v1314_v20 = vmax.f32 %v1196_v10, 0.0 }
 0x216   : > { %v1312_v24 = vmax.f32 %v1188_v15, 0.0 }
 0x217   : > { %v1344_v27 = vpack.c.bf16 %v1314_v20, %v1313_v19 }
 0x218   : > { %v1343_v28 = vpack.c.bf16 %v1312_v24, %v1311_v23 }
 0x21a   : > { %5810 = vmatprep.mubr.msk.bf16.mxu1 %vm10473_vm2, %v1343_v28 }
 0x21b   : > { %5811 = vmatmul.mubr.msk.bf16.vlgmr.msra.gmra.mrb[32].mxu1 %vm10473_vm2, %v1344_v27 }
 0x220   : > { %v5780_v31 = vpop.f32.mrb[4].mxu1 }
 0x221   : > { %v1209_v32 = vadd.f32 %v5780_v31, %v6829_v0  ;;  %v1200_v35 = vpop.f32.mrb[5].mxu1 }
 0x222   : > { %v1201_v36 = vadd.f32 %v1200_v35, %v6829_v0  ;;  %v5781_v39 = vpop.f32.mrb[6].mxu1 }
 0x223   : > { %v1212_v40 = vadd.f32 %v5781_v39, %v6829_v0  ;;  %v1203_v43 = vpop.f32.mrb[7].mxu1  ;;  %v1317_v47 = vmax.f32 %v1209_v32, 0.0 }
 0x224   : > { %v1204_v44 = vadd.f32 %v1203_v43, %v6829_v0  ;;  %v1315_v51 = vmax.f32 %v1201_v36, 0.0 }
 0x225   : > { %v1318_v48 = vmax.f32 %v1212_v40, 0.0 }
 0x226   : > { %v1316_v52 = vmax.f32 %v1204_v44, 0.0 }
 0x227   : > { %v1346_v55 = vpack.c.bf16 %v1318_v48, %v1317_v47 }
 0x228   : > { %v1345_v59 = vpack.c.bf16 %v1316_v52, %v1315_v51 }
 0x22a   : > { %5814 = vmatprep.mubr.msk.bf16.mxu1 %vm10473_vm2, %v1345_v59 }
 0x22b   : > { %5815 = vmatmul.mubr.msk.bf16.gmra.mrb[36].mxu1 %vm10473_vm2, %v1346_v55 }
 0x230   : > { %v5784_v3 = vpop.f32.mrb[8].mxu1 }
 0x231   : > { %v1225_v4 = vadd.f32 %v5784_v3, %v6829_v0  ;;  %v1216_v7 = vpop.f32.mrb[9].mxu1 }
 0x232   : > { %v1217_v8 = vadd.f32 %v1216_v7, %v6829_v0  ;;  %v5785_v9 = vpop.f32.mrb[10].mxu1 }
 0x233   : > { %v1228_v10 = vadd.f32 %v5785_v9, %v6829_v0  ;;  %v1219_v14 = vpop.f32.mrb[11].mxu1  ;;  %v1321_v19 = vmax.f32 %v1225_v4, 0.0 }
 0x234   : > { %v1220_v15 = vadd.f32 %v1219_v14, %v6829_v0  ;;  %v1319_v23 = vmax.f32 %v1217_v8, 0.0 }
 0x235   : > { %v1322_v20 = vmax.f32 %v1228_v10, 0.0 }
 0x236   : > { %v1320_v24 = vmax.f32 %v1220_v15, 0.0 }
 0x237   : > { %v1348_v27 = vpack.c.bf16 %v1322_v20, %v1321_v19 }
 0x238   : > { %v1347_v28 = vpack.c.bf16 %v1320_v24, %v1319_v23 }
 0x23a   : > { %5818 = vmatprep.mubr.msk.bf16.mxu1 %vm10473_vm2, %v1347_v28 }
 0x23b   : > { %5819 = vmatmul.mubr.msk.bf16.gmra.mrb[40].mxu1 %vm10473_vm2, %v1348_v27 }
 0x240   : > { %v5788_v31 = vpop.f32.mrb[12].mxu1 }
 0x241   : > { %v1241_v32 = vadd.f32 %v5788_v31, %v6829_v0  ;;  %v1232_v35 = vpop.f32.mrb[13].mxu1 }
 0x242   : > { %v1233_v36 = vadd.f32 %v1232_v35, %v6829_v0  ;;  %v5789_v39 = vpop.f32.mrb[14].mxu1 }
 0x243   : > { %v1244_v40 = vadd.f32 %v5789_v39, %v6829_v0  ;;  %v1235_v43 = vpop.f32.mrb[15].mxu1  ;;  %v1325_v47 = vmax.f32 %v1241_v32, 0.0 }
 0x244   : > { %v1236_v44 = vadd.f32 %v1235_v43, %v6829_v0  ;;  %v1323_v51 = vmax.f32 %v1233_v36, 0.0 }
 0x245   : > { %v1326_v48 = vmax.f32 %v1244_v40, 0.0 }
 0x246   : > { %v1324_v52 = vmax.f32 %v1236_v44, 0.0 }
 0x247   : > { %v1350_v55 = vpack.c.bf16 %v1326_v48, %v1325_v47 }
 0x248   : > { %v1349_v59 = vpack.c.bf16 %v1324_v52, %v1323_v51 }
 0x24a   : > { %5822 = vmatprep.mubr.msk.bf16.mxu1 %vm10473_vm2, %v1349_v59 }
 0x24b   : > { %5823 = vmatmul.mubr.msk.bf16.gmra.mrb[44].mxu1 %vm10473_vm2, %v1350_v55 }
 0x250   : > { %v5792_v3 = vpop.f32.mrb[16].mxu1 }
 0x251   : > { %v1257_v4 = vadd.f32 %v5792_v3, %v6829_v0  ;;  %v1248_v7 = vpop.f32.mrb[17].mxu1 }
 0x252   : > { %v1249_v8 = vadd.f32 %v1248_v7, %v6829_v0  ;;  %v5793_v9 = vpop.f32.mrb[18].mxu1 }
 0x253   : > { %v1260_v10 = vadd.f32 %v5793_v9, %v6829_v0  ;;  %v1251_v14 = vpop.f32.mrb[19].mxu1  ;;  %v1329_v19 = vmax.f32 %v1257_v4, 0.0 }
 0x254   : > { %v1252_v15 = vadd.f32 %v1251_v14, %v6829_v0  ;;  %v1327_v23 = vmax.f32 %v1249_v8, 0.0 }
 0x255   : > { %v1330_v20 = vmax.f32 %v1260_v10, 0.0 }
 0x256   : > { %v1328_v24 = vmax.f32 %v1252_v15, 0.0 }
 0x257   : > { %v1352_v27 = vpack.c.bf16 %v1330_v20, %v1329_v19 }
 0x258   : > { %v1351_v28 = vpack.c.bf16 %v1328_v24, %v1327_v23 }
 0x25a   : > { %5826 = vmatprep.mubr.msk.bf16.mxu1 %vm10473_vm2, %v1351_v28 }
 0x25b   : > { %5827 = vmatmul.mubr.msk.bf16.gmra.mrb[48].mxu1 %vm10473_vm2, %v1352_v27 }
 0x260   : > { %v5796_v31 = vpop.f32.mrb[20].mxu1 }
 0x261   : > { %v1273_v32 = vadd.f32 %v5796_v31, %v6829_v0  ;;  %v1264_v35 = vpop.f32.mrb[21].mxu1 }
 0x262   : > { %v1265_v36 = vadd.f32 %v1264_v35, %v6829_v0  ;;  %v5797_v39 = vpop.f32.mrb[22].mxu1 }
 0x263   : > { %v1276_v40 = vadd.f32 %v5797_v39, %v6829_v0  ;;  %v1267_v43 = vpop.f32.mrb[23].mxu1  ;;  %v1333_v47 = vmax.f32 %v1273_v32, 0.0 }
 0x264   : > { %v1268_v44 = vadd.f32 %v1267_v43, %v6829_v0  ;;  %v1331_v51 = vmax.f32 %v1265_v36, 0.0 }
 0x265   : > { %v1334_v48 = vmax.f32 %v1276_v40, 0.0 }
 0x266   : > { %v1332_v52 = vmax.f32 %v1268_v44, 0.0 }
 0x267   : > { %v1354_v55 = vpack.c.bf16 %v1334_v48, %v1333_v47 }
 0x268   : > { %v1353_v59 = vpack.c.bf16 %v1332_v52, %v1331_v51 }
 0x26a   : > { %5830 = vmatprep.mubr.msk.bf16.mxu1 %vm10473_vm2, %v1353_v59 }
 0x26b   : > { %5831 = vmatmul.mubr.msk.bf16.gmra.mrb[52].mxu1 %vm10473_vm2, %v1354_v55 }
 0x270   : > { %v5800_v3 = vpop.f32.mrb[24].mxu1 }
 0x271   : > { %v1289_v4 = vadd.f32 %v5800_v3, %v6829_v0  ;;  %v1280_v7 = vpop.f32.mrb[25].mxu1 }
 0x272   : > { %v1281_v8 = vadd.f32 %v1280_v7, %v6829_v0  ;;  %v5801_v9 = vpop.f32.mrb[26].mxu1 }
 0x273   : > { %v1292_v10 = vadd.f32 %v5801_v9, %v6829_v0  ;;  %v1283_v14 = vpop.f32.mrb[27].mxu1  ;;  %v1337_v19 = vmax.f32 %v1289_v4, 0.0 }
 0x274   : > { %v1284_v15 = vadd.f32 %v1283_v14, %v6829_v0  ;;  %v1335_v23 = vmax.f32 %v1281_v8, 0.0 }
 0x275   : > { %v1338_v20 = vmax.f32 %v1292_v10, 0.0 }
 0x276   : > { %v1336_v24 = vmax.f32 %v1284_v15, 0.0 }
 0x277   : > { %v1356_v27 = vpack.c.bf16 %v1338_v20, %v1337_v19 }
 0x278   : > { %v1355_v28 = vpack.c.bf16 %v1336_v24, %v1335_v23 }
 0x27a   : > { %5834 = vmatprep.mubr.msk.bf16.mxu1 %vm10473_vm2, %v1355_v28 }
 0x27b   : > { %5835 = vmatmul.mubr.msk.bf16.gmra.mrb[56].mxu1 %vm10473_vm2, %v1356_v27 }
 0x280   : > { %v5804_v31 = vpop.f32.mrb[28].mxu1 }
 0x281   : > { %v1305_v32 = vadd.f32 %v5804_v31, %v6829_v0  ;;  %v1296_v35 = vpop.f32.mrb[29].mxu1 }
 0x282   : > { %v1297_v36 = vadd.f32 %v1296_v35, %v6829_v0  ;;  %v5805_v39 = vpop.f32.mrb[30].mxu1 }
 0x283   : > { %v1308_v40 = vadd.f32 %v5805_v39, %v6829_v0  ;;  %v1299_v43 = vpop.f32.mrb[31].mxu1  ;;  %v1341_v47 = vmax.f32 %v1305_v32, 0.0 }
 0x284   : > { %v1300_v44 = vadd.f32 %v1299_v43, %v6829_v0  ;;  %v1339_v51 = vmax.f32 %v1297_v36, 0.0 }
 0x285   : > { %v1342_v48 = vmax.f32 %v1308_v40, 0.0 }
 0x286   : > { %v1340_v52 = vmax.f32 %v1300_v44, 0.0 }
 0x287   : > { %v1358_v55 = vpack.c.bf16 %v1342_v48, %v1341_v47 }
 0x288   : > { %v1357_v59 = vpack.c.bf16 %v1340_v52, %v1339_v51 }
 0x28a   : > { %5838 = vmatprep.mubr.msk.bf16.mxu1 %vm10473_vm2, %v1357_v59 }
 0x28b   : > { %5839 = vmatmul.mubr.msk.bf16.gmra.mrb[60].mxu1 %vm10473_vm2, %v1358_v55 }
 0x28c   : > { %1633 = vmatprep.mubr.bf16.mxu1 %v6661_v13 }
 0x2ee   : > { %v5812_v3 = vpop.f32.mrb[32].mxu1 }
 0x2ef   : > { %v1454_v4 = vpop.f32.mrb[33].mxu1 }
 0x2f0   : > { %v5813_v7 = vpop.f32.mrb[34].mxu1 }
 0x2f1   : > { %v1582_v8 = vpack.c.bf16 %v5813_v7, %v5812_v3  ;;  %v1457_v9 = vpop.f32.mrb[35].mxu1 }
 0x2f2   : > { %v1581_v10 = vpack.c.bf16 %v1457_v9, %v1454_v4 }
 0x2fe   : > { %v5816_v14 = vpop.f32.mrb[36].mxu1 }
 0x2ff   : > { %v1470_v0 = vpop.f32.mrb[37].mxu1 }
 0x300   : > { %v5817_v15 = vpop.f32.mrb[38].mxu1 }
 0x301   : > { %v1584_v19 = vpack.c.bf16 %v5817_v15, %v5816_v14  ;;  %v1473_v20 = vpop.f32.mrb[39].mxu1 }
 0x302   : > { %v1583_v23 = vpack.c.bf16 %v1473_v20, %v1470_v0 }
 0x30e   : > { %v5820_v24 = vpop.f32.mrb[40].mxu1 }
 0x30f   : > { %v1486_v27 = vpop.f32.mrb[41].mxu1 }
 0x310   : > { %v5821_v28 = vpop.f32.mrb[42].mxu1 }
 0x311   : > { %v1586_v31 = vpack.c.bf16 %v5821_v28, %v5820_v24  ;;  %v1489_v32 = vpop.f32.mrb[43].mxu1 }
 0x312   : > { %v1585_v35 = vpack.c.bf16 %v1489_v32, %v1486_v27 }
 0x31e   : > { %v5824_v36 = vpop.f32.mrb[44].mxu1 }
 0x31f   : > { %v1502_v13 = vpop.f32.mrb[45].mxu1 }
 0x320   : > { %v5825_v39 = vpop.f32.mrb[46].mxu1 }
 0x321   : > { %v1588_v40 = vpack.c.bf16 %v5825_v39, %v5824_v36  ;;  %v1505_v43 = vpop.f32.mrb[47].mxu1 }
 0x322   : > { %v1587_v44 = vpack.c.bf16 %v1505_v43, %v1502_v13 }
 0x32e   : > { %v5828_v47 = vpop.f32.mrb[48].mxu1 }
 0x32f   : > { %v1518_v48 = vpop.f32.mrb[49].mxu1 }
 0x330   : > { %v5829_v51 = vpop.f32.mrb[50].mxu1 }
 0x331   : > { %v1590_v52 = vpack.c.bf16 %v5829_v51, %v5828_v47  ;;  %v1521_v55 = vpop.f32.mrb[51].mxu1 }
 0x332   : > { %v1589_v59 = vpack.c.bf16 %v1521_v55, %v1518_v48 }
 0x334   : > { %5386 = vmatprep.subr.bf16.mxu1 %v1589_v59 }
 0x335   : > { %5387 = vmatpush3.bf16.msra.mxu1 %v1581_v10 }
 0x336   : > { %5388 = vmatprep.subr.bf16.mxu1 %v1590_v52 }
 0x339   : > { %5389 = vmatpush3.bf16.msra.mxu1 %v1582_v8 }
 0x33e   : > { %v5832_v3 = vpop.f32.mrb[52].mxu1 }
 0x33f   : > { %v1534_v4 = vpop.f32.mrb[53].mxu1 }
 0x340   : > { %v5833_v7 = vpop.f32.mrb[54].mxu1 }
 0x341   : > { %v1592_v9 = vpack.c.bf16 %v5833_v7, %v5832_v3  ;;  %v1537_v14 = vpop.f32.mrb[55].mxu1 }
 0x342   : > { %v1591_v0 = vpack.c.bf16 %v1537_v14, %v1534_v4 }
 0x344   : > { %5390 = vmatprep.subr.bf16.mxu1 %v1591_v0 }
 0x345   : > { %5391 = vmatpush3.bf16.msra.mxu1 %v1583_v23 }
 0x346   : > { %5392 = vmatprep.subr.bf16.mxu1 %v1592_v9 }
 0x349   : > { %5393 = vmatpush3.bf16.msra.mxu1 %v1584_v19  ;;  %v6019_v19 = vld [vmem:[%s10280_s3 + $0x14] sm:$0xff]  }
 0x34a   : > { %5842 = vmatprep.subr.bf16.mxu0 %v6019_v19 }
 0x34b   : > { %5843 = vmatpush3.bf16.msra.mxu0 %v6019_v19 }
 0x34e   : > { %v5836_v15 = vpop.f32.mrb[56].mxu1 }
 0x34f   : > { %v1550_v20 = vpop.f32.mrb[57].mxu1 }
 0x350   : > { %v5837_v24 = vpop.f32.mrb[58].mxu1 }
 0x351   : > { %v1594_v27 = vpack.c.bf16 %v5837_v24, %v5836_v15  ;;  %v1553_v28 = vpop.f32.mrb[59].mxu1 }
 0x352   : > { %v1593_v32 = vpack.c.bf16 %v1553_v28, %v1550_v20 }
 0x354   : > { %5394 = vmatprep.subr.bf16.mxu1 %v1593_v32 }
 0x355   : > { %5395 = vmatpush3.bf16.msra.mxu1 %v1585_v35 }
 0x356   : > { %5396 = vmatprep.subr.bf16.mxu1 %v1594_v27 }
 0x359   : > { %5397 = vmatpush3.bf16.msra.mxu1 %v1586_v31 }
 0x35e   : > { %v5840_v8 = vpop.f32.mrb[60].mxu1 }
 0x35f   : > { %v1566_v10 = vpop.f32.mrb[61].mxu1 }
 0x360   : > { %v5841_v36 = vpop.f32.mrb[62].mxu1 }
 0x361   : > { %v1596_v13 = vpack.c.bf16 %v5841_v36, %v5840_v8  ;;  %v1569_v39 = vpop.f32.mrb[63].mxu1 }
 0x362   : > { %v1595_v43 = vpack.c.bf16 %v1569_v39, %v1566_v10 }
 0x364   : > { %5398 = vmatprep.subr.bf16.mxu1 %v1595_v43 }
 0x365   : > { %5399 = vmatpush3.bf16.msra.mxu1 %v1587_v44 }
 0x366   : > { %5400 = vmatprep.subr.bf16.mxu1 %v1596_v13 }
 0x369   : > { %5401 = vmatpush3.bf16.msra.mxu1 %v1588_v40 }
 0x36c   : > { %1634 = vmatmul.mubr.bf16.vlgmr.msra.gmra.mrb[64].mxu1 %v6671_v21  ;;  %v6020_v21 = vld [vmem:[%s10280_s3 + $0x1c] sm:$0xff]  }
 0x36d   : > { %1641 = vmatprep.mubr.bf16.mxu1 %v6673_v22  ;;  %5844 = vmatprep.subr.bf16.mxu0 %v6020_v21  ;;  %v1599_v22 = vsub.s32 1, %v6817_v56 }
 0x36e   : > { %5845 = vmatpush3.bf16.msra.mxu0 %v6020_v21 }
 0x374   : > { %1642 = vmatmul.mubr.bf16.gmra.mrb[68].mxu1 %v6679_v25 }
 0x375   : > { %1649 = vmatprep.mubr.bf16.mxu1 %v6681_v26  ;;  %v6919_v26 = vrot.slane %v6822_v60, %v1599_v22 }
 0x37c   : > { %1650 = vmatmul.mubr.bf16.gmra.mrb[72].mxu1 %v6687_v29 }
 0x37d   : > { %1657 = vmatprep.mubr.bf16.mxu1 %v6689_v30 }
 0x384   : > { %1658 = vmatmul.mubr.bf16.gmra.mrb[76].mxu1 %v6695_v33 }
 0x385   : > { %1665 = vmatprep.mubr.bf16.mxu1 %v6697_v34 }
 0x38c   : > { %1666 = vmatmul.mubr.bf16.gmra.mrb[80].mxu1 %v6703_v37 }
 0x38d   : > { %1673 = vmatprep.mubr.bf16.mxu1 %v6705_v38 }
 0x394   : > { %1674 = vmatmul.mubr.bf16.gmra.mrb[84].mxu1 %v6711_v41  ;;  %v10282_v41 = vmov 65  }
 0x395   : > { %1681 = vmatprep.mubr.bf16.mxu1 %v6713_v42  ;;  %5935 = vset.pattern.permute.xlu1 %v10282_v41 }
 0x39c   : > { %1682 = vmatmul.mubr.bf16.gmra.mrb[88].mxu1 %v6719_v45 }
 0x39d   : > { %1689 = vmatprep.mubr.bf16.mxu1 %v6721_v46 }
 0x3a4   : > { %1690 = vmatmul.mubr.bf16.gmra.mrb[92].mxu1 %v6727_v49 }
 0x3a5   : > { %1697 = vmatprep.mubr.bf16.mxu1 %v6729_v50 }
 0x3ac   : > { %1698 = vmatmul.mubr.bf16.gmra.mrb[96].mxu1 %v6735_v53 }
 0x3ad   : > { %1705 = vmatprep.mubr.bf16.mxu1 %v6737_v54 }
 0x3b4   : > { %1706 = vmatmul.mubr.bf16.gmra.mrb[100].mxu1 %v6743_v57 }
 0x3b5   : > { %1713 = vmatprep.mubr.bf16.mxu1 %v6745_v58 }
 0x3bc   : > { %1714 = vmatmul.mubr.bf16.gmra.mrb[104].mxu1 %v6751_v61 }
 0x3bd   : > { %1721 = vmatprep.mubr.bf16.mxu1 %v6753_v62 }
 0x3c4   : > { %1722 = vmatmul.mubr.bf16.gmra.mrb[108].mxu1 %v6759_v1 }
 0x3c5   : > { %1729 = vmatprep.mubr.bf16.mxu1 %v6761_v2 }
 0x3cc   : > { %1730 = vmatmul.mubr.bf16.gmra.mrb[112].mxu1 %v6767_v5 }
 0x3cd   : > { %1737 = vmatprep.mubr.bf16.mxu1 %v6769_v6 }
 0x3d4   : > { %1738 = vmatmul.mubr.bf16.gmra.mrb[116].mxu1 %v6778_v11 }
 0x3d5   : > { %1745 = vmatprep.mubr.bf16.mxu1 %v6780_v12 }
 0x3dc   : > { %1746 = vmatmul.mubr.bf16.gmra.mrb[120].mxu1 %v6786_v16 }
 0x3dd   : > { %1753 = vmatprep.mubr.bf16.mxu1 %v6788_v17 }
 0x3e4   : > { %1754 = vmatmul.mubr.bf16.gmra.mrb[124].mxu1 %v6792_v18 }
 0x43f   : > { %v5402_v25 = vpop.f32.mrb[64].mxu1 }
 0x440   : > { %v5403_v29 = vpop.f32.mrb[65].mxu1 }
 0x441   : > { %v5404_v30 = vadd.f32 %v5403_v29, %v5402_v25  ;;  %v5405_v33 = vpop.f32.mrb[66].mxu1 }
 0x442   : > { %v5406_v34 = vpop.f32.mrb[67].mxu1 }
 0x443   : > { %v1636_v37 = vadd.f32 %v5404_v30, %v6919_v26  ;;  %v5407_v38 = vadd.f32 %v5406_v34, %v5405_v33 }
 0x445   : > { %v1639_v42 = vadd.f32 %v5407_v38, %v6919_v26  ;;  %v1762_v45 = vmax.f32 %v1636_v37, 0.0 }
 0x447   : > { %v1763_v46 = vmax.f32 %v1639_v42, 0.0  ;;  %v5408_v49 = vpop.f32.mrb[68].mxu1 }
 0x448   : > { %v5409_v50 = vpop.f32.mrb[69].mxu1 }
 0x449   : > { %v1794_v53 = vpack.c.bf16 %v1763_v46, %v1762_v45  ;;  %v5410_v54 = vadd.f32 %v5409_v50, %v5408_v49  ;;  %v5411_v57 = vpop.f32.mrb[70].mxu1 }
 0x44a   : > { %v5412_v58 = vpop.f32.mrb[71].mxu1 }
 0x44b   : > { %v1644_v61 = vadd.f32 %v5410_v54, %v6919_v26  ;;  %v5413_v62 = vadd.f32 %v5412_v58, %v5411_v57  ;;  %5846 = vmatprep.mubr.msk.bf16.mxu0 %vm10473_vm2, %v1794_v53 }
 0x44d   : > { %v1647_v1 = vadd.f32 %v5413_v62, %v6919_v26  ;;  %v1764_v2 = vmax.f32 %v1644_v61, 0.0 }
 0x44f   : > { %v1765_v5 = vmax.f32 %v1647_v1, 0.0  ;;  %v5414_v6 = vpop.f32.mrb[72].mxu1 }
 0x450   : > { %v5415_v11 = vpop.f32.mrb[73].mxu1 }
 0x451   : > { %v1795_v12 = vpack.c.bf16 %v1765_v5, %v1764_v2  ;;  %v5416_v16 = vadd.f32 %v5415_v11, %v5414_v6  ;;  %v5417_v17 = vpop.f32.mrb[74].mxu1 }
 0x452   : > { %v5418_v18 = vpop.f32.mrb[75].mxu1 }
 0x453   : > { %5847 = vmatmul.mubr.msk.bf16.vlgmr.msra.gmra.mrb[64].mxu0 %vm10473_vm2, %v1795_v12  ;;  %v1652_v23 = vadd.f32 %v5416_v16, %v6919_v26  ;;  %v5419_v31 = vadd.f32 %v5418_v18, %v5417_v17 }
 0x455   : > { %v1766_v35 = vmax.f32 %v1652_v23, 0.0  ;;  %v1655_v40 = vadd.f32 %v5419_v31, %v6919_v26 }
 0x457   : > { %v1767_v44 = vmax.f32 %v1655_v40, 0.0  ;;  %v5420_v47 = vpop.f32.mrb[76].mxu1 }
 0x458   : > { %v5421_v48 = vpop.f32.mrb[77].mxu1 }
 0x459   : > { %v1796_v51 = vpack.c.bf16 %v1767_v44, %v1766_v35  ;;  %v5422_v52 = vadd.f32 %v5421_v48, %v5420_v47  ;;  %v5423_v55 = vpop.f32.mrb[78].mxu1 }
 0x45a   : > { %v5424_v59 = vpop.f32.mrb[79].mxu1 }
 0x45b   : > { %v1660_v3 = vadd.f32 %v5422_v52, %v6919_v26  ;;  %v5425_v4 = vadd.f32 %v5424_v59, %v5423_v55  ;;  %5850 = vmatprep.mubr.msk.bf16.mxu0 %vm10473_vm2, %v1796_v51 }
 0x45d   : > { %v1768_v7 = vmax.f32 %v1660_v3, 0.0  ;;  %v1663_v9 = vadd.f32 %v5425_v4, %v6919_v26 }
 0x45f   : > { %v1769_v14 = vmax.f32 %v1663_v9, 0.0  ;;  %v5426_v0 = vpop.f32.mrb[80].mxu1 }
 0x460   : > { %v5427_v15 = vpop.f32.mrb[81].mxu1 }
 0x461   : > { %v1797_v20 = vpack.c.bf16 %v1769_v14, %v1768_v7  ;;  %v5428_v24 = vadd.f32 %v5427_v15, %v5426_v0  ;;  %v5429_v27 = vpop.f32.mrb[82].mxu1 }
 0x462   : > { %v5430_v28 = vpop.f32.mrb[83].mxu1 }
 0x463   : > { %5851 = vmatmul.mubr.msk.bf16.gmra.mrb[68].mxu0 %vm10473_vm2, %v1797_v20  ;;  %v1668_v32 = vadd.f32 %v5428_v24, %v6919_v26  ;;  %v5431_v8 = vadd.f32 %v5430_v28, %v5429_v27 }
 0x465   : > { %v1770_v10 = vmax.f32 %v1668_v32, 0.0  ;;  %v1671_v36 = vadd.f32 %v5431_v8, %v6919_v26 }
 0x467   : > { %v1771_v13 = vmax.f32 %v1671_v36, 0.0  ;;  %v5432_v39 = vpop.f32.mrb[84].mxu1 }
 0x468   : > { %v5433_v43 = vpop.f32.mrb[85].mxu1 }
 0x469   : > { %v1798_v19 = vpack.c.bf16 %v1771_v13, %v1770_v10  ;;  %v5434_v21 = vadd.f32 %v5433_v43, %v5432_v39  ;;  %v5435_v22 = vpop.f32.mrb[86].mxu1 }
 0x46a   : > { %v5436_v25 = vpop.f32.mrb[87].mxu1 }
 0x46b   : > { %v1676_v29 = vadd.f32 %v5434_v21, %v6919_v26  ;;  %v5437_v30 = vadd.f32 %v5436_v25, %v5435_v22  ;;  %5854 = vmatprep.mubr.msk.bf16.mxu0 %vm10473_vm2, %v1798_v19 }
 0x46d   : > { %v1772_v33 = vmax.f32 %v1676_v29, 0.0  ;;  %v1679_v34 = vadd.f32 %v5437_v30, %v6919_v26 }
 0x46f   : > { %v1773_v37 = vmax.f32 %v1679_v34, 0.0  ;;  %v5438_v38 = vpop.f32.mrb[88].mxu1 }
 0x470   : > { %v5439_v42 = vpop.f32.mrb[89].mxu1 }
 0x471   : > { %v1799_v45 = vpack.c.bf16 %v1773_v37, %v1772_v33  ;;  %v5440_v46 = vadd.f32 %v5439_v42, %v5438_v38  ;;  %v5441_v49 = vpop.f32.mrb[90].mxu1 }
 0x472   : > { %v5442_v50 = vpop.f32.mrb[91].mxu1 }
 0x473   : > { %v1684_v53 = vadd.f32 %v5440_v46, %v6919_v26  ;;  %v5443_v54 = vadd.f32 %v5442_v50, %v5441_v49  ;;  %5855 = vmatmul.mubr.msk.bf16.gmra.mrb[72].mxu0 %vm10473_vm2, %v1799_v45 }
 0x475   : > { %v1774_v57 = vmax.f32 %v1684_v53, 0.0  ;;  %v1687_v58 = vadd.f32 %v5443_v54, %v6919_v26 }
 0x477   : > { %v1775_v61 = vmax.f32 %v1687_v58, 0.0  ;;  %v5444_v62 = vpop.f32.mrb[92].mxu1 }
 0x478   : > { %v5445_v1 = vpop.f32.mrb[93].mxu1 }
 0x479   : > { %v1800_v2 = vpack.c.bf16 %v1775_v61, %v1774_v57  ;;  %v5446_v5 = vadd.f32 %v5445_v1, %v5444_v62  ;;  %v5447_v6 = vpop.f32.mrb[94].mxu1 }
 0x47a   : > { %v5448_v11 = vpop.f32.mrb[95].mxu1 }
 0x47b   : > { %v1692_v12 = vadd.f32 %v5446_v5, %v6919_v26  ;;  %v5449_v16 = vadd.f32 %v5448_v11, %v5447_v6  ;;  %5858 = vmatprep.mubr.msk.bf16.mxu0 %vm10473_vm2, %v1800_v2 }
 0x47d   : > { %v1776_v17 = vmax.f32 %v1692_v12, 0.0  ;;  %v1695_v18 = vadd.f32 %v5449_v16, %v6919_v26 }
 0x47f   : > { %v1777_v23 = vmax.f32 %v1695_v18, 0.0  ;;  %v5450_v31 = vpop.f32.mrb[96].mxu1 }
 0x480   : > { %v5451_v35 = vpop.f32.mrb[97].mxu1 }
 0x481   : > { %v1801_v40 = vpack.c.bf16 %v1777_v23, %v1776_v17  ;;  %v5452_v44 = vadd.f32 %v5451_v35, %v5450_v31  ;;  %v5453_v47 = vpop.f32.mrb[98].mxu1 }
 0x482   : > { %v5454_v48 = vpop.f32.mrb[99].mxu1 }
 0x483   : > { %v1700_v51 = vadd.f32 %v5452_v44, %v6919_v26  ;;  %v5455_v52 = vadd.f32 %v5454_v48, %v5453_v47  ;;  %5859 = vmatmul.mubr.msk.bf16.gmra.mrb[76].mxu0 %vm10473_vm2, %v1801_v40  ;;  %v10289_v47 = vmov 67  }
 0x484   : > { %5936 = vset.pattern.permute.xlu0 %v10289_v47 }
 0x485   : > { %v1778_v55 = vmax.f32 %v1700_v51, 0.0  ;;  %v1703_v59 = vadd.f32 %v5455_v52, %v6919_v26 }
 0x487   : > { %v1779_v3 = vmax.f32 %v1703_v59, 0.0  ;;  %v5456_v4 = vpop.f32.mrb[100].mxu1 }
 0x488   : > { %v5457_v7 = vpop.f32.mrb[101].mxu1 }
 0x489   : > { %v1802_v9 = vpack.c.bf16 %v1779_v3, %v1778_v55  ;;  %v5458_v14 = vadd.f32 %v5457_v7, %v5456_v4  ;;  %v5459_v0 = vpop.f32.mrb[102].mxu1 }
 0x48a   : > { %v5460_v15 = vpop.f32.mrb[103].mxu1 }
 0x48b   : > { %v1708_v20 = vadd.f32 %v5458_v14, %v6919_v26  ;;  %v5461_v24 = vadd.f32 %v5460_v15, %v5459_v0  ;;  %5862 = vmatprep.mubr.msk.bf16.mxu0 %vm10473_vm2, %v1802_v9 }
 0x48d   : > { %v1780_v27 = vmax.f32 %v1708_v20, 0.0  ;;  %v1711_v28 = vadd.f32 %v5461_v24, %v6919_v26 }
 0x48f   : > { %v1781_v32 = vmax.f32 %v1711_v28, 0.0  ;;  %v5462_v8 = vpop.f32.mrb[104].mxu1 }
 0x490   : > { %v5463_v10 = vpop.f32.mrb[105].mxu1 }
 0x491   : > { %v1803_v36 = vpack.c.bf16 %v1781_v32, %v1780_v27  ;;  %v5464_v13 = vadd.f32 %v5463_v10, %v5462_v8  ;;  %v5465_v39 = vpop.f32.mrb[106].mxu1 }
 0x492   : > { %v5466_v43 = vpop.f32.mrb[107].mxu1 }
 0x493   : > { %5863 = vmatmul.mubr.msk.bf16.gmra.mrb[80].mxu0 %vm10473_vm2, %v1803_v36  ;;  %v1716_v19 = vadd.f32 %v5464_v13, %v6919_v26  ;;  %v5467_v21 = vadd.f32 %v5466_v43, %v5465_v39 }
 0x495   : > { %v1782_v22 = vmax.f32 %v1716_v19, 0.0  ;;  %v1719_v25 = vadd.f32 %v5467_v21, %v6919_v26 }
 0x497   : > { %v1783_v29 = vmax.f32 %v1719_v25, 0.0  ;;  %v5468_v30 = vpop.f32.mrb[108].mxu1 }
 0x498   : > { %v5469_v33 = vpop.f32.mrb[109].mxu1 }
 0x499   : > { %v1804_v34 = vpack.c.bf16 %v1783_v29, %v1782_v22  ;;  %v5470_v37 = vadd.f32 %v5469_v33, %v5468_v30  ;;  %v5471_v38 = vpop.f32.mrb[110].mxu1 }
 0x49a   : > { %v5472_v42 = vpop.f32.mrb[111].mxu1 }
 0x49b   : > { %v1724_v45 = vadd.f32 %v5470_v37, %v6919_v26  ;;  %v5473_v46 = vadd.f32 %v5472_v42, %v5471_v38  ;;  %5866 = vmatprep.mubr.msk.bf16.mxu0 %vm10473_vm2, %v1804_v34 }
 0x49d   : > { %v1784_v49 = vmax.f32 %v1724_v45, 0.0  ;;  %v1727_v50 = vadd.f32 %v5473_v46, %v6919_v26 }
 0x49f   : > { %v1785_v53 = vmax.f32 %v1727_v50, 0.0  ;;  %v5474_v54 = vpop.f32.mrb[112].mxu1 }
 0x4a0   : > { %v5475_v57 = vpop.f32.mrb[113].mxu1 }
 0x4a1   : > { %v1805_v58 = vpack.c.bf16 %v1785_v53, %v1784_v49  ;;  %v5476_v61 = vadd.f32 %v5475_v57, %v5474_v54  ;;  %v5477_v62 = vpop.f32.mrb[114].mxu1 }
 0x4a2   : > { %v5478_v1 = vpop.f32.mrb[115].mxu1 }
 0x4a3   : > { %5867 = vmatmul.mubr.msk.bf16.gmra.mrb[84].mxu0 %vm10473_vm2, %v1805_v58  ;;  %v1732_v2 = vadd.f32 %v5476_v61, %v6919_v26  ;;  %v5479_v5 = vadd.f32 %v5478_v1, %v5477_v62 }
 0x4a5   : > { %v1786_v6 = vmax.f32 %v1732_v2, 0.0  ;;  %v1735_v11 = vadd.f32 %v5479_v5, %v6919_v26 }
 0x4a7   : > { %v1787_v12 = vmax.f32 %v1735_v11, 0.0  ;;  %v5480_v16 = vpop.f32.mrb[116].mxu1 }
 0x4a8   : > { %v5481_v17 = vpop.f32.mrb[117].mxu1 }
 0x4a9   : > { %v1806_v18 = vpack.c.bf16 %v1787_v12, %v1786_v6  ;;  %v5482_v23 = vadd.f32 %v5481_v17, %v5480_v16  ;;  %v5483_v31 = vpop.f32.mrb[118].mxu1 }
 0x4aa   : > { %v5484_v35 = vpop.f32.mrb[119].mxu1 }
 0x4ab   : > { %v1740_v40 = vadd.f32 %v5482_v23, %v6919_v26  ;;  %v5485_v44 = vadd.f32 %v5484_v35, %v5483_v31  ;;  %5870 = vmatprep.mubr.msk.bf16.mxu0 %vm10473_vm2, %v1806_v18 }
 0x4ad   : > { %v1788_v48 = vmax.f32 %v1740_v40, 0.0  ;;  %v1743_v51 = vadd.f32 %v5485_v44, %v6919_v26 }
 0x4af   : > { %v1789_v52 = vmax.f32 %v1743_v51, 0.0  ;;  %v5486_v55 = vpop.f32.mrb[120].mxu1 }
 0x4b0   : > { %v5487_v59 = vpop.f32.mrb[121].mxu1 }
 0x4b1   : > { %v1807_v3 = vpack.c.bf16 %v1789_v52, %v1788_v48  ;;  %v5488_v4 = vadd.f32 %v5487_v59, %v5486_v55  ;;  %v5489_v7 = vpop.f32.mrb[122].mxu1 }
 0x4b2   : > { %v5490_v9 = vpop.f32.mrb[123].mxu1 }
 0x4b3   : > { %5871 = vmatmul.mubr.msk.bf16.gmra.mrb[88].mxu0 %vm10473_vm2, %v1807_v3  ;;  %v1748_v14 = vadd.f32 %v5488_v4, %v6919_v26  ;;  %v5491_v0 = vadd.f32 %v5490_v9, %v5489_v7 }
 0x4b5   : > { %v1790_v15 = vmax.f32 %v1748_v14, 0.0  ;;  %v1751_v20 = vadd.f32 %v5491_v0, %v6919_v26 }
 0x4b7   : > { %v1791_v24 = vmax.f32 %v1751_v20, 0.0  ;;  %v5492_v27 = vpop.f32.mrb[124].mxu1 }
 0x4b8   : > { %v5493_v28 = vpop.f32.mrb[125].mxu1 }
 0x4b9   : > { %v1808_v32 = vpack.c.bf16 %v1791_v24, %v1790_v15  ;;  %v5494_v8 = vadd.f32 %v5493_v28, %v5492_v27  ;;  %v5495_v10 = vpop.f32.mrb[126].mxu1 }
 0x4ba   : > { %v5496_v36 = vpop.f32.mrb[127].mxu1 }
 0x4bb   : > { %v1756_v13 = vadd.f32 %v5494_v8, %v6919_v26  ;;  %v5497_v39 = vadd.f32 %v5496_v36, %v5495_v10  ;;  %5874 = vmatprep.mubr.msk.bf16.mxu0 %vm10473_vm2, %v1808_v32 }
 0x4bd   : > { %v1792_v43 = vmax.f32 %v1756_v13, 0.0  ;;  %v1759_v19 = vadd.f32 %v5497_v39, %v6919_v26 }
 0x4bf   : > { %v1793_v21 = vmax.f32 %v1759_v19, 0.0 }
 0x4c1   : > { %v1809_v22 = vpack.c.bf16 %v1793_v21, %v1792_v43 }
 0x4c3   : > { %5875 = vmatmul.mubr.msk.bf16.gmra.mrb[92].mxu0 %vm10473_vm2, %v1809_v22 }
 0x526   : > { %v5848_v25 = vpop.f32.mrb[64].mxu0 }
 0x527   : > { %2248 = vperm.xlu1 %5935, %v5848_v25   ;;  %2083 = vrot.lane.b32.xlu0 %v5848_v25, %s6516_s27  ;;  %v1904_v29 = vpop.f32.mrb[65].mxu0 }
 0x528   : > { %v5849_v30 = vpop.f32.mrb[66].mxu0 }
 0x529   : > { %v1907_v33 = vpop.f32.mrb[67].mxu0  ;;  %v6972_v34 = vpack.c.bf16 %v5849_v30, %v5848_v25 }
 0x52a   : > { %v6974_v37 = vpack.c.bf16 %v1907_v33, %v1904_v29 }
 0x52b   : > { %3211 = vrot.lane.b32.xlu0 %v5848_v25, %s6517_s28  ;;  %3207 = vrot.lane.b32.xlu1 %v1904_v29, %s6517_s28 }
 0x52c   : > { %5938 = vset.pattern.permute.xlu1 %v10289_v47 }
 0x52f   : > { %3376 = vperm.xlu0 %5936, %v5848_v25   ;;  %3368 = vperm.xlu1 %5938, %v1904_v29  }
 0x533   : > { %5939 = vset.pattern.permute.xlu1 %v10282_v41  ;;  %2079 = vrot.lane.b32.xlu0 %v1904_v29, %s6516_s27 }
 0x534   : > { %2252 = vperm.xlu1 %5939, %v5849_v30   ;;  %5937 = vset.pattern.permute.xlu0 %v10282_v41 }
 0x536   : > { %v5852_v26 = vpop.f32.mrb[68].mxu0 }
 0x537   : > { %2240 = vperm.xlu0 %5937, %v1904_v29   ;;  %v1920_v38 = vpop.f32.mrb[69].mxu0 }
 0x538   : > { %5940 = vset.pattern.permute.xlu1 %v10289_v47  ;;  %v6983_v42 = vpop.f32.mrb[70].mxu0 }
 0x539   : > { %3380 = vperm.xlu1 %5940, %v5849_v30   ;;  %v6985_v45 = vpop.f32.mrb[71].mxu0  ;;  %v6988_v46 = vpack.c.bf16 %v6983_v42, %v5852_v26 }
 0x53a   : > { %v6991_v49 = vpack.c.bf16 %v6985_v45, %v1920_v38 }
 0x53b   : > { %2085 = vrot.lane.b32.xlu0 %v5849_v30, %s6516_s27 }
 0x53c   : > { %5942 = vset.pattern.permute.xlu0 %v10289_v47 }
 0x53d   : > { %5941 = vset.pattern.permute.xlu1 %v10282_v41 }
 0x53e   : > { %2244 = vperm.xlu1 %5941, %v1907_v33  }
 0x53f   : > { %3213 = vrot.lane.b32.xlu0 %v5849_v30, %s6517_s28 }
 0x542   : > { %2264 = vperm.xlu1 %5941, %v5852_v26  }
 0x543   : > { %2081 = vrot.lane.b32.xlu0 %v1907_v33, %s6516_s27 }
 0x546   : > { %5944 = vset.pattern.permute.xlu1 %v10289_v47  ;;  %v6999_v50 = vpop.f32.mrb[72].mxu0 }
 0x547   : > { %3209 = vrot.lane.b32.xlu0 %v1907_v33, %s6517_s28  ;;  %3384 = vperm.xlu1 %5944, %v1920_v38   ;;  %v7002_v53 = vpop.f32.mrb[73].mxu0 }
 0x548   : > { %v7004_v54 = vpop.f32.mrb[74].mxu0 }
 0x549   : > { %v7006_v57 = vpop.f32.mrb[75].mxu0  ;;  %v7010_v58 = vpack.c.bf16 %v7004_v54, %v6999_v50 }
 0x54a   : > { %v7014_v61 = vpack.c.bf16 %v7006_v57, %v7002_v53 }
 0x54b   : > { %3372 = vperm.xlu0 %5942, %v1907_v33   ;;  %5945 = vset.pattern.permute.xlu1 %v10282_v41 }
 0x54c   : > { %2268 = vperm.xlu1 %5945, %v6983_v42  }
 0x54f   : > { %4353 = vrot.lane.b32.xlu0 %v6972_v34, %s6518_s29 }
 0x550   : > { %5946 = vset.pattern.permute.xlu1 %v10289_v47 }
 0x551   : > { %3396 = vperm.xlu1 %5946, %v6983_v42  }
 0x553   : > { %4351 = vrot.lane.b32.xlu0 %v6974_v37, %s6518_s29 }
 0x555   : > { %5947 = vset.pattern.permute.xlu1 %v10282_v41 }
 0x556   : > { %2260 = vperm.xlu1 %5947, %v6985_v45   ;;  %v7026_v62 = vpop.f32.mrb[76].mxu0 }
 0x557   : > { %2091 = vrot.lane.b32.xlu0 %v5852_v26, %s6516_s27  ;;  %v7029_v1 = vpop.f32.mrb[77].mxu0 }
 0x558   : > { %v7031_v2 = vpop.f32.mrb[78].mxu0 }
 0x559   : > { %v7033_v5 = vpop.f32.mrb[79].mxu0  ;;  %v7037_v6 = vpack.c.bf16 %v7031_v2, %v7026_v62 }
 0x55a   : > { %2280 = vperm.xlu1 %5947, %v6999_v50   ;;  %v7042_v11 = vpack.c.bf16 %v7033_v5, %v7029_v1 }
 0x55b   : > { %3219 = vrot.lane.b32.xlu0 %v5852_v26, %s6517_s28 }
 0x55e   : > { %5949 = vset.pattern.permute.xlu1 %v10289_v47 }
 0x55f   : > { %3392 = vperm.xlu0 %5942, %v5852_v26   ;;  %3408 = vperm.xlu1 %5949, %v6999_v50  }
 0x563   : > { %2087 = vrot.lane.b32.xlu0 %v1920_v38, %s6516_s27  ;;  %3412 = vperm.xlu1 %5949, %v7004_v54  }
 0x564   : > { %5943 = vset.pattern.permute.xlu0 %v10282_v41 }
 0x566   : > { %v5864_v12 = vpop.f32.mrb[80].mxu0 }
 0x567   : > { %3215 = vrot.lane.b32.xlu0 %v1920_v38, %s6517_s28  ;;  %5953 = vset.pattern.permute.xlu1 %v10282_v41  ;;  %v7052_v16 = vpop.f32.mrb[81].mxu0 }
 0x568   : > { %2276 = vperm.xlu1 %5953, %v7006_v57   ;;  %v7055_v17 = vpop.f32.mrb[82].mxu0 }
 0x569   : > { %v7057_v18 = vpop.f32.mrb[83].mxu0  ;;  %v7060_v23 = vpack.c.bf16 %v7055_v17, %v5864_v12 }
 0x56a   : > { %v7064_v31 = vpack.c.bf16 %v7057_v18, %v7052_v16 }
 0x56b   : > { %2256 = vperm.xlu0 %5943, %v1920_v38  }
 0x56c   : > { %5954 = vset.pattern.permute.xlu1 %v10289_v47  ;;  %5628 = vmatprep.subr.bf16.mxu1 %v7064_v31 }
 0x56d   : > { %3404 = vperm.xlu1 %5954, %v7006_v57   ;;  %5629 = vmatpush3.bf16.msra.mxu1 %v6974_v37 }
 0x56e   : > { %5630 = vmatprep.subr.bf16.mxu1 %v7060_v23 }
 0x56f   : > { %2093 = vrot.lane.b32.xlu0 %v6983_v42, %s6516_s27 }
 0x570   : > { %5948 = vset.pattern.permute.xlu0 %v10289_v47 }
 0x571   : > { %5955 = vset.pattern.permute.xlu1 %v10282_v41  ;;  %5631 = vmatpush3.bf16.msra.mxu1 %v6972_v34 }
 0x572   : > { %2296 = vperm.xlu1 %5955, %v7026_v62  }
 0x573   : > { %3221 = vrot.lane.b32.xlu0 %v6983_v42, %s6517_s28 }
 0x576   : > { %5956 = vset.pattern.permute.xlu1 %v10289_v47  ;;  %v7080_v35 = vpop.f32.mrb[84].mxu0 }
 0x577   : > { %2089 = vrot.lane.b32.xlu0 %v6985_v45, %s6516_s27  ;;  %3424 = vperm.xlu1 %5956, %v7026_v62   ;;  %v7085_v40 = vpop.f32.mrb[85].mxu0 }
 0x578   : > { %v7087_v44 = vpop.f32.mrb[86].mxu0 }
 0x579   : > { %v7089_v48 = vpop.f32.mrb[87].mxu0  ;;  %v7093_v51 = vpack.c.bf16 %v7087_v44, %v7080_v35 }
 0x57a   : > { %v7097_v52 = vpack.c.bf16 %v7089_v48, %v7085_v40 }
 0x57b   : > { %3217 = vrot.lane.b32.xlu0 %v6985_v45, %s6517_s28  ;;  %3428 = vperm.xlu1 %5956, %v7031_v2  }
 0x57c   : > { %5632 = vmatprep.subr.bf16.mxu1 %v7097_v52 }
 0x57d   : > { %5633 = vmatpush3.bf16.msra.mxu1 %v6991_v49 }
 0x57e   : > { %5634 = vmatprep.subr.bf16.mxu1 %v7093_v51 }
 0x57f   : > { %3388 = vperm.xlu0 %5948, %v6985_v45   ;;  %5959 = vset.pattern.permute.xlu1 %v10282_v41 }
 0x580   : > { %2292 = vperm.xlu1 %5959, %v7033_v5  }
 0x581   : > { %5635 = vmatpush3.bf16.msra.mxu1 %v6988_v46 }
 0x583   : > { %4357 = vrot.lane.b32.xlu0 %v6988_v46, %s6518_s29 }
 0x584   : > { %5960 = vset.pattern.permute.xlu1 %v10289_v47  ;;  %5950 = vset.pattern.permute.xlu0 %v10282_v41 }
 0x585   : > { %3420 = vperm.xlu1 %5960, %v7033_v5  }
 0x586   : > { %v7114_v55 = vpop.f32.mrb[88].mxu0 }
 0x587   : > { %4355 = vrot.lane.b32.xlu0 %v6991_v49, %s6518_s29  ;;  %v7118_v59 = vpop.f32.mrb[89].mxu0 }
 0x588   : > { %v7120_v3 = vpop.f32.mrb[90].mxu0 }
 0x589   : > { %2115 = vrot.lane.b32.xlu1 %v5864_v12, %s6516_s27  ;;  %v7123_v4 = vpop.f32.mrb[91].mxu0  ;;  %v7127_v7 = vpack.c.bf16 %v7120_v3, %v7114_v55 }
 0x58a   : > { %v7131_v9 = vpack.c.bf16 %v7123_v4, %v7118_v59  ;;  %5961 = vset.pattern.permute.xlu1 %v10282_v41 }
 0x58b   : > { %2099 = vrot.lane.b32.xlu0 %v6999_v50, %s6516_s27 }
 0x58c   : > { %5636 = vmatprep.subr.bf16.mxu1 %v7131_v9 }
 0x58d   : > { %3243 = vrot.lane.b32.xlu1 %v5864_v12, %s6517_s28  ;;  %5637 = vmatpush3.bf16.msra.mxu1 %v7014_v61 }
 0x58e   : > { %5638 = vmatprep.subr.bf16.mxu1 %v7127_v7 }
 0x58f   : > { %3227 = vrot.lane.b32.xlu0 %v6999_v50, %s6517_s28 }
 0x591   : > { %2312 = vperm.xlu1 %5961, %v5864_v12   ;;  %5639 = vmatpush3.bf16.msra.mxu1 %v7010_v58 }
 0x593   : > { %2095 = vrot.lane.b32.xlu0 %v7002_v53, %s6516_s27 }
 0x595   : > { %5962 = vset.pattern.permute.xlu1 %v10289_v47 }
 0x596   : > { %3440 = vperm.xlu1 %5962, %v5864_v12   ;;  %v7146_v14 = vpop.f32.mrb[92].mxu0 }
 0x597   : > { %3223 = vrot.lane.b32.xlu0 %v7002_v53, %s6517_s28  ;;  %v7150_v0 = vpop.f32.mrb[93].mxu0 }
 0x598   : > { %v7152_v15 = vpop.f32.mrb[94].mxu0 }
 0x599   : > { %v7154_v20 = vpop.f32.mrb[95].mxu0  ;;  %v7158_v24 = vpack.c.bf16 %v7152_v15, %v7146_v14  ;;  %v7178_v28 = vpop.permute.xlu0 %2083 }
 0x59a   : > { %3239 = vrot.lane.b32.xlu1 %v7052_v16, %s6517_s28  ;;  %v7164_v27 = vpack.c.bf16 %v7154_v20, %v7150_v0 }
 0x59b   : > { %2272 = vperm.xlu0 %5950, %v7002_v53   ;;  %5966 = vset.pattern.permute.xlu1 %v10282_v41 }
 0x59c   : > { %5640 = vmatprep.subr.bf16.mxu1 %v7164_v27 }
 0x59d   : > { %5641 = vmatpush3.bf16.msra.mxu1 %v7042_v11  ;;  %v7189_v8 = vpop.permute.xlu0 %3211 }
 0x59e   : > { %2117 = vrot.lane.b32.xlu1 %v7055_v17, %s6516_s27  ;;  %5642 = vmatprep.subr.bf16.mxu1 %v7158_v24 }
 0x59f   : > { %5951 = vset.pattern.permute.xlu0 %v10289_v47 }
 0x5a0   : > { %3400 = vperm.xlu0 %5951, %v7002_v53  }
 0x5a1   : > { %5643 = vmatpush3.bf16.msra.mxu1 %v7037_v6 }
 0x5a2   : > { %3245 = vrot.lane.b32.xlu1 %v7055_v17, %s6517_s28 }
 0x5a4   : > { %2101 = vrot.lane.b32.xlu0 %v7004_v54, %s6516_s27 }
 0x5a5   : > { %5952 = vset.pattern.permute.xlu0 %v10282_v41 }
 0x5a6   : > { %v7183_v32 = vpop.permute.xlu1 %2248  ;;  %2113 = vrot.lane.b32.xlu1 %v7057_v18, %s6516_s27 }
 0x5a8   : > { %3229 = vrot.lane.b32.xlu0 %v7004_v54, %s6517_s28 }
 0x5aa   : > { %v7191_v10 = vpop.permute.xlu1 %3207  ;;  %3241 = vrot.lane.b32.xlu1 %v7057_v18, %s6517_s28 }
 0x5ac   : > { %2284 = vperm.xlu0 %5952, %v7004_v54  }
 0x5ae   : > { %v7196_v36 = vpop.permute.xlu0 %3376  ;;  %v7198_v13 = vpop.permute.xlu1 %3368  ;;  %2308 = vperm.xlu1 %5966, %v7057_v18  }
 0x5af   : > { %10589 = vst [vmem:[#allocation7_spill] sm:$0xff] %v7196_v36  ;;  %10590 = vst [vmem:[#allocation8_spill] sm:$0xff] %v7198_v13 }
 0x5b0   : > { %2097 = vrot.lane.b32.xlu0 %v7006_v57, %s6516_s27 }
 0x5b2   : > { %v7203_v39 = vpop.permute.xlu0 %2079  ;;  %5967 = vset.pattern.permute.xlu1 %v10289_v47 }
 0x5b3   : > { %v7206_v43 = vpop.permute.xlu1 %2252  ;;  %3436 = vperm.xlu1 %5967, %v7057_v18  }
 0x5b4   : > { %3225 = vrot.lane.b32.xlu0 %v7006_v57, %s6517_s28 }
 0x5b6   : > { %v7211_v19 = vpop.permute.xlu0 %2240 }
 0x5b7   : > { %4369 = vrot.lane.b32.xlu1 %v7060_v23, %s6518_s29 }
 0x5b8   : > { %v7215_v21 = vpop.permute.xlu1 %3380  ;;  %4361 = vrot.lane.b32.xlu0 %v7010_v58, %s6518_s29  ;;  %5968 = vset.pattern.permute.xlu1 %v10282_v41 }
 0x5b9   : > { %10591 = vst [vmem:[#allocation9_spill] sm:$0xff] %v7215_v21 }
 0x5ba   : > { %v7220_v22 = vpop.permute.xlu0 %2085 }
 0x5bb   : > { %4367 = vrot.lane.b32.xlu1 %v7064_v31, %s6518_s29 }
 0x5bc   : > { %4359 = vrot.lane.b32.xlu0 %v7014_v61, %s6518_s29 }
 0x5bd   : > { %v7226_v25 = vpop.permute.xlu1 %2244 }
 0x5be   : > { %v7228_v29 = vpop.permute.xlu0 %3213 }
 0x5bf   : > { %2123 = vrot.lane.b32.xlu1 %v7080_v35, %s6516_s27 }
 0x5c0   : > { %2107 = vrot.lane.b32.xlu0 %v7026_v62, %s6516_s27 }
 0x5c1   : > { %v7234_v30 = vpop.permute.xlu1 %2264 }
 0x5c2   : > { %10592 = vst [vmem:[#allocation10_spill] sm:$0xff] %v7234_v30  ;;  %v7236_v33 = vpop.permute.xlu0 %2081 }
 0x5c3   : > { %3251 = vrot.lane.b32.xlu1 %v7080_v35, %s6517_s28 }
 0x5c4   : > { %3235 = vrot.lane.b32.xlu0 %v7026_v62, %s6517_s28 }
 0x5c6   : > { %v7242_v34 = vpop.permute.xlu0 %3209  ;;  %v7244_v37 = vpop.permute.xlu1 %3384 }
 0x5c7   : > { %10593 = vst [vmem:[#allocation11_spill] sm:$0xff] %v7244_v37  ;;  %2328 = vperm.xlu1 %5968, %v7080_v35  }
 0x5c8   : > { %2103 = vrot.lane.b32.xlu0 %v7029_v1, %s6516_s27 }
 0x5ca   : > { %v7249_v26 = vpop.permute.xlu0 %3372 }
 0x5cb   : > { %10594 = vst [vmem:[#allocation12_spill] sm:$0xff] %v7249_v26  ;;  %v7251_v38 = vpop.permute.xlu1 %2268  ;;  %2119 = vrot.lane.b32.xlu1 %v7085_v40, %s6516_s27 }
 0x5cc   : > { %10595 = vst [vmem:[#allocation13_spill] sm:$0xff] %v7251_v38  ;;  %3231 = vrot.lane.b32.xlu0 %v7029_v1, %s6517_s28 }
 0x5ce   : > { %v7257_v42 = vpop.permute.xlu0 %4353 }
 0x5cf   : > { %3247 = vrot.lane.b32.xlu1 %v7085_v40, %s6517_s28 }
 0x5d0   : > { %v7261_v45 = vpop.permute.xlu1 %3396  ;;  %2288 = vperm.xlu0 %5952, %v7029_v1  }
 0x5d1   : > { %10596 = vst [vmem:[#allocation14_spill] sm:$0xff] %v7261_v45 }
 0x5d2   : > { %v7264_v46 = vpop.permute.xlu0 %4351 }
 0x5d3   : > { %2320 = vperm.xlu1 %5968, %v7085_v40  }
 0x5d4   : > { %5957 = vset.pattern.permute.xlu0 %v10289_v47 }
 0x5d5   : > { %v7268_v49 = vpop.permute.xlu1 %2260  ;;  %3416 = vperm.xlu0 %5957, %v7029_v1  }
 0x5d6   : > { %10597 = vst [vmem:[#allocation15_spill] sm:$0xff] %v7268_v49  ;;  %v7271_v50 = vpop.permute.xlu0 %2091 }
 0x5d7   : > { %2125 = vrot.lane.b32.xlu1 %v7087_v44, %s6516_s27 }
 0x5d9   : > { %v7275_v53 = vpop.permute.xlu1 %2280  ;;  %2109 = vrot.lane.b32.xlu0 %v7031_v2, %s6516_s27 }
 0x5da   : > { %10598 = vst [vmem:[#allocation16_spill] sm:$0xff] %v7275_v53  ;;  %v7279_v54 = vpop.permute.xlu0 %3219  ;;  %5958 = vset.pattern.permute.xlu0 %v10282_v41 }
 0x5db   : > { %3253 = vrot.lane.b32.xlu1 %v7087_v44, %s6517_s28 }
 0x5dd   : > { %3237 = vrot.lane.b32.xlu0 %v7031_v2, %s6517_s28 }
 0x5de   : > { %v7286_v57 = vpop.permute.xlu0 %3392  ;;  %v7288_v58 = vpop.permute.xlu1 %3408 }
 0x5df   : > { %10599 = vst [vmem:[#allocation17_spill] sm:$0xff] %v7286_v57  ;;  %10600 = vst [vmem:[#allocation18_spill] sm:$0xff] %v7288_v58  ;;  %2332 = vperm.xlu1 %5968, %v7087_v44  }
 0x5e1   : > { %2300 = vperm.xlu0 %5958, %v7031_v2  }
 0x5e2   : > { %v7292_v61 = vpop.permute.xlu0 %2087  ;;  %v7294_v62 = vpop.permute.xlu1 %3412 }
 0x5e3   : > { %10601 = vst [vmem:[#allocation19_spill] sm:$0xff] %v7294_v62  ;;  %2121 = vrot.lane.b32.xlu1 %v7089_v48, %s6516_s27  ;;  %v10612_v62 = vmov 67  }
 0x5e5   : > { %2105 = vrot.lane.b32.xlu0 %v7033_v5, %s6516_s27 }
 0x5e6   : > { %v7300_v1 = vpop.permute.xlu0 %3215 }
 0x5e7   : > { %v7302_v12 = vpop.permute.xlu1 %2276  ;;  %3249 = vrot.lane.b32.xlu1 %v7089_v48, %s6517_s28 }
 0x5e8   : > { %10602 = vst [vmem:[#allocation20_spill] sm:$0xff] %v7302_v12 }
 0x5e9   : > { %3233 = vrot.lane.b32.xlu0 %v7033_v5, %s6517_s28 }
 0x5ea   : > { %v7308_v2 = vpop.permute.xlu0 %2256 }
 0x5eb   : > { %10603 = vst [vmem:[#allocation21_spill] sm:$0xff] %v7308_v2  ;;  %2324 = vperm.xlu1 %5968, %v7089_v48  }
 0x5ec   : > { %v7311_v18 = vpop.permute.xlu1 %3404 }
 0x5ed   : > { %10604 = vst [vmem:[#allocation22_spill] sm:$0xff] %v7311_v18  ;;  %4365 = vrot.lane.b32.xlu0 %v7037_v6, %s6518_s29 }
 0x5ee   : > { %v7315_v23 = vpop.permute.xlu0 %2093 }
 0x5ef   : > { %4373 = vrot.lane.b32.xlu1 %v7093_v51, %s6518_s29 }
 0x5f1   : > { %v7319_v31 = vpop.permute.xlu1 %2296  ;;  %4363 = vrot.lane.b32.xlu0 %v7042_v11, %s6518_s29 }
 0x5f2   : > { %10605 = vst [vmem:[#allocation23_spill] sm:$0xff] %v7319_v31  ;;  %v7323_v5 = vpop.permute.xlu0 %3221 }
 0x5f3   : > { %4371 = vrot.lane.b32.xlu1 %v7097_v52, %s6518_s29 }
 0x5f5   : > { %2111 = vrot.lane.b32.xlu0 %v7052_v16, %s6516_s27 }
 0x5f6   : > { %v7329_v41 = vpop.permute.xlu0 %2089  ;;  %v7331_v6 = vpop.permute.xlu1 %3424 }
 0x5f7   : > { %10606 = vst [vmem:[#allocation24_spill] sm:$0xff] %v7331_v6  ;;  %2131 = vrot.lane.b32.xlu1 %v7114_v55, %s6516_s27  ;;  %v10610_v6 = vmov 65  }
 0x5f9   : > { %2304 = vperm.xlu0 %5958, %v7052_v16  }
 0x5fa   : > { %v7336_v51 = vpop.permute.xlu0 %3217  ;;  %v7338_v11 = vpop.permute.xlu1 %3428 }
 0x5fb   : > { %10607 = vst [vmem:[#allocation25_spill] sm:$0xff] %v7338_v11  ;;  %3259 = vrot.lane.b32.xlu1 %v7114_v55, %s6517_s28 }
 0x5fd   : > { %5963 = vset.pattern.permute.xlu0 %v10289_v47 }
 0x5fe   : > { %v7343_v52 = vpop.permute.xlu0 %3388  ;;  %3432 = vperm.xlu0 %5963, %v7052_v16  }
 0x5ff   : > { %10608 = vst [vmem:[#allocation26_spill] sm:$0xff] %v7343_v52  ;;  %v7346_v60 = vpop.permute.xlu1 %2292  ;;  %2344 = vperm.xlu1 %5968, %v7114_v55  }
 0x600   : > { %10609 = vst [vmem:[#allocation27_spill] sm:$0xff] %v7346_v60 }
 0x602   : > { %v7349_v56 = vpop.permute.xlu0 %4357  ;;  %5964 = vset.pattern.permute.xlu0 %v10610_v6 }
 0x603   : > { %2316 = vperm.xlu0 %5964, %v7055_v17   ;;  %2127 = vrot.lane.b32.xlu1 %v7118_v59, %s6516_s27 }
 0x604   : > { %v7355_v11 = vpop.permute.xlu1 %3420 }
 0x605   : > { %10611 = vst [vmem:[#allocation28_spill] sm:$0xff] %v7355_v11 }
 0x606   : > { %v7357_v47 = vpop.permute.xlu0 %4355 }
 0x607   : > { %5965 = vset.pattern.permute.xlu0 %v10612_v62  ;;  %3255 = vrot.lane.b32.xlu1 %v7118_v59, %s6517_s28 }
 0x608   : > { %v7362_v16 = vpop.permute.xlu1 %2115  ;;  %3444 = vperm.xlu0 %5965, %v7055_v17  }
 0x60a   : > { %v7365_v58 = vpop.permute.xlu0 %2099 }
 0x60b   : > { %2336 = vperm.xlu1 %5968, %v7118_v59  }
 0x60c   : > { %v7368_v6 = vpop.permute.xlu1 %3243  ;;  %3456 = vperm.xlu0 %5965, %v7080_v35  }
 0x60e   : > { %v7371_v11 = vpop.permute.xlu0 %3227 }
 0x60f   : > { %2133 = vrot.lane.b32.xlu1 %v7120_v3, %s6516_s27 }
 0x610   : > { %v7375_v62 = vpop.permute.xlu1 %2312  ;;  %3448 = vperm.xlu0 %5965, %v7085_v40  }
 0x611   : > { %10613 = vst [vmem:[#allocation29_spill] sm:$0xff] %v7375_v62 }
 0x612   : > { %v7378_v18 = vpop.permute.xlu0 %2095 }
 0x613   : > { %3261 = vrot.lane.b32.xlu1 %v7120_v3, %s6517_s28 }
 0x614   : > { %3460 = vperm.xlu0 %5965, %v7087_v44  }
 0x615   : > { %v7383_v17 = vpop.permute.xlu1 %3440 }
 0x616   : > { %10614 = vst [vmem:[#allocation30_spill] sm:$0xff] %v7383_v17  ;;  %v7385_v45 = vpop.permute.xlu0 %3223 }
 0x617   : > { %2348 = vperm.xlu1 %5968, %v7120_v3  }
 0x618   : > { %3452 = vperm.xlu0 %5965, %v7089_v48  }
 0x619   : > { %v7389_v35 = vpop.permute.xlu1 %3239 }
 0x61a   : > { %v7391_v57 = vpop.permute.xlu0 %2272 }
 0x61b   : > { %10615 = vst [vmem:[#allocation31_spill] sm:$0xff] %v7391_v57  ;;  %2129 = vrot.lane.b32.xlu1 %v7123_v4, %s6516_s27 }
 0x61c   : > { %3472 = vperm.xlu0 %5965, %v7114_v55  }
 0x61d   : > { %v7396_v40 = vpop.permute.xlu1 %2117 }
 0x61f   : > { %v7398_v44 = vpop.permute.xlu0 %3400  ;;  %3257 = vrot.lane.b32.xlu1 %v7123_v4, %s6517_s28 }
 0x620   : > { %10616 = vst [vmem:[#allocation32_spill] sm:$0xff] %v7398_v44  ;;  %3464 = vperm.xlu0 %5965, %v7118_v59  }
 0x621   : > { %v7403_v17 = vpop.permute.xlu1 %3245 }
 0x623   : > { %v7405_v48 = vpop.permute.xlu0 %2101  ;;  %2340 = vperm.xlu1 %5968, %v7123_v4  }
 0x624   : > { %3476 = vperm.xlu0 %5965, %v7120_v3  }
 0x625   : > { %v7409_v52 = vpop.permute.xlu1 %2113 }
 0x627   : > { %v7411_v55 = vpop.permute.xlu0 %3229  ;;  %4377 = vrot.lane.b32.xlu1 %v7127_v7, %s6518_s29 }
 0x628   : > { %3468 = vperm.xlu0 %5965, %v7123_v4  }
 0x629   : > { %v7416_v44 = vpop.permute.xlu1 %3241 }
 0x62b   : > { %v7418_v59 = vpop.permute.xlu0 %2284  ;;  %4375 = vrot.lane.b32.xlu1 %v7131_v9, %s6518_s29 }
 0x62c   : > { %10617 = vst [vmem:[#allocation33_spill] sm:$0xff] %v7418_v59  ;;  %3488 = vperm.xlu0 %5965, %v7146_v14  }
 0x62d   : > { %v7423_v37 = vpop.permute.xlu1 %2308 }
 0x62e   : > { %10618 = vst [vmem:[#allocation34_spill] sm:$0xff] %v7423_v37 }
 0x62f   : > { %v7425_v3 = vpop.permute.xlu0 %2097  ;;  %2139 = vrot.lane.b32.xlu1 %v7146_v14, %s6516_s27 }
 0x630   : > { %3480 = vperm.xlu0 %5965, %v7150_v0  }
 0x632   : > { %v7430_v7 = vpop.permute.xlu1 %3436 }
 0x633   : > { %10619 = vst [vmem:[#allocation35_spill] sm:$0xff] %v7430_v7  ;;  %v7432_v4 = vpop.permute.xlu0 %3225  ;;  %3267 = vrot.lane.b32.xlu1 %v7146_v14, %s6517_s28 }
 0x634   : > { %3492 = vperm.xlu0 %5965, %v7152_v15  }
 0x636   : > { %v4370_v9 = vpop.permute.xlu1 %4369 }
 0x637   : > { %v7437_v21 = vpop.permute.xlu0 %4361  ;;  %2360 = vperm.xlu1 %5968, %v7146_v14  }
 0x638   : > { %3484 = vperm.xlu0 %5965, %v7154_v20  }
 0x63a   : > { %v4368_v36 = vpop.permute.xlu1 %4367 }
 0x63b   : > { %v7441_v13 = vpop.permute.xlu0 %4359  ;;  %5516 = vmatprep.subr.bf16.mxu0 %v4368_v36  ;;  %2135 = vrot.lane.b32.xlu1 %v7150_v0, %s6516_s27 }
 0x63c   : > { %5517 = vmatpush3.bf16.msra.mxu0 %v7264_v46 }
 0x63d   : > { %5518 = vmatprep.subr.bf16.mxu0 %v4370_v9 }
 0x63e   : > { %v7446_v7 = vpop.permute.xlu1 %2123 }
 0x63f   : > { %v7448_v26 = vpop.permute.xlu0 %2107  ;;  %3263 = vrot.lane.b32.xlu1 %v7150_v0, %s6517_s28 }
 0x640   : > { %5519 = vmatpush3.bf16.msra.mxu0 %v7257_v42 }
 0x642   : > { %v7453_v14 = vpop.permute.xlu1 %3251 }
 0x643   : > { %v7455_v62 = vpop.permute.xlu0 %3235  ;;  %2352 = vperm.xlu1 %5968, %v7150_v0  }
 0x646   : > { %v7458_v36 = vpop.permute.xlu1 %2328 }
 0x647   : > { %10620 = vst [vmem:[#allocation36_spill] sm:$0xff] %v7458_v36  ;;  %2141 = vrot.lane.b32.xlu1 %v7152_v15, %s6516_s27  ;;  %v2104_v46 = vpop.permute.xlu0 %2103 }
 0x64a   : > { %v7462_v9 = vpop.permute.xlu1 %2119 }
 0x64b   : > { %3269 = vrot.lane.b32.xlu1 %v7152_v15, %s6517_s28  ;;  %v7468_v42 = vpop.permute.xlu0 %3231 }
 0x64e   : > { %v7466_v37 = vpop.permute.xlu1 %3247 }
 0x64f   : > { %2364 = vperm.xlu1 %5968, %v7152_v15   ;;  %v7475_v0 = vpop.permute.xlu0 %2288 }
 0x650   : > { %10622 = vst [vmem:[#allocation38_spill] sm:$0xff] %v7475_v0 }
 0x652   : > { %v7471_v31 = vpop.permute.xlu1 %2320 }
 0x653   : > { %10621 = vst [vmem:[#allocation37_spill] sm:$0xff] %v7471_v31  ;;  %2137 = vrot.lane.b32.xlu1 %v7154_v20, %s6516_s27 }
 0x654   : > { %v7485_v59 = vpop.permute.xlu0 %3416 }
 0x655   : > { %10623 = vst [vmem:[#allocation39_spill] sm:$0xff] %v7485_v59 }
 0x656   : > { %v7477_v36 = vpop.permute.xlu1 %2125  ;;  %2175 = vxpose.xlu0.b32.start [1/16] (narrow) %v7203_v39, 8 }
 0x657   : > { %3265 = vrot.lane.b32.xlu1 %v7154_v20, %s6517_s28 }
 0x658   : > { %v2110_v31 = vpop.permute.xlu0 %2109 }
 0x65a   : > { %v7482_v60 = vpop.permute.xlu1 %3253  ;;  %2176 = vxpose.xlu0.b32.cont [2/16] (narrow) %v7236_v33, 8 }
 0x65b   : > { %2356 = vperm.xlu1 %5968, %v7154_v20  }
 0x65c   : > { %v7499_v33 = vpop.permute.xlu0 %3237 }
 0x65e   : > { %v7488_v15 = vpop.permute.xlu1 %2332  ;;  %2177 = vxpose.xlu0.b32.cont [3/16] (narrow) %v7178_v28, 8 }
 0x65f   : > { %10624 = vst [vmem:[#allocation40_spill] sm:$0xff] %v7488_v15  ;;  %4381 = vrot.lane.b32.xlu1 %v7158_v24, %s6518_s29 }
 0x660   : > { %v7504_v28 = vpop.permute.xlu0 %2300 }
 0x661   : > { %10626 = vst [vmem:[#allocation42_spill] sm:$0xff] %v7504_v28 }
 0x662   : > { %v2122_v39 = vpop.permute.xlu1 %2121  ;;  %2178 = vxpose.xlu0.b32.cont [4/16] (narrow) %v7220_v22, 8 }
 0x663   : > { %4379 = vrot.lane.b32.xlu1 %v7164_v27, %s6518_s29 }
 0x664   : > { %v2106_v22 = vpop.permute.xlu0 %2105 }
 0x666   : > { %v7496_v0 = vpop.permute.xlu1 %3249  ;;  %2179 = vxpose.xlu0.b32.cont [5/16] (narrow) %v7292_v61, 8 }
 0x668   : > { %v3234_v61 = vpop.permute.xlu0 %3233 }
 0x66a   : > { %v7501_v20 = vpop.permute.xlu1 %2324  ;;  %2180 = vxpose.xlu0.b32.cont [6/16] (narrow) %v7329_v41, 8 }
 0x66b   : > { %10625 = vst [vmem:[#allocation41_spill] sm:$0xff] %v7501_v20 }
 0x66e   : > { %v4374_v24 = vpop.permute.xlu1 %4373  ;;  %2181 = vxpose.xlu0.b32.cont [7/16] (narrow) %v7271_v50, 8  ;;  %v7517_v50 = vpop.permute.xlu0 %4365 }
 0x672   : > { %v4372_v59 = vpop.permute.xlu1 %4371  ;;  %2182 = vxpose.xlu0.b32.cont [8/16] (narrow) %v7315_v23, 8 }
 0x673   : > { %5520 = vmatprep.subr.bf16.mxu0 %v4372_v59 }
 0x674   : > { %5521 = vmatpush3.bf16.msra.mxu0 %v7357_v47  ;;  %v7520_v47 = vpop.permute.xlu0 %4363 }
 0x675   : > { %5522 = vmatprep.subr.bf16.mxu0 %v4374_v24 }
 0x676   : > { %v2132_v27 = vpop.permute.xlu1 %2131  ;;  %2183 = vxpose.xlu0.b32.cont [9/16] (narrow) %v7378_v18, 8 }
 0x678   : > { %5523 = vmatpush3.bf16.msra.mxu0 %v7349_v56  ;;  %v2112_v18 = vpop.permute.xlu0 %2111 }
 0x67a   : > { %v7511_v41 = vpop.permute.xlu1 %3259  ;;  %2184 = vxpose.xlu0.b32.cont [10/16] (narrow) %v7425_v3, 8 }
 0x67e   : > { %v7514_v15 = vpop.permute.xlu1 %2344  ;;  %2185 = vxpose.xlu0.b32.cont [11/16] (narrow) %v7365_v58, 8 }
 0x67f   : > { %10627 = vst [vmem:[#allocation43_spill] sm:$0xff] %v7514_v15 }
 0x682   : > { %v2128_v23 = vpop.permute.xlu1 %2127  ;;  %2186 = vxpose.xlu0.b32.cont [12/16] (narrow) %v7405_v48, 8 }
 0x686   : > { %v7522_v59 = vpop.permute.xlu1 %3255  ;;  %2187 = vxpose.xlu0.b32.cont [13/16] (narrow) %v2104_v46, 8 }
 0x68a   : > { %v7524_v56 = vpop.permute.xlu1 %2336  ;;  %2188 = vxpose.xlu0.b32.cont [14/16] (narrow) %v2106_v22, 8 }
 0x68b   : > { %10628 = vst [vmem:[#allocation44_spill] sm:$0xff] %v7524_v56 }
 0x68c   : > { %2207 = vxpose.xlu1.b32.start [1/16] (narrow) %v2112_v18, 8 }
 0x68e   : > { %v2134_v3 = vpop.permute.xlu1 %2133  ;;  %2189 = vxpose.xlu0.b32.cont [15/16] (narrow) %v7448_v26, 8 }
 0x690   : > { %2208 = vxpose.xlu1.b32.cont [2/16] (narrow) %v7409_v52, 8 }
 0x692   : > { %v7528_v58 = vpop.permute.xlu1 %3261  ;;  %2190 = vxpose.xlu0.b32.end [16/16] (narrow) %v2110_v31, 8 }
 0x694   : > { %2209 = vxpose.xlu1.b32.cont [3/16] (narrow) %v7362_v16, 8 }
 0x696   : > { %v7531_v48 = vpop.permute.xlu1 %2348  ;;  %3303 = vxpose.xlu0.b32.start [1/16] (narrow) %v7191_v10, 8 }
 0x697   : > { %10629 = vst [vmem:[#allocation45_spill] sm:$0xff] %v7531_v48 }
 0x698   : > { %2210 = vxpose.xlu1.b32.cont [4/16] (narrow) %v7396_v40, 8 }
 0x69a   : > { %v2130_v46 = vpop.permute.xlu1 %2129  ;;  %3304 = vxpose.xlu0.b32.cont [2/16] (narrow) %v7242_v34, 8 }
 0x69c   : > { %2211 = vxpose.xlu1.b32.cont [5/16] (narrow) %v7462_v9, 8 }
 0x69e   : > { %v7537_v24 = vpop.permute.xlu1 %3257  ;;  %3305 = vxpose.xlu0.b32.cont [3/16] (narrow) %v7189_v8, 8 }
 0x6a0   : > { %2212 = vxpose.xlu1.b32.cont [6/16] (narrow) %v2122_v39, 8 }
 0x6a2   : > { %v7540_v26 = vpop.permute.xlu1 %2340  ;;  %3306 = vxpose.xlu0.b32.cont [4/16] (narrow) %v7228_v29, 8 }
 0x6a3   : > { %10630 = vst [vmem:[#allocation46_spill] sm:$0xff] %v7540_v26 }
 0x6a4   : > { %2213 = vxpose.xlu1.b32.cont [7/16] (narrow) %v7446_v7, 8 }
 0x6a6   : > { %v4378_v31 = vpop.permute.xlu1 %4377  ;;  %3307 = vxpose.xlu0.b32.cont [5/16] (narrow) %v7300_v1, 8 }
 0x6a8   : > { %2214 = vxpose.xlu1.b32.cont [8/16] (narrow) %v7477_v36, 8 }
 0x6aa   : > { %v4376_v10 = vpop.permute.xlu1 %4375  ;;  %3308 = vxpose.xlu0.b32.cont [6/16] (narrow) %v7336_v51, 8 }
 0x6ab   : > { %5524 = vmatprep.subr.bf16.mxu0 %v4376_v10 }
 0x6ac   : > { %5525 = vmatpush3.bf16.msra.mxu0 %v7441_v13  ;;  %2215 = vxpose.xlu1.b32.cont [9/16] (narrow) %v2128_v23, 8 }
 0x6ad   : > { %5526 = vmatprep.subr.bf16.mxu0 %v4378_v31 }
 0x6ae   : > { %v2140_v8 = vpop.permute.xlu1 %2139  ;;  %3309 = vxpose.xlu0.b32.cont [7/16] (narrow) %v7279_v54, 8 }
 0x6b0   : > { %5527 = vmatpush3.bf16.msra.mxu0 %v7437_v21  ;;  %2216 = vxpose.xlu1.b32.cont [10/16] (narrow) %v2130_v46, 8  ;;  %v7559_v21 = vpop.permute.xlu0 %2304 }
 0x6b1   : > { %10633 = vst [vmem:[#allocation49_spill] sm:$0xff] %v7559_v21 }
 0x6b2   : > { %v3268_v29 = vpop.permute.xlu1 %3267  ;;  %3310 = vxpose.xlu0.b32.cont [8/16] (narrow) %v7323_v5, 8 }
 0x6b4   : > { %2217 = vxpose.xlu1.b32.cont [11/16] (narrow) %v2132_v27, 8 }
 0x6b6   : > { %v7551_v34 = vpop.permute.xlu1 %2360  ;;  %3311 = vxpose.xlu0.b32.cont [9/16] (narrow) %v7385_v45, 8  ;;  %v7562_v45 = vpop.permute.xlu0 %3432 }
 0x6b7   : > { %10631 = vst [vmem:[#allocation47_spill] sm:$0xff] %v7551_v34  ;;  %10634 = vst [vmem:[#allocation50_spill] sm:$0xff] %v7562_v45 }
 0x6b8   : > { %2218 = vxpose.xlu1.b32.cont [12/16] (narrow) %v2134_v3, 8 }
 0x6ba   : > { %v2136_v1 = vpop.permute.xlu1 %2135  ;;  %3312 = vxpose.xlu0.b32.cont [10/16] (narrow) %v7432_v4, 8  ;;  %v7567_v16 = vpop.permute.xlu0 %2316 }
 0x6bb   : > { %10636 = vst [vmem:[#allocation52_spill] sm:$0xff] %v7567_v16 }
 0x6bc   : > { %2219 = vxpose.xlu1.b32.cont [13/16] (narrow) %v2136_v1, 8  ;;  %v6414_v1 = vld [vmem:[%s6632_s9 + $0x8] sm:$0xff] }
 0x6bd   : > { %vm326_vm8 = vcmp.gt.bf16.partialorder %v6414_v1, 0 }
 0x6be   : > { %v3264_v13 = vpop.permute.xlu1 %3263  ;;  %3313 = vxpose.xlu0.b32.cont [11/16] (narrow) %v7371_v11, 8 }
 0x6c2   : > { %v7556_v54 = vpop.permute.xlu1 %2352  ;;  %3314 = vxpose.xlu0.b32.cont [12/16] (narrow) %v7411_v55, 8  ;;  %v7570_v55 = vpop.permute.xlu0 %3444 }
 0x6c3   : > { %10632 = vst [vmem:[#allocation48_spill] sm:$0xff] %v7556_v54  ;;  %10637 = vst [vmem:[#allocation53_spill] sm:$0xff] %v7570_v55 }
 0x6c6   : > { %v2142_v5 = vpop.permute.xlu1 %2141  ;;  %3315 = vxpose.xlu0.b32.cont [13/16] (narrow) %v7468_v42, 8  ;;  %v7574_v4 = vpop.permute.xlu0 %3456 }
 0x6c7   : > { %10639 = vst [vmem:[#allocation55_spill] sm:$0xff] %v7574_v4 }
 0x6ca   : > { %v3270_v51 = vpop.permute.xlu1 %3269  ;;  %3316 = vxpose.xlu0.b32.cont [14/16] (narrow) %v3234_v61, 8 }
 0x6ce   : > { %v7564_v52 = vpop.permute.xlu1 %2364  ;;  %3317 = vxpose.xlu0.b32.cont [15/16] (narrow) %v7455_v62, 8  ;;  %v7577_v62 = vpop.permute.xlu0 %3448 }
 0x6cf   : > { %10635 = vst [vmem:[#allocation51_spill] sm:$0xff] %v7564_v52  ;;  %10640 = vst [vmem:[#allocation56_spill] sm:$0xff] %v7577_v62 }
 0x6d2   : > { %3318 = vxpose.xlu0.b32.end [16/16] (narrow) %v7499_v33, 8  ;;  %v2138_v11 = vpop.permute.xlu1 %2137  ;;  %v7581_v42 = vpop.permute.xlu0 %3460 }
 0x6d3   : > { %2220 = vxpose.xlu1.b32.cont [14/16] (narrow) %v2138_v11, 8  ;;  %10641 = vst [vmem:[#allocation57_spill] sm:$0xff] %v7581_v42 }
 0x6d6   : > { %v3266_v40 = vpop.permute.xlu1 %3265  ;;  %v7585_v39 = vpop.permute.xlu0 %3452 }
 0x6d7   : > { %2221 = vxpose.xlu1.b32.cont [15/16] (narrow) %v2140_v8, 8  ;;  %10642 = vst [vmem:[#allocation58_spill] sm:$0xff] %v7585_v39 }
 0x6da   : > { %v7572_v7 = vpop.permute.xlu1 %2356 }
 0x6db   : > { %10638 = vst [vmem:[#allocation54_spill] sm:$0xff] %v7572_v7  ;;  %2222 = vxpose.xlu1.b32.end [16/16] (narrow) %v2142_v5, 8 }
 0x6de   : > { %v4382_v36 = vpop.permute.xlu1 %4381 }
 0x6df   : > { %3335 = vxpose.xlu1.b32.start [1/16] (narrow) %v7389_v35, 8  ;;  %v7588_v35 = vpop.permute.xlu0 %3472 }
 0x6e0   : > { %10643 = vst [vmem:[#allocation59_spill] sm:$0xff] %v7588_v35 }
 0x6e2   : > { %v4380_v9 = vpop.permute.xlu1 %4379 }
 0x6e3   : > { %5528 = vmatprep.subr.bf16.mxu0 %v4380_v9  ;;  %3336 = vxpose.xlu1.b32.cont [2/16] (narrow) %v7416_v44, 8  ;;  %v7592_v33 = vpop.permute.xlu0 %3464 }
 0x6e4   : > { %5529 = vmatpush3.bf16.msra.mxu0 %v7520_v47  ;;  %10644 = vst [vmem:[#allocation60_spill] sm:$0xff] %v7592_v33 }
 0x6e5   : > { %5530 = vmatprep.subr.bf16.mxu0 %v4382_v36 }
 0x6e7   : > { %3337 = vxpose.xlu1.b32.cont [3/16] (narrow) %v7368_v6, 8  ;;  %v7595_v22 = vpop.permute.xlu0 %3476 }
 0x6e8   : > { %5531 = vmatpush3.bf16.msra.mxu0 %v7517_v50  ;;  %10645 = vst [vmem:[#allocation61_spill] sm:$0xff] %v7595_v22 }
 0x6eb   : > { %3338 = vxpose.xlu1.b32.cont [4/16] (narrow) %v7403_v17, 8  ;;  %v7599_v6 = vpop.permute.xlu0 %3468 }
 0x6ec   : > { %10646 = vst [vmem:[#allocation62_spill] sm:$0xff] %v7599_v6 }
 0x6ef   : > { %3339 = vxpose.xlu1.b32.cont [5/16] (narrow) %v7466_v37, 8  ;;  %v7602_v17 = vpop.permute.xlu0 %3488 }
 0x6f0   : > { %10647 = vst [vmem:[#allocation63_spill] sm:$0xff] %v7602_v17 }
 0x6f3   : > { %3340 = vxpose.xlu1.b32.cont [6/16] (narrow) %v7496_v0, 8  ;;  %v7606_v37 = vpop.permute.xlu0 %3480 }
 0x6f4   : > { %10648 = vst [vmem:[#allocation64_spill] sm:$0xff] %v7606_v37 }
 0x6f7   : > { %3341 = vxpose.xlu1.b32.cont [7/16] (narrow) %v7453_v14, 8  ;;  %v7608_v44 = vpop.permute.xlu0 %3492 }
 0x6f8   : > { %10649 = vst [vmem:[#allocation65_spill] sm:$0xff] %v7608_v44 }
 0x6fb   : > { %3342 = vxpose.xlu1.b32.cont [8/16] (narrow) %v7482_v60, 8  ;;  %v7610_v60 = vpop.permute.xlu0 %3484 }
 0x6fc   : > { %10650 = vst [vmem:[#allocation66_spill] sm:$0xff] %v7610_v60 }
 0x6ff   : > { %3343 = vxpose.xlu1.b32.cont [9/16] (narrow) %v7522_v59, 8  ;;  %v2191_v14 = vpop.trf.xlu0 }
 0x700   : > { %v7613_v27 = vrot.slane %v2191_v14, %v6825_v63 }
 0x702   : > { %v7654_v36 = vadd.f32 %v7613_v27, %v7206_v43  ;;  %v7658_v9 = vadd.f32 %v7613_v27, %v7308_v2  ;;  %v7662_v14 = vadd.f32 %v7613_v27, %v7268_v49  ;;  %v7702_v11 = vadd.f32 %v7613_v27, %v7504_v28  ;;  %v10664_v28 = vld [vmem:[#allocation36_spill] sm:$0xff] }
 0x703   : > { %3344 = vxpose.xlu1.b32.cont [10/16] (narrow) %v7537_v24, 8 }
 0x704   : > { %v2511_v60 = vmul.f32 0.2, %v7658_v9  ;;  %v2533_v4 = vmul.f32 0.2, %v7702_v11  ;;  %vm2445_vm9 = vcmp.gt.f32.partialorder %v7654_v36, 0.0  ;;  %vm2449_vm11 = vcmp.gt.f32.partialorder %v7662_v14, 0.0 }
 0x705   : > { %vm2447_vm12 = vcmp.gt.f32.partialorder %v7658_v9, 0.0 }
 0x707   : > { %3345 = vxpose.xlu1.b32.cont [11/16] (narrow) %v7511_v41, 8  ;;  %v2377_v41 = vadd.f32 %v7613_v27, %v7226_v25 }
 0x709   : > { %v2505_v23 = vmul.f32 0.2, %v2377_v41  ;;  %vm2441_vm3 = vcmp.gt.f32.partialorder %v2377_v41, 0.0 }
 0x70b   : > { %3346 = vxpose.xlu1.b32.cont [12/16] (narrow) %v7528_v58, 8  ;;  %v7622_v59 = vsel %vm2441_vm3, %v2377_v41, %v2505_v23  ;;  %v7670_v41 = vadd.f32 %v7613_v27, %v7251_v38  ;;  %v7678_v23 = vadd.f32 %v7613_v27, %v7302_v12  ;;  %v7799_v38 = vadd.f32 %v7613_v27, %v7572_v7 }
 0x70c   : > { %10651 = vst [vmem:[#allocation67_spill] sm:$0xff] %v7622_v59 }
 0x70d   : > { %v2521_v35 = vmul.f32 0.2, %v7678_v23  ;;  %vm2453_vm13 = vcmp.gt.f32.partialorder %v7670_v41, 0.0  ;;  %vm2457_vm15 = vcmp.gt.f32.partialorder %v7678_v23, 0.0 }
 0x70f   : > { %3347 = vxpose.xlu1.b32.cont [13/16] (narrow) %v3264_v13, 8  ;;  %v10315_v13 = vmov 0  }
 0x713   : > { %3348 = vxpose.xlu1.b32.cont [14/16] (narrow) %v3266_v40, 8  ;;  %v7650_v40 = vadd.f32 %v7613_v27, %v7183_v32 }
 0x715   : > { %v2507_v17 = vmul.f32 0.2, %v7650_v40  ;;  %vm2443_vm10 = vcmp.gt.f32.partialorder %v7650_v40, 0.0 }
 0x717   : > { %3349 = vxpose.xlu1.b32.cont [15/16] (narrow) %v3268_v29, 8  ;;  %v6413_v29 = vld [vmem:[%s6632_s9] sm:$0xff] }
 0x718   : > { %vm325_vm7 = vcmp.gt.bf16.partialorder %v6413_v29, 0  ;;  %v10660_v29 = vld [vmem:[#allocation23_spill] sm:$0xff] }
 0x719   : > { %v7641_v5 = vsel %vm325_vm7, 65537, %v10315_v13  ;;  %v7698_v1 = vadd.f32 %v7613_v27, %v10660_v29  ;;  %v10665_v29 = vld [vmem:[#allocation40_spill] sm:$0xff] }
 0x71a   : > { %10655 = vst [vmem:[#allocation71_spill] sm:$0xff] %v7641_v5 }
 0x71b   : > { %3350 = vxpose.xlu1.b32.end [16/16] (narrow) %v3270_v51, 8  ;;  %v7706_v51 = vadd.f32 %v7613_v27, %v7559_v21  ;;  %v7726_v21 = vadd.f32 %v7613_v27, %v7501_v20  ;;  %v7744_v20 = vadd.f32 %v7613_v27, %v7540_v26  ;;  %v7758_v26 = vadd.f32 %v7613_v27, %v7531_v48 }
 0x71c   : > { %v2531_v42 = vmul.f32 0.2, %v7698_v1  ;;  %v7772_v48 = vadd.f32 %v7613_v27, %v7551_v34 }
 0x71d   : > { %v2535_v39 = vmul.f32 0.2, %v7706_v51  ;;  %v2545_v34 = vmul.f32 0.2, %v7726_v21  ;;  %v7807_v2 = vmul.f32 0.2, %v7758_v26 }
 0x71e   : > { %v7818_v7 = vmul.f32 0.2, %v7772_v48 }
 0x71f   : > { %v2223_v0 = vpop.trf.xlu1 }
 0x720   : > { %v7616_v61 = vrot.slane %v2223_v0, %v6825_v63  ;;  %v7666_v0 = vadd.f32 %v7613_v27, %v7234_v30  ;;  %v2553_v30 = vmul.f32 0.2, %v7744_v20  ;;  %10670 = vst [vmem:[#allocation77_spill] sm:$0xff] %v7818_v7  ;;  %v7835_v7 = vsel %vm2447_vm12, %v7658_v9, %v2511_v60 }
 0x721   : > { %10674 = vst [vmem:[#allocation81_spill] sm:$0xff] %v7835_v7 }
 0x722   : > { %v2378_v50 = vadd.f32 %v7616_v61, %v7226_v25  ;;  %v2376_v58 = vadd.f32 %v7616_v61, %v7211_v19  ;;  %v2375_v25 = vadd.f32 %v7613_v27, %v7211_v19  ;;  %v7644_v19 = vsel %vm326_vm8, 65537, %v10315_v13  ;;  %v10661_v13 = vld [vmem:[#allocation34_spill] sm:$0xff] }
 0x723   : > { %10656 = vst [vmem:[#allocation72_spill] sm:$0xff] %v7644_v19  ;;  %v2515_v37 = vmul.f32 0.2, %v7666_v0  ;;  %vm2451_vm14 = vcmp.gt.f32.partialorder %v7666_v0, 0.0  ;;  %vm2469_vm8 = vcmp.gt.f32.partialorder %v7702_v11, 0.0 }
 0x724   : > { %vm2442_vm4 = vcmp.gt.f32.partialorder %v2378_v50, 0.0  ;;  %v2506_v47 = vmul.f32 0.2, %v2378_v50  ;;  %v2504_v46 = vmul.f32 0.2, %v2376_v58  ;;  %vm2440_vm5 = vcmp.gt.f32.partialorder %v2376_v58, 0.0 }
 0x725   : > { %v2503_v24 = vmul.f32 0.2, %v2375_v25  ;;  %vm2439_vm6 = vcmp.gt.f32.partialorder %v2375_v25, 0.0 }
 0x726   : > { %v7624_v18 = vsel %vm2442_vm4, %v2378_v50, %v2506_v47  ;;  %v7632_v31 = vsel %vm2440_vm5, %v2376_v58, %v2504_v46  ;;  %v7674_v50 = vadd.f32 %v7613_v27, %v7391_v57  ;;  %v7682_v47 = vadd.f32 %v7613_v27, %v7275_v53 }
 0x727   : > { %10652 = vst [vmem:[#allocation68_spill] sm:$0xff] %v7624_v18  ;;  %v2634_v3 = vmax.f32 %v7622_v59, %v7624_v18  ;;  %10653 = vst [vmem:[#allocation69_spill] sm:$0xff] %v7632_v31  ;;  %v7634_v10 = vsel %vm2439_vm6, %v2375_v25, %v2503_v24  ;;  %v10658_v25 = vld [vmem:[#allocation38_spill] sm:$0xff]  ;;  %v10659_v24 = vld [vmem:[#allocation27_spill] sm:$0xff]  ;;  %v7718_v18 = vadd.f32 %v7613_v27, %v7567_v16  ;;  %vm2467_vm6 = vcmp.gt.f32.partialorder %v7698_v1, 0.0 }
 0x728   : > { %10654 = vst [vmem:[#allocation70_spill] sm:$0xff] %v7634_v10  ;;  %v2631_v8 = vmax.f32 %v7634_v10, %v7632_v31  ;;  %v7690_v46 = vadd.f32 %v7613_v27, %v10658_v25  ;;  %v7710_v31 = vadd.f32 %v7613_v27, %v10661_v13  ;;  %v10662_v10 = vld [vmem:[#allocation29_spill] sm:$0xff]  ;;  %v7730_v13 = vadd.f32 %v7613_v27, %v10664_v28 }
 0x729   : > { %2635 = vmax.xlane.f32.xlu0 %v2634_v3  ;;  %v10657_v3 = vld [vmem:[#allocation33_spill] sm:$0xff]  ;;  %v7714_v5 = vadd.f32 %v7613_v27, %v10662_v10  ;;  %v7734_v10 = vadd.f32 %v7613_v27, %v10665_v29  ;;  %v7738_v16 = vadd.f32 %v7613_v27, %v7524_v56  ;;  %v2513_v28 = vmul.f32 0.2, %v7662_v14 }
 0x72a   : > { %v7686_v58 = vadd.f32 %v7613_v27, %v10657_v3  ;;  %v10663_v59 = vld [vmem:[#allocation37_spill] sm:$0xff]  ;;  %v7751_v29 = vadd.f32 %v7613_v27, %v7514_v15  ;;  %v2517_v56 = vmul.f32 0.2, %v7670_v41  ;;  %v2519_v22 = vmul.f32 0.2, %v7674_v50 }
 0x72b   : > { %v7722_v44 = vadd.f32 %v7613_v27, %v10663_v59  ;;  %v2509_v59 = vmul.f32 0.2, %v7654_v36  ;;  %v2523_v6 = vmul.f32 0.2, %v7682_v47  ;;  %v2527_v25 = vmul.f32 0.2, %v7690_v46 }
 0x72c   : > { %10666 = vst [vmem:[#allocation73_spill] sm:$0xff] %v7751_v29  ;;  %v7765_v15 = vadd.f32 %v7613_v27, %v7556_v54  ;;  %v7776_v62 = vmul.f32 0.2, %v7710_v31  ;;  %v7779_v55 = vmul.f32 0.2, %v7714_v5  ;;  %v7783_v54 = vadd.f32 %v7613_v27, %v7564_v52 }
 0x72d   : > { %v2541_v3 = vmul.f32 0.2, %v7718_v18  ;;  %v7787_v53 = vmul.f32 0.2, %v7722_v44  ;;  %v7791_v45 = vmul.f32 0.2, %v7730_v13  ;;  %v7832_v19 = vsel %vm2449_vm11, %v7662_v14, %v2513_v28 }
 0x72e   : > { %v2549_v12 = vmul.f32 0.2, %v7734_v10  ;;  %v7795_v57 = vmul.f32 0.2, %v7738_v16  ;;  %v7804_v49 = vmul.f32 0.2, %v7751_v29  ;;  %v7826_v29 = vsel %vm2445_vm9, %v7654_v36, %v2509_v59  ;;  %v3319_v59 = vpop.trf.xlu0 }
 0x72f   : > { %v7815_v52 = vmul.f32 0.2, %v7765_v15  ;;  %10671 = vst [vmem:[#allocation78_spill] sm:$0xff] %v7826_v29  ;;  %10673 = vst [vmem:[#allocation80_spill] sm:$0xff] %v7832_v19  ;;  %vm2455_vm0 = vcmp.gt.f32.partialorder %v7674_v50, 0.0  ;;  %vm2461_vm1 = vcmp.gt.f32.partialorder %v7686_v58, 0.0  ;;  %v7844_v36 = vsel %vm2451_vm14, %v7666_v0, %v2515_v37 }
 0x730   : > { %10667 = vst [vmem:[#allocation74_spill] sm:$0xff] %v7795_v57  ;;  %10668 = vst [vmem:[#allocation75_spill] sm:$0xff] %v7804_v49  ;;  %v2565_v49 = vmul.f32 0.2, %v7783_v54  ;;  %v2561_v57 = vmul.f32 0.2, %v7799_v38  ;;  %v7866_v60 = vrot.slane %v3319_v59, %v6825_v63 }
 0x731   : > { %10669 = vst [vmem:[#allocation76_spill] sm:$0xff] %v7815_v52  ;;  %v7838_v52 = vsel %vm2453_vm13, %v7670_v41, %v2517_v56  ;;  %vm2459_vm3 = vcmp.gt.f32.partialorder %v7682_v47, 0.0  ;;  %10676 = vst [vmem:[#allocation83_spill] sm:$0xff] %v7844_v36  ;;  %vm2463_vm5 = vcmp.gt.f32.partialorder %v7690_v46, 0.0  ;;  %vm2477_vm7 = vcmp.gt.f32.partialorder %v7718_v18, 0.0 }
 0x732   : > { %10675 = vst [vmem:[#allocation82_spill] sm:$0xff] %v7838_v52  ;;  %vm2481_vm9 = vcmp.gt.f32.partialorder %v7726_v21, 0.0  ;;  %v7856_v56 = vsel %vm2455_vm0, %v7674_v50, %v2519_v22  ;;  %v7872_v9 = vsel %vm2463_vm5, %v7690_v46, %v2527_v25  ;;  %vm2485_vm11 = vcmp.gt.f32.partialorder %v7734_v10, 0.0 }
 0x733   : > { %10678 = vst [vmem:[#allocation85_spill] sm:$0xff] %v7856_v56  ;;  %10682 = vst [vmem:[#allocation89_spill] sm:$0xff] %v7872_v9  ;;  %v7876_v22 = vsel %vm2467_vm6, %v7698_v1, %v2531_v42  ;;  %v7879_v14 = vsel %vm2477_vm7, %v7718_v18, %v2541_v3  ;;  %v7885_v0 = vsel %vm2481_vm9, %v7726_v21, %v2545_v34  ;;  %vm2473_vm12 = vcmp.gt.f32.partialorder %v7710_v31, 0.0  ;;  %v10689_v34 = vld [vmem:[#allocation12_spill] sm:$0xff] }
 0x734   : > { %10683 = vst [vmem:[#allocation90_spill] sm:$0xff] %v7876_v22  ;;  %10684 = vst [vmem:[#allocation91_spill] sm:$0xff] %v7879_v14  ;;  %vm2489_vm13 = vcmp.gt.f32.partialorder %v7744_v20, 0.0  ;;  %v7896_v42 = vsel %vm2485_vm11, %v7734_v10, %v2549_v12  ;;  %vm2475_vm14 = vcmp.gt.f32.partialorder %v7714_v5, 0.0  ;;  %vm2479_vm0 = vcmp.gt.f32.partialorder %v7722_v44, 0.0  ;;  %v10690_v21 = vld [vmem:[#allocation8_spill] sm:$0xff] }
 0x735   : > { %10686 = vst [vmem:[#allocation93_spill] sm:$0xff] %v7885_v0  ;;  %10688 = vst [vmem:[#allocation95_spill] sm:$0xff] %v7896_v42  ;;  %v2382_v12 = vadd.f32 %v7616_v61, %v7206_v43  ;;  %v7915_v18 = vsel %vm2489_vm13, %v7744_v20, %v2553_v30  ;;  %vm2487_vm5 = vcmp.gt.f32.partialorder %v7738_v16, 0.0  ;;  %vm2499_vm13 = vcmp.gt.f32.partialorder %v7772_v48, 0.0 }
 0x736   : > { %10692 = vst [vmem:[#allocation8_spill] sm:$0xff] %v7915_v18 }
 0x737   : > { %v10709_v1 = vld [vmem:[#allocation75_spill] sm:$0xff] }
 0x742   : > { %2632 = vmax.xlane.f32.xlu1 %v2631_v8  ;;  %v7694_v8 = vadd.f32 %v7613_v27, %v10659_v24  ;;  %v2525_v24 = vmul.f32 0.2, %v7686_v58  ;;  %v7829_v27 = vsel %vm2443_vm10, %v7650_v40, %v2507_v17  ;;  %v7847_v17 = vsel %vm2457_vm15, %v7678_v23, %v2521_v35  ;;  %v10705_v23 = vld [vmem:[#allocation9_spill] sm:$0xff] }
 0x743   : > { %10672 = vst [vmem:[#allocation79_spill] sm:$0xff] %v7829_v27  ;;  %10677 = vst [vmem:[#allocation84_spill] sm:$0xff] %v7847_v17  ;;  %v7862_v35 = vsel %vm2459_vm3, %v7682_v47, %v2523_v6  ;;  %vm2471_vm10 = vcmp.gt.f32.partialorder %v7706_v51, 0.0  ;;  %v7882_v6 = vsel %vm2469_vm8, %v7702_v11, %v2533_v4  ;;  %vm2493_vm15 = vcmp.gt.f32.partialorder %v7758_v26, 0.0 }
 0x744   : > { %v2529_v33 = vmul.f32 0.2, %v7694_v8  ;;  %vm2465_vm4 = vcmp.gt.f32.partialorder %v7694_v8, 0.0  ;;  %v7859_v37 = vsel %vm2461_vm1, %v7686_v58, %v2525_v24  ;;  %10680 = vst [vmem:[#allocation87_spill] sm:$0xff] %v7862_v35  ;;  %10685 = vst [vmem:[#allocation92_spill] sm:$0xff] %v7882_v6  ;;  %v7891_v41 = vsel %vm2471_vm10, %v7706_v51, %v2535_v39 }
 0x745   : > { %10679 = vst [vmem:[#allocation86_spill] sm:$0xff] %v7859_v37  ;;  %10687 = vst [vmem:[#allocation94_spill] sm:$0xff] %v7891_v41  ;;  %vm2497_vm1 = vcmp.gt.f32.partialorder %v7799_v38, 0.0  ;;  %vm2483_vm3 = vcmp.gt.f32.partialorder %v7730_v13, 0.0  ;;  %v3503_v4 = vadd.f32 %v7866_v60, %v10690_v21  ;;  %v7912_v39 = vsel %vm2473_vm12, %v7710_v31, %v7776_v62 }
 0x746   : > { %v7869_v40 = vsel %vm2465_vm4, %v7694_v8, %v2529_v33  ;;  %vm2501_vm4 = vcmp.gt.f32.partialorder %v7783_v54, 0.0  ;;  %10691 = vst [vmem:[#allocation12_spill] sm:$0xff] %v7912_v39  ;;  %v7923_v11 = vsel %vm2475_vm14, %v7714_v5, %v7779_v55  ;;  %v7927_v43 = vsel %vm2493_vm15, %v7758_v26, %v7807_v2  ;;  %v10699_v2 = vld [vmem:[#allocation73_spill] sm:$0xff] }
 0x747   : > { %10681 = vst [vmem:[#allocation88_spill] sm:$0xff] %v7869_v40  ;;  %10693 = vst [vmem:[#allocation96_spill] sm:$0xff] %v7923_v11  ;;  %v7931_v62 = vsel %vm2479_vm0, %v7722_v44, %v7787_v53  ;;  %v7934_v30 = vsel %vm2497_vm1, %v7799_v38, %v2561_v57  ;;  %v7938_v20 = vsel %vm2483_vm3, %v7730_v13, %v7791_v45  ;;  %vm2491_vm6 = vcmp.gt.f32.partialorder %v10699_v2, 0.0 }
 0x748   : > { %10694 = vst [vmem:[#allocation97_spill] sm:$0xff] %v7927_v43  ;;  %10695 = vst [vmem:[#allocation98_spill] sm:$0xff] %v7931_v62  ;;  %v7941_v31 = vsel %vm2501_vm4, %v7783_v54, %v2565_v49  ;;  %v2380_v5 = vadd.f32 %v7616_v61, %v7183_v32  ;;  %v3631_v53 = vmul.f32 0.2, %v3503_v4  ;;  %v2510_v26 = vmul.f32 0.2, %v2382_v12 }
 0x749   : > { %10696 = vst [vmem:[#allocation99_spill] sm:$0xff] %v7934_v30  ;;  %10697 = vst [vmem:[#allocation100_spill] sm:$0xff] %v7938_v20  ;;  %vm2495_vm8 = vcmp.gt.f32.partialorder %v7765_v15, 0.0  ;;  %vm3567_vm10 = vcmp.gt.f32.partialorder %v3503_v4, 0.0  ;;  %vm2446_vm12 = vcmp.gt.f32.partialorder %v2382_v12, 0.0  ;;  %v10700_v49 = vld [vmem:[#allocation74_spill] sm:$0xff]  ;;  %v3509_v47 = vadd.f32 %v7866_v60, %v10705_v23 }
 0x74a   : > { %10698 = vst [vmem:[#allocation101_spill] sm:$0xff] %v7941_v31  ;;  %v7950_v54 = vsel %vm2487_vm5, %v7738_v16, %v10700_v49  ;;  %v10702_v32 = vld [vmem:[#allocation7_spill] sm:$0xff]  ;;  %v2508_v44 = vmul.f32 0.2, %v2380_v5  ;;  %v7963_v58 = vsel %vm3567_vm10, %v3503_v4, %v3631_v53  ;;  %vm2444_vm14 = vcmp.gt.f32.partialorder %v2380_v5, 0.0  ;;  %v10763_v43 = vld [vmem:[#allocation57_spill] sm:$0xff] }
 0x74b   : > { %10701 = vst [vmem:[#allocation73_spill] sm:$0xff] %v7950_v54  ;;  %v3507_v45 = vadd.f32 %v7866_v60, %v10702_v32  ;;  %10706 = vst [vmem:[#allocation9_spill] sm:$0xff] %v7963_v58  ;;  %v7971_v24 = vsel %vm2446_vm12, %v2382_v12, %v2510_v26  ;;  %v7979_v59 = vsel %vm2491_vm6, %v10699_v2, %v10709_v1  ;;  %v10715_v4 = vld [vmem:[#allocation11_spill] sm:$0xff]  ;;  %v10722_v1 = vld [vmem:[#allocation13_spill] sm:$0xff]  ;;  %vm3573_vm0 = vcmp.gt.f32.partialorder %v3509_v47, 0.0 }
 0x74c   : > { %10708 = vst [vmem:[#allocation103_spill] sm:$0xff] %v7971_v24  ;;  %10710 = vst [vmem:[#allocation75_spill] sm:$0xff] %v7979_v59  ;;  %v7995_v12 = vadd.f32 %v7866_v60, %v10715_v4  ;;  %v8001_v53 = vsel %vm2444_vm14, %v2380_v5, %v2508_v44  ;;  %v2640_v49 = vmax.f32 %v7826_v29, %v7971_v24  ;;  %v10727_v24 = vld [vmem:[#allocation14_spill] sm:$0xff]  ;;  %v10749_v54 = vld [vmem:[#allocation35_spill] sm:$0xff] }
 0x74d   : > { %10718 = vst [vmem:[#allocation11_spill] sm:$0xff] %v8001_v53  ;;  %vm3571_vm15 = vcmp.gt.f32.partialorder %v3507_v45, 0.0  ;;  %v8035_v29 = vadd.f32 %v7866_v60, %v10727_v24 }
 0x75f   : > { %v3351_v28 = vpop.trf.xlu1 }
 0x760   : > { %v7888_v33 = vrot.slane %v3351_v28, %v6825_v63  ;;  %v3505_v63 = vadd.f32 %v7866_v60, %v10689_v34  ;;  %v10711_v28 = vld [vmem:[#allocation76_spill] sm:$0xff] }
 0x762   : > { %v3504_v10 = vadd.f32 %v7888_v33, %v10690_v21  ;;  %v3506_v51 = vadd.f32 %v7888_v33, %v10689_v34  ;;  %v3633_v55 = vmul.f32 0.2, %v3505_v63  ;;  %vm3569_vm7 = vcmp.gt.f32.partialorder %v3505_v63, 0.0 }
 0x763   : > { %v3508_v16 = vadd.f32 %v7888_v33, %v10702_v32  ;;  %v3510_v25 = vadd.f32 %v7888_v33, %v10705_v23  ;;  %v7985_v34 = vsel %vm2495_vm8, %v7765_v15, %v10711_v28  ;;  %v10719_v15 = vld [vmem:[#allocation26_spill] sm:$0xff]  ;;  %v3637_v32 = vmul.f32 0.2, %v3509_v47 }
 0x764   : > { %vm3570_vm9 = vcmp.gt.f32.partialorder %v3506_v51, 0.0  ;;  %v3634_v38 = vmul.f32 0.2, %v3506_v51  ;;  %v3632_v57 = vmul.f32 0.2, %v3504_v10  ;;  %vm3568_vm11 = vcmp.gt.f32.partialorder %v3504_v10, 0.0 }
 0x765   : > { %v7955_v13 = vsel %vm3569_vm7, %v3505_v63, %v3633_v55  ;;  %10712 = vst [vmem:[#allocation76_spill] sm:$0xff] %v7985_v34  ;;  %v10713_v63 = vld [vmem:[#allocation77_spill] sm:$0xff]  ;;  %v10717_v55 = vld [vmem:[#allocation15_spill] sm:$0xff]  ;;  %v8005_v26 = vadd.f32 %v7866_v60, %v10719_v15  ;;  %v10721_v23 = vld [vmem:[#allocation10_spill] sm:$0xff]  ;;  %v3636_v5 = vmul.f32 0.2, %v3508_v16  ;;  %v2390_v28 = vadd.f32 %v7616_v61, %v10722_v1 }
 0x766   : > { %10703 = vst [vmem:[#allocation74_spill] sm:$0xff] %v7955_v13  ;;  %v7957_v50 = vsel %vm3570_vm9, %v3506_v51, %v3634_v38  ;;  %v7969_v46 = vsel %vm3568_vm11, %v3504_v10, %v3632_v57  ;;  %v7991_v21 = vsel %vm2499_vm13, %v7772_v48, %v10713_v63  ;;  %v10716_v10 = vld [vmem:[#allocation21_spill] sm:$0xff]  ;;  %v2386_v2 = vadd.f32 %v7616_v61, %v10717_v55 }
 0x767   : > { %10704 = vst [vmem:[#allocation7_spill] sm:$0xff] %v7957_v50  ;;  %v3762_v3 = vmax.f32 %v7955_v13, %v7957_v50  ;;  %10707 = vst [vmem:[#allocation102_spill] sm:$0xff] %v7969_v46  ;;  %v3759_v8 = vmax.f32 %v7963_v58, %v7969_v46  ;;  %v2384_v51 = vadd.f32 %v7616_v61, %v10716_v10  ;;  %v10720_v38 = vld [vmem:[#allocation17_spill] sm:$0xff]  ;;  %v3635_v57 = vmul.f32 0.2, %v3507_v45  ;;  %v10735_v58 = vld [vmem:[#allocation19_spill] sm:$0xff] }
 0x768   : > { %10714 = vst [vmem:[#allocation77_spill] sm:$0xff] %v7991_v21  ;;  %v8009_v48 = vadd.f32 %v7866_v60, %v10720_v38  ;;  %v3638_v44 = vmul.f32 0.2, %v3510_v25  ;;  %v2637_v63 = vmax.f32 %v7829_v27, %v8001_v53  ;;  %v2514_v10 = vmul.f32 0.2, %v2386_v2 }
 0x769   : > { %3763 = vmax.xlane.f32.xlu0 %v3762_v3  ;;  %3760 = vmax.xlane.f32.xlu1 %v3759_v8  ;;  %v8015_v3 = vadd.f32 %v7616_v61, %v10721_v23  ;;  %v2512_v8 = vmul.f32 0.2, %v2384_v51  ;;  %v3512_v55 = vadd.f32 %v7888_v33, %v10715_v4  ;;  %v3514_v23 = vadd.f32 %v7888_v33, %v10719_v15  ;;  %v10728_v4 = vld [vmem:[#allocation32_spill] sm:$0xff] }
 0x76a   : > { %vm3572_vm1 = vcmp.gt.f32.partialorder %v3508_v16, 0.0  ;;  %vm3574_vm3 = vcmp.gt.f32.partialorder %v3510_v25, 0.0  ;;  %vm2450_vm4 = vcmp.gt.f32.partialorder %v2386_v2, 0.0  ;;  %vm2448_vm5 = vcmp.gt.f32.partialorder %v2384_v51, 0.0 }
 0x76b   : > { %v8025_v1 = vsel %vm3571_vm15, %v3507_v45, %v3635_v57  ;;  %v8029_v53 = vsel %vm3573_vm0, %v3509_v47, %v3637_v32  ;;  %v8031_v27 = vsel %vm3574_vm3, %v3510_v25, %v3638_v44  ;;  %v8039_v15 = vadd.f32 %v7866_v60, %v10728_v4  ;;  %v10731_v32 = vld [vmem:[#allocation22_spill] sm:$0xff] }
 0x76c   : > { %10723 = vst [vmem:[#allocation21_spill] sm:$0xff] %v8025_v1  ;;  %10725 = vst [vmem:[#allocation26_spill] sm:$0xff] %v8029_v53  ;;  %v3768_v45 = vmax.f32 %v8029_v53, %v8031_v27  ;;  %v3642_v57 = vmul.f32 0.2, %v3514_v23  ;;  %v8045_v47 = vsel %vm2450_vm4, %v2386_v2, %v2514_v10  ;;  %v8047_v25 = vsel %vm2448_vm5, %v2384_v51, %v2512_v8 }
 0x76d   : > { %2641 = vmax.xlane.f32.xlu0 %v2640_v49  ;;  %2638 = vmax.xlane.f32.xlu1 %v2637_v63  ;;  %v8027_v49 = vsel %vm3572_vm1, %v3508_v16, %v3636_v5  ;;  %10726 = vst [vmem:[#allocation17_spill] sm:$0xff] %v8031_v27  ;;  %v3640_v16 = vmul.f32 0.2, %v3512_v55  ;;  %10729 = vst [vmem:[#allocation10_spill] sm:$0xff] %v8045_v47  ;;  %v8051_v5 = vadd.f32 %v7866_v60, %v10731_v32 }
 0x76e   : > { %10724 = vst [vmem:[#allocation15_spill] sm:$0xff] %v8027_v49  ;;  %v3765_v63 = vmax.f32 %v8025_v1, %v8027_v49  ;;  %10730 = vst [vmem:[#allocation13_spill] sm:$0xff] %v8047_v25  ;;  %v3639_v44 = vmul.f32 0.2, %v7995_v12  ;;  %vm3576_vm6 = vcmp.gt.f32.partialorder %v3512_v55, 0.0  ;;  %vm3578_vm7 = vcmp.gt.f32.partialorder %v3514_v23, 0.0 }
 0x76f   : > { %v10732_v49 = vld [vmem:[#allocation18_spill] sm:$0xff]  ;;  %v3641_v27 = vmul.f32 0.2, %v8005_v26  ;;  %v2516_v2 = vmul.f32 0.2, %v8015_v3  ;;  %v2646_v8 = vmax.f32 %v7832_v19, %v8045_v47  ;;  %v2643_v10 = vmax.f32 %v7835_v7, %v8047_v25  ;;  %v10736_v19 = vld [vmem:[#allocation39_spill] sm:$0xff] }
 0x770   : > { %v8056_v1 = vadd.f32 %v7866_v60, %v10732_v49  ;;  %v2518_v51 = vmul.f32 0.2, %v2390_v28  ;;  %vm3575_vm8 = vcmp.gt.f32.partialorder %v7995_v12, 0.0  ;;  %vm3577_vm9 = vcmp.gt.f32.partialorder %v8005_v26, 0.0  ;;  %v10741_v7 = vld [vmem:[#allocation28_spill] sm:$0xff] }
 0x771   : > { %3766 = vmax.xlane.f32.xlu0 %v3765_v63  ;;  %3769 = vmax.xlane.f32.xlu1 %v3768_v45  ;;  %v3516_v63 = vadd.f32 %v7888_v33, %v10720_v38  ;;  %v3518_v45 = vadd.f32 %v7888_v33, %v10727_v24  ;;  %v8070_v53 = vsel %vm3576_vm6, %v3512_v55, %v3640_v16  ;;  %vm2454_vm10 = vcmp.gt.f32.partialorder %v2390_v28, 0.0  ;;  %v10737_v38 = vld [vmem:[#allocation31_spill] sm:$0xff]  ;;  %v10738_v55 = vld [vmem:[#allocation20_spill] sm:$0xff] }
 0x772   : > { %10733 = vst [vmem:[#allocation14_spill] sm:$0xff] %v8070_v53  ;;  %v8072_v46 = vsel %vm3578_vm7, %v3514_v23, %v3642_v57  ;;  %v8076_v47 = vadd.f32 %v7866_v60, %v10735_v58  ;;  %v8080_v25 = vadd.f32 %v7866_v60, %v10736_v19  ;;  %vm2452_vm11 = vcmp.gt.f32.partialorder %v8015_v3, 0.0 }
 0x773   : > { %10734 = vst [vmem:[#allocation32_spill] sm:$0xff] %v8072_v46  ;;  %v2392_v24 = vadd.f32 %v7616_v61, %v10737_v38  ;;  %v2394_v23 = vadd.f32 %v7616_v61, %v10738_v55  ;;  %v8088_v16 = vsel %vm3575_vm8, %v7995_v12, %v3639_v44  ;;  %v8091_v57 = vsel %vm3577_vm9, %v8005_v26, %v3641_v27  ;;  %v10745_v26 = vld [vmem:[#allocation25_spill] sm:$0xff] }
 0x774   : > { %10739 = vst [vmem:[#allocation22_spill] sm:$0xff] %v8088_v16  ;;  %10740 = vst [vmem:[#allocation18_spill] sm:$0xff] %v8091_v57  ;;  %v8095_v50 = vadd.f32 %v7866_v60, %v10741_v7  ;;  %v3771_v38 = vmax.f32 %v8088_v16, %v8070_v53  ;;  %v3774_v55 = vmax.f32 %v8091_v57, %v8072_v46  ;;  %v3644_v13 = vmul.f32 0.2, %v3516_v63  ;;  %v10746_v53 = vld [vmem:[#allocation50_spill] sm:$0xff] }
 0x775   : > { %2647 = vmax.xlane.f32.xlu0 %v2646_v8  ;;  %2644 = vmax.xlane.f32.xlu1 %v2643_v10  ;;  %v10742_v8 = vld [vmem:[#allocation24_spill] sm:$0xff]  ;;  %v3646_v12 = vmul.f32 0.2, %v3518_v45  ;;  %v8105_v44 = vsel %vm2454_vm10, %v2390_v28, %v2518_v51  ;;  %v8108_v27 = vsel %vm2452_vm11, %v8015_v3, %v2516_v2  ;;  %v8112_v21 = vadd.f32 %v7866_v60, %v10745_v26 }
 0x776   : > { %v8099_v10 = vadd.f32 %v7866_v60, %v10742_v8  ;;  %10743 = vst [vmem:[#allocation19_spill] sm:$0xff] %v8105_v44  ;;  %10744 = vst [vmem:[#allocation39_spill] sm:$0xff] %v8108_v27  ;;  %v3643_v34 = vmul.f32 0.2, %v8009_v48  ;;  %vm3580_vm12 = vcmp.gt.f32.partialorder %v3516_v63, 0.0  ;;  %vm3582_vm13 = vcmp.gt.f32.partialorder %v3518_v45, 0.0 }
 0x777   : > { %v8117_v46 = vadd.f32 %v7866_v60, %v10746_v53  ;;  %v3645_v28 = vmul.f32 0.2, %v8035_v29  ;;  %v2520_v51 = vmul.f32 0.2, %v2392_v24  ;;  %v2522_v57 = vmul.f32 0.2, %v2394_v23 }
 0x778   : > { %v2652_v3 = vmax.f32 %v7838_v52, %v8105_v44  ;;  %v2649_v2 = vmax.f32 %v7844_v36, %v8108_v27  ;;  %vm3579_vm14 = vcmp.gt.f32.partialorder %v8009_v48, 0.0  ;;  %vm3581_vm15 = vcmp.gt.f32.partialorder %v8035_v29, 0.0  ;;  %v10750_v52 = vld [vmem:[#allocation30_spill] sm:$0xff] }
 0x779   : > { %3772 = vmax.xlane.f32.xlu0 %v3771_v38  ;;  %3775 = vmax.xlane.f32.xlu1 %v3774_v55  ;;  %v3520_v38 = vadd.f32 %v7888_v33, %v10728_v4  ;;  %v3522_v55 = vadd.f32 %v7888_v33, %v10731_v32  ;;  %v8130_v16 = vsel %vm3580_vm12, %v3516_v63, %v3644_v13  ;;  %vm2458_vm0 = vcmp.gt.f32.partialorder %v2394_v23, 0.0  ;;  %v10751_v4 = vld [vmem:[#allocation16_spill] sm:$0xff]  ;;  %v10752_v32 = vld [vmem:[#allocation33_spill] sm:$0xff] }
 0x77a   : > { %10747 = vst [vmem:[#allocation31_spill] sm:$0xff] %v8130_v16  ;;  %v8132_v59 = vsel %vm3582_vm13, %v3518_v45, %v3646_v12  ;;  %v8136_v44 = vadd.f32 %v7866_v60, %v10749_v54  ;;  %v8140_v27 = vadd.f32 %v7866_v60, %v10750_v52  ;;  %vm2456_vm1 = vcmp.gt.f32.partialorder %v2392_v24, 0.0  ;;  %v10755_v12 = vld [vmem:[#allocation53_spill] sm:$0xff] }
 0x77b   : > { %10748 = vst [vmem:[#allocation20_spill] sm:$0xff] %v8132_v59  ;;  %v2396_v36 = vadd.f32 %v7616_v61, %v10751_v4  ;;  %v2398_v13 = vadd.f32 %v7616_v61, %v10752_v32  ;;  %v8147_v63 = vsel %vm3579_vm14, %v8009_v48, %v3643_v34  ;;  %v8150_v45 = vsel %vm3581_vm15, %v8035_v29, %v3645_v28  ;;  %v10759_v28 = vld [vmem:[#allocation58_spill] sm:$0xff] }
 0x77c   : > { %10753 = vst [vmem:[#allocation28_spill] sm:$0xff] %v8147_v63  ;;  %10754 = vst [vmem:[#allocation24_spill] sm:$0xff] %v8150_v45  ;;  %v8154_v31 = vadd.f32 %v7866_v60, %v10755_v12  ;;  %v3777_v4 = vmax.f32 %v8147_v63, %v8130_v16  ;;  %v3780_v32 = vmax.f32 %v8150_v45, %v8132_v59  ;;  %v3648_v20 = vmul.f32 0.2, %v3520_v38  ;;  %v10760_v16 = vld [vmem:[#allocation55_spill] sm:$0xff] }
 0x77d   : > { %2653 = vmax.xlane.f32.xlu0 %v2652_v3  ;;  %2650 = vmax.xlane.f32.xlu1 %v2649_v2  ;;  %v10756_v3 = vld [vmem:[#allocation56_spill] sm:$0xff]  ;;  %v3650_v34 = vmul.f32 0.2, %v3522_v55  ;;  %v8164_v48 = vsel %vm2458_vm0, %v2394_v23, %v2522_v57  ;;  %v8166_v29 = vsel %vm2456_vm1, %v2392_v24, %v2520_v51  ;;  %v8170_v30 = vadd.f32 %v7866_v60, %v10759_v28 }
 0x77e   : > { %v8158_v2 = vadd.f32 %v7866_v60, %v10756_v3  ;;  %10757 = vst [vmem:[#allocation25_spill] sm:$0xff] %v8164_v48  ;;  %10758 = vst [vmem:[#allocation50_spill] sm:$0xff] %v8166_v29  ;;  %v3647_v62 = vmul.f32 0.2, %v8039_v15  ;;  %vm3584_vm3 = vcmp.gt.f32.partialorder %v3520_v38, 0.0  ;;  %vm3586_vm4 = vcmp.gt.f32.partialorder %v3522_v55, 0.0 }
 0x77f   : > { %v8175_v63 = vadd.f32 %v7866_v60, %v10760_v16  ;;  %v3649_v59 = vmul.f32 0.2, %v8051_v5  ;;  %v2524_v23 = vmul.f32 0.2, %v2396_v36  ;;  %v2526_v57 = vmul.f32 0.2, %v2398_v13 }
 0x780   : > { %v2658_v24 = vmax.f32 %v7847_v17, %v8164_v48  ;;  %v2655_v51 = vmax.f32 %v7856_v56, %v8166_v29  ;;  %vm3583_vm5 = vcmp.gt.f32.partialorder %v8039_v15, 0.0  ;;  %vm3585_vm6 = vcmp.gt.f32.partialorder %v8051_v5, 0.0  ;;  %v10764_v17 = vld [vmem:[#allocation60_spill] sm:$0xff] }
 0x781   : > { %3778 = vmax.xlane.f32.xlu0 %v3777_v4  ;;  %3781 = vmax.xlane.f32.xlu1 %v3780_v32  ;;  %v3524_v4 = vadd.f32 %v7888_v33, %v10732_v49  ;;  %v3526_v32 = vadd.f32 %v7888_v33, %v10735_v58  ;;  %v8188_v45 = vsel %vm3584_vm3, %v3520_v38, %v3648_v20  ;;  %vm2462_vm7 = vcmp.gt.f32.partialorder %v2398_v13, 0.0  ;;  %v10765_v49 = vld [vmem:[#allocation38_spill] sm:$0xff]  ;;  %v10766_v58 = vld [vmem:[#allocation27_spill] sm:$0xff] }
 0x782   : > { %10761 = vst [vmem:[#allocation35_spill] sm:$0xff] %v8188_v45  ;;  %v8190_v16 = vsel %vm3586_vm4, %v3522_v55, %v3650_v34  ;;  %v8194_v48 = vadd.f32 %v7866_v60, %v10763_v43  ;;  %v8198_v29 = vadd.f32 %v7866_v60, %v10764_v17  ;;  %vm2460_vm8 = vcmp.gt.f32.partialorder %v2396_v36, 0.0  ;;  %v10769_v34 = vld [vmem:[#allocation62_spill] sm:$0xff] }
 0x783   : > { %10762 = vst [vmem:[#allocation30_spill] sm:$0xff] %v8190_v16  ;;  %v2400_v56 = vadd.f32 %v7616_v61, %v10765_v49  ;;  %v2402_v20 = vadd.f32 %v7616_v61, %v10766_v58  ;;  %v8205_v38 = vsel %vm3583_vm5, %v8039_v15, %v3647_v62  ;;  %v8208_v55 = vsel %vm3585_vm6, %v8051_v5, %v3649_v59 }
 0x784   : > { %10767 = vst [vmem:[#allocation16_spill] sm:$0xff] %v8205_v38  ;;  %10768 = vst [vmem:[#allocation33_spill] sm:$0xff] %v8208_v55  ;;  %v8212_v17 = vadd.f32 %v7866_v60, %v10769_v34  ;;  %v3783_v49 = vmax.f32 %v8205_v38, %v8188_v45  ;;  %v3786_v58 = vmax.f32 %v8208_v55, %v8190_v16  ;;  %v3652_v3 = vmul.f32 0.2, %v3524_v4  ;;  %v10776_v55 = vld [vmem:[#allocation64_spill] sm:$0xff] }
 0x785   : > { %2659 = vmax.xlane.f32.xlu0 %v2658_v24  ;;  %2656 = vmax.xlane.f32.xlu1 %v2655_v51  ;;  %v10770_v24 = vld [vmem:[#allocation59_spill] sm:$0xff]  ;;  %v3654_v62 = vmul.f32 0.2, %v3526_v32  ;;  %v8222_v15 = vsel %vm2462_vm7, %v2398_v13, %v2526_v57  ;;  %v8224_v59 = vsel %vm2460_vm8, %v2396_v36, %v2524_v23  ;;  %v3651_v5 = vmul.f32 0.2, %v8056_v1 }
 0x786   : > { %v8216_v51 = vadd.f32 %v7866_v60, %v10770_v24  ;;  %10771 = vst [vmem:[#allocation53_spill] sm:$0xff] %v8222_v15  ;;  %10772 = vst [vmem:[#allocation58_spill] sm:$0xff] %v8224_v59  ;;  %v3653_v11 = vmul.f32 0.2, %v8076_v47  ;;  %vm3588_vm9 = vcmp.gt.f32.partialorder %v3524_v4, 0.0  ;;  %vm3590_vm10 = vcmp.gt.f32.partialorder %v3526_v32, 0.0 }
 0x787   : > { %v10773_v24 = vld [vmem:[#allocation61_spill] sm:$0xff]  ;;  %v2528_v38 = vmul.f32 0.2, %v2400_v56  ;;  %v2530_v16 = vmul.f32 0.2, %v2402_v20  ;;  %vm3587_vm11 = vcmp.gt.f32.partialorder %v8056_v1, 0.0  ;;  %v2664_v36 = vmax.f32 %v7859_v37, %v8222_v15 }
 0x788   : > { %v8230_v45 = vadd.f32 %v7866_v60, %v10773_v24  ;;  %v2661_v13 = vmax.f32 %v7862_v35, %v8224_v59  ;;  %vm3589_vm12 = vcmp.gt.f32.partialorder %v8076_v47, 0.0  ;;  %vm2466_vm13 = vcmp.gt.f32.partialorder %v2402_v20, 0.0  ;;  %v10777_v15 = vld [vmem:[#allocation66_spill] sm:$0xff]  ;;  %v10778_v35 = vld [vmem:[#allocation63_spill] sm:$0xff] }
 0x789   : > { %3784 = vmax.xlane.f32.xlu0 %v3783_v49  ;;  %3787 = vmax.xlane.f32.xlu1 %v3786_v58  ;;  %v3528_v23 = vadd.f32 %v7888_v33, %v10736_v19  ;;  %v3530_v57 = vadd.f32 %v7888_v33, %v10741_v7  ;;  %v8242_v49 = vsel %vm3588_vm9, %v3524_v4, %v3652_v3  ;;  %vm2464_vm14 = vcmp.gt.f32.partialorder %v2400_v56, 0.0 }
 0x78a   : > { %10774 = vst [vmem:[#allocation57_spill] sm:$0xff] %v8242_v49  ;;  %v8244_v58 = vsel %vm3590_vm10, %v3526_v32, %v3654_v62  ;;  %v8248_v24 = vadd.f32 %v7866_v60, %v10776_v55  ;;  %v8252_v59 = vadd.f32 %v7866_v60, %v10777_v15  ;;  %v8256_v37 = vadd.f32 %v7866_v60, %v10778_v35  ;;  %v10781_v32 = vld [vmem:[#allocation23_spill] sm:$0xff] }
 0x78b   : > { %10775 = vst [vmem:[#allocation38_spill] sm:$0xff] %v8244_v58  ;;  %v3655_v7 = vmul.f32 0.2, %v8080_v25  ;;  %v3657_v19 = vmul.f32 0.2, %v8095_v50  ;;  %v8263_v3 = vsel %vm3587_vm11, %v8056_v1, %v3651_v5  ;;  %v8266_v4 = vsel %vm3589_vm12, %v8076_v47, %v3653_v11 }
 0x78c   : > { %10779 = vst [vmem:[#allocation27_spill] sm:$0xff] %v8263_v3  ;;  %10780 = vst [vmem:[#allocation62_spill] sm:$0xff] %v8266_v4  ;;  %v2404_v62 = vadd.f32 %v7616_v61, %v10781_v32  ;;  %v8275_v35 = vsel %vm2466_vm13, %v2402_v20, %v2530_v16  ;;  %v3538_v55 = vadd.f32 %v7888_v33, %v10749_v54  ;;  %v3656_v1 = vmul.f32 0.2, %v3528_v23  ;;  %v10784_v54 = vld [vmem:[#allocation42_spill] sm:$0xff] }
 0x78d   : > { %2665 = vmax.xlane.f32.xlu0 %v2664_v36  ;;  %2662 = vmax.xlane.f32.xlu1 %v2661_v13  ;;  %v3789_v36 = vmax.f32 %v8263_v3, %v8242_v49  ;;  %v3792_v13 = vmax.f32 %v8266_v4, %v8244_v58  ;;  %10782 = vst [vmem:[#allocation23_spill] sm:$0xff] %v8275_v35  ;;  %v3658_v5 = vmul.f32 0.2, %v3530_v57  ;;  %v8282_v11 = vmul.f32 0.2, %v8099_v10 }
 0x78e   : > { %v8279_v15 = vsel %vm2464_vm14, %v2400_v56, %v2528_v38  ;;  %v8285_v47 = vmul.f32 0.2, %v8112_v21  ;;  %vm3592_vm15 = vcmp.gt.f32.partialorder %v3528_v23, 0.0  ;;  %vm3594_vm0 = vcmp.gt.f32.partialorder %v3530_v57, 0.0  ;;  %v10785_v56 = vld [vmem:[#allocation52_spill] sm:$0xff] }
 0x78f   : > { %10783 = vst [vmem:[#allocation104_spill] sm:$0xff] %v8279_v15  ;;  %v8288_v16 = vmul.f32 0.2, %v8117_v46  ;;  %v3665_v20 = vmul.f32 0.2, %v8136_v44  ;;  %v2406_v32 = vadd.f32 %v7616_v61, %v10784_v54  ;;  %v2414_v38 = vadd.f32 %v7616_v61, %v10785_v56 }
 0x790   : > { %v2670_v58 = vmax.f32 %v7869_v40, %v8275_v35  ;;  %vm3591_vm1 = vcmp.gt.f32.partialorder %v8080_v25, 0.0  ;;  %vm3593_vm3 = vcmp.gt.f32.partialorder %v8095_v50, 0.0  ;;  %v3666_v4 = vmul.f32 0.2, %v3538_v55 }
 0x791   : > { %3790 = vmax.xlane.f32.xlu0 %v3789_v36  ;;  %3793 = vmax.xlane.f32.xlu1 %v3792_v13  ;;  %v2667_v36 = vmax.f32 %v7872_v9, %v8279_v15  ;;  %v2532_v13 = vmul.f32 0.2, %v2404_v62  ;;  %v8301_v49 = vsel %vm3592_vm15, %v3528_v23, %v3656_v1  ;;  %v8303_v3 = vsel %vm3594_vm0, %v3530_v57, %v3658_v5 }
 0x792   : > { %10786 = vst [vmem:[#allocation42_spill] sm:$0xff] %v8301_v49  ;;  %10787 = vst [vmem:[#allocation52_spill] sm:$0xff] %v8303_v3  ;;  %v8306_v54 = vmul.f32 0.2, %v8140_v27  ;;  %v3669_v56 = vmul.f32 0.2, %v8154_v31  ;;  %v8310_v35 = vsel %vm3591_vm1, %v8080_v25, %v3655_v7  ;;  %v8313_v40 = vsel %vm3593_vm3, %v8095_v50, %v3657_v19 }
 0x793   : > { %vm3602_vm4 = vcmp.gt.f32.partialorder %v3538_v55, 0.0  ;;  %vm2468_vm5 = vcmp.gt.f32.partialorder %v2404_v62, 0.0  ;;  %v2534_v15 = vmul.f32 0.2, %v2406_v32  ;;  %v2542_v9 = vmul.f32 0.2, %v2414_v38 }
 0x794   : > { %10788 = vst [vmem:[#allocation105_spill] sm:$0xff] %v8310_v35  ;;  %10789 = vst [vmem:[#allocation106_spill] sm:$0xff] %v8313_v40  ;;  %v3795_v23 = vmax.f32 %v8310_v35, %v8301_v49  ;;  %v3798_v57 = vmax.f32 %v8313_v40, %v8303_v3  ;;  %vm3601_vm6 = vcmp.gt.f32.partialorder %v8136_v44, 0.0  ;;  %vm2478_vm7 = vcmp.gt.f32.partialorder %v2414_v38, 0.0  ;;  %v10792_v50 = vld [vmem:[#allocation65_spill] sm:$0xff] }
 0x795   : > { %2671 = vmax.xlane.f32.xlu0 %v2670_v58  ;;  %2668 = vmax.xlane.f32.xlu1 %v2667_v36  ;;  %v3532_v58 = vadd.f32 %v7888_v33, %v10742_v8  ;;  %v3542_v1 = vadd.f32 %v7888_v33, %v10755_v12  ;;  %v8324_v25 = vsel %vm3602_vm4, %v3538_v55, %v3666_v4  ;;  %v8333_v5 = vmul.f32 0.2, %v8158_v2  ;;  %v10793_v55 = vld [vmem:[#allocation41_spill] sm:$0xff] }
 0x796   : > { %10790 = vst [vmem:[#allocation107_spill] sm:$0xff] %v8324_v25  ;;  %v8326_v7 = vsel %vm2468_vm5, %v2404_v62, %v2532_v13  ;;  %v8330_v19 = vadd.f32 %v7866_v60, %v10792_v50  ;;  %v8336_v36 = vmul.f32 0.2, %v8170_v30  ;;  %vm2470_vm8 = vcmp.gt.f32.partialorder %v2406_v32, 0.0 }
 0x797   : > { %10791 = vst [vmem:[#allocation108_spill] sm:$0xff] %v8326_v7  ;;  %v8339_v8 = vmul.f32 0.2, %v8175_v63  ;;  %v8342_v12 = vmul.f32 0.2, %v8194_v48  ;;  %v2418_v4 = vadd.f32 %v7616_v61, %v10793_v55  ;;  %v8347_v60 = vsel %vm3601_vm6, %v8136_v44, %v3665_v20 }
 0x798   : > { %10794 = vst [vmem:[#allocation65_spill] sm:$0xff] %v8347_v60  ;;  %v8350_v62 = vmul.f32 0.2, %v8198_v29  ;;  %v3810_v13 = vmax.f32 %v8347_v60, %v8324_v25  ;;  %v3534_v3 = vadd.f32 %v7888_v33, %v10745_v26  ;;  %v3660_v40 = vmul.f32 0.2, %v3532_v58  ;;  %v10797_v26 = vld [vmem:[#allocation49_spill] sm:$0xff] }
 0x799   : > { %3796 = vmax.xlane.f32.xlu0 %v3795_v23  ;;  %3799 = vmax.xlane.f32.xlu1 %v3798_v57  ;;  %v2673_v23 = vmax.f32 %v7876_v22, %v8326_v7  ;;  %v8357_v57 = vsel %vm2478_vm7, %v2414_v38, %v2542_v9  ;;  %v3670_v55 = vmul.f32 0.2, %v3542_v1  ;;  %v8361_v49 = vsel %vm2470_vm8, %v2406_v32, %v2534_v15 }
 0x79a   : > { %10795 = vst [vmem:[#allocation41_spill] sm:$0xff] %v8357_v57  ;;  %10796 = vst [vmem:[#allocation109_spill] sm:$0xff] %v8361_v49  ;;  %v8364_v44 = vmul.f32 0.2, %v8212_v17  ;;  %v8367_v20 = vmul.f32 0.2, %v8216_v51  ;;  %v2408_v15 = vadd.f32 %v7616_v61, %v10797_v26  ;;  %v2688_v7 = vmax.f32 %v7879_v14, %v8357_v57 }
 0x79b   : > { %vm3606_vm9 = vcmp.gt.f32.partialorder %v3542_v1, 0.0  ;;  %vm3596_vm10 = vcmp.gt.f32.partialorder %v3532_v58, 0.0  ;;  %v8370_v9 = vmul.f32 0.2, %v8230_v45  ;;  %v8373_v38 = vmul.f32 0.2, %v8248_v24 }
 0x79c   : > { %v2546_v32 = vmul.f32 0.2, %v2418_v4  ;;  %v2676_v22 = vmax.f32 %v7882_v6, %v8361_v49  ;;  %vm3605_vm11 = vcmp.gt.f32.partialorder %v8154_v31, 0.0  ;;  %vm3595_vm12 = vcmp.gt.f32.partialorder %v8099_v10, 0.0  ;;  %v10800_v49 = vld [vmem:[#allocation34_spill] sm:$0xff]  ;;  %v10801_v14 = vld [vmem:[#allocation40_spill] sm:$0xff] }
 0x79d   : > { %3811 = vmax.xlane.f32.xlu0 %v3810_v13  ;;  %2674 = vmax.xlane.f32.xlu1 %v2673_v23  ;;  %v3546_v13 = vadd.f32 %v7888_v33, %v10759_v28  ;;  %v3662_v23 = vmul.f32 0.2, %v3534_v3  ;;  %v8385_v25 = vsel %vm3606_vm9, %v3542_v1, %v3670_v55  ;;  %v8387_v60 = vsel %vm3596_vm10, %v3532_v58, %v3660_v40 }
 0x79e   : > { %10798 = vst [vmem:[#allocation49_spill] sm:$0xff] %v8385_v25  ;;  %10799 = vst [vmem:[#allocation110_spill] sm:$0xff] %v8387_v60  ;;  %v8390_v26 = vmul.f32 0.2, %v8252_v59  ;;  %v8393_v57 = vmul.f32 0.2, %v8256_v37  ;;  %v2410_v6 = vadd.f32 %v7616_v61, %v10800_v49  ;;  %v2422_v28 = vadd.f32 %v7616_v61, %v10801_v14 }
 0x79f   : > { %vm2482_vm13 = vcmp.gt.f32.partialorder %v2418_v4, 0.0  ;;  %vm3598_vm14 = vcmp.gt.f32.partialorder %v3534_v3, 0.0  ;;  %v8400_v1 = vsel %vm3605_vm11, %v8154_v31, %v3669_v56  ;;  %v8404_v40 = vsel %vm3595_vm12, %v8099_v10, %v8282_v11  ;;  %v10806_v56 = vld [vmem:[#allocation29_spill] sm:$0xff] }
 0x7a0   : > { %10802 = vst [vmem:[#allocation34_spill] sm:$0xff] %v8400_v1  ;;  %10803 = vst [vmem:[#allocation40_spill] sm:$0xff] %v8404_v40  ;;  %v8407_v58 = vmul.f32 0.2, %v8330_v19  ;;  %vm3597_vm15 = vcmp.gt.f32.partialorder %v8112_v21, 0.0  ;;  %v8414_v55 = vsel %vm2482_vm13, %v2418_v4, %v2546_v32  ;;  %v8416_v31 = vsel %vm3598_vm14, %v3534_v3, %v3662_v23  ;;  %v10807_v11 = vld [vmem:[#allocation37_spill] sm:$0xff] }
 0x7a1   : > { %2689 = vmax.xlane.f32.xlu0 %v2688_v7  ;;  %2677 = vmax.xlane.f32.xlu1 %v2676_v22  ;;  %v3816_v22 = vmax.f32 %v8400_v1, %v8385_v25  ;;  %v3801_v7 = vmax.f32 %v8404_v40, %v8387_v60  ;;  %v2536_v49 = vmul.f32 0.2, %v2408_v15  ;;  %v3674_v14 = vmul.f32 0.2, %v3546_v13  ;;  %10804 = vst [vmem:[#allocation111_spill] sm:$0xff] %v8414_v55  ;;  %v10808_v60 = vld [vmem:[#allocation36_spill] sm:$0xff] }
 0x7a2   : > { %10805 = vst [vmem:[#allocation112_spill] sm:$0xff] %v8416_v31  ;;  %v8420_v10 = vadd.f32 %v7616_v61, %v10806_v56  ;;  %v8424_v35 = vadd.f32 %v7616_v61, %v10807_v11  ;;  %vm3610_vm0 = vcmp.gt.f32.partialorder %v3546_v13, 0.0  ;;  %vm2472_vm1 = vcmp.gt.f32.partialorder %v2408_v15, 0.0 }
 0x7a3   : > { %v8428_v40 = vadd.f32 %v7616_v61, %v10808_v60  ;;  %v2538_v4 = vmul.f32 0.2, %v2410_v6  ;;  %v2550_v32 = vmul.f32 0.2, %v2422_v28  ;;  %v8432_v3 = vsel %vm3597_vm15, %v8112_v21, %v8285_v47  ;;  %v10811_v21 = vld [vmem:[#allocation44_spill] sm:$0xff] }
 0x7a4   : > { %10809 = vst [vmem:[#allocation29_spill] sm:$0xff] %v8432_v3  ;;  %v2694_v23 = vmax.f32 %v7885_v0, %v8414_v55  ;;  %v3804_v56 = vmax.f32 %v8432_v3, %v8416_v31  ;;  %vm3609_vm3 = vcmp.gt.f32.partialorder %v8170_v30, 0.0  ;;  %vm2486_vm4 = vcmp.gt.f32.partialorder %v2422_v28, 0.0  ;;  %v10812_v55 = vld [vmem:[#allocation46_spill] sm:$0xff]  ;;  %v10813_v3 = vld [vmem:[#allocation43_spill] sm:$0xff] }
 0x7a5   : > { %3817 = vmax.xlane.f32.xlu0 %v3816_v22  ;;  %3802 = vmax.xlane.f32.xlu1 %v3801_v7  ;;  %v3536_v22 = vadd.f32 %v7888_v33, %v10746_v53  ;;  %v3550_v60 = vadd.f32 %v7888_v33, %v10763_v43  ;;  %v8443_v7 = vsel %vm3610_vm0, %v3546_v13, %v3674_v14  ;;  %vm2474_vm5 = vcmp.gt.f32.partialorder %v2410_v6, 0.0  ;;  %v10814_v53 = vld [vmem:[#allocation45_spill] sm:$0xff]  ;;  %v10815_v13 = vld [vmem:[#allocation48_spill] sm:$0xff] }
 0x7a6   : > { %v8445_v11 = vsel %vm2472_vm1, %v2408_v15, %v2536_v49  ;;  %v8449_v47 = vadd.f32 %v7616_v61, %v10811_v21  ;;  %v2426_v31 = vadd.f32 %v7616_v61, %v10812_v55  ;;  %v8455_v0 = vadd.f32 %v7616_v61, %v10813_v3  ;;  %v10816_v49 = vld [vmem:[#allocation54_spill] sm:$0xff]  ;;  %v10817_v3 = vld [vmem:[#allocation47_spill] sm:$0xff] }
 0x7a7   : > { %10810 = vst [vmem:[#allocation37_spill] sm:$0xff] %v8445_v11  ;;  %v2430_v43 = vadd.f32 %v7616_v61, %v10814_v53  ;;  %v8461_v15 = vadd.f32 %v7616_v61, %v10815_v13  ;;  %v8465_v14 = vadd.f32 %v7616_v61, %v10816_v49  ;;  %v8469_v55 = vsel %vm3609_vm3, %v8170_v30, %v8336_v36 }
 0x7a8   : > { %v2679_v21 = vmax.f32 %v7891_v41, %v8445_v11  ;;  %v8480_v53 = vsel %vm2486_vm4, %v2422_v28, %v2550_v32  ;;  %v2540_v13 = vmul.f32 0.2, %v8420_v10  ;;  %v3664_v49 = vmul.f32 0.2, %v3536_v22 }
 0x7a9   : > { %2695 = vmax.xlane.f32.xlu0 %v2694_v23  ;;  %3805 = vmax.xlane.f32.xlu1 %v3804_v56  ;;  %v8473_v23 = vadd.f32 %v7616_v61, %v10817_v3  ;;  %v3822_v56 = vmax.f32 %v8469_v55, %v8443_v7  ;;  %10818 = vst [vmem:[#allocation36_spill] sm:$0xff] %v8480_v53  ;;  %v3678_v25 = vmul.f32 0.2, %v3550_v60  ;;  %v2544_v30 = vmul.f32 0.2, %v8424_v35 }
 0x7aa   : > { %v8483_v1 = vsel %vm2474_vm5, %v2410_v6, %v2538_v4  ;;  %v8487_v36 = vmul.f32 0.2, %v8428_v40  ;;  %vm3614_vm6 = vcmp.gt.f32.partialorder %v3550_v60, 0.0  ;;  %vm3600_vm7 = vcmp.gt.f32.partialorder %v3536_v22, 0.0 }
 0x7ab   : > { %10819 = vst [vmem:[#allocation44_spill] sm:$0xff] %v8483_v1  ;;  %v8490_v3 = vmul.f32 0.2, %v8449_v47  ;;  %v2554_v28 = vmul.f32 0.2, %v2426_v31  ;;  %v2700_v32 = vmax.f32 %v7896_v42, %v8480_v53  ;;  %vm3613_vm8 = vcmp.gt.f32.partialorder %v8194_v48, 0.0 }
 0x7ac   : > { %v2682_v6 = vmax.f32 %v7912_v39, %v8483_v1  ;;  %vm3599_vm9 = vcmp.gt.f32.partialorder %v8117_v46, 0.0  ;;  %vm2490_vm10 = vcmp.gt.f32.partialorder %v2426_v31, 0.0  ;;  %vm2476_vm11 = vcmp.gt.f32.partialorder %v8420_v10, 0.0  ;;  %v10821_v53 = vld [vmem:[#allocation51_spill] sm:$0xff] }
 0x7ad   : > { %3823 = vmax.xlane.f32.xlu0 %v3822_v56  ;;  %2680 = vmax.xlane.f32.xlu1 %v2679_v21  ;;  %v3540_v4 = vadd.f32 %v7888_v33, %v10750_v52  ;;  %v3554_v56 = vadd.f32 %v7888_v33, %v10769_v34  ;;  %v8503_v21 = vsel %vm3614_vm6, %v3550_v60, %v3678_v25  ;;  %v8512_v1 = vmul.f32 0.2, %v8455_v0 }
 0x7ae   : > { %v8505_v11 = vsel %vm3600_vm7, %v3536_v22, %v3664_v49  ;;  %v8509_v42 = vadd.f32 %v7616_v61, %v10821_v53  ;;  %v2558_v39 = vmul.f32 0.2, %v2430_v43  ;;  %v8515_v41 = vmul.f32 0.2, %v8461_v15 }
 0x7af   : > { %10820 = vst [vmem:[#allocation46_spill] sm:$0xff] %v8505_v11  ;;  %v2562_v52 = vmul.f32 0.2, %v8465_v14  ;;  %v8519_v34 = vmul.f32 0.2, %v8473_v23  ;;  %v8525_v61 = vsel %vm3613_vm8, %v8194_v48, %v8342_v12  ;;  %v8531_v25 = vsel %vm3599_vm9, %v8117_v46, %v8288_v16 }
 0x7b0   : > { %10822 = vst [vmem:[#allocation43_spill] sm:$0xff] %v8531_v25  ;;  %v3828_v22 = vmax.f32 %v8525_v61, %v8503_v21  ;;  %v3807_v60 = vmax.f32 %v8531_v25, %v8505_v11  ;;  %v8538_v53 = vsel %vm2490_vm10, %v2426_v31, %v2554_v28  ;;  %v8543_v48 = vsel %vm2476_vm11, %v8420_v10, %v2540_v13  ;;  %v10825_v31 = vld [vmem:[#allocation96_spill] sm:$0xff]  ;;  %v10965_v11 = vld [vmem:[#allocation11_spill] sm:$0xff] }
 0x7b1   : > { %2701 = vmax.xlane.f32.xlu0 %v2700_v32  ;;  %2683 = vmax.xlane.f32.xlu1 %v2682_v6  ;;  %10823 = vst [vmem:[#allocation45_spill] sm:$0xff] %v8538_v53  ;;  %10824 = vst [vmem:[#allocation48_spill] sm:$0xff] %v8543_v48  ;;  %v3668_v12 = vmul.f32 0.2, %v3540_v4  ;;  %v3682_v49 = vmul.f32 0.2, %v3554_v56  ;;  %v2706_v16 = vmax.f32 %v7915_v18, %v8538_v53 }
 0x7b2   : > { %vm2494_vm12 = vcmp.gt.f32.partialorder %v2430_v43, 0.0  ;;  %vm2480_vm13 = vcmp.gt.f32.partialorder %v8424_v35, 0.0  ;;  %v2566_v46 = vmul.f32 0.2, %v8509_v42  ;;  %vm3617_vm14 = vcmp.gt.f32.partialorder %v8212_v17, 0.0  ;;  %v10828_v32 = vld [vmem:[#allocation56_spill] sm:$0xff] }
 0x7b3   : > { %vm3618_vm15 = vcmp.gt.f32.partialorder %v3554_v56, 0.0  ;;  %vm3604_vm0 = vcmp.gt.f32.partialorder %v3540_v4, 0.0  ;;  %v2685_v10 = vmax.f32 %v10825_v31, %v8543_v48  ;;  %vm3603_vm1 = vcmp.gt.f32.partialorder %v8140_v27, 0.0 }
 0x7b4   : > { %vm3621_vm3 = vcmp.gt.f32.partialorder %v8230_v45, 0.0  ;;  %v8554_v13 = vsel %vm2494_vm12, %v2430_v43, %v2558_v39  ;;  %v8557_v28 = vsel %vm2480_vm13, %v8424_v35, %v2544_v30  ;;  %vm3607_vm4 = vcmp.gt.f32.partialorder %v8158_v2, 0.0 }
 0x7b5   : > { %3829 = vmax.xlane.f32.xlu0 %v3828_v22  ;;  %3808 = vmax.xlane.f32.xlu1 %v3807_v60  ;;  %10826 = vst [vmem:[#allocation54_spill] sm:$0xff] %v8554_v13  ;;  %10827 = vst [vmem:[#allocation47_spill] sm:$0xff] %v8557_v28  ;;  %vm2498_vm5 = vcmp.gt.f32.partialorder %v8465_v14, 0.0  ;;  %v3544_v6 = vadd.f32 %v7888_v33, %v10828_v32  ;;  %v10829_v22 = vld [vmem:[#allocation61_spill] sm:$0xff]  ;;  %v8565_v48 = vsel %vm3618_vm15, %v3554_v56, %v3682_v49 }
 0x7b6   : > { %v3558_v60 = vadd.f32 %v7888_v33, %v10829_v22  ;;  %10830 = vst [vmem:[#allocation51_spill] sm:$0xff] %v8565_v48  ;;  %v8567_v31 = vsel %vm3604_vm0, %v3540_v4, %v3668_v12  ;;  %v8573_v35 = vsel %vm3617_vm14, %v8212_v17, %v8364_v44  ;;  %v8577_v39 = vsel %vm3603_vm1, %v8140_v27, %v8306_v54  ;;  %v2636_v30 = vpop.xlane.xlu0 %2635  ;;  %v10835_v4 = vld [vmem:[#allocation97_spill] sm:$0xff]  ;;  %v10836_v12 = vld [vmem:[#allocation98_spill] sm:$0xff] }
 0x7b7   : > { %10831 = vst [vmem:[#allocation56_spill] sm:$0xff] %v8567_v31  ;;  %10832 = vst [vmem:[#allocation61_spill] sm:$0xff] %v8573_v35  ;;  %v8581_v43 = vsel %vm3621_vm3, %v8230_v45, %v8370_v9  ;;  %vm2484_vm6 = vcmp.gt.f32.partialorder %v8428_v40, 0.0  ;;  %v2712_v56 = vmax.f32 %v10835_v4, %v8554_v13  ;;  %v2691_v49 = vmax.f32 %v10836_v12, %v8557_v28  ;;  %v6434_v28 = vld [vmem:[%s6632_s9 + $0xa0] sm:$0xff] }
 0x7b8   : > { %10833 = vst [vmem:[#allocation113_spill] sm:$0xff] %v8577_v39  ;;  %10834 = vst [vmem:[#allocation114_spill] sm:$0xff] %v8581_v43  ;;  %v8590_v17 = vsel %vm3607_vm4, %v8158_v2, %v8333_v5  ;;  %v8593_v27 = vsel %vm2498_vm5, %v8465_v14, %v2562_v52  ;;  %v3834_v45 = vmax.f32 %v8573_v35, %v8565_v48  ;;  %vm3625_vm7 = vcmp.gt.f32.partialorder %v8252_v59, 0.0  ;;  %v10840_v2 = vld [vmem:[#allocation67_spill] sm:$0xff] }
 0x7b9   : > { %2707 = vmax.xlane.f32.xlu0 %v2706_v16  ;;  %2686 = vmax.xlane.f32.xlu1 %v2685_v10  ;;  %10837 = vst [vmem:[#allocation115_spill] sm:$0xff] %v8590_v17  ;;  %10838 = vst [vmem:[#allocation116_spill] sm:$0xff] %v8593_v27  ;;  %v3813_v54 = vmax.f32 %v8577_v39, %v8567_v31  ;;  %vm3611_vm8 = vcmp.gt.f32.partialorder %v8175_v63, 0.0  ;;  %v3672_v44 = vmul.f32 0.2, %v3544_v6  ;;  %vm2502_vm9 = vcmp.gt.f32.partialorder %v8509_v42, 0.0 }
 0x7ba   : > { %v3686_v9 = vmul.f32 0.2, %v3558_v60  ;;  %v8603_v16 = vsel %vm2484_vm6, %v8428_v40, %v8487_v36  ;;  %v2729_v5 = vsub.f32 %v10840_v2, %v2636_v30  ;;  %vm3622_vm10 = vcmp.gt.f32.partialorder %v3558_v60, 0.0  ;;  %v10841_v14 = vld [vmem:[#allocation99_spill] sm:$0xff]  ;;  %v10842_v10 = vld [vmem:[#allocation68_spill] sm:$0xff]  ;;  %v10848_v2 = vld [vmem:[#allocation66_spill] sm:$0xff] }
 0x7bb   : > { %10839 = vst [vmem:[#allocation117_spill] sm:$0xff] %v8603_v16  ;;  %vm3608_vm11 = vcmp.gt.f32.partialorder %v3544_v6, 0.0  ;;  %v2718_v52 = vmax.f32 %v10841_v14, %v8593_v27  ;;  %v2730_v32 = vsub.f32 %v10842_v10, %v2636_v30  ;;  %v8612_v22 = vsel %vm3625_vm7, %v8252_v59, %v8390_v26  ;;  %v10844_v40 = vld [vmem:[#allocation100_spill] sm:$0xff]  ;;  %v10847_v26 = vld [vmem:[#allocation55_spill] sm:$0xff] }
 0x7bc   : > { %10843 = vst [vmem:[#allocation67_spill] sm:$0xff] %v8612_v22  ;;  %vm2488_vm12 = vcmp.gt.f32.partialorder %v8449_v47, 0.0  ;;  %vm3629_vm13 = vcmp.gt.f32.partialorder %v8330_v19, 0.0  ;;  %v2697_v36 = vmax.f32 %v10844_v40, %v8603_v16  ;;  %vm2492_vm14 = vcmp.gt.f32.partialorder %v8455_v0, 0.0  ;;  %v8629_v59 = vld [vmem:[%s6632_s9 + $0x18] sm:$0xff]  ;;  %v10948_v48 = vld [vmem:[#allocation7_spill] sm:$0xff] }
 0x7bd   : > { %3835 = vmax.xlane.f32.xlu0 %v3834_v45  ;;  %3814 = vmax.xlane.f32.xlu1 %v3813_v54  ;;  %v8622_v45 = vsel %vm3611_vm8, %v8175_v63, %v8339_v8  ;;  %v8625_v54 = vsel %vm2502_vm9, %v8509_v42, %v2566_v46  ;;  %vm328_vm15 = vcmp.gt.bf16.partialorder %v8629_v59, 0  ;;  %v3548_v30 = vadd.f32 %v7888_v33, %v10847_v26 }
 0x7be   : > { %10845 = vst [vmem:[#allocation68_spill] sm:$0xff] %v8622_v45  ;;  %10846 = vst [vmem:[#allocation118_spill] sm:$0xff] %v8625_v54  ;;  %v3562_v10 = vadd.f32 %v7888_v33, %v10848_v2  ;;  %v8636_v16 = vsel %vm3622_vm10, %v3558_v60, %v3686_v9  ;;  %v8638_v63 = vsel %vm3608_vm11, %v3544_v6, %v3672_v44  ;;  %v2795_v8 = vmul.f32 1.442695, %v2729_v5  ;;  %v10853_v60 = vld [vmem:[#allocation101_spill] sm:$0xff] }
 0x7bf   : > { %10849 = vst [vmem:[#allocation55_spill] sm:$0xff] %v8636_v16  ;;  %10850 = vst [vmem:[#allocation66_spill] sm:$0xff] %v8638_v63  ;;  %v8642_v42 = vsel %vm2488_vm12, %v8449_v47, %v8490_v3  ;;  %v8646_v46 = vsel %vm3629_vm13, %v8330_v19, %v8407_v58  ;;  %vm3615_vm0 = vcmp.gt.f32.partialorder %v8198_v29, 0.0  ;;  %v2797_v26 = vmul.f32 1.442695, %v2730_v32  ;;  %v8663_v58 = vld [vmem:[%s6632_s9 + $0x10] sm:$0xff] }
 0x7c0   : > { %10851 = vst [vmem:[#allocation119_spill] sm:$0xff] %v8642_v42  ;;  %10852 = vst [vmem:[#allocation120_spill] sm:$0xff] %v8646_v46  ;;  %v8653_v6 = vsel %vm2492_vm14, %v8455_v0, %v8512_v1  ;;  %vm3619_vm1 = vcmp.gt.f32.partialorder %v8216_v51, 0.0  ;;  %v3840_v47 = vmax.f32 %v8581_v43, %v8636_v16  ;;  %v3819_v19 = vmax.f32 %v8590_v17, %v8638_v63  ;;  %v10855_v3 = vld [vmem:[#allocation60_spill] sm:$0xff]  ;;  %v10856_v1 = vld [vmem:[#allocation59_spill] sm:$0xff] }
 0x7c1   : > { %2713 = vmax.xlane.f32.xlu0 %v2712_v56  ;;  %2692 = vmax.xlane.f32.xlu1 %v2691_v49  ;;  %10854 = vst [vmem:[#allocation121_spill] sm:$0xff] %v8653_v6  ;;  %vm2496_vm3 = vcmp.gt.f32.partialorder %v8461_v15, 0.0  ;;  %vm3623_vm4 = vcmp.gt.f32.partialorder %v8248_v24, 0.0  ;;  %vm327_vm5 = vcmp.gt.bf16.partialorder %v8663_v58, 0  ;;  %v3552_v0 = vadd.f32 %v7888_v33, %v10855_v3  ;;  %v8673_v32 = vld [vmem:[%s6632_s9 + $0x28] sm:$0xff]  ;;  %v10857_v2 = vld [vmem:[#allocation73_spill] sm:$0xff] }
 0x7c2   : > { %v3556_v56 = vadd.f32 %v7888_v33, %v10856_v1  ;;  %v3676_v49 = vmul.f32 0.2, %v3548_v30  ;;  %v3690_v44 = vmul.f32 0.2, %v3562_v10  ;;  %v3566_v5 = vadd.f32 %v7888_v33, %v10792_v50  ;;  %v10859_v50 = vld [vmem:[#allocation75_spill] sm:$0xff] }
 0x7c3   : > { %6029 = vpow2.f32 %v2795_v8  ;;  %vm3626_vm6 = vcmp.gt.f32.partialorder %v3562_v10, 0.0  ;;  %vm3612_vm7 = vcmp.gt.f32.partialorder %v3548_v30, 0.0  ;;  %vm330_vm8 = vcmp.gt.bf16.partialorder %v8673_v32, 0 }
 0x7c4   : > { %6031 = vpow2.f32 %v2797_v26  ;;  %v2703_v3 = vmax.f32 %v10857_v2, %v8642_v42  ;;  %v8682_v1 = vsel %vm3615_vm0, %v8198_v29, %v8350_v62  ;;  %v8692_v26 = vsel %vm3619_vm1, %v8216_v51, %v8367_v20  ;;  %v8702_v29 = vld [vmem:[%s6632_s9 + $0x20] sm:$0xff] }
 0x7c5   : > { %3841 = vmax.xlane.f32.xlu0 %v3840_v47  ;;  %3820 = vmax.xlane.f32.xlu1 %v3819_v19  ;;  %10858 = vst [vmem:[#allocation60_spill] sm:$0xff] %v8682_v1  ;;  %v10860_v47 = vld [vmem:[#allocation64_spill] sm:$0xff]  ;;  %10861 = vst [vmem:[#allocation59_spill] sm:$0xff] %v8692_v26  ;;  %v8698_v9 = vsel %vm2496_vm3, %v8461_v15, %v8515_v41  ;;  %vm2500_vm9 = vcmp.gt.f32.partialorder %v8473_v23, 0.0  ;;  %vm329_vm10 = vcmp.gt.bf16.partialorder %v8702_v29, 0  ;;  %vm3627_vm11 = vcmp.gt.f32.partialorder %v8256_v37, 0.0 }
 0x7c6   : > { %v3560_v19 = vadd.f32 %v7888_v33, %v10860_v47  ;;  %10862 = vst [vmem:[#allocation64_spill] sm:$0xff] %v8698_v9  ;;  %v8705_v62 = vsel %vm3626_vm6, %v3562_v10, %v3690_v44  ;;  %v8707_v47 = vsel %vm3612_vm7, %v3548_v30, %v3676_v49  ;;  %v8713_v51 = vsel %vm3623_vm4, %v8248_v24, %v8373_v38  ;;  %v10866_v41 = vld [vmem:[#allocation63_spill] sm:$0xff]  ;;  %v8719_v10 = vld [vmem:[%s6632_s9 + $0x38] sm:$0xff] }
 0x7c7   : > { %10863 = vst [vmem:[#allocation122_spill] sm:$0xff] %v8705_v62  ;;  %10864 = vst [vmem:[#allocation123_spill] sm:$0xff] %v8707_v47  ;;  %v3564_v20 = vadd.f32 %v7888_v33, %v10866_v41  ;;  %v3680_v15 = vmul.f32 0.2, %v3552_v0  ;;  %v3684_v8 = vmul.f32 0.2, %v3556_v56  ;;  %v8726_v24 = vsel %vm2500_vm9, %v8473_v23, %v8519_v34 }
 0x7c8   : > { %10865 = vst [vmem:[#allocation124_spill] sm:$0xff] %v8713_v51  ;;  %v3694_v42 = vmul.f32 0.2, %v3566_v5  ;;  %vm332_vm12 = vcmp.gt.bf16.partialorder %v8719_v10, 0  ;;  %vm3630_vm13 = vcmp.gt.f32.partialorder %v3566_v5, 0.0  ;;  %vm3616_vm14 = vcmp.gt.f32.partialorder %v3552_v0, 0.0 }
 0x7c9   : > { %2719 = vmax.xlane.f32.xlu0 %v2718_v52  ;;  %2698 = vmax.xlane.f32.xlu1 %v2697_v36  ;;  %vm3620_vm0 = vcmp.gt.f32.partialorder %v3556_v56, 0.0  ;;  %10867 = vst [vmem:[#allocation63_spill] sm:$0xff] %v8726_v24  ;;  %v8729_v38 = vld [vmem:[%s6632_s9 + $0x30] sm:$0xff]  ;;  %v3688_v33 = vmul.f32 0.2, %v3560_v19  ;;  %v3846_v52 = vmax.f32 %v8612_v22, %v8705_v62  ;;  %v3825_v36 = vmax.f32 %v8622_v45, %v8707_v47  ;;  %v10869_v44 = vld [vmem:[#allocation72_spill] sm:$0xff] }
 0x7ca   : > { %vm331_vm1 = vcmp.gt.bf16.partialorder %v8729_v38, 0  ;;  %v10868_v30 = vmov 0   ;;  %v10870_v41 = vunpack.c.l.b16 %v10869_v44  ;;  %v10871_v23 = vunpack.c.h.b16 %v10869_v44  ;;  %v10877_v44 = vld [vmem:[#allocation76_spill] sm:$0xff]  ;;  %v8775_v62 = vld [vmem:[%s6632_s9 + $0x40] sm:$0xff]  ;;  %v10883_v34 = vld [vmem:[#allocation71_spill] sm:$0xff] }
 0x7cb   : > { %v360_v49 = vsel %vm328_vm15, 65537, %v10868_v30  ;;  %vm3624_vm6 = vcmp.gt.f32.partialorder %v3560_v19, 0.0  ;;  %v3692_v2 = vmul.f32 0.2, %v3564_v20  ;;  %v8748_v47 = vsel %vm3630_vm13, %v3566_v5, %v3694_v42 }
 0x7cc   : > { %vm455_vm3 = vcmp.ne.s32.totalorder %v10870_v41, 0  ;;  %vm8743_vm4 = vcmp.ne.s32.totalorder %v10871_v23, 0  ;;  %10874 = vst [vmem:[#allocation72_spill] sm:$0xff] %v8748_v47  ;;  %v8751_v59 = vsel %vm3616_vm14, %v3552_v0, %v3680_v15  ;;  %v8754_v41 = vsel %vm3620_vm0, %v3556_v56, %v3684_v8  ;;  %v10880_v56 = vld [vmem:[#allocation77_spill] sm:$0xff]  ;;  %v8794_v8 = vld [vmem:[%s6632_s9 + $0x58] sm:$0xff] }
 0x7cd   : > { %3847 = vmax.xlane.f32.xlu0 %v3846_v52  ;;  %3826 = vmax.xlane.f32.xlu1 %v3825_v36  ;;  %10875 = vst [vmem:[#allocation125_spill] sm:$0xff] %v8751_v59  ;;  %10876 = vst [vmem:[#allocation126_spill] sm:$0xff] %v8754_v41  ;;  %vm3628_vm15 = vcmp.gt.f32.partialorder %v3564_v20, 0.0  ;;  %v8762_v52 = vsel %vm3627_vm11, %v8256_v37, %v8393_v57  ;;  %v395_v36 = vunpack.c.l.b16 %v360_v49  ;;  %v6030_v42 = vpop.eup %6029  ;;  %v10452_v5 = vmov 0.0   ;;  %v8779_v37 = vld [vmem:[%s6632_s9 + $0x48] sm:$0xff] }
 0x7ce   : > { %10878 = vst [vmem:[#allocation127_spill] sm:$0xff] %v8762_v52  ;;  %v8765_v0 = vsel %vm455_vm3, 1.0, %v10452_v5  ;;  %v8767_v15 = vsel %vm3624_vm6, %v3560_v19, %v3688_v33  ;;  %v359_v23 = vsel %vm327_vm5, 65537, %v10868_v30  ;;  %v6032_v45 = vpop.eup %6031  ;;  %vm333_vm7 = vcmp.gt.bf16.partialorder %v8775_v62, 0 }
 0x7cf   : > { %10879 = vst [vmem:[#allocation128_spill] sm:$0xff] %v8767_v15  ;;  %vm334_vm9 = vcmp.gt.bf16.partialorder %v8779_v37, 0  ;;  %v3852_v57 = vmax.f32 %v8646_v46, %v8748_v47  ;;  %v3831_v19 = vmax.f32 %v8682_v1, %v8751_v59  ;;  %v8789_v58 = vsel %vm8743_vm4, 1.0, %v10452_v5  ;;  %v2633_v22 = vpop.xlane.xlu1 %2632  ;;  %v8813_v46 = vld [vmem:[%s6632_s9 + $0x50] sm:$0xff] }
 0x7d0   : > { %vm336_vm5 = vcmp.gt.bf16.partialorder %v8794_v8, 0  ;;  %v10881_v40 = vmax.f32 %v10853_v60, %v8625_v54  ;;  %v8801_v59 = vsel %vm3628_vm15, %v3564_v20, %v3692_v2  ;;  %v10884_v5 = vunpack.c.l.b16 %v10883_v34 }
 0x7d1   : > { %2704 = vmax.xlane.f32.xlu1 %v2703_v3  ;;  %10882 = vst [vmem:[#allocation129_spill] sm:$0xff] %v8801_v59  ;;  %v396_v33 = vunpack.c.h.b16 %v360_v49  ;;  %v362_v47 = vsel %vm330_vm8, 65537, %v10868_v30  ;;  %vm335_vm13 = vcmp.gt.bf16.partialorder %v8813_v46, 0  ;;  %v10887_v2 = vunpack.c.h.b16 %v10883_v34 }
 0x7d2   : > { %2725 = vmax.xlane.f32.xlu0 %v10881_v40  ;;  %vm8805_vm11 = vcmp.ne.s32.totalorder %v10884_v5, 0  ;;  %vm8824_vm0 = vcmp.ne.s32.totalorder %v395_v36, 0  ;;  %v393_v49 = vunpack.c.l.b16 %v359_v23  ;;  %v8829_v32 = vmul.f32 %v6030_v42, %v8765_v0  ;;  %v10894_v36 = vld [vmem:[#allocation70_spill] sm:$0xff] }
 0x7d3   : > { %vm8820_vm14 = vcmp.ne.s32.totalorder %v10887_v2, 0  ;;  %v8832_v5 = vmul.f32 %v6032_v45, %v8789_v58  ;;  %v394_v54 = vunpack.c.h.b16 %v359_v23  ;;  %v361_v34 = vsel %vm329_vm10, 65537, %v10868_v30  ;;  %v8838_v2 = vld [vmem:[%s6632_s9 + $0x68] sm:$0xff]  ;;  %v10896_v23 = vld [vmem:[#allocation69_spill] sm:$0xff] }
 0x7d4   : > { %10892 = vst [vmem:[#allocation71_spill] sm:$0xff] %v8829_v32  ;;  %vm338_vm8 = vcmp.gt.bf16.partialorder %v8838_v2, 0  ;;  %v2727_v40 = vsub.f32 %v10894_v36, %v2633_v22  ;;  %v10895_v42 = vmov 0.0   ;;  %v399_v45 = vunpack.c.l.b16 %v362_v47  ;;  %v8854_v36 = vld [vmem:[%s6632_s9 + $0x60] sm:$0xff] }
 0x7d5   : > { %10893 = vst [vmem:[#allocation130_spill] sm:$0xff] %v8832_v5  ;;  %v8847_v27 = vsel %vm8805_vm11, 1.0, %v10895_v42  ;;  %v2728_v14 = vsub.f32 %v10896_v23, %v2633_v22  ;;  %3832 = vmax.xlane.f32.xlu1 %v3831_v19  ;;  %vm460_vm10 = vcmp.ne.s32.totalorder %v396_v33, 0  ;;  %v400_v29 = vunpack.c.h.b16 %v362_v47 }
 0x7d6   : > { %3853 = vmax.xlane.f32.xlu0 %v3852_v57  ;;  %v364_v63 = vsel %vm332_vm12, 65537, %v10868_v30  ;;  %vm337_vm3 = vcmp.gt.bf16.partialorder %v8854_v36, 0  ;;  %v8860_v1 = vsel %vm8820_vm14, 1.0, %v10895_v42  ;;  %v8865_v22 = vsel %vm8824_vm0, 1.0, %v10895_v42 }
 0x7d7   : > { %v397_v57 = vunpack.c.l.b16 %v361_v34  ;;  %v363_v47 = vsel %vm331_vm1, 65537, %v10868_v30  ;;  %v2986_v10 = vadd.f32 %v8832_v5, %v8829_v32  ;;  %vm457_vm12 = vcmp.ne.s32.totalorder %v393_v49, 0  ;;  %v8932_v32 = vld [vmem:[%s6632_s9 + $0x80] sm:$0xff] }
 0x7d8   : > { %vm458_vm4 = vcmp.ne.s32.totalorder %v394_v54, 0  ;;  %v398_v19 = vunpack.c.h.b16 %v361_v34  ;;  %v2791_v33 = vmul.f32 1.442695, %v2727_v40  ;;  %v8873_v3 = vsel %vm460_vm10, 1.0, %v10895_v42  ;;  %v8887_v34 = vld [vmem:[%s6632_s9 + $0x70] sm:$0xff] }
 0x7d9   : > { %vm8875_vm6 = vcmp.ne.s32.totalorder %v399_v45, 0  ;;  %v403_v23 = vunpack.c.l.b16 %v364_v63  ;;  %v2793_v60 = vmul.f32 1.442695, %v2728_v14  ;;  %v10899_v38 = vmax.f32 %v10859_v50, %v8653_v6  ;;  %v6431_v50 = vld [vmem:[%s6632_s9 + $0x98] sm:$0xff] }
 0x7da   : > { %2987 = vadd.xlane.f32.xlu0 %v2986_v10  ;;  %vm8882_vm1 = vcmp.ne.s32.totalorder %v400_v29, 0  ;;  %v404_v54 = vunpack.c.h.b16 %v364_v63  ;;  %v401_v40 = vunpack.c.l.b16 %v363_v47  ;;  %vm339_vm15 = vcmp.gt.bf16.partialorder %v8887_v34, 0 }
 0x7db   : > { %2710 = vmax.xlane.f32.xlu1 %v10899_v38  ;;  %v8891_v45 = vsel %vm457_vm12, 1.0, %v10895_v42  ;;  %v8894_v14 = vsel %vm458_vm4, 1.0, %v10895_v42  ;;  %vm8896_vm11 = vcmp.ne.s32.totalorder %v397_v57, 0  ;;  %v402_v29 = vunpack.c.h.b16 %v363_v47  ;;  %v8901_v38 = vld [vmem:[%s6632_s9 + $0x78] sm:$0xff] }
 0x7dc   : > { %vm340_vm14 = vcmp.gt.bf16.partialorder %v8901_v38, 0  ;;  %v8907_v63 = vsel %vm8875_vm6, 1.0, %v10895_v42  ;;  %vm8909_vm0 = vcmp.ne.s32.totalorder %v398_v19, 0  ;;  %v366_v57 = vsel %vm334_vm9, 65537, %v10868_v30 }
 0x7dd   : > { %v365_v47 = vsel %vm333_vm7, 65537, %v10868_v30  ;;  %6033 = vpow2.f32 %v2791_v33  ;;  %v8922_v20 = vsel %vm8882_vm1, 1.0, %v10895_v42  ;;  %vm8924_vm10 = vcmp.ne.s32.totalorder %v403_v23, 0  ;;  %v6433_v33 = vld [vmem:[%s6632_s9 + $0xa8] sm:$0xff] }
 0x7de   : > { %v368_v37 = vsel %vm336_vm5, 65537, %v10868_v30  ;;  %vm341_vm9 = vcmp.gt.bf16.partialorder %v8932_v32, 0  ;;  %6035 = vpow2.f32 %v2793_v60  ;;  %v10908_v62 = vmax.f32 %v8692_v26, %v8754_v41 }
 0x7df   : > { %vm8938_vm7 = vcmp.ne.s32.totalorder %v404_v54, 0  ;;  %vm8942_vm12 = vcmp.ne.s32.totalorder %v401_v40, 0  ;;  %v367_v8 = vsel %vm335_vm13, 65537, %v10868_v30  ;;  %vm8949_vm5 = vcmp.ne.s32.totalorder %v402_v29, 0  ;;  %v8954_v54 = vld [vmem:[%s6632_s9 + $0x88] sm:$0xff] }
 0x7e0   : > { %3838 = vmax.xlane.f32.xlu1 %v10908_v62  ;;  %v407_v60 = vunpack.c.l.b16 %v366_v57  ;;  %v408_v41 = vunpack.c.h.b16 %v366_v57  ;;  %v405_v62 = vunpack.c.l.b16 %v365_v47  ;;  %vm342_vm4 = vcmp.gt.bf16.partialorder %v8954_v54, 0 }
 0x7e1   : > { %v406_v40 = vunpack.c.h.b16 %v365_v47  ;;  %v411_v26 = vunpack.c.l.b16 %v368_v37  ;;  %v412_v6 = vunpack.c.h.b16 %v368_v37  ;;  %v370_v46 = vsel %vm338_vm8, 65537, %v10868_v30  ;;  %v6432_v37 = vld [vmem:[%s6632_s9 + $0x90] sm:$0xff] }
 0x7e2   : > { %vm344_vm13 = vcmp.gt.bf16.partialorder %v6431_v50, 0  ;;  %v8964_v29 = vsel %vm8896_vm11, 1.0, %v10895_v42  ;;  %v8969_v57 = vsel %vm8909_vm0, 1.0, %v10895_v42  ;;  %v409_v47 = vunpack.c.l.b16 %v367_v8 }
 0x7e3   : > { %v410_v17 = vunpack.c.h.b16 %v367_v8  ;;  %vm343_vm6 = vcmp.gt.bf16.partialorder %v6432_v37, 0  ;;  %v10915_v2 = vmax.f32 %v10877_v44, %v8698_v9  ;;  %v8978_v10 = vsel %vm8924_vm10, 1.0, %v10895_v42 }
 0x7e4   : > { %v8983_v16 = vsel %vm8938_vm7, 1.0, %v10895_v42  ;;  %v8988_v5 = vsel %vm8942_vm12, 1.0, %v10895_v42  ;;  %v369_v8 = vsel %vm337_vm3, 65537, %v10868_v30  ;;  %v8996_v19 = vsel %vm8949_vm5, 1.0, %v10895_v42 }
 0x7e5   : > { %2716 = vmax.xlane.f32.xlu1 %v10915_v2  ;;  %vm471_vm8 = vcmp.ne.s32.totalorder %v407_v60, 0  ;;  %vm472_vm1 = vcmp.ne.s32.totalorder %v408_v41, 0  ;;  %v415_v2 = vunpack.c.l.b16 %v370_v46  ;;  %vm346_vm11 = vcmp.gt.bf16.partialorder %v6433_v33, 0 }
 0x7e6   : > { %vm8999_vm0 = vcmp.ne.s32.totalorder %v405_v62, 0  ;;  %vm9003_vm10 = vcmp.ne.s32.totalorder %v406_v40, 0  ;;  %vm9007_vm3 = vcmp.ne.s32.totalorder %v411_v26, 0  ;;  %vm9011_vm7 = vcmp.ne.s32.totalorder %v412_v6, 0 }
 0x7e7   : > { %vm9015_vm12 = vcmp.ne.s32.totalorder %v409_v47, 0  ;;  %vm9019_vm5 = vcmp.ne.s32.totalorder %v410_v17, 0  ;;  %v416_v62 = vunpack.c.h.b16 %v370_v46  ;;  %v413_v40 = vunpack.c.l.b16 %v369_v8  ;;  %v6034_v43 = vpop.eup %6033 }
 0x7e8   : > { %v10928_v26 = vmax.f32 %v8713_v51, %v8767_v15  ;;  %v9027_v44 = vsel %vm471_vm8, 1.0, %v10895_v42  ;;  %v9030_v6 = vsel %vm472_vm1, 1.0, %v10895_v42  ;;  %v414_v47 = vunpack.c.h.b16 %v369_v8  ;;  %v6036_v34 = vpop.eup %6035 }
 0x7e9   : > { %v371_v17 = vsel %vm339_vm15, 65537, %v10868_v30  ;;  %vm345_vm2 = vcmp.gt.bf16.partialorder %v6434_v28, 0  ;;  %v9039_v46 = vsel %vm8999_vm0, 1.0, %v10895_v42  ;;  %vm479_vm8 = vcmp.ne.s32.totalorder %v415_v2, 0 }
 0x7ea   : > { %3844 = vmax.xlane.f32.xlu1 %v10928_v26  ;;  %v9044_v26 = vsel %vm9003_vm10, 1.0, %v10895_v42  ;;  %v372_v8 = vsel %vm340_vm14, 65537, %v10868_v30  ;;  %v9052_v15 = vsel %vm9007_vm3, 1.0, %v10895_v42  ;;  %v9057_v9 = vsel %vm9011_vm7, 1.0, %v10895_v42 }
 0x7eb   : > { %v9062_v23 = vsel %vm9015_vm12, 1.0, %v10895_v42  ;;  %v9067_v38 = vsel %vm9019_vm5, 1.0, %v10895_v42  ;;  %vm480_vm15 = vcmp.ne.s32.totalorder %v416_v62, 0  ;;  %vm477_vm14 = vcmp.ne.s32.totalorder %v413_v40, 0 }
 0x7ec   : > { %v417_v2 = vunpack.c.l.b16 %v371_v17  ;;  %v373_v36 = vsel %vm341_vm9, 65537, %v10868_v30  ;;  %v10929_v49 = vmax.f32 %v10880_v56, %v8726_v24  ;;  %v9076_v41 = vsel %vm479_vm8, 1.0, %v10895_v42  ;;  %v6435_v56 = vld [vmem:[%s6632_s9 + $0xb8] sm:$0xff] }
 0x7ed   : > { %vm478_vm1 = vcmp.ne.s32.totalorder %v414_v47, 0  ;;  %v418_v51 = vunpack.c.h.b16 %v371_v17  ;;  %v419_v60 = vunpack.c.l.b16 %v372_v8  ;;  %v9079_v12 = vmul.f32 %v6034_v43, %v8847_v27 }
 0x7ee   : > { %2722 = vmax.xlane.f32.xlu1 %v10929_v49  ;;  %v9082_v62 = vmul.f32 %v6036_v34, %v8860_v1  ;;  %v420_v40 = vunpack.c.h.b16 %v372_v8  ;;  %v374_v32 = vsel %vm342_vm4, 65537, %v10868_v30  ;;  %v9088_v49 = vsel %vm480_vm15, 1.0, %v10895_v42 }
 0x7ef   : > { %10930 = vst [vmem:[#allocation70_spill] sm:$0xff] %v9079_v12  ;;  %v9091_v24 = vsel %vm477_vm14, 1.0, %v10895_v42  ;;  %v421_v47 = vunpack.c.l.b16 %v373_v36  ;;  %v376_v17 = vsel %vm344_vm13, 65537, %v10868_v30  ;;  %v9096_v43 = vsel %vm478_vm1, 1.0, %v10895_v42 }
 0x7f0   : > { %10931 = vst [vmem:[#allocation69_spill] sm:$0xff] %v9082_v62  ;;  %vm9098_vm9 = vcmp.ne.s32.totalorder %v417_v2, 0  ;;  %v422_v8 = vunpack.c.h.b16 %v373_v36  ;;  %v375_v54 = vsel %vm343_vm6, 65537, %v10868_v30  ;;  %vm348_vm4 = vcmp.gt.bf16.partialorder %v6435_v56, 0 }
 0x7f1   : > { %v10934_v13 = vmax.f32 %v8762_v52, %v8801_v59  ;;  %vm482_vm0 = vcmp.ne.s32.totalorder %v418_v51, 0  ;;  %vm483_vm10 = vcmp.ne.s32.totalorder %v419_v60, 0  ;;  %v423_v50 = vunpack.c.l.b16 %v374_v32  ;;  %v10947_v52 = vld [vmem:[#allocation74_spill] sm:$0xff] }
 0x7f2   : > { %v424_v4 = vunpack.c.h.b16 %v374_v32  ;;  %v2983_v2 = vadd.f32 %v9082_v62, %v9079_v12  ;;  %vm9110_vm13 = vcmp.ne.s32.totalorder %v420_v40, 0  ;;  %v427_v36 = vunpack.c.l.b16 %v376_v17 }
 0x7f3   : > { %3850 = vmax.xlane.f32.xlu1 %v10934_v13  ;;  %v378_v37 = vsel %vm346_vm11, 65537, %v10868_v30  ;;  %vm485_vm6 = vcmp.ne.s32.totalorder %v421_v47, 0  ;;  %v428_v39 = vunpack.c.h.b16 %v376_v17  ;;  %v425_v59 = vunpack.c.l.b16 %v375_v54 }
 0x7f4   : > { %v426_v13 = vunpack.c.h.b16 %v375_v54  ;;  %v9119_v51 = vsel %vm9098_vm9, 1.0, %v10895_v42  ;;  %v9122_v60 = vsel %vm482_vm0, 1.0, %v10895_v42  ;;  %v9125_v40 = vsel %vm483_vm10, 1.0, %v10895_v42  ;;  %v10955_v54 = vld [vmem:[#allocation9_spill] sm:$0xff] }
 0x7f5   : > { %vm486_vm3 = vcmp.ne.s32.totalorder %v422_v8, 0  ;;  %vm9127_vm11 = vcmp.ne.s32.totalorder %v423_v50, 0  ;;  %vm9131_vm7 = vcmp.ne.s32.totalorder %v424_v4, 0  ;;  %v431_v47 = vunpack.c.l.b16 %v378_v37  ;;  %v6436_v50 = vld [vmem:[%s6632_s9 + $0xb0] sm:$0xff] }
 0x7f6   : > { %v377_v17 = vsel %vm345_vm2, 65537, %v10868_v30  ;;  %v9140_v34 = vsel %vm9110_vm13, 1.0, %v10895_v42  ;;  %v9143_v8 = vsel %vm485_vm6, 1.0, %v10895_v42  ;;  %vm9145_vm12 = vcmp.ne.s32.totalorder %v427_v36, 0  ;;  %v3764_v31 = vpop.xlane.xlu0 %3763 }
 0x7f7   : > { %2984 = vadd.xlane.f32.xlu1 %v2983_v2  ;;  %10941 = vst [vmem:[#allocation131_spill] sm:$0xff] %v9143_v8  ;;  %v432_v4 = vunpack.c.h.b16 %v378_v37  ;;  %vm347_vm5 = vcmp.gt.bf16.partialorder %v6436_v50, 0  ;;  %v6437_v2 = vld [vmem:[%s6632_s9 + $0xc8] sm:$0xff]  ;;  %v9152_v28 = vsel %vm486_vm3, 1.0, %v10895_v42  ;;  %vm492_vm2 = vcmp.ne.s32.totalorder %v428_v39, 0 }
 0x7f8   : > { %vm350_vm8 = vcmp.gt.bf16.partialorder %v6437_v2, 0  ;;  %10944 = vst [vmem:[#allocation132_spill] sm:$0xff] %v9152_v28  ;;  %vm489_vm15 = vcmp.ne.s32.totalorder %v425_v59, 0  ;;  %vm490_vm14 = vcmp.ne.s32.totalorder %v426_v13, 0  ;;  %v9157_v62 = vsel %vm9127_vm11, 1.0, %v10895_v42  ;;  %v3761_v59 = vpop.xlane.xlu1 %3760 }
 0x7f9   : > { %10945 = vst [vmem:[#allocation133_spill] sm:$0xff] %v9157_v62  ;;  %v9162_v36 = vsel %vm9131_vm7, 1.0, %v10895_v42  ;;  %v429_v37 = vunpack.c.l.b16 %v377_v17  ;;  %v430_v12 = vunpack.c.h.b16 %v377_v17  ;;  %v3857_v8 = vsub.f32 %v10947_v52, %v3764_v31  ;;  %v10970_v52 = vld [vmem:[#allocation26_spill] sm:$0xff] }
 0x7fa   : > { %10946 = vst [vmem:[#allocation134_spill] sm:$0xff] %v9162_v36  ;;  %v3858_v28 = vsub.f32 %v10948_v48, %v3764_v31  ;;  %v9169_v39 = vsel %vm9145_vm12, 1.0, %v10895_v42  ;;  %vm495_vm1 = vcmp.ne.s32.totalorder %v431_v47, 0  ;;  %v9172_v13 = vsel %vm492_vm2, 1.0, %v10895_v42  ;;  %v2642_v36 = vpop.xlane.xlu0 %2641 }
 0x7fb   : > { %10949 = vst [vmem:[#allocation74_spill] sm:$0xff] %v9169_v39  ;;  %10950 = vst [vmem:[#allocation7_spill] sm:$0xff] %v9172_v13  ;;  %v9175_v33 = vsel %vm489_vm15, 1.0, %v10895_v42  ;;  %v9178_v32 = vsel %vm490_vm14, 1.0, %v10895_v42  ;;  %vm9180_vm9 = vcmp.ne.s32.totalorder %v432_v4, 0  ;;  %v3855_v31 = vsub.f32 %v10955_v54, %v3761_v59  ;;  %v10956_v39 = vld [vmem:[#allocation102_spill] sm:$0xff] }
 0x7fc   : > { %10951 = vst [vmem:[#allocation135_spill] sm:$0xff] %v9175_v33  ;;  %10952 = vst [vmem:[#allocation136_spill] sm:$0xff] %v9178_v32  ;;  %v3923_v48 = vmul.f32 1.442695, %v3857_v8  ;;  %v3925_v17 = vmul.f32 1.442695, %v3858_v28  ;;  %v3856_v47 = vsub.f32 %v10956_v39, %v3761_v59 }
 0x7fd   : > { %v9187_v62 = vsel %vm495_vm1, 1.0, %v10895_v42  ;;  %vm9189_vm0 = vcmp.ne.s32.totalorder %v429_v37, 0  ;;  %vm9193_vm10 = vcmp.ne.s32.totalorder %v430_v12, 0  ;;  %v380_v8 = vsel %vm348_vm4, 65537, %v10868_v30  ;;  %v10962_v54 = vld [vmem:[#allocation78_spill] sm:$0xff]  ;;  %v10963_v59 = vld [vmem:[#allocation103_spill] sm:$0xff] }
 0x7fe   : > { %10957 = vst [vmem:[#allocation9_spill] sm:$0xff] %v9187_v62  ;;  %6037 = vpow2.f32 %v3923_v48  ;;  %v3919_v4 = vmul.f32 1.442695, %v3855_v31  ;;  %v3921_v28 = vmul.f32 1.442695, %v3856_v47  ;;  %v2733_v39 = vsub.f32 %v10962_v54, %v2642_v36  ;;  %v2639_v62 = vpop.xlane.xlu1 %2638  ;;  %v10964_v12 = vld [vmem:[#allocation79_spill] sm:$0xff]  ;;  %v3767_v47 = vpop.xlane.xlu0 %3766 }
 0x7ff   : > { %6039 = vpow2.f32 %v3925_v17  ;;  %v2734_v33 = vsub.f32 %v10963_v59, %v2642_v36  ;;  %v435_v37 = vunpack.c.l.b16 %v380_v8  ;;  %v436_v35 = vunpack.c.h.b16 %v380_v8  ;;  %v10974_v17 = vld [vmem:[#allocation80_spill] sm:$0xff] }
 0x800   : > { %6041 = vpow2.f32 %v3919_v4  ;;  %v2803_v53 = vmul.f32 1.442695, %v2733_v39  ;;  %v2731_v18 = vsub.f32 %v10964_v12, %v2639_v62  ;;  %v2732_v25 = vsub.f32 %v10965_v11, %v2639_v62 }
 0x801   : > { %6043 = vpow2.f32 %v3921_v28  ;;  %v2805_v56 = vmul.f32 1.442695, %v2734_v33  ;;  %v9206_v48 = vsel %vm9180_vm9, 1.0, %v10895_v42  ;;  %vm9208_vm4 = vcmp.ne.s32.totalorder %v435_v37, 0  ;;  %v10971_v28 = vld [vmem:[#allocation17_spill] sm:$0xff] }
 0x802   : > { %6045 = vpow2.f32 %v2803_v53  ;;  %v2799_v36 = vmul.f32 1.442695, %v2731_v18  ;;  %v2801_v31 = vmul.f32 1.442695, %v2732_v25  ;;  %vm500_vm13 = vcmp.ne.s32.totalorder %v436_v35, 0  ;;  %v3770_v8 = vpop.xlane.xlu1 %3769  ;;  %v10968_v18 = vld [vmem:[#allocation21_spill] sm:$0xff] }
 0x803   : > { %6047 = vpow2.f32 %v2805_v56  ;;  %v9215_v11 = vsel %vm9189_vm0, 1.0, %v10895_v42  ;;  %v9219_v62 = vsel %vm347_vm5, 65537, %v10868_v30  ;;  %v9223_v33 = vsel %vm350_vm8, 65537, %v10868_v30  ;;  %v10969_v53 = vld [vmem:[#allocation15_spill] sm:$0xff]  ;;  %v2648_v56 = vpop.xlane.xlu0 %2647  ;;  %v10976_v30 = vld [vmem:[#allocation81_spill] sm:$0xff] }
 0x804   : > { %6049 = vpow2.f32 %v2799_v36  ;;  %v3859_v25 = vsub.f32 %v10968_v18, %v3767_v47  ;;  %v3860_v35 = vsub.f32 %v10969_v53, %v3767_v47  ;;  %v3861_v4 = vsub.f32 %v10970_v52, %v3770_v8  ;;  %v10975_v52 = vld [vmem:[#allocation10_spill] sm:$0xff] }
 0x805   : > { %v3862_v54 = vsub.f32 %v10971_v28, %v3770_v8  ;;  %v9232_v13 = vsel %vm9193_vm10, 1.0, %v10895_v42  ;;  %v9237_v50 = vsel %vm9208_vm4, 1.0, %v10895_v42  ;;  %v9240_v2 = vsel %vm500_vm13, 1.0, %v10895_v42 }
 0x806   : > { %10972 = vst [vmem:[#allocation102_spill] sm:$0xff] %v9237_v50  ;;  %10973 = vst [vmem:[#allocation78_spill] sm:$0xff] %v9240_v2  ;;  %6051 = vpow2.f32 %v2801_v31  ;;  %v3927_v39 = vmul.f32 1.442695, %v3859_v25  ;;  %v3929_v59 = vmul.f32 1.442695, %v3860_v35  ;;  %v2645_v36 = vpop.xlane.xlu1 %2644  ;;  %v2737_v53 = vsub.f32 %v10974_v17, %v2648_v56 }
 0x807   : > { %v3931_v37 = vmul.f32 1.442695, %v3861_v4  ;;  %v3933_v12 = vmul.f32 1.442695, %v3862_v54  ;;  %v2738_v28 = vsub.f32 %v10975_v52, %v2648_v56  ;;  %v2735_v31 = vsub.f32 %v10976_v30, %v2645_v36  ;;  %v10977_v35 = vld [vmem:[#allocation13_spill] sm:$0xff]  ;;  %v3773_v56 = vpop.xlane.xlu0 %3772 }
 0x808   : > { %v6038_v18 = vpop.eup %6037  ;;  %6053 = vpow2.f32 %v3927_v39  ;;  %v2736_v4 = vsub.f32 %v10977_v35, %v2645_v36  ;;  %v2811_v8 = vmul.f32 1.442695, %v2737_v53  ;;  %v10981_v36 = vld [vmem:[#allocation22_spill] sm:$0xff] }
 0x809   : > { %v6040_v25 = vpop.eup %6039  ;;  %6055 = vpow2.f32 %v3929_v59  ;;  %v9250_v54 = vmul.f32 %v6038_v18, %v8765_v0  ;;  %v2813_v2 = vmul.f32 1.442695, %v2738_v28  ;;  %v2807_v39 = vmul.f32 1.442695, %v2735_v31  ;;  %v10982_v35 = vld [vmem:[#allocation14_spill] sm:$0xff] }
 0x80a   : > { %v6042_v32 = vpop.eup %6041  ;;  %6057 = vpow2.f32 %v3931_v37  ;;  %v2809_v17 = vmul.f32 1.442695, %v2736_v4  ;;  %v3776_v52 = vpop.xlane.xlu1 %3775  ;;  %v9254_v30 = vmul.f32 %v6040_v25, %v8789_v58  ;;  %v3863_v18 = vsub.f32 %v10981_v36, %v3773_v56  ;;  %v10983_v53 = vld [vmem:[#allocation18_spill] sm:$0xff] }
 0x80b   : > { %10978 = vst [vmem:[#allocation103_spill] sm:$0xff] %v9250_v54  ;;  %v6044_v50 = vpop.eup %6043  ;;  %6059 = vpow2.f32 %v3933_v12  ;;  %v9257_v59 = vmul.f32 %v6042_v32, %v8847_v27  ;;  %v3864_v37 = vsub.f32 %v10982_v35, %v3773_v56  ;;  %v3865_v28 = vsub.f32 %v10983_v53, %v3776_v52  ;;  %v10984_v12 = vld [vmem:[#allocation32_spill] sm:$0xff]  ;;  %v2654_v56 = vpop.xlane.xlu0 %2653 }
 0x80c   : > { %10979 = vst [vmem:[#allocation79_spill] sm:$0xff] %v9254_v30  ;;  %v6046_v0 = vpop.eup %6045  ;;  %6061 = vpow2.f32 %v2811_v8  ;;  %v3866_v4 = vsub.f32 %v10984_v12, %v3776_v52  ;;  %v4114_v47 = vadd.f32 %v9254_v30, %v9250_v54  ;;  %v9266_v58 = vmul.f32 %v6044_v50, %v8860_v1  ;;  %v10987_v1 = vld [vmem:[#allocation82_spill] sm:$0xff]  ;;  %v10988_v12 = vld [vmem:[#allocation19_spill] sm:$0xff] }
 0x80d   : > { %10980 = vst [vmem:[#allocation11_spill] sm:$0xff] %v9257_v59  ;;  %v6048_v31 = vpop.eup %6047  ;;  %6063 = vpow2.f32 %v2813_v2  ;;  %v3935_v32 = vmul.f32 1.442695, %v3863_v18  ;;  %v3937_v8 = vmul.f32 1.442695, %v3864_v37  ;;  %v9271_v52 = vmul.f32 %v6046_v0, %v8865_v22  ;;  %v10989_v18 = vld [vmem:[#allocation83_spill] sm:$0xff] }
 0x80e   : > { %10985 = vst [vmem:[#allocation21_spill] sm:$0xff] %v9266_v58  ;;  %v6050_v27 = vpop.eup %6049  ;;  %6065 = vpow2.f32 %v2807_v39  ;;  %v3939_v25 = vmul.f32 1.442695, %v3865_v28  ;;  %v3941_v36 = vmul.f32 1.442695, %v3866_v4  ;;  %4115 = vadd.xlane.f32.xlu0 %v4114_v47  ;;  %v4111_v2 = vadd.f32 %v9266_v58, %v9257_v59  ;;  %v2651_v35 = vpop.xlane.xlu1 %2650 }
 0x80f   : > { %6067 = vpow2.f32 %v2809_v17  ;;  %10986 = vst [vmem:[#allocation15_spill] sm:$0xff] %v9271_v52  ;;  %v2741_v50 = vsub.f32 %v10987_v1, %v2654_v56  ;;  %v2742_v39 = vsub.f32 %v10988_v12, %v2654_v56  ;;  %v2739_v37 = vsub.f32 %v10989_v18, %v2651_v35  ;;  %v10990_v17 = vld [vmem:[#allocation39_spill] sm:$0xff] }
 0x810   : > { %v6052_v53 = vpop.eup %6051  ;;  %6069 = vpow2.f32 %v3935_v32  ;;  %4112 = vadd.xlane.f32.xlu1 %v4111_v2  ;;  %v2740_v47 = vsub.f32 %v10990_v17, %v2651_v35  ;;  %v9278_v28 = vmul.f32 %v6048_v31, %v8873_v3  ;;  %v9281_v4 = vmul.f32 %v6050_v27, %v8891_v45  ;;  %v3779_v2 = vpop.xlane.xlu0 %3778  ;;  %v10992_v27 = vld [vmem:[#allocation28_spill] sm:$0xff]  ;;  %v10993_v17 = vld [vmem:[#allocation31_spill] sm:$0xff] }
 0x811   : > { %6071 = vpow2.f32 %v3937_v8  ;;  %v2819_v58 = vmul.f32 1.442695, %v2741_v50  ;;  %v2821_v32 = vmul.f32 1.442695, %v2742_v39  ;;  %v2815_v59 = vmul.f32 1.442695, %v2739_v37 }
 0x812   : > { %10991 = vst [vmem:[#allocation26_spill] sm:$0xff] %v9278_v28  ;;  %v6054_v0 = vpop.eup %6053  ;;  %6073 = vpow2.f32 %v3939_v25  ;;  %v2817_v56 = vmul.f32 1.442695, %v2740_v47  ;;  %v2992_v8 = vadd.f32 %v9278_v28, %v9271_v52  ;;  %v9286_v35 = vmul.f32 %v6052_v53, %v8894_v14  ;;  %v3782_v31 = vpop.xlane.xlu1 %3781  ;;  %v10994_v50 = vld [vmem:[#allocation24_spill] sm:$0xff] }
 0x813   : > { %v6056_v1 = vpop.eup %6055  ;;  %6075 = vpow2.f32 %v3941_v36  ;;  %v3867_v18 = vsub.f32 %v10992_v27, %v3779_v2  ;;  %v3868_v25 = vsub.f32 %v10993_v17, %v3779_v2  ;;  %v3869_v39 = vsub.f32 %v10994_v50, %v3782_v31  ;;  %v10995_v47 = vld [vmem:[#allocation20_spill] sm:$0xff] }
 0x814   : > { %v6058_v12 = vpop.eup %6057  ;;  %6077 = vpow2.f32 %v2819_v58  ;;  %2993 = vadd.xlane.f32.xlu0 %v2992_v8  ;;  %v2989_v36 = vadd.f32 %v9286_v35, %v9281_v4  ;;  %v3870_v52 = vsub.f32 %v10995_v47, %v3782_v31  ;;  %v9295_v53 = vmul.f32 %v6054_v0, %v8891_v45  ;;  %v2660_v17 = vpop.xlane.xlu0 %2659  ;;  %v10999_v45 = vld [vmem:[#allocation84_spill] sm:$0xff] }
 0x815   : > { %v6060_v37 = vpop.eup %6059  ;;  %6079 = vpow2.f32 %v2821_v32  ;;  %v3943_v58 = vmul.f32 1.442695, %v3867_v18  ;;  %v3945_v30 = vmul.f32 1.442695, %v3868_v25  ;;  %v3947_v27 = vmul.f32 1.442695, %v3869_v39 }
 0x816   : > { %10996 = vst [vmem:[#allocation17_spill] sm:$0xff] %v9295_v53  ;;  %v6062_v28 = vpop.eup %6061  ;;  %6081 = vpow2.f32 %v2815_v59  ;;  %2990 = vadd.xlane.f32.xlu1 %v2989_v36  ;;  %v3949_v2 = vmul.f32 1.442695, %v3870_v52  ;;  %v9298_v32 = vmul.f32 %v6056_v1, %v8894_v14  ;;  %v9301_v8 = vmul.f32 %v6058_v12, %v8865_v22  ;;  %v2657_v31 = vpop.xlane.xlu1 %2656  ;;  %v11000_v59 = vld [vmem:[#allocation25_spill] sm:$0xff]  ;;  %v11003_v39 = vld [vmem:[#allocation50_spill] sm:$0xff] }
 0x817   : > { %v6064_v54 = vpop.eup %6063  ;;  %6083 = vpow2.f32 %v2817_v56  ;;  %v2745_v0 = vsub.f32 %v10999_v45, %v2660_v17  ;;  %v2746_v18 = vsub.f32 %v11000_v59, %v2660_v17  ;;  %v9306_v25 = vmul.f32 %v6060_v37, %v8873_v3  ;;  %v11002_v14 = vld [vmem:[#allocation85_spill] sm:$0xff] }
 0x818   : > { %10997 = vst [vmem:[#allocation80_spill] sm:$0xff] %v9298_v32  ;;  %10998 = vst [vmem:[#allocation10_spill] sm:$0xff] %v9301_v8  ;;  %v6066_v50 = vpop.eup %6065  ;;  %6085 = vpow2.f32 %v3943_v58  ;;  %v4117_v52 = vadd.f32 %v9298_v32, %v9295_v53  ;;  %v2743_v1 = vsub.f32 %v11002_v14, %v2657_v31  ;;  %v2744_v22 = vsub.f32 %v11003_v39, %v2657_v31  ;;  %v11005_v31 = vld [vmem:[#allocation16_spill] sm:$0xff] }
 0x819   : > { %11001 = vst [vmem:[#allocation81_spill] sm:$0xff] %v9306_v25  ;;  %v6068_v56 = vpop.eup %6067  ;;  %6087 = vpow2.f32 %v3945_v30  ;;  %v2827_v36 = vmul.f32 1.442695, %v2745_v0  ;;  %v2829_v47 = vmul.f32 1.442695, %v2746_v18  ;;  %v4120_v58 = vadd.f32 %v9306_v25, %v9301_v8  ;;  %v3785_v30 = vpop.xlane.xlu0 %3784  ;;  %v11006_v0 = vld [vmem:[#allocation35_spill] sm:$0xff] }
 0x81a   : > { %v6070_v12 = vpop.eup %6069  ;;  %6089 = vpow2.f32 %v3947_v27  ;;  %4118 = vadd.xlane.f32.xlu1 %v4117_v52  ;;  %v2823_v3 = vmul.f32 1.442695, %v2743_v1  ;;  %v2825_v37 = vmul.f32 1.442695, %v2744_v22  ;;  %v9315_v45 = vmul.f32 %v6062_v28, %v8907_v63  ;;  %v3788_v59 = vpop.xlane.xlu1 %3787  ;;  %v11008_v28 = vld [vmem:[#allocation33_spill] sm:$0xff] }
 0x81b   : > { %v6072_v17 = vpop.eup %6071  ;;  %6091 = vpow2.f32 %v3949_v2  ;;  %4121 = vadd.xlane.f32.xlu0 %v4120_v58  ;;  %v3871_v27 = vsub.f32 %v11005_v31, %v3785_v30  ;;  %v3872_v18 = vsub.f32 %v11006_v0, %v3785_v30  ;;  %v9320_v39 = vmul.f32 %v6064_v54, %v8922_v20 }
 0x81c   : > { %11004 = vst [vmem:[#allocation13_spill] sm:$0xff] %v9315_v45  ;;  %v6074_v14 = vpop.eup %6073  ;;  %6093 = vpow2.f32 %v2827_v36  ;;  %v9323_v2 = vmul.f32 %v6066_v50, %v8964_v29  ;;  %v9326_v52 = vmul.f32 %v6068_v56, %v8969_v57  ;;  %v3873_v1 = vsub.f32 %v11008_v28, %v3788_v59  ;;  %v11010_v28 = vld [vmem:[#allocation86_spill] sm:$0xff] }
 0x81d   : > { %v6076_v8 = vpop.eup %6075  ;;  %6095 = vpow2.f32 %v2829_v47  ;;  %v3951_v36 = vmul.f32 1.442695, %v3871_v27  ;;  %v3953_v58 = vmul.f32 1.442695, %v3872_v18  ;;  %v2998_v30 = vadd.f32 %v9320_v39, %v9315_v45  ;;  %v11009_v47 = vld [vmem:[#allocation30_spill] sm:$0xff]  ;;  %v2666_v25 = vpop.xlane.xlu0 %2665  ;;  %v11011_v27 = vld [vmem:[#allocation53_spill] sm:$0xff] }
 0x81e   : > { %11007 = vst [vmem:[#allocation22_spill] sm:$0xff] %v9323_v2  ;;  %v6078_v22 = vpop.eup %6077  ;;  %6097 = vpow2.f32 %v2823_v3  ;;  %v2995_v54 = vadd.f32 %v9326_v52, %v9323_v2  ;;  %v3874_v50 = vsub.f32 %v11009_v47, %v3788_v59  ;;  %v3955_v0 = vmul.f32 1.442695, %v3873_v1  ;;  %v2663_v56 = vpop.xlane.xlu1 %2662 }
 0x81f   : > { %v6080_v31 = vpop.eup %6079  ;;  %6099 = vpow2.f32 %v2825_v37  ;;  %2999 = vadd.xlane.f32.xlu0 %v2998_v30  ;;  %v2749_v3 = vsub.f32 %v11010_v28, %v2666_v25  ;;  %v2750_v18 = vsub.f32 %v11011_v27, %v2666_v25  ;;  %v9337_v32 = vmul.f32 %v6070_v12, %v8964_v29  ;;  %v11016_v12 = vld [vmem:[#allocation87_spill] sm:$0xff] }
 0x820   : > { %v6082_v53 = vpop.eup %6081  ;;  %6101 = vpow2.f32 %v3951_v36  ;;  %2996 = vadd.xlane.f32.xlu1 %v2995_v54  ;;  %v3957_v37 = vmul.f32 1.442695, %v3874_v50  ;;  %v9340_v2 = vmul.f32 %v6072_v17, %v8969_v57  ;;  %v9343_v59 = vmul.f32 %v6074_v14, %v8907_v63  ;;  %v11017_v54 = vld [vmem:[#allocation58_spill] sm:$0xff] }
 0x821   : > { %11012 = vst [vmem:[#allocation14_spill] sm:$0xff] %v9337_v32  ;;  %v6084_v45 = vpop.eup %6083  ;;  %6103 = vpow2.f32 %v3953_v58  ;;  %v2835_v36 = vmul.f32 1.442695, %v2749_v3  ;;  %v2837_v30 = vmul.f32 1.442695, %v2750_v18  ;;  %v9346_v47 = vmul.f32 %v6076_v8, %v8922_v20  ;;  %v3791_v17 = vpop.xlane.xlu0 %3790  ;;  %v11019_v20 = vld [vmem:[#allocation57_spill] sm:$0xff] }
 0x822   : > { %11013 = vst [vmem:[#allocation18_spill] sm:$0xff] %v9340_v2  ;;  %11014 = vst [vmem:[#allocation32_spill] sm:$0xff] %v9343_v59  ;;  %v6086_v1 = vpop.eup %6085  ;;  %6105 = vpow2.f32 %v3955_v0  ;;  %v4123_v29 = vadd.f32 %v9340_v2, %v9337_v32  ;;  %v2747_v58 = vsub.f32 %v11016_v12, %v2663_v56  ;;  %v2748_v57 = vsub.f32 %v11017_v54, %v2663_v56  ;;  %v3794_v50 = vpop.xlane.xlu1 %3793  ;;  %v11018_v0 = vld [vmem:[#allocation27_spill] sm:$0xff] }
 0x823   : > { %11015 = vst [vmem:[#allocation82_spill] sm:$0xff] %v9346_v47  ;;  %v6088_v25 = vpop.eup %6087  ;;  %6107 = vpow2.f32 %v3957_v37  ;;  %v4126_v14 = vadd.f32 %v9346_v47, %v9343_v59  ;;  %v3875_v28 = vsub.f32 %v11018_v0, %v3791_v17  ;;  %v3876_v8 = vsub.f32 %v11019_v20, %v3791_v17 }
 0x824   : > { %v6090_v63 = vpop.eup %6089  ;;  %6109 = vpow2.f32 %v2835_v36  ;;  %4124 = vadd.xlane.f32.xlu1 %v4123_v29  ;;  %v2831_v27 = vmul.f32 1.442695, %v2747_v58  ;;  %v2833_v18 = vmul.f32 1.442695, %v2748_v57  ;;  %v9357_v37 = vmul.f32 %v6078_v22, %v8978_v10  ;;  %v11021_v29 = vld [vmem:[#allocation62_spill] sm:$0xff] }
 0x825   : > { %v6092_v3 = vpop.eup %6091  ;;  %6111 = vpow2.f32 %v2837_v30  ;;  %4127 = vadd.xlane.f32.xlu0 %v4126_v14  ;;  %v3959_v12 = vmul.f32 1.442695, %v3875_v28  ;;  %v3961_v54 = vmul.f32 1.442695, %v3876_v8  ;;  %v9360_v36 = vmul.f32 %v6080_v31, %v8983_v16  ;;  %v11022_v57 = vld [vmem:[#allocation38_spill] sm:$0xff]  ;;  %v2672_v17 = vpop.xlane.xlu0 %2671  ;;  %v11023_v28 = vld [vmem:[#allocation88_spill] sm:$0xff] }
 0x826   : > { %11020 = vst [vmem:[#allocation19_spill] sm:$0xff] %v9357_v37  ;;  %v6094_v56 = vpop.eup %6093  ;;  %v9363_v59 = vmul.f32 %v6082_v53, %v8988_v5  ;;  %6113 = vpow2.f32 %v2831_v27  ;;  %v9366_v30 = vmul.f32 %v6084_v45, %v8996_v19  ;;  %v3877_v58 = vsub.f32 %v11021_v29, %v3794_v50  ;;  %v2669_v20 = vpop.xlane.xlu1 %2668  ;;  %v11024_v53 = vld [vmem:[#allocation23_spill] sm:$0xff] }
 0x827   : > { %v6096_v0 = vpop.eup %6095  ;;  %v3878_v22 = vsub.f32 %v11022_v57, %v3794_v50  ;;  %6115 = vpow2.f32 %v2833_v18  ;;  %v3004_v31 = vadd.f32 %v9360_v36, %v9357_v37  ;;  %v2753_v8 = vsub.f32 %v11023_v28, %v2672_v17 }
 0x828   : > { %v6098_v14 = vpop.eup %6097  ;;  %v2754_v47 = vsub.f32 %v11024_v53, %v2672_v17  ;;  %6117 = vpow2.f32 %v3959_v12  ;;  %v3001_v45 = vadd.f32 %v9366_v30, %v9363_v59  ;;  %v3963_v27 = vmul.f32 1.442695, %v3877_v58 }
 0x829   : > { %v6100_v32 = vpop.eup %6099  ;;  %v3965_v29 = vmul.f32 1.442695, %v3878_v22  ;;  %6119 = vpow2.f32 %v3961_v54  ;;  %3005 = vadd.xlane.f32.xlu0 %v3004_v31  ;;  %v2843_v50 = vmul.f32 1.442695, %v2753_v8  ;;  %v9377_v18 = vmul.f32 %v6086_v1, %v8988_v5  ;;  %v3797_v22 = vpop.xlane.xlu0 %3796  ;;  %v11030_v5 = vld [vmem:[#allocation104_spill] sm:$0xff]  ;;  %v11031_v8 = vld [vmem:[#allocation105_spill] sm:$0xff] }
 0x82a   : > { %v6102_v2 = vpop.eup %6101  ;;  %v2845_v57 = vmul.f32 1.442695, %v2754_v47  ;;  %3002 = vadd.xlane.f32.xlu1 %v3001_v45  ;;  %6121 = vpow2.f32 %v3963_v27  ;;  %v9380_v17 = vmul.f32 %v6088_v25, %v8996_v19  ;;  %v9383_v12 = vmul.f32 %v6090_v63, %v8978_v10  ;;  %v3800_v54 = vpop.xlane.xlu1 %3799  ;;  %v11029_v47 = vld [vmem:[#allocation89_spill] sm:$0xff] }
 0x82b   : > { %11025 = vst [vmem:[#allocation83_spill] sm:$0xff] %v9377_v18  ;;  %v6104_v37 = vpop.eup %6103  ;;  %v9386_v58 = vmul.f32 %v6092_v3, %v8983_v16  ;;  %6123 = vpow2.f32 %v3965_v29  ;;  %v2751_v28 = vsub.f32 %v11029_v47, %v2669_v20  ;;  %v2752_v1 = vsub.f32 %v11030_v5, %v2669_v20  ;;  %v11032_v16 = vld [vmem:[#allocation42_spill] sm:$0xff] }
 0x82c   : > { %11026 = vst [vmem:[#allocation39_spill] sm:$0xff] %v9380_v17  ;;  %11027 = vst [vmem:[#allocation28_spill] sm:$0xff] %v9383_v12  ;;  %v6106_v31 = vpop.eup %6105  ;;  %v3879_v53 = vsub.f32 %v11031_v8, %v3797_v22  ;;  %6125 = vpow2.f32 %v2843_v50  ;;  %v4129_v19 = vadd.f32 %v9380_v17, %v9377_v18  ;;  %v3880_v25 = vsub.f32 %v11032_v16, %v3797_v22  ;;  %v11037_v18 = vld [vmem:[#allocation107_spill] sm:$0xff] }
 0x82d   : > { %11028 = vst [vmem:[#allocation31_spill] sm:$0xff] %v9386_v58  ;;  %v6108_v45 = vpop.eup %6107  ;;  %v4132_v10 = vadd.f32 %v9386_v58, %v9383_v12  ;;  %6127 = vpow2.f32 %v2845_v57  ;;  %v2839_v3 = vmul.f32 1.442695, %v2751_v28  ;;  %v2841_v27 = vmul.f32 1.442695, %v2752_v1  ;;  %v3812_v22 = vpop.xlane.xlu0 %3811  ;;  %v11034_v28 = vld [vmem:[#allocation106_spill] sm:$0xff] }
 0x82e   : > { %v9396_v63 = vpop.eup %6109  ;;  %v3967_v29 = vmul.f32 1.442695, %v3879_v53  ;;  %4130 = vadd.xlane.f32.xlu1 %v4129_v19  ;;  %v3969_v20 = vmul.f32 1.442695, %v3880_v25  ;;  %v9399_v50 = vmul.f32 %v6094_v56, %v9027_v44  ;;  %v9402_v5 = vmul.f32 %v6096_v0, %v9030_v6  ;;  %v2675_v16 = vpop.xlane.xlu1 %2674  ;;  %v11035_v53 = vld [vmem:[#allocation52_spill] sm:$0xff]  ;;  %v11036_v0 = vld [vmem:[#allocation65_spill] sm:$0xff] }
 0x82f   : > { %v6112_v47 = vpop.eup %6111  ;;  %4133 = vadd.xlane.f32.xlu0 %v4132_v10  ;;  %v9405_v8 = vmul.f32 %v6098_v14, %v9039_v46  ;;  %6129 = vpow2.f32 %v2839_v3  ;;  %v9408_v57 = vmul.f32 %v6100_v32, %v9044_v26  ;;  %v3881_v1 = vsub.f32 %v11034_v28, %v3800_v54 }
 0x830   : > { %11033 = vst [vmem:[#allocation24_spill] sm:$0xff] %v9399_v50  ;;  %v3882_v19 = vsub.f32 %v11035_v53, %v3800_v54  ;;  %v6114_v10 = vpop.eup %6113  ;;  %6131 = vpow2.f32 %v2841_v27  ;;  %v3010_v56 = vadd.f32 %v9402_v5, %v9399_v50  ;;  %v3889_v25 = vsub.f32 %v11036_v0, %v3812_v22 }
 0x831   : > { %v3890_v14 = vsub.f32 %v11037_v18, %v3812_v22  ;;  %v6116_v17 = vpop.eup %6115  ;;  %6133 = vpow2.f32 %v3967_v29  ;;  %v3007_v3 = vadd.f32 %v9408_v57, %v9405_v8  ;;  %v3971_v32 = vmul.f32 1.442695, %v3881_v1  ;;  %v2690_v53 = vpop.xlane.xlu0 %2689  ;;  %v11042_v1 = vld [vmem:[#allocation90_spill] sm:$0xff] }
 0x832   : > { %v3973_v12 = vmul.f32 1.442695, %v3882_v19  ;;  %v6118_v58 = vpop.eup %6117  ;;  %6135 = vpow2.f32 %v3969_v20  ;;  %v3987_v54 = vmul.f32 1.442695, %v3889_v25  ;;  %v9419_v27 = vmul.f32 %v6102_v2, %v9039_v46  ;;  %v2678_v50 = vpop.xlane.xlu1 %2677  ;;  %v11043_v46 = vld [vmem:[#allocation108_spill] sm:$0xff] }
 0x833   : > { %3011 = vadd.xlane.f32.xlu0 %v3010_v56  ;;  %v3989_v28 = vmul.f32 1.442695, %v3890_v14  ;;  %v6120_v0 = vpop.eup %6119  ;;  %3008 = vadd.xlane.f32.xlu1 %v3007_v3  ;;  %6137 = vpow2.f32 %v3971_v32  ;;  %v9422_v18 = vmul.f32 %v6104_v37, %v9044_v26  ;;  %v9425_v29 = vmul.f32 %v6106_v31, %v9027_v44  ;;  %v11044_v56 = vld [vmem:[#allocation91_spill] sm:$0xff]  ;;  %v11045_v37 = vld [vmem:[#allocation41_spill] sm:$0xff] }
 0x834   : > { %11038 = vst [vmem:[#allocation20_spill] sm:$0xff] %v9419_v27  ;;  %v9428_v22 = vmul.f32 %v6108_v45, %v9030_v6  ;;  %v6122_v20 = vpop.eup %6121  ;;  %6139 = vpow2.f32 %v3973_v12  ;;  %v2755_v19 = vsub.f32 %v11042_v1, %v2675_v16  ;;  %v2756_v2 = vsub.f32 %v11043_v46, %v2675_v16 }
 0x835   : > { %11039 = vst [vmem:[#allocation84_spill] sm:$0xff] %v9422_v18  ;;  %11040 = vst [vmem:[#allocation25_spill] sm:$0xff] %v9425_v29  ;;  %v2765_v25 = vsub.f32 %v11044_v56, %v2690_v53  ;;  %v6124_v14 = vpop.eup %6123  ;;  %6141 = vpow2.f32 %v3987_v54  ;;  %v4135_v26 = vadd.f32 %v9422_v18, %v9419_v27  ;;  %v2766_v31 = vsub.f32 %v11045_v37, %v2690_v53  ;;  %v3818_v32 = vpop.xlane.xlu0 %3817  ;;  %v11049_v37 = vld [vmem:[#allocation34_spill] sm:$0xff] }
 0x836   : > { %11041 = vst [vmem:[#allocation85_spill] sm:$0xff] %v9428_v22  ;;  %v4138_v44 = vadd.f32 %v9428_v22, %v9425_v29  ;;  %v9438_v6 = vpop.eup %6125  ;;  %6143 = vpow2.f32 %v3989_v28  ;;  %v2847_v12 = vmul.f32 1.442695, %v2755_v19  ;;  %v2849_v45 = vmul.f32 1.442695, %v2756_v2  ;;  %v3803_v16 = vpop.xlane.xlu1 %3802  ;;  %v11047_v19 = vld [vmem:[#allocation92_spill] sm:$0xff] }
 0x837   : > { %v2867_v3 = vmul.f32 1.442695, %v2765_v25  ;;  %v6128_v1 = vpop.eup %6127  ;;  %4136 = vadd.xlane.f32.xlu1 %v4135_v26  ;;  %v2869_v54 = vmul.f32 1.442695, %v2766_v31  ;;  %v9442_v46 = vmul.f32 %v9396_v63, %v9052_v15  ;;  %v9445_v56 = vmul.f32 %v6112_v47, %v9057_v9  ;;  %v11048_v25 = vld [vmem:[#allocation109_spill] sm:$0xff] }
 0x838   : > { %4139 = vadd.xlane.f32.xlu0 %v4138_v44  ;;  %v9448_v53 = vmul.f32 %v6114_v10, %v9062_v23  ;;  %6145 = vpow2.f32 %v2847_v12  ;;  %v9451_v28 = vmul.f32 %v6116_v17, %v9067_v38  ;;  %v2757_v2 = vsub.f32 %v11047_v19, %v2678_v50  ;;  %v11050_v47 = vld [vmem:[#allocation49_spill] sm:$0xff] }
 0x839   : > { %v2758_v26 = vsub.f32 %v11048_v25, %v2678_v50  ;;  %v6130_v44 = vpop.eup %6129  ;;  %6147 = vpow2.f32 %v2849_v45  ;;  %v3016_v63 = vadd.f32 %v9445_v56, %v9442_v46  ;;  %v3893_v31 = vsub.f32 %v11049_v37, %v3818_v32  ;;  %v2696_v29 = vpop.xlane.xlu0 %2695 }
 0x83a   : > { %11046 = vst [vmem:[#allocation50_spill] sm:$0xff] %v9448_v53  ;;  %v3894_v27 = vsub.f32 %v11050_v47, %v3818_v32  ;;  %v6132_v18 = vpop.eup %6131  ;;  %6149 = vpow2.f32 %v2867_v3  ;;  %v3013_v10 = vadd.f32 %v9451_v28, %v9448_v53  ;;  %v2851_v17 = vmul.f32 1.442695, %v2757_v2  ;;  %v3806_v19 = vpop.xlane.xlu1 %3805 }
 0x83b   : > { %v2853_v12 = vmul.f32 1.442695, %v2758_v26  ;;  %v6134_v22 = vpop.eup %6133  ;;  %6151 = vpow2.f32 %v2869_v54  ;;  %v3995_v50 = vmul.f32 1.442695, %v3893_v31  ;;  %v9462_v25 = vmul.f32 %v6118_v58, %v9062_v23  ;;  %v11055_v54 = vld [vmem:[#allocation40_spill] sm:$0xff]  ;;  %v11057_v23 = vld [vmem:[#allocation93_spill] sm:$0xff] }
 0x83c   : > { %3017 = vadd.xlane.f32.xlu0 %v3016_v63  ;;  %v3997_v45 = vmul.f32 1.442695, %v3894_v27  ;;  %v6136_v37 = vpop.eup %6135  ;;  %3014 = vadd.xlane.f32.xlu1 %v3013_v10  ;;  %6153 = vpow2.f32 %v2851_v17  ;;  %v9465_v3 = vmul.f32 %v6120_v0, %v9067_v38  ;;  %v9468_v32 = vmul.f32 %v6122_v20, %v9052_v15  ;;  %v11056_v27 = vld [vmem:[#allocation110_spill] sm:$0xff]  ;;  %v11058_v0 = vld [vmem:[#allocation111_spill] sm:$0xff] }
 0x83d   : > { %11051 = vst [vmem:[#allocation16_spill] sm:$0xff] %v9462_v25  ;;  %v9471_v2 = vmul.f32 %v6124_v14, %v9057_v9  ;;  %v6138_v26 = vpop.eup %6137  ;;  %6155 = vpow2.f32 %v2853_v12  ;;  %v3883_v63 = vsub.f32 %v11055_v54, %v3803_v16  ;;  %v3884_v31 = vsub.f32 %v11056_v27, %v3803_v16  ;;  %v3824_v9 = vpop.xlane.xlu0 %3823 }
 0x83e   : > { %11052 = vst [vmem:[#allocation35_spill] sm:$0xff] %v9465_v3  ;;  %11053 = vst [vmem:[#allocation33_spill] sm:$0xff] %v9468_v32  ;;  %v2769_v58 = vsub.f32 %v11057_v23, %v2696_v29  ;;  %v6140_v47 = vpop.eup %6139  ;;  %6157 = vpow2.f32 %v3995_v50  ;;  %v4141_v38 = vadd.f32 %v9465_v3, %v9462_v25  ;;  %v2770_v20 = vsub.f32 %v11058_v0, %v2696_v29  ;;  %v2681_v14 = vpop.xlane.xlu1 %2680 }
 0x83f   : > { %11054 = vst [vmem:[#allocation30_spill] sm:$0xff] %v9471_v2  ;;  %v4144_v15 = vadd.f32 %v9471_v2, %v9468_v32  ;;  %v9481_v10 = vpop.eup %6141  ;;  %6159 = vpow2.f32 %v3997_v45  ;;  %v3975_v17 = vmul.f32 1.442695, %v3883_v63  ;;  %v3977_v12 = vmul.f32 1.442695, %v3884_v31  ;;  %v11063_v63 = vld [vmem:[#allocation29_spill] sm:$0xff] }
 0x840   : > { %v2875_v16 = vmul.f32 1.442695, %v2769_v58  ;;  %v9483_v54 = vpop.eup %6143  ;;  %4142 = vadd.xlane.f32.xlu1 %v4141_v38  ;;  %v2877_v50 = vmul.f32 1.442695, %v2770_v20  ;;  %v9487_v27 = vmul.f32 %v9438_v6, %v9076_v41  ;;  %v9490_v23 = vmul.f32 %v6128_v1, %v9088_v49  ;;  %v11064_v58 = vld [vmem:[#allocation112_spill] sm:$0xff] }
 0x841   : > { %4145 = vadd.xlane.f32.xlu0 %v4144_v15  ;;  %v9493_v29 = vmul.f32 %v6130_v44, %v9091_v24  ;;  %6161 = vpow2.f32 %v3975_v17  ;;  %v9496_v45 = vmul.f32 %v6132_v18, %v9096_v43  ;;  %v3885_v31 = vsub.f32 %v11063_v63, %v3806_v19  ;;  %v2702_v20 = vpop.xlane.xlu0 %2701 }
 0x842   : > { %11059 = vst [vmem:[#allocation86_spill] sm:$0xff] %v9487_v27  ;;  %11060 = vst [vmem:[#allocation53_spill] sm:$0xff] %v9490_v23  ;;  %v3886_v38 = vsub.f32 %v11064_v58, %v3806_v19  ;;  %v6146_v15 = vpop.eup %6145  ;;  %6163 = vpow2.f32 %v3977_v12  ;;  %v3022_v6 = vadd.f32 %v9490_v23, %v9487_v27  ;;  %v3897_v0 = vsub.f32 %v8469_v55, %v3824_v9  ;;  %v2684_v44 = vpop.xlane.xlu1 %2683  ;;  %v11108_v23 = vld [vmem:[#allocation66_spill] sm:$0xff] }
 0x843   : > { %11061 = vst [vmem:[#allocation87_spill] sm:$0xff] %v9493_v29  ;;  %11062 = vst [vmem:[#allocation58_spill] sm:$0xff] %v9496_v45  ;;  %v3898_v1 = vsub.f32 %v8443_v7, %v3824_v9  ;;  %v6148_v25 = vpop.eup %6147  ;;  %6165 = vpow2.f32 %v2875_v16  ;;  %v3019_v18 = vadd.f32 %v9496_v45, %v9493_v29  ;;  %v3979_v17 = vmul.f32 1.442695, %v3885_v31  ;;  %v11069_v31 = vld [vmem:[#allocation94_spill] sm:$0xff]  ;;  %v11102_v45 = vld [vmem:[#allocation55_spill] sm:$0xff] }
 0x844   : > { %v3981_v63 = vmul.f32 1.442695, %v3886_v38  ;;  %v9506_v3 = vpop.eup %6149  ;;  %6167 = vpow2.f32 %v2877_v50  ;;  %v4003_v19 = vmul.f32 1.442695, %v3897_v0  ;;  %v9509_v58 = vmul.f32 %v6134_v22, %v9091_v24  ;;  %v11071_v22 = vld [vmem:[#allocation95_spill] sm:$0xff] }
 0x845   : > { %3023 = vadd.xlane.f32.xlu0 %v3022_v6  ;;  %v4005_v12 = vmul.f32 1.442695, %v3898_v1  ;;  %v9511_v55 = vpop.eup %6151  ;;  %3020 = vadd.xlane.f32.xlu1 %v3019_v18  ;;  %6169 = vpow2.f32 %v3979_v17  ;;  %v9514_v7 = vmul.f32 %v6136_v37, %v9096_v43  ;;  %v9517_v9 = vmul.f32 %v6138_v26, %v9076_v41  ;;  %v11070_v6 = vld [vmem:[#allocation37_spill] sm:$0xff]  ;;  %v3830_v1 = vpop.xlane.xlu0 %3829 }
 0x846   : > { %11065 = vst [vmem:[#allocation27_spill] sm:$0xff] %v9509_v58  ;;  %v9520_v16 = vmul.f32 %v6140_v47, %v9088_v49  ;;  %v6154_v50 = vpop.eup %6153  ;;  %6171 = vpow2.f32 %v3981_v63  ;;  %v2759_v38 = vsub.f32 %v11069_v31, %v2681_v14  ;;  %v2760_v24 = vsub.f32 %v11070_v6, %v2681_v14  ;;  %v3809_v18 = vpop.xlane.xlu1 %3808  ;;  %v11072_v49 = vld [vmem:[#allocation36_spill] sm:$0xff] }
 0x847   : > { %11066 = vst [vmem:[#allocation57_spill] sm:$0xff] %v9514_v7  ;;  %11067 = vst [vmem:[#allocation62_spill] sm:$0xff] %v9517_v9  ;;  %v2773_v0 = vsub.f32 %v11071_v22, %v2702_v20  ;;  %v6156_v17 = vpop.eup %6155  ;;  %6173 = vpow2.f32 %v4003_v19  ;;  %v4147_v43 = vadd.f32 %v9514_v7, %v9509_v58  ;;  %v2774_v37 = vsub.f32 %v11072_v49, %v2702_v20  ;;  %v11075_v58 = vld [vmem:[#allocation12_spill] sm:$0xff] }
 0x848   : > { %11068 = vst [vmem:[#allocation38_spill] sm:$0xff] %v9520_v16  ;;  %v4150_v41 = vadd.f32 %v9520_v16, %v9517_v9  ;;  %v9530_v26 = vpop.eup %6157  ;;  %6175 = vpow2.f32 %v4005_v12  ;;  %v2855_v47 = vmul.f32 1.442695, %v2759_v38  ;;  %v2857_v63 = vmul.f32 1.442695, %v2760_v24  ;;  %v11076_v20 = vld [vmem:[#allocation44_spill] sm:$0xff] }
 0x849   : > { %v2883_v14 = vmul.f32 1.442695, %v2773_v0  ;;  %v9532_v31 = vpop.eup %6159  ;;  %4148 = vadd.xlane.f32.xlu1 %v4147_v43  ;;  %v2885_v6 = vmul.f32 1.442695, %v2774_v37  ;;  %v9535_v19 = vmul.f32 %v6146_v15, %v9119_v51  ;;  %v9538_v22 = vmul.f32 %v6148_v25, %v9122_v60  ;;  %v2708_v24 = vpop.xlane.xlu0 %2707  ;;  %v11087_v16 = vld [vmem:[#allocation61_spill] sm:$0xff] }
 0x84a   : > { %4151 = vadd.xlane.f32.xlu0 %v4150_v41  ;;  %v2761_v7 = vsub.f32 %v11075_v58, %v2684_v44  ;;  %6177 = vpow2.f32 %v2855_v47  ;;  %v2762_v49 = vsub.f32 %v11076_v20, %v2684_v44  ;;  %v3901_v12 = vsub.f32 %v8525_v61, %v3830_v1  ;;  %v2687_v0 = vpop.xlane.xlu1 %2686  ;;  %v11079_v61 = vld [vmem:[#allocation43_spill] sm:$0xff] }
 0x84b   : > { %11073 = vst [vmem:[#allocation88_spill] sm:$0xff] %v9535_v19  ;;  %11074 = vst [vmem:[#allocation23_spill] sm:$0xff] %v9538_v22  ;;  %v3902_v38 = vsub.f32 %v8503_v21, %v3830_v1  ;;  %v6162_v43 = vpop.eup %6161  ;;  %6179 = vpow2.f32 %v2857_v63  ;;  %v3025_v15 = vadd.f32 %v9538_v22, %v9535_v19  ;;  %v9547_v25 = vmul.f32 %v6154_v50, %v9125_v40  ;;  %v11080_v63 = vld [vmem:[#allocation46_spill] sm:$0xff]  ;;  %v11081_v50 = vld [vmem:[#allocation8_spill] sm:$0xff] }
 0x84c   : > { %v2859_v41 = vmul.f32 1.442695, %v2761_v7  ;;  %v6164_v37 = vpop.eup %6163  ;;  %6181 = vpow2.f32 %v2883_v14  ;;  %v2861_v58 = vmul.f32 1.442695, %v2762_v49  ;;  %v4011_v47 = vmul.f32 1.442695, %v3901_v12 }
 0x84d   : > { %11077 = vst [vmem:[#allocation89_spill] sm:$0xff] %v9547_v25  ;;  %v4013_v44 = vmul.f32 1.442695, %v3902_v38  ;;  %v9549_v20 = vpop.eup %6165  ;;  %6183 = vpow2.f32 %v2885_v6  ;;  %3026 = vadd.xlane.f32.xlu1 %v3025_v15  ;;  %v9552_v21 = vmul.f32 %v6156_v17, %v9140_v34  ;;  %v3887_v1 = vsub.f32 %v11079_v61, %v3809_v18  ;;  %v11082_v14 = vld [vmem:[#allocation45_spill] sm:$0xff]  ;;  %v3836_v38 = vpop.xlane.xlu0 %3835 }
 0x84e   : > { %v3888_v19 = vsub.f32 %v11080_v63, %v3809_v18  ;;  %v9556_v7 = vpop.eup %6167  ;;  %6185 = vpow2.f32 %v2859_v41  ;;  %v2777_v22 = vsub.f32 %v11081_v50, %v2708_v24  ;;  %v2778_v49 = vsub.f32 %v11082_v14, %v2708_v24  ;;  %v3815_v6 = vpop.xlane.xlu1 %3814  ;;  %v11086_v14 = vld [vmem:[#allocation48_spill] sm:$0xff] }
 0x84f   : > { %11078 = vst [vmem:[#allocation104_spill] sm:$0xff] %v9552_v21  ;;  %v9561_v12 = vmul.f32 %v6162_v43, %v9119_v51  ;;  %v6170_v15 = vpop.eup %6169  ;;  %6187 = vpow2.f32 %v2861_v58  ;;  %v3028_v17 = vadd.f32 %v9552_v21, %v9547_v25  ;;  %v3983_v61 = vmul.f32 1.442695, %v3887_v1  ;;  %v11085_v51 = vld [vmem:[#allocation96_spill] sm:$0xff] }
 0x850   : > { %v3985_v9 = vmul.f32 1.442695, %v3888_v19  ;;  %v6172_v18 = vpop.eup %6171  ;;  %6189 = vpow2.f32 %v4011_v47  ;;  %v2891_v63 = vmul.f32 1.442695, %v2777_v22  ;;  %v2893_v41 = vmul.f32 1.442695, %v2778_v49 }
 0x851   : > { %11083 = vst [vmem:[#allocation105_spill] sm:$0xff] %v9561_v12  ;;  %v9566_v50 = vmul.f32 %v6164_v37, %v9122_v60  ;;  %v9568_v24 = vpop.eup %6173  ;;  %6191 = vpow2.f32 %v4013_v44  ;;  %3029 = vadd.xlane.f32.xlu0 %v3028_v17  ;;  %v2763_v43 = vsub.f32 %v11085_v51, %v2687_v0  ;;  %v2764_v58 = vsub.f32 %v11086_v14, %v2687_v0  ;;  %v11088_v22 = vld [vmem:[#allocation51_spill] sm:$0xff]  ;;  %v2714_v37 = vpop.xlane.xlu0 %2713  ;;  %v11091_v51 = vld [vmem:[#allocation113_spill] sm:$0xff] }
 0x852   : > { %v3905_v29 = vsub.f32 %v11087_v16, %v3836_v38  ;;  %v9573_v25 = vpop.eup %6175  ;;  %6193 = vpow2.f32 %v3983_v61  ;;  %v3906_v47 = vsub.f32 %v11088_v22, %v3836_v38  ;;  %v9579_v60 = vmul.f32 %v6170_v15, %v9125_v40  ;;  %v2693_v44 = vpop.xlane.xlu1 %2692  ;;  %v11092_v38 = vld [vmem:[#allocation56_spill] sm:$0xff]  ;;  %v11093_v15 = vld [vmem:[#allocation97_spill] sm:$0xff] }
 0x853   : > { %11084 = vst [vmem:[#allocation42_spill] sm:$0xff] %v9566_v50  ;;  %v4153_v19 = vadd.f32 %v9566_v50, %v9561_v12  ;;  %6195 = vpow2.f32 %v3985_v9  ;;  %v2863_v1 = vmul.f32 1.442695, %v2763_v43  ;;  %v2865_v49 = vmul.f32 1.442695, %v2764_v58  ;;  %v11094_v50 = vld [vmem:[#allocation54_spill] sm:$0xff] }
 0x854   : > { %11089 = vst [vmem:[#allocation106_spill] sm:$0xff] %v9579_v60  ;;  %v4019_v17 = vmul.f32 1.442695, %v3905_v29  ;;  %v6178_v0 = vpop.eup %6177  ;;  %6197 = vpow2.f32 %v2891_v63  ;;  %v4021_v16 = vmul.f32 1.442695, %v3906_v47  ;;  %v9582_v61 = vmul.f32 %v6172_v18, %v9140_v34  ;;  %v11095_v58 = vld [vmem:[#allocation131_spill] sm:$0xff] }
 0x855   : > { %4154 = vadd.xlane.f32.xlu1 %v4153_v19  ;;  %v3891_v14 = vsub.f32 %v11091_v51, %v3815_v6  ;;  %v6180_v12 = vpop.eup %6179  ;;  %6199 = vpow2.f32 %v2893_v41  ;;  %v3892_v40 = vsub.f32 %v11092_v38, %v3815_v6  ;;  %v2781_v22 = vsub.f32 %v11093_v15, %v2714_v37  ;;  %v3842_v18 = vpop.xlane.xlu0 %3841 }
 0x856   : > { %11090 = vst [vmem:[#allocation52_spill] sm:$0xff] %v9582_v61  ;;  %v2782_v9 = vsub.f32 %v11094_v50, %v2714_v37  ;;  %v9588_v43 = vpop.eup %6181  ;;  %6201 = vpow2.f32 %v2863_v1  ;;  %v4156_v29 = vadd.f32 %v9582_v61, %v9579_v60  ;;  %v9593_v34 = vmul.f32 %v6178_v0, %v11095_v58  ;;  %v3821_v19 = vpop.xlane.xlu1 %3820  ;;  %v11097_v50 = vld [vmem:[#allocation132_spill] sm:$0xff]  ;;  %v11099_v1 = vld [vmem:[#allocation98_spill] sm:$0xff] }
 0x857   : > { %v3991_v63 = vmul.f32 1.442695, %v3891_v14  ;;  %v9595_v47 = vpop.eup %6183  ;;  %6203 = vpow2.f32 %v2865_v49  ;;  %v3993_v6 = vmul.f32 1.442695, %v3892_v40  ;;  %v2899_v41 = vmul.f32 1.442695, %v2781_v22 }
 0x858   : > { %11096 = vst [vmem:[#allocation65_spill] sm:$0xff] %v9593_v34  ;;  %v2901_v51 = vmul.f32 1.442695, %v2782_v9  ;;  %v6186_v38 = vpop.eup %6185  ;;  %6205 = vpow2.f32 %v4019_v17  ;;  %4157 = vadd.xlane.f32.xlu0 %v4156_v29  ;;  %v9598_v37 = vmul.f32 %v6180_v12, %v11097_v50  ;;  %v2767_v15 = vsub.f32 %v11099_v1, %v2693_v44  ;;  %v11100_v14 = vld [vmem:[#allocation47_spill] sm:$0xff]  ;;  %v11101_v61 = vld [vmem:[#allocation114_spill] sm:$0xff]  ;;  %v11103_v49 = vld [vmem:[#allocation133_spill] sm:$0xff] }
 0x859   : > { %v2768_v60 = vsub.f32 %v11100_v14, %v2693_v44  ;;  %v6188_v0 = vpop.eup %6187  ;;  %6207 = vpow2.f32 %v4021_v16  ;;  %v3909_v21 = vsub.f32 %v11101_v61, %v3842_v18  ;;  %v3910_v27 = vsub.f32 %v11102_v45, %v3842_v18  ;;  %v2720_v29 = vpop.xlane.xlu0 %2719  ;;  %v11105_v14 = vld [vmem:[#allocation134_spill] sm:$0xff] }
 0x85a   : > { %11098 = vst [vmem:[#allocation107_spill] sm:$0xff] %v9598_v37  ;;  %v9605_v40 = vmul.f32 %v6186_v38, %v11103_v49  ;;  %v9607_v22 = vpop.eup %6189  ;;  %6209 = vpow2.f32 %v3991_v63  ;;  %v3031_v12 = vadd.f32 %v9598_v37, %v9593_v34  ;;  %v2871_v17 = vmul.f32 1.442695, %v2767_v15  ;;  %v2699_v1 = vpop.xlane.xlu1 %2698  ;;  %v11107_v38 = vld [vmem:[#allocation115_spill] sm:$0xff] }
 0x85b   : > { %v2873_v9 = vmul.f32 1.442695, %v2768_v60  ;;  %v9611_v44 = vpop.eup %6191  ;;  %6211 = vpow2.f32 %v3993_v6  ;;  %v4027_v16 = vmul.f32 1.442695, %v3909_v21  ;;  %v4029_v61 = vmul.f32 1.442695, %v3910_v27 }
 0x85c   : > { %11104 = vst [vmem:[#allocation90_spill] sm:$0xff] %v9605_v40  ;;  %v9614_v45 = vmul.f32 %v6188_v0, %v11105_v14  ;;  %v6194_v18 = vpop.eup %6193  ;;  %6213 = vpow2.f32 %v2899_v41  ;;  %3032 = vadd.xlane.f32.xlu1 %v3031_v12  ;;  %v3895_v63 = vsub.f32 %v11107_v38, %v3821_v19  ;;  %v3896_v32 = vsub.f32 %v11108_v23, %v3821_v19  ;;  %v11109_v34 = vld [vmem:[#allocation99_spill] sm:$0xff]  ;;  %v11110_v6 = vld [vmem:[#allocation116_spill] sm:$0xff] }
 0x85d   : > { %v2785_v15 = vsub.f32 %v11109_v34, %v2720_v29  ;;  %v6196_v60 = vpop.eup %6195  ;;  %6215 = vpow2.f32 %v2901_v51  ;;  %v2786_v21 = vsub.f32 %v11110_v6, %v2720_v29  ;;  %v9624_v27 = vmul.f32 %v9481_v10, %v11103_v49  ;;  %v3848_v23 = vpop.xlane.xlu0 %3847 }
 0x85e   : > { %11106 = vst [vmem:[#allocation108_spill] sm:$0xff] %v9614_v45  ;;  %v3034_v37 = vadd.f32 %v9614_v45, %v9605_v40  ;;  %v9626_v0 = vpop.eup %6197  ;;  %6217 = vpow2.f32 %v2871_v17  ;;  %v3999_v41 = vmul.f32 1.442695, %v3895_v63  ;;  %v4001_v12 = vmul.f32 1.442695, %v3896_v32  ;;  %v3827_v19 = vpop.xlane.xlu1 %3826  ;;  %v11115_v32 = vld [vmem:[#allocation100_spill] sm:$0xff] }
 0x85f   : > { %11111 = vst [vmem:[#allocation91_spill] sm:$0xff] %v9624_v27  ;;  %v2907_v38 = vmul.f32 1.442695, %v2785_v15  ;;  %v9628_v34 = vpop.eup %6199  ;;  %6219 = vpow2.f32 %v2873_v9  ;;  %v2909_v51 = vmul.f32 1.442695, %v2786_v21  ;;  %v9632_v29 = vmul.f32 %v9483_v54, %v11105_v14  ;;  %v11116_v15 = vld [vmem:[#allocation117_spill] sm:$0xff] }
 0x860   : > { %3035 = vadd.xlane.f32.xlu0 %v3034_v37  ;;  %v9635_v10 = vmul.f32 %v6194_v18, %v11095_v58  ;;  %v6202_v49 = vpop.eup %6201  ;;  %6221 = vpow2.f32 %v4027_v16  ;;  %v9638_v17 = vmul.f32 %v6196_v60, %v11097_v50  ;;  %v2771_v63 = vsub.f32 %v11115_v32, %v2699_v1  ;;  %v11117_v9 = vld [vmem:[#allocation67_spill] sm:$0xff]  ;;  %v11118_v14 = vld [vmem:[#allocation122_spill] sm:$0xff] }
 0x861   : > { %11112 = vst [vmem:[#allocation41_spill] sm:$0xff] %v9632_v29  ;;  %v2772_v6 = vsub.f32 %v11116_v15, %v2699_v1  ;;  %v6204_v40 = vpop.eup %6203  ;;  %6223 = vpow2.f32 %v4029_v61  ;;  %v4162_v37 = vadd.f32 %v9632_v29, %v9624_v27  ;;  %v3913_v54 = vsub.f32 %v11117_v9, %v3848_v23  ;;  %v2726_v60 = vpop.xlane.xlu0 %2725  ;;  %v11119_v27 = vld [vmem:[#allocation74_spill] sm:$0xff]  ;;  %v11127_v29 = vld [vmem:[#allocation101_spill] sm:$0xff] }
 0x862   : > { %11113 = vst [vmem:[#allocation92_spill] sm:$0xff] %v9635_v10  ;;  %11114 = vst [vmem:[#allocation109_spill] sm:$0xff] %v9638_v17  ;;  %v3914_v21 = vsub.f32 %v11118_v14, %v3848_v23  ;;  %v9646_v58 = vpop.eup %6205  ;;  %6225 = vpow2.f32 %v3999_v41  ;;  %v4159_v50 = vadd.f32 %v9638_v17, %v9635_v10  ;;  %v2879_v16 = vmul.f32 1.442695, %v2771_v63  ;;  %v2705_v32 = vpop.xlane.xlu1 %2704  ;;  %v11121_v41 = vld [vmem:[#allocation7_spill] sm:$0xff]  ;;  %v11124_v10 = vld [vmem:[#allocation136_spill] sm:$0xff] }
 0x863   : > { %v2881_v18 = vmul.f32 1.442695, %v2772_v6  ;;  %v9650_v1 = vpop.eup %6207  ;;  %6227 = vpow2.f32 %v4001_v12  ;;  %v4035_v61 = vmul.f32 1.442695, %v3913_v54  ;;  %v9654_v9 = vmul.f32 %v9506_v3, %v11119_v27  ;;  %v11122_v63 = vld [vmem:[#allocation135_spill] sm:$0xff] }
 0x864   : > { %4163 = vadd.xlane.f32.xlu0 %v4162_v37  ;;  %v4037_v15 = vmul.f32 1.442695, %v3914_v21  ;;  %v6210_v23 = vpop.eup %6209  ;;  %6229 = vpow2.f32 %v2907_v38  ;;  %4160 = vadd.xlane.f32.xlu1 %v4159_v50  ;;  %v9658_v14 = vmul.f32 %v9511_v55, %v11121_v41  ;;  %v9661_v6 = vmul.f32 %v6202_v49, %v11122_v63  ;;  %v11125_v37 = vld [vmem:[#allocation68_spill] sm:$0xff]  ;;  %v11126_v21 = vld [vmem:[#allocation123_spill] sm:$0xff]  ;;  %v11128_v50 = vld [vmem:[#allocation118_spill] sm:$0xff] }
 0x865   : > { %11120 = vst [vmem:[#allocation34_spill] sm:$0xff] %v9654_v9  ;;  %v9664_v17 = vmul.f32 %v6204_v40, %v11124_v10  ;;  %v6212_v12 = vpop.eup %6211  ;;  %6231 = vpow2.f32 %v2909_v51  ;;  %v3899_v54 = vsub.f32 %v11125_v37, %v3827_v19  ;;  %v3900_v3 = vsub.f32 %v11126_v21, %v3827_v19  ;;  %v3854_v53 = vpop.xlane.xlu0 %3853  ;;  %v11152_v37 = vld [vmem:[#allocation102_spill] sm:$0xff] }
 0x866   : > { %11123 = vst [vmem:[#allocation49_spill] sm:$0xff] %v9661_v6  ;;  %v2789_v45 = vsub.f32 %v11127_v29, %v2726_v60  ;;  %v9669_v38 = vpop.eup %6213  ;;  %6233 = vpow2.f32 %v2879_v16  ;;  %v3040_v55 = vadd.f32 %v9658_v14, %v9654_v9  ;;  %v2790_v40 = vsub.f32 %v11128_v50, %v2726_v60  ;;  %v3833_v2 = vpop.xlane.xlu1 %3832 }
 0x867   : > { %v3037_v49 = vadd.f32 %v9664_v17, %v9661_v6  ;;  %v11129_v51 = vunpack.c.l.b16 %v9219_v62  ;;  %v9682_v19 = vpop.eup %6215  ;;  %6235 = vpow2.f32 %v2881_v18  ;;  %v4007_v29 = vmul.f32 1.442695, %v3899_v54 }
 0x868   : > { %v4009_v16 = vmul.f32 1.442695, %v3900_v3  ;;  %v2915_v21 = vmul.f32 1.442695, %v2789_v45  ;;  %v6218_v9 = vpop.eup %6217  ;;  %6237 = vpow2.f32 %v4035_v61  ;;  %3041 = vadd.xlane.f32.xlu0 %v3040_v55  ;;  %v2917_v6 = vmul.f32 1.442695, %v2790_v40 }
 0x869   : > { %vm9678_vm6 = vcmp.ne.s32.totalorder %v11129_v51, 0  ;;  %3038 = vadd.xlane.f32.xlu1 %v3037_v49  ;;  %v9686_v60 = vmul.f32 %v9530_v26, %v11119_v27  ;;  %v9690_v50 = vmul.f32 %v9532_v31, %v11121_v41  ;;  %v11133_v51 = vunpack.c.h.b16 %v9219_v62  ;;  %v6220_v45 = vpop.eup %6219  ;;  %v11136_v26 = vld [vmem:[#allocation73_spill] sm:$0xff]  ;;  %v11137_v31 = vld [vmem:[#allocation119_spill] sm:$0xff]  ;;  %v11138_v55 = vld [vmem:[#allocation120_spill] sm:$0xff] }
 0x86a   : > { %6239 = vpow2.f32 %v4037_v15  ;;  %v9699_v61 = vmul.f32 %v6210_v23, %v11122_v63  ;;  %v9702_v54 = vmul.f32 %v6212_v12, %v11124_v10  ;;  %v2775_v27 = vsub.f32 %v11136_v26, %v2705_v32  ;;  %v9705_v3 = vpop.eup %6221  ;;  %v2711_v40 = vpop.xlane.xlu1 %2710  ;;  %v11139_v63 = vld [vmem:[#allocation72_spill] sm:$0xff] }
 0x86b   : > { %11132 = vst [vmem:[#allocation40_spill] sm:$0xff] %v9686_v60  ;;  %vm9694_vm3 = vcmp.ne.s32.totalorder %v11133_v51, 0  ;;  %6241 = vpow2.f32 %v4007_v29  ;;  %v4168_v62 = vadd.f32 %v9690_v50, %v9686_v60  ;;  %v2776_v41 = vsub.f32 %v11137_v31, %v2705_v32  ;;  %v9711_v15 = vpop.eup %6223  ;;  %v11140_v60 = vld [vmem:[#allocation9_spill] sm:$0xff] }
 0x86c   : > { %v3917_v49 = vsub.f32 %v11138_v55, %v3854_v53  ;;  %6243 = vpow2.f32 %v4009_v16  ;;  %v4165_v10 = vadd.f32 %v9702_v54, %v9699_v61  ;;  %v2887_v23 = vmul.f32 1.442695, %v2775_v27  ;;  %v6226_v51 = vpop.eup %6225 }
 0x86d   : > { %v3918_v12 = vsub.f32 %v11139_v63, %v3854_v53  ;;  %6245 = vpow2.f32 %v2915_v21  ;;  %4169 = vadd.xlane.f32.xlu0 %v4168_v62  ;;  %v2889_v29 = vmul.f32 1.442695, %v2776_v41  ;;  %v9718_v32 = vmul.f32 %v9549_v20, %v11140_v60  ;;  %v6228_v31 = vpop.eup %6227  ;;  %v9730_v21 = vld [vmem:[%s6632_s9 + $0xc0] sm:$0xff] }
 0x86e   : > { %v4043_v26 = vmul.f32 1.442695, %v3917_v49  ;;  %6247 = vpow2.f32 %v2917_v6  ;;  %4166 = vadd.xlane.f32.xlu1 %v4165_v10  ;;  %v9722_v55 = vmul.f32 %v9556_v7, %v9206_v48  ;;  %v9725_v27 = vmul.f32 %v6218_v9, %v9215_v11  ;;  %v9727_v53 = vpop.eup %6229  ;;  %v11144_v6 = vld [vmem:[#allocation60_spill] sm:$0xff]  ;;  %v11145_v41 = vld [vmem:[#allocation125_spill] sm:$0xff]  ;;  %v3839_v10 = vpop.xlane.xlu1 %3838 }
 0x86f   : > { %11141 = vst [vmem:[#allocation110_spill] sm:$0xff] %v9718_v32  ;;  %v4045_v16 = vmul.f32 1.442695, %v3918_v12  ;;  %vm349_vm11 = vcmp.gt.bf16.partialorder %v9730_v21, 0  ;;  %6249 = vpow2.f32 %v2887_v23  ;;  %v9734_v20 = vmul.f32 %v6220_v45, %v9232_v13  ;;  %v9738_v7 = vpop.eup %6231 }
 0x870   : > { %11142 = vst [vmem:[#allocation93_spill] sm:$0xff] %v9725_v27  ;;  %v3903_v62 = vsub.f32 %v11144_v6, %v3833_v2  ;;  %v3904_v49 = vsub.f32 %v11145_v41, %v3833_v2  ;;  %6251 = vpow2.f32 %v2889_v29  ;;  %v3046_v9 = vadd.f32 %v9722_v55, %v9718_v32  ;;  %v6234_v45 = vpop.eup %6233 }
 0x871   : > { %11143 = vst [vmem:[#allocation111_spill] sm:$0xff] %v9734_v20  ;;  %v9744_v63 = vmul.f32 %v9568_v24, %v11140_v60  ;;  %v9748_v23 = vmul.f32 %v9573_v25, %v9206_v48  ;;  %6253 = vpow2.f32 %v4043_v26  ;;  %v3043_v2 = vadd.f32 %v9734_v20, %v9725_v27  ;;  %v6236_v41 = vpop.eup %6235  ;;  %v2988_v60 = vpop.xlane.xlu0 %2987  ;;  %v11157_v27 = vld [vmem:[#allocation126_spill] sm:$0xff] }
 0x872   : > { %v4015_v12 = vmul.f32 1.442695, %v3903_v62  ;;  %v4017_v6 = vmul.f32 1.442695, %v3904_v49  ;;  %6255 = vpow2.f32 %v4045_v16  ;;  %3047 = vadd.xlane.f32.xlu0 %v3046_v9  ;;  %v9753_v29 = vmul.f32 %v6226_v51, %v9215_v11  ;;  %v9761_v25 = vpop.eup %6237  ;;  %v11150_v16 = vld [vmem:[#allocation75_spill] sm:$0xff]  ;;  %v11151_v49 = vld [vmem:[#allocation121_spill] sm:$0xff]  ;;  %v2717_v51 = vpop.xlane.xlu1 %2716 }
 0x873   : > { %11146 = vst [vmem:[#allocation29_spill] sm:$0xff] %v9744_v63  ;;  %11147 = vst [vmem:[#allocation112_spill] sm:$0xff] %v9748_v23  ;;  %v9756_v24 = vmul.f32 %v6228_v31, %v9232_v13  ;;  %v5105_v48 = vsel %vm9678_vm6, 1.0, %v10895_v42  ;;  %3044 = vadd.xlane.f32.xlu1 %v3043_v2  ;;  %v4174_v26 = vadd.f32 %v9748_v23, %v9744_v63  ;;  %v11154_v2 = vld [vmem:[#allocation78_spill] sm:$0xff] }
 0x874   : > { %11148 = vst [vmem:[#allocation94_spill] sm:$0xff] %v9753_v29  ;;  %6257 = vpow2.f32 %v4015_v12  ;;  %v2779_v62 = vsub.f32 %v11150_v16, %v2711_v40  ;;  %v2780_v11 = vsub.f32 %v11151_v49, %v2711_v40  ;;  %v9767_v9 = vpop.eup %6239  ;;  %v9773_v31 = vmul.f32 %v9588_v43, %v11152_v37 }
 0x875   : > { %11149 = vst [vmem:[#allocation37_spill] sm:$0xff] %v9756_v24  ;;  %v4171_v13 = vadd.f32 %v9756_v24, %v9753_v29  ;;  %v9777_v12 = vmul.f32 %v9595_v47, %v11154_v2  ;;  %v5106_v16 = vsel %vm9694_vm3, 1.0, %v10895_v42  ;;  %v6242_v63 = vpop.eup %6241  ;;  %6259 = vpow2.f32 %v4017_v6  ;;  %v11156_v24 = vld [vmem:[#allocation59_spill] sm:$0xff] }
 0x876   : > { %11153 = vst [vmem:[#allocation95_spill] sm:$0xff] %v9773_v31  ;;  %v2895_v40 = vmul.f32 1.442695, %v2779_v62  ;;  %v2897_v49 = vmul.f32 1.442695, %v2780_v11  ;;  %v9782_v23 = vmul.f32 %v6234_v45, %v5105_v48  ;;  %v6244_v29 = vpop.eup %6243  ;;  %6261 = vrcp.f32 %v2988_v60  ;;  %4175 = vadd.xlane.f32.xlu0 %v4174_v26  ;;  %v11162_v62 = vld [vmem:[#allocation76_spill] sm:$0xff] }
 0x877   : > { %v9784_v43 = vmul.f32 %v6236_v41, %v5106_v16  ;;  %v3907_v47 = vsub.f32 %v11156_v24, %v3839_v10  ;;  %v3908_v20 = vsub.f32 %v11157_v27, %v3839_v10  ;;  %v9788_v32 = vpop.eup %6245  ;;  %4172 = vadd.xlane.f32.xlu1 %v4171_v13  ;;  %v9792_v18 = vmul.f32 %v9607_v22, %v11152_v37  ;;  %v3845_v41 = vpop.xlane.xlu1 %3844  ;;  %v9803_v24 = vld [vmem:[%s6632_s9 + $0xd0] sm:$0xff]  ;;  %v9807_v27 = vld [vmem:[%s6632_s9 + $0xd8] sm:$0xff] }
 0x878   : > { %11155 = vst [vmem:[#allocation36_spill] sm:$0xff] %v9782_v23  ;;  %6263 = vpow2.f32 %v2895_v40  ;;  %v9796_v45 = vmul.f32 %v9611_v44, %v11154_v2  ;;  %v9798_v6 = vmul.f32 %v6242_v63, %v5105_v48  ;;  %v9800_v60 = vpop.eup %6247  ;;  %vm351_vm7 = vcmp.gt.bf16.partialorder %v9803_v24, 0  ;;  %v11163_v13 = vld [vmem:[#allocation64_spill] sm:$0xff] }
 0x879   : > { %11158 = vst [vmem:[#allocation12_spill] sm:$0xff] %v9792_v18  ;;  %vm352_vm12 = vcmp.gt.bf16.partialorder %v9807_v27, 0  ;;  %6265 = vpow2.f32 %v2897_v49  ;;  %v3052_v22 = vadd.f32 %v9777_v12, %v9773_v31  ;;  %v3049_v44 = vadd.f32 %v9784_v43, %v9782_v23  ;;  %v6250_v63 = vpop.eup %6249  ;;  %v11177_v27 = vld [vmem:[#allocation129_spill] sm:$0xff] }
 0x87a   : > { %11159 = vst [vmem:[#allocation44_spill] sm:$0xff] %v9796_v45  ;;  %11160 = vst [vmem:[#allocation43_spill] sm:$0xff] %v9798_v6  ;;  %v4023_v10 = vmul.f32 1.442695, %v3907_v47  ;;  %v4025_v48 = vmul.f32 1.442695, %v3908_v20  ;;  %v9814_v26 = vmul.f32 %v6244_v29, %v5106_v16  ;;  %v2783_v11 = vsub.f32 %v11162_v62, %v2717_v51  ;;  %v6252_v2 = vpop.eup %6251 }
 0x87b   : > { %v2784_v37 = vsub.f32 %v11163_v13, %v2717_v51  ;;  %3053 = vadd.xlane.f32.xlu0 %v3052_v22  ;;  %v4180_v40 = vadd.f32 %v9796_v45, %v9792_v18  ;;  %v11164_v49 = vunpack.c.l.b16 %v9223_v33  ;;  %v11165_v31 = vunpack.c.h.b16 %v9223_v33  ;;  %v9827_v29 = vpop.eup %6253  ;;  %3050 = vadd.xlane.f32.xlu1 %v3049_v44  ;;  %v2723_v18 = vpop.xlane.xlu1 %2722 }
 0x87c   : > { %11161 = vst [vmem:[#allocation46_spill] sm:$0xff] %v9814_v26  ;;  %v11166_v47 = vmov 0   ;;  %6267 = vpow2.f32 %v4023_v10  ;;  %v4177_v51 = vadd.f32 %v9814_v26, %v9798_v6  ;;  %v2903_v16 = vmul.f32 1.442695, %v2783_v11  ;;  %v9831_v62 = vpop.eup %6255  ;;  %v11168_v11 = vld [vmem:[#allocation124_spill] sm:$0xff] }
 0x87d   : > { %vm503_vm5 = vcmp.ne.s32.totalorder %v11164_v49, 0  ;;  %vm504_vm8 = vcmp.ne.s32.totalorder %v11165_v31, 0  ;;  %v381_v20 = vsel %vm349_vm11, 65537, %v11166_v47  ;;  %v2905_v22 = vmul.f32 1.442695, %v2784_v37  ;;  %v11169_v6 = vld [vmem:[#allocation128_spill] sm:$0xff] }
 0x87e   : > { %v5111_v13 = vsel %vm503_vm5, 1.0, %v10895_v42  ;;  %v5112_v33 = vsel %vm504_vm8, 1.0, %v10895_v42  ;;  %v437_v31 = vunpack.c.l.b16 %v381_v20  ;;  %v438_v49 = vunpack.c.h.b16 %v381_v20  ;;  %v6258_v21 = vpop.eup %6257 }
 0x87f   : > { %6269 = vpow2.f32 %v4025_v48  ;;  %v9836_v44 = vmul.f32 %v9626_v0, %v5111_v13  ;;  %v9839_v10 = vmul.f32 %v9628_v34, %v5112_v33  ;;  %v3911_v37 = vsub.f32 %v11168_v11, %v3845_v41  ;;  %4181 = vadd.xlane.f32.xlu0 %v4180_v40  ;;  %v6260_v45 = vpop.eup %6259  ;;  %4178 = vadd.xlane.f32.xlu1 %v4177_v51  ;;  %v9848_v34 = vld [vmem:[%s6632_s9 + $0xe8] sm:$0xff] }
 0x880   : > { %6271 = vpow2.f32 %v2903_v16  ;;  %vm501_vm2 = vcmp.ne.s32.totalorder %v437_v31, 0  ;;  %vm502_vm15 = vcmp.ne.s32.totalorder %v438_v49, 0  ;;  %v3912_v26 = vsub.f32 %v11169_v6, %v3845_v41  ;;  %v9845_v23 = vpop.eup %6261 }
 0x881   : > { %11167 = vst [vmem:[#allocation8_spill] sm:$0xff] %v9836_v44  ;;  %6273 = vpow2.f32 %v2905_v22  ;;  %v5109_v48 = vsel %vm501_vm2, 1.0, %v10895_v42  ;;  %v5110_v0 = vsel %vm502_vm15, 1.0, %v10895_v42  ;;  %v4031_v20 = vmul.f32 1.442695, %v3911_v37  ;;  %v9866_v37 = vld [vmem:[%s6632_s9 + $0xe0] sm:$0xff] }
 0x882   : > { %vm354_vm14 = vcmp.gt.bf16.partialorder %v9848_v34, 0  ;;  %v3058_v40 = vadd.f32 %v9839_v10, %v9836_v44  ;;  %v9853_v16 = vmul.f32 %v6250_v63, %v5109_v48  ;;  %v9855_v6 = vmul.f32 %v6252_v2, %v5110_v0  ;;  %v6264_v51 = vpop.eup %6263  ;;  %v11174_v2 = vld [vmem:[#allocation77_spill] sm:$0xff] }
 0x883   : > { %v4033_v41 = vmul.f32 1.442695, %v3912_v26  ;;  %6275 = vpow2.f32 %v4031_v20  ;;  %v9858_v22 = vmul.f32 %v9646_v58, %v5111_v13  ;;  %v9861_v31 = vmul.f32 %v9650_v1, %v5112_v33  ;;  %v6266_v11 = vpop.eup %6265  ;;  %v3851_v13 = vpop.xlane.xlu1 %3850  ;;  %v9875_v20 = vld [vmem:[%s6632_s9 + $0xf8] sm:$0xff]  ;;  %v11175_v33 = vld [vmem:[#allocation63_spill] sm:$0xff] }
 0x884   : > { %11170 = vst [vmem:[#allocation45_spill] sm:$0xff] %v9853_v16  ;;  %11171 = vst [vmem:[#allocation96_spill] sm:$0xff] %v9855_v6  ;;  %v9863_v49 = vmul.f32 %v6258_v21, %v5109_v48  ;;  %vm353_vm1 = vcmp.gt.bf16.partialorder %v9866_v37, 0  ;;  %3059 = vadd.xlane.f32.xlu0 %v3058_v40  ;;  %v3055_v63 = vadd.f32 %v9855_v6, %v9853_v16  ;;  %vm356_vm9 = vcmp.gt.bf16.partialorder %v9875_v20, 0 }
 0x885   : > { %11172 = vst [vmem:[#allocation48_spill] sm:$0xff] %v9858_v22  ;;  %11173 = vst [vmem:[#allocation61_spill] sm:$0xff] %v9861_v31  ;;  %6277 = vpow2.f32 %v4033_v41  ;;  %v9871_v26 = vmul.f32 %v6260_v45, %v5110_v0  ;;  %v2787_v58 = vsub.f32 %v11174_v2, %v2723_v18  ;;  %v4186_v1 = vadd.f32 %v9861_v31, %v9858_v22 }
 0x886   : > { %v2788_v21 = vsub.f32 %v11175_v33, %v2723_v18  ;;  %v384_v48 = vsel %vm352_vm12, 65537, %v11166_v47  ;;  %v383_v45 = vsel %vm351_vm7, 65537, %v11166_v47  ;;  %3056 = vadd.xlane.f32.xlu1 %v3055_v63  ;;  %v6268_v16 = vpop.eup %6267  ;;  %v11176_v18 = vld [vmem:[#allocation127_spill] sm:$0xff]  ;;  %v3916_v24 = vsub.f32 %v11177_v27, %v3851_v13 }
 0x887   : > { %v4183_v0 = vadd.f32 %v9871_v26, %v9863_v49  ;;  %v2911_v40 = vmul.f32 1.442695, %v2787_v58  ;;  %v443_v41 = vunpack.c.l.b16 %v384_v48  ;;  %v444_v2 = vunpack.c.h.b16 %v384_v48 }
 0x888   : > { %v2913_v6 = vmul.f32 1.442695, %v2788_v21  ;;  %v441_v22 = vunpack.c.l.b16 %v383_v45  ;;  %v442_v31 = vunpack.c.h.b16 %v383_v45  ;;  %v3915_v33 = vsub.f32 %v11176_v18, %v3851_v13  ;;  %4187 = vadd.xlane.f32.xlu0 %v4186_v1  ;;  %v6444_v18 = vld [vmem:[%s6632_s9 + $0xf0] sm:$0xff] }
 0x889   : > { %6279 = vpow2.f32 %v2911_v40  ;;  %vm507_vm0 = vcmp.ne.s32.totalorder %v443_v41, 0  ;;  %vm508_vm10 = vcmp.ne.s32.totalorder %v444_v2, 0  ;;  %v6270_v44 = vpop.eup %6269  ;;  %v4041_v2 = vmul.f32 1.442695, %v3916_v24 }
 0x88a   : > { %6281 = vpow2.f32 %v2913_v6  ;;  %v5115_v63 = vsel %vm507_vm0, 1.0, %v10895_v42  ;;  %v5116_v58 = vsel %vm508_vm10, 1.0, %v10895_v42  ;;  %vm505_vm4 = vcmp.ne.s32.totalorder %v441_v22, 0  ;;  %v6272_v48 = vpop.eup %6271  ;;  %4184 = vadd.xlane.f32.xlu1 %v4183_v0  ;;  %v2985_v0 = vpop.xlane.xlu1 %2984 }
 0x88b   : > { %v9894_v21 = vmul.f32 %v9669_v38, %v5115_v63  ;;  %v9897_v1 = vmul.f32 %v9682_v19, %v5116_v58  ;;  %vm506_vm13 = vcmp.ne.s32.totalorder %v442_v31, 0  ;;  %v5113_v45 = vsel %vm505_vm4, 1.0, %v10895_v42  ;;  %v6274_v13 = vpop.eup %6273 }
 0x88c   : > { %v5114_v40 = vsel %vm506_vm13, 1.0, %v10895_v42  ;;  %v9901_v6 = vmul.f32 %v6264_v51, %v5113_v45  ;;  %v4039_v41 = vmul.f32 1.442695, %v3915_v33  ;;  %vm355_vm6 = vcmp.gt.bf16.partialorder %v6444_v18, 0 }
 0x88d   : > { %11178 = vst [vmem:[#allocation51_spill] sm:$0xff] %v9894_v21  ;;  %v3064_v22 = vadd.f32 %v9897_v1, %v9894_v21  ;;  %v9906_v38 = vmul.f32 %v6266_v11, %v5114_v40  ;;  %v9909_v19 = vmul.f32 %v9705_v3, %v5115_v63  ;;  %v9912_v31 = vmul.f32 %v9711_v15, %v5116_v58  ;;  %v6276_v27 = vpop.eup %6275 }
 0x88e   : > { %6283 = vpow2.f32 %v4039_v41  ;;  %v9914_v51 = vmul.f32 %v6268_v16, %v5113_v45  ;;  %v9916_v33 = vmul.f32 %v6270_v44, %v5114_v40  ;;  %v386_v24 = vsel %vm354_vm14, 65537, %v11166_v47 }
 0x88f   : > { %v6278_v21 = vpop.eup %6277  ;;  %3065 = vadd.xlane.f32.xlu0 %v3064_v22  ;;  %v3061_v3 = vadd.f32 %v9906_v38, %v9901_v6  ;;  %6285 = vpow2.f32 %v4041_v2  ;;  %v4192_v15 = vadd.f32 %v9912_v31, %v9909_v19  ;;  %v447_v11 = vunpack.c.l.b16 %v386_v24 }
 0x890   : > { %v4189_v16 = vadd.f32 %v9916_v33, %v9914_v51  ;;  %6287 = vrcp.f32 %v2985_v0  ;;  %v448_v44 = vunpack.c.h.b16 %v386_v24  ;;  %v385_v34 = vsel %vm353_vm1, 65537, %v11166_v47 }
 0x891   : > { %3062 = vadd.xlane.f32.xlu1 %v3061_v3  ;;  %vm511_vm3 = vcmp.ne.s32.totalorder %v447_v11, 0  ;;  %v445_v63 = vunpack.c.l.b16 %v385_v34  ;;  %v446_v58 = vunpack.c.h.b16 %v385_v34  ;;  %v388_v45 = vsel %vm356_vm9, 65537, %v11166_v47 }
 0x892   : > { %vm512_vm11 = vcmp.ne.s32.totalorder %v448_v44, 0  ;;  %v5119_v40 = vsel %vm511_vm3, 1.0, %v10895_v42  ;;  %v451_v41 = vunpack.c.l.b16 %v388_v45  ;;  %v452_v2 = vunpack.c.h.b16 %v388_v45 }
 0x893   : > { %v6280_v22 = vpop.eup %6279  ;;  %4193 = vadd.xlane.f32.xlu0 %v4192_v15  ;;  %v5120_v0 = vsel %vm512_vm11, 1.0, %v10895_v42  ;;  %v9936_v37 = vmul.f32 %v9727_v53, %v5119_v40  ;;  %vm509_vm7 = vcmp.ne.s32.totalorder %v445_v63, 0  ;;  %vm510_vm12 = vcmp.ne.s32.totalorder %v446_v58, 0 }
 0x894   : > { %v6282_v24 = vpop.eup %6281  ;;  %v9939_v3 = vmul.f32 %v9738_v7, %v5120_v0  ;;  %v5117_v20 = vsel %vm509_vm7, 1.0, %v10895_v42  ;;  %v5118_v11 = vsel %vm510_vm12, 1.0, %v10895_v42  ;;  %v9944_v44 = vmul.f32 %v9761_v25, %v5119_v40 }
 0x895   : > { %4190 = vadd.xlane.f32.xlu1 %v4189_v16  ;;  %v9946_v15 = vmul.f32 %v6272_v48, %v5117_v20  ;;  %v9948_v34 = vmul.f32 %v6274_v13, %v5118_v11  ;;  %v9951_v53 = vmul.f32 %v9767_v9, %v5120_v0  ;;  %v9953_v63 = vmul.f32 %v6276_v27, %v5117_v20 }
 0x896   : > { %11179 = vst [vmem:[#allocation113_spill] sm:$0xff] %v9944_v44  ;;  %v3070_v7 = vadd.f32 %v9939_v3, %v9936_v37  ;;  %v9957_v58 = vmul.f32 %v6278_v21, %v5118_v11  ;;  %vm515_vm5 = vcmp.ne.s32.totalorder %v451_v41, 0  ;;  %vm516_vm8 = vcmp.ne.s32.totalorder %v452_v2, 0  ;;  %v11183_v2 = vld [vmem:[#allocation71_spill] sm:$0xff] }
 0x897   : > { %11180 = vst [vmem:[#allocation56_spill] sm:$0xff] %v9951_v53  ;;  %11181 = vst [vmem:[#allocation97_spill] sm:$0xff] %v9953_v63  ;;  %v3067_v25 = vadd.f32 %v9948_v34, %v9946_v15  ;;  %v5123_v48 = vsel %vm515_vm5, 1.0, %v10895_v42  ;;  %v5124_v13 = vsel %vm516_vm8, 1.0, %v10895_v42  ;;  %v387_v9 = vsel %vm355_vm6, 65537, %v11166_v47  ;;  %v11184_v47 = vld [vmem:[#allocation70_spill] sm:$0xff] }
 0x898   : > { %11182 = vst [vmem:[#allocation54_spill] sm:$0xff] %v9957_v58  ;;  %v6284_v16 = vpop.eup %6283  ;;  %3071 = vadd.xlane.f32.xlu0 %v3070_v7  ;;  %v4195_v21 = vadd.f32 %v9957_v58, %v9953_v63  ;;  %v449_v45 = vunpack.c.l.b16 %v387_v9  ;;  %v450_v40 = vunpack.c.h.b16 %v387_v9  ;;  %v3113_v0 = vmul.f32 %v9845_v23, %v11183_v2  ;;  %v11185_v63 = vld [vmem:[#allocation69_spill] sm:$0xff] }
 0x899   : > { %v6286_v27 = vpop.eup %6285  ;;  %3068 = vadd.xlane.f32.xlu1 %v3067_v25  ;;  %v4198_v20 = vadd.f32 %v9951_v53, %v9944_v44  ;;  %v9972_v11 = vmul.f32 %v9788_v32, %v5123_v48  ;;  %v9975_v18 = vmul.f32 %v9800_v60, %v5124_v13  ;;  %v9979_v25 = vmul.f32 %v9827_v29, %v5123_v48  ;;  %v11186_v44 = vld [vmem:[#allocation130_spill] sm:$0xff] }
 0x89a   : > { %v6288_v41 = vpop.eup %6287  ;;  %vm513_vm2 = vcmp.ne.s32.totalorder %v449_v45, 0  ;;  %vm514_vm15 = vcmp.ne.s32.totalorder %v450_v40, 0  ;;  %v3114_v32 = vmul.f32 %v9845_v23, %v11186_v44  ;;  %v9997_v48 = vmul.f32 %v9831_v62, %v5124_v13 }
 0x89b   : > { %v3111_v7 = vmul.f32 %v6288_v41, %v11184_v47  ;;  %v5121_v9 = vsel %vm513_vm2, 1.0, %v10895_v42  ;;  %v5122_v2 = vsel %vm514_vm15, 1.0, %v10895_v42  ;;  %v3112_v58 = vmul.f32 %v6288_v41, %v11185_v63  ;;  %v4116_v44 = vpop.xlane.xlu0 %4115 }
 0x89c   : > { %4199 = vadd.xlane.f32.xlu0 %v4198_v20  ;;  %v9986_v60 = vmul.f32 %v6280_v22, %v5121_v9  ;;  %v9988_v53 = vmul.f32 %v6282_v24, %v5122_v2  ;;  %v9990_v45 = vmul.f32 %v6284_v16, %v5121_v9  ;;  %v9992_v40 = vmul.f32 %v6286_v27, %v5122_v2  ;;  %v11187_v27 = vld [vmem:[#allocation103_spill] sm:$0xff] }
 0x89d   : > { %4196 = vadd.xlane.f32.xlu1 %v4195_v21  ;;  %v3076_v29 = vadd.f32 %v9975_v18, %v9972_v11  ;;  %v3176_v42 = vpack.c.bf16 %v3114_v32, %v3112_v58  ;;  %v3175_v63 = vpack.c.bf16 %v3113_v0, %v3111_v7  ;;  %6289 = vrcp.f32 %v4116_v44  ;;  %v4113_v24 = vpop.xlane.xlu1 %4112  ;;  %v11188_v0 = vld [vmem:[#allocation79_spill] sm:$0xff]  ;;  %v11190_v32 = vld [vmem:[#allocation21_spill] sm:$0xff] }
 0x89e   : > { %v3073_v23 = vadd.f32 %v9988_v53, %v9986_v60  ;;  %v4201_v22 = vadd.f32 %v9992_v40, %v9990_v45  ;;  %v4204_v16 = vadd.f32 %v9997_v48, %v9979_v25  ;;  %6291 = vrcp.f32 %v4113_v24  ;;  %v11189_v9 = vld [vmem:[#allocation11_spill] sm:$0xff]  ;;  %v11191_v24 = vld [vmem:[#allocation26_spill] sm:$0xff] }
 0x89f   : > { %4592 = vmatprep.mubr.bf16.mxu1 %v3176_v42  ;;  %vm11270_vm14 = vcmask 261120   ;;  %vm4951_vm9 = vcmask 64512  }
 0x8a0   : > { %3077 = vadd.xlane.f32.xlu0 %v3076_v29  ;;  %4593 = vmatmul.mubr.bf16.vlgmr.msra.gmra.mrb[128].mxu1 %v3175_v63  ;;  %vm11271_vm1 = vmmov %vm11270_vm14 }
 0x8a1   : > { %3074 = vadd.xlane.f32.xlu1 %v3073_v23  ;;  %v2994_v62 = vpop.xlane.xlu0 %2993 }
 0x8a2   : > { %6293 = vrcp.f32 %v2994_v62  ;;  %v11192_v62 = vld [vmem:[#allocation15_spill] sm:$0xff] }
 0x8a3   : > { %v2991_v58 = vpop.xlane.xlu1 %2990 }
 0x8a4   : > { %4205 = vadd.xlane.f32.xlu0 %v4204_v16  ;;  %6295 = vrcp.f32 %v2991_v58 }
 0x8a5   : > { %4202 = vadd.xlane.f32.xlu1 %v4201_v22 }
 0x8a7   : > { %v6290_v13 = vpop.eup %6289  ;;  %v4119_v41 = vpop.xlane.xlu1 %4118 }
 0x8a8   : > { %v4241_v21 = vmul.f32 %v6290_v13, %v11187_v27  ;;  %v4242_v20 = vmul.f32 %v6290_v13, %v11188_v0  ;;  %v6292_v47 = vpop.eup %6291  ;;  %v4122_v7 = vpop.xlane.xlu0 %4121  ;;  %6297 = vrcp.f32 %v4119_v41 }
 0x8a9   : > { %v4239_v2 = vmul.f32 %v6292_v47, %v11189_v9  ;;  %6299 = vrcp.f32 %v4122_v7  ;;  %v4240_v29 = vmul.f32 %v6292_v47, %v11190_v32 }
 0x8ab   : > { %v4304_v42 = vpack.c.bf16 %v4242_v20, %v4240_v29  ;;  %v4303_v63 = vpack.c.bf16 %v4241_v21, %v4239_v2  ;;  %v11193_v2 = vld [vmem:[#allocation80_spill] sm:$0xff]  ;;  %v11194_v29 = vld [vmem:[#allocation17_spill] sm:$0xff] }
 0x8ac   : > { %v6294_v23 = vpop.eup %6293  ;;  %v3000_v44 = vpop.xlane.xlu0 %2999 }
 0x8ad   : > { %6301 = vrcp.f32 %v3000_v44  ;;  %v2997_v22 = vpop.xlane.xlu1 %2996  ;;  %4431 = vmatprep.mubr.bf16.mxu0 %v4304_v42  ;;  %v3118_v16 = vmul.f32 %v6294_v23, %v11191_v24  ;;  %v3117_v58 = vmul.f32 %v6294_v23, %v11192_v62  ;;  %v11195_v23 = vld [vmem:[#allocation81_spill] sm:$0xff]  ;;  %v11196_v44 = vld [vmem:[#allocation10_spill] sm:$0xff] }
 0x8ae   : > { %v6296_v13 = vpop.eup %6295  ;;  %6303 = vrcp.f32 %v2997_v22  ;;  %4432 = vmatmul.mubr.bf16.vlgmr.msra.gmra.mrb[96].mxu0 %v4303_v63 }
 0x8af   : > { %v3116_v27 = vmul.f32 %v6296_v13, %v9286_v35  ;;  %v3115_v41 = vmul.f32 %v6296_v13, %v9281_v4 }
 0x8b1   : > { %v4125_v0 = vpop.xlane.xlu1 %4124  ;;  %v3178_v47 = vpack.c.bf16 %v3118_v16, %v3116_v27  ;;  %v3177_v20 = vpack.c.bf16 %v3117_v58, %v3115_v41  ;;  %v11197_v27 = vld [vmem:[#allocation13_spill] sm:$0xff] }
 0x8b2   : > { %v6298_v21 = vpop.eup %6297  ;;  %v4128_v7 = vpop.xlane.xlu0 %4127  ;;  %6305 = vrcp.f32 %v4125_v0 }
 0x8b3   : > { %v6300_v9 = vpop.eup %6299  ;;  %6307 = vrcp.f32 %v4128_v7  ;;  %4600 = vmatprep.mubr.bf16.mxu1 %v3178_v47  ;;  %v4244_v32 = vmul.f32 %v6298_v21, %v11193_v2  ;;  %v4243_v42 = vmul.f32 %v6298_v21, %v11194_v29  ;;  %v11198_v47 = vld [vmem:[#allocation22_spill] sm:$0xff] }
 0x8b4   : > { %4601 = vmatmul.mubr.bf16.gmra.mrb[132].mxu1 %v3177_v20  ;;  %v4246_v63 = vmul.f32 %v6300_v9, %v11195_v23  ;;  %v4245_v35 = vmul.f32 %v6300_v9, %v11196_v44  ;;  %v11201_v44 = vld [vmem:[#allocation82_spill] sm:$0xff] }
 0x8b6   : > { %v3006_v22 = vpop.xlane.xlu0 %3005  ;;  %v4306_v4 = vpack.c.bf16 %v4246_v63, %v4244_v32  ;;  %v4305_v24 = vpack.c.bf16 %v4245_v35, %v4243_v42  ;;  %v11199_v42 = vld [vmem:[#allocation18_spill] sm:$0xff] }
 0x8b7   : > { %v6302_v16 = vpop.eup %6301  ;;  %6309 = vrcp.f32 %v3006_v22  ;;  %v3003_v62 = vpop.xlane.xlu1 %3002  ;;  %v11200_v63 = vld [vmem:[#allocation14_spill] sm:$0xff]  ;;  %v11202_v22 = vld [vmem:[#allocation32_spill] sm:$0xff] }
 0x8b8   : > { %v6304_v58 = vpop.eup %6303  ;;  %6311 = vrcp.f32 %v3003_v62  ;;  %4439 = vmatprep.mubr.bf16.mxu0 %v4306_v4  ;;  %v3122_v13 = vmul.f32 %v6302_v16, %v9320_v39  ;;  %v3121_v41 = vmul.f32 %v6302_v16, %v11197_v27 }
 0x8b9   : > { %4440 = vmatmul.mubr.bf16.gmra.mrb[100].mxu0 %v4305_v24  ;;  %v3120_v0 = vmul.f32 %v6304_v58, %v9326_v52  ;;  %v3119_v20 = vmul.f32 %v6304_v58, %v11198_v47 }
 0x8bb   : > { %v4131_v7 = vpop.xlane.xlu1 %4130  ;;  %v3180_v9 = vpack.c.bf16 %v3122_v13, %v3120_v0  ;;  %v3179_v2 = vpack.c.bf16 %v3121_v41, %v3119_v20  ;;  %v11203_v41 = vld [vmem:[#allocation19_spill] sm:$0xff] }
 0x8bc   : > { %v4134_v21 = vpop.xlane.xlu0 %4133  ;;  %v6306_v32 = vpop.eup %6305 }
 0x8bd   : > { %6313 = vrcp.f32 %v4134_v21  ;;  %v6308_v29 = vpop.eup %6307  ;;  %4608 = vmatprep.mubr.bf16.mxu1 %v3180_v9  ;;  %v4248_v23 = vmul.f32 %v6306_v32, %v11199_v42  ;;  %v4247_v39 = vmul.f32 %v6306_v32, %v11200_v63  ;;  %v11204_v42 = vld [vmem:[#allocation31_spill] sm:$0xff]  ;;  %v11205_v63 = vld [vmem:[#allocation28_spill] sm:$0xff] }
 0x8be   : > { %6315 = vrcp.f32 %v4131_v7  ;;  %4609 = vmatmul.mubr.bf16.gmra.mrb[136].mxu1 %v3179_v2  ;;  %v4250_v35 = vmul.f32 %v6308_v29, %v11201_v44  ;;  %v4249_v52 = vmul.f32 %v6308_v29, %v11202_v22  ;;  %v11206_v44 = vld [vmem:[#allocation39_spill] sm:$0xff] }
 0x8c0   : > { %v3012_v4 = vpop.xlane.xlu0 %3011  ;;  %v3009_v24 = vpop.xlane.xlu1 %3008  ;;  %v4308_v16 = vpack.c.bf16 %v4250_v35, %v4248_v23  ;;  %v4307_v62 = vpack.c.bf16 %v4249_v52, %v4247_v39 }
 0x8c1   : > { %6317 = vrcp.f32 %v3012_v4  ;;  %v6310_v58 = vpop.eup %6309 }
 0x8c2   : > { %6319 = vrcp.f32 %v3009_v24  ;;  %v6312_v13 = vpop.eup %6311  ;;  %4447 = vmatprep.mubr.bf16.mxu0 %v4308_v16  ;;  %v3126_v27 = vmul.f32 %v6310_v58, %v9360_v36  ;;  %v3125_v0 = vmul.f32 %v6310_v58, %v11203_v41  ;;  %v11208_v58 = vld [vmem:[#allocation24_spill] sm:$0xff] }
 0x8c3   : > { %4448 = vmatmul.mubr.bf16.gmra.mrb[104].mxu0 %v4307_v62  ;;  %v3124_v47 = vmul.f32 %v6312_v13, %v9366_v30  ;;  %v3123_v20 = vmul.f32 %v6312_v13, %v9363_v59  ;;  %v11207_v30 = vld [vmem:[#allocation83_spill] sm:$0xff] }
 0x8c4   : > { %v4137_v7 = vpop.xlane.xlu1 %4136 }
 0x8c5   : > { %v4140_v21 = vpop.xlane.xlu0 %4139  ;;  %v3182_v9 = vpack.c.bf16 %v3126_v27, %v3124_v47  ;;  %v3181_v2 = vpack.c.bf16 %v3125_v0, %v3123_v20 }
 0x8c6   : > { %6321 = vrcp.f32 %v4140_v21 }
 0x8c7   : > { %v6314_v32 = vpop.eup %6313  ;;  %6323 = vrcp.f32 %v4137_v7  ;;  %4616 = vmatprep.mubr.bf16.mxu1 %v3182_v9 }
 0x8c8   : > { %v6316_v29 = vpop.eup %6315  ;;  %v4254_v23 = vmul.f32 %v6314_v32, %v11204_v42  ;;  %v4253_v36 = vmul.f32 %v6314_v32, %v11205_v63  ;;  %4617 = vmatmul.mubr.bf16.gmra.mrb[140].mxu1 %v3181_v2  ;;  %v11209_v2 = vld [vmem:[#allocation85_spill] sm:$0xff]  ;;  %v11212_v63 = vld [vmem:[#allocation20_spill] sm:$0xff] }
 0x8c9   : > { %v3018_v39 = vpop.xlane.xlu0 %3017  ;;  %v4252_v35 = vmul.f32 %v6316_v29, %v11206_v44  ;;  %v4251_v22 = vmul.f32 %v6316_v29, %v11207_v30  ;;  %v3015_v59 = vpop.xlane.xlu1 %3014 }
 0x8ca   : > { %6325 = vrcp.f32 %v3018_v39 }
 0x8cb   : > { %v6318_v52 = vpop.eup %6317  ;;  %6327 = vrcp.f32 %v3015_v59  ;;  %v4310_v4 = vpack.c.bf16 %v4254_v23, %v4252_v35  ;;  %v4309_v24 = vpack.c.bf16 %v4253_v36, %v4251_v22  ;;  %v11211_v23 = vld [vmem:[#allocation84_spill] sm:$0xff] }
 0x8cc   : > { %v6320_v16 = vpop.eup %6319  ;;  %v3130_v62 = vmul.f32 %v6318_v52, %v9402_v5  ;;  %v3129_v13 = vmul.f32 %v6318_v52, %v11208_v58  ;;  %v11210_v5 = vld [vmem:[#allocation25_spill] sm:$0xff] }
 0x8cd   : > { %4455 = vmatprep.mubr.bf16.mxu0 %v4310_v4  ;;  %v3128_v27 = vmul.f32 %v6320_v16, %v9408_v57  ;;  %v3127_v41 = vmul.f32 %v6320_v16, %v9405_v8  ;;  %v4143_v47 = vpop.xlane.xlu1 %4142  ;;  %v11213_v4 = vld [vmem:[#allocation50_spill] sm:$0xff] }
 0x8ce   : > { %v4146_v0 = vpop.xlane.xlu0 %4145  ;;  %4456 = vmatmul.mubr.bf16.gmra.mrb[108].mxu0 %v4309_v24 }
 0x8cf   : > { %6329 = vrcp.f32 %v4146_v0  ;;  %v3184_v20 = vpack.c.bf16 %v3130_v62, %v3128_v27  ;;  %v3183_v21 = vpack.c.bf16 %v3129_v13, %v3127_v41  ;;  %v11214_v0 = vld [vmem:[#allocation30_spill] sm:$0xff] }
 0x8d0   : > { %v6322_v7 = vpop.eup %6321  ;;  %6331 = vrcp.f32 %v4143_v47 }
 0x8d1   : > { %v6324_v9 = vpop.eup %6323  ;;  %4624 = vmatprep.mubr.bf16.mxu1 %v3184_v20  ;;  %v4258_v32 = vmul.f32 %v6322_v7, %v11209_v2  ;;  %v4257_v29 = vmul.f32 %v6322_v7, %v11210_v5  ;;  %v11217_v7 = vld [vmem:[#allocation16_spill] sm:$0xff] }
 0x8d2   : > { %v3024_v42 = vpop.xlane.xlu0 %3023  ;;  %4625 = vmatmul.mubr.bf16.gmra.mrb[144].mxu1 %v3183_v21  ;;  %v4256_v57 = vmul.f32 %v6324_v9, %v11211_v23  ;;  %v4255_v8 = vmul.f32 %v6324_v9, %v11212_v63  ;;  %v3021_v36 = vpop.xlane.xlu1 %3020  ;;  %v11216_v21 = vld [vmem:[#allocation35_spill] sm:$0xff] }
 0x8d3   : > { %6333 = vrcp.f32 %v3024_v42  ;;  %v11218_v42 = vld [vmem:[#allocation53_spill] sm:$0xff] }
 0x8d4   : > { %v6326_v39 = vpop.eup %6325  ;;  %6335 = vrcp.f32 %v3021_v36  ;;  %v4312_v44 = vpack.c.bf16 %v4258_v32, %v4256_v57  ;;  %v4311_v35 = vpack.c.bf16 %v4257_v29, %v4255_v8  ;;  %v11219_v57 = vld [vmem:[#allocation86_spill] sm:$0xff] }
 0x8d5   : > { %v6328_v30 = vpop.eup %6327  ;;  %v3134_v22 = vmul.f32 %v6326_v39, %v9445_v56  ;;  %v3133_v59 = vmul.f32 %v6326_v39, %v9442_v46  ;;  %v11215_v56 = vld [vmem:[#allocation33_spill] sm:$0xff]  ;;  %v11220_v36 = vld [vmem:[#allocation58_spill] sm:$0xff] }
 0x8d6   : > { %4463 = vmatprep.mubr.bf16.mxu0 %v4312_v44  ;;  %v3132_v52 = vmul.f32 %v6328_v30, %v9451_v28  ;;  %v3131_v24 = vmul.f32 %v6328_v30, %v11213_v4  ;;  %v4149_v62 = vpop.xlane.xlu1 %4148  ;;  %v11221_v44 = vld [vmem:[#allocation87_spill] sm:$0xff] }
 0x8d7   : > { %v4152_v16 = vpop.xlane.xlu0 %4151  ;;  %4464 = vmatmul.mubr.bf16.gmra.mrb[112].mxu0 %v4311_v35 }
 0x8d8   : > { %6337 = vrcp.f32 %v4152_v16  ;;  %v3186_v58 = vpack.c.bf16 %v3134_v22, %v3132_v52  ;;  %v3185_v13 = vpack.c.bf16 %v3133_v59, %v3131_v24  ;;  %v11222_v24 = vld [vmem:[#allocation38_spill] sm:$0xff] }
 0x8d9   : > { %v6330_v27 = vpop.eup %6329  ;;  %6339 = vrcp.f32 %v4149_v62  ;;  %v11223_v62 = vld [vmem:[#allocation62_spill] sm:$0xff] }
 0x8da   : > { %v6332_v41 = vpop.eup %6331  ;;  %4632 = vmatprep.mubr.bf16.mxu1 %v3186_v58  ;;  %v4262_v47 = vmul.f32 %v6330_v27, %v11214_v0  ;;  %v4261_v20 = vmul.f32 %v6330_v27, %v11215_v56  ;;  %v3027_v46 = vpop.xlane.xlu1 %3026 }
 0x8db   : > { %4633 = vmatmul.mubr.bf16.gmra.mrb[148].mxu1 %v3185_v13  ;;  %v4260_v28 = vmul.f32 %v6332_v41, %v11216_v21  ;;  %v4259_v9 = vmul.f32 %v6332_v41, %v11217_v7  ;;  %6341 = vrcp.f32 %v3027_v46  ;;  %v11224_v13 = vld [vmem:[#allocation57_spill] sm:$0xff]  ;;  %v11225_v41 = vld [vmem:[#allocation27_spill] sm:$0xff] }
 0x8dc   : > { %v11226_v7 = vld [vmem:[#allocation23_spill] sm:$0xff] }
 0x8dd   : > { %v6334_v2 = vpop.eup %6333  ;;  %v4314_v32 = vpack.c.bf16 %v4262_v47, %v4260_v28  ;;  %v4313_v5 = vpack.c.bf16 %v4261_v20, %v4259_v9 }
 0x8de   : > { %v6336_v29 = vpop.eup %6335  ;;  %v3138_v23 = vmul.f32 %v6334_v2, %v11218_v42  ;;  %v3137_v63 = vmul.f32 %v6334_v2, %v11219_v57  ;;  %v3030_v8 = vpop.xlane.xlu0 %3029  ;;  %v11227_v2 = vld [vmem:[#allocation104_spill] sm:$0xff]  ;;  %v11229_v42 = vld [vmem:[#allocation89_spill] sm:$0xff] }
 0x8df   : > { %4471 = vmatprep.mubr.bf16.mxu0 %v4314_v32  ;;  %v3136_v39 = vmul.f32 %v6336_v29, %v11220_v36  ;;  %v3135_v35 = vmul.f32 %v6336_v29, %v11221_v44  ;;  %6343 = vrcp.f32 %v3030_v8 }
 0x8e0   : > { %4472 = vmatmul.mubr.bf16.gmra.mrb[116].mxu0 %v4313_v5  ;;  %v11228_v5 = vld [vmem:[#allocation88_spill] sm:$0xff] }
 0x8e1   : > { %v3188_v30 = vpack.c.bf16 %v3138_v23, %v3136_v39  ;;  %v3187_v22 = vpack.c.bf16 %v3137_v63, %v3135_v35  ;;  %v11230_v35 = vld [vmem:[#allocation42_spill] sm:$0xff] }
 0x8e2   : > { %v6338_v59 = vpop.eup %6337  ;;  %v4155_v52 = vpop.xlane.xlu1 %4154 }
 0x8e3   : > { %v6340_v4 = vpop.eup %6339  ;;  %4640 = vmatprep.mubr.bf16.mxu1 %v3188_v30  ;;  %v4266_v16 = vmul.f32 %v6338_v59, %v11222_v24  ;;  %v4265_v58 = vmul.f32 %v6338_v59, %v11223_v62  ;;  %6345 = vrcp.f32 %v4155_v52  ;;  %v11231_v59 = vld [vmem:[#allocation52_spill] sm:$0xff] }
 0x8e4   : > { %4641 = vmatmul.mubr.bf16.gmra.mrb[152].mxu1 %v3187_v22  ;;  %v4264_v27 = vmul.f32 %v6340_v4, %v11224_v13  ;;  %v4263_v0 = vmul.f32 %v6340_v4, %v11225_v41  ;;  %v11232_v4 = vld [vmem:[#allocation105_spill] sm:$0xff] }
 0x8e5   : > { %v4158_v47 = vpop.xlane.xlu0 %4157  ;;  %v6342_v46 = vpop.eup %6341 }
 0x8e6   : > { %v4316_v56 = vpack.c.bf16 %v4266_v16, %v4264_v27  ;;  %v4315_v20 = vpack.c.bf16 %v4265_v58, %v4263_v0  ;;  %6347 = vrcp.f32 %v4158_v47  ;;  %v3140_v9 = vmul.f32 %v6342_v46, %v11226_v7  ;;  %v11233_v16 = vld [vmem:[#allocation106_spill] sm:$0xff] }
 0x8e7   : > { %v3139_v29 = vmul.f32 %v6342_v46, %v11228_v5  ;;  %v11235_v46 = vld [vmem:[#allocation108_spill] sm:$0xff] }
 0x8e8   : > { %4479 = vmatprep.mubr.bf16.mxu0 %v4316_v56  ;;  %v11234_v56 = vld [vmem:[#allocation107_spill] sm:$0xff] }
 0x8e9   : > { %4480 = vmatmul.mubr.bf16.gmra.mrb[120].mxu0 %v4315_v20  ;;  %v6344_v21 = vpop.eup %6343  ;;  %v3033_v28 = vpop.xlane.xlu1 %3032 }
 0x8ea   : > { %v3142_v32 = vmul.f32 %v6344_v21, %v11227_v2  ;;  %v3141_v23 = vmul.f32 %v6344_v21, %v11229_v42  ;;  %6349 = vrcp.f32 %v3033_v28  ;;  %v11236_v28 = vld [vmem:[#allocation65_spill] sm:$0xff] }
 0x8ec   : > { %v3190_v63 = vpack.c.bf16 %v3142_v32, %v3140_v9  ;;  %v3189_v8 = vpack.c.bf16 %v3141_v23, %v3139_v29  ;;  %v11237_v9 = vld [vmem:[#allocation90_spill] sm:$0xff] }
 0x8ed   : > { %v3036_v57 = vpop.xlane.xlu0 %3035  ;;  %v6346_v36 = vpop.eup %6345 }
 0x8ee   : > { %6351 = vrcp.f32 %v3036_v57  ;;  %4648 = vmatprep.mubr.bf16.mxu1 %v3190_v63  ;;  %v4268_v30 = vmul.f32 %v6346_v36, %v11230_v35  ;;  %v4267_v24 = vmul.f32 %v6346_v36, %v11232_v4  ;;  %v11238_v63 = vld [vmem:[#allocation41_spill] sm:$0xff]  ;;  %v11239_v36 = vld [vmem:[#allocation91_spill] sm:$0xff] }
 0x8ef   : > { %4649 = vmatmul.mubr.bf16.gmra.mrb[156].mxu1 %v3189_v8 }
 0x8f0   : > { %v6348_v39 = vpop.eup %6347 }
 0x8f1   : > { %v4164_v44 = vpop.xlane.xlu0 %4163  ;;  %v4161_v22 = vpop.xlane.xlu1 %4160  ;;  %v4270_v52 = vmul.f32 %v6348_v39, %v11231_v59  ;;  %v4269_v62 = vmul.f32 %v6348_v39, %v11233_v16 }
 0x8f2   : > { %6353 = vrcp.f32 %v4164_v44  ;;  %v11240_v44 = vld [vmem:[#allocation109_spill] sm:$0xff] }
 0x8f3   : > { %6355 = vrcp.f32 %v4161_v22  ;;  %v4318_v58 = vpack.c.bf16 %v4270_v52, %v4268_v30  ;;  %v4317_v13 = vpack.c.bf16 %v4269_v62, %v4267_v24  ;;  %v11241_v30 = vld [vmem:[#allocation92_spill] sm:$0xff] }
 0x8f4   : > { %v6350_v27 = vpop.eup %6349 }
 0x8f5   : > { %v3042_v41 = vpop.xlane.xlu0 %3041  ;;  %4487 = vmatprep.mubr.bf16.mxu0 %v4318_v58  ;;  %v3144_v20 = vmul.f32 %v6350_v27, %v11234_v56  ;;  %v3143_v7 = vmul.f32 %v6350_v27, %v11236_v28 }
 0x8f6   : > { %v3039_v0 = vpop.xlane.xlu1 %3038  ;;  %6357 = vrcp.f32 %v3042_v41  ;;  %4488 = vmatmul.mubr.bf16.gmra.mrb[124].mxu0 %v4317_v13  ;;  %v11242_v13 = vld [vmem:[#allocation34_spill] sm:$0xff] }
 0x8f7   : > { %6359 = vrcp.f32 %v3039_v0 }
 0x8f8   : > { %v6352_v47 = vpop.eup %6351 }
 0x8f9   : > { %v3146_v21 = vmul.f32 %v6352_v47, %v11235_v46  ;;  %v3145_v2 = vmul.f32 %v6352_v47, %v11237_v9  ;;  %v11243_v47 = vld [vmem:[#allocation49_spill] sm:$0xff] }
 0x8fa   : > { %v4170_v32 = vpop.xlane.xlu0 %4169 }
 0x8fb   : > { %6361 = vrcp.f32 %v4170_v32  ;;  %v4167_v5 = vpop.xlane.xlu1 %4166  ;;  %v3192_v29 = vpack.c.bf16 %v3146_v21, %v3144_v20  ;;  %v3191_v42 = vpack.c.bf16 %v3145_v2, %v3143_v7  ;;  %v11244_v2 = vld [vmem:[#allocation40_spill] sm:$0xff] }
 0x8fc   : > { %v6354_v23 = vpop.eup %6353  ;;  %6363 = vrcp.f32 %v4167_v5 }
 0x8fd   : > { %v6356_v57 = vpop.eup %6355  ;;  %4656 = vmatprep.mubr.bf16.mxu1 %v3192_v29  ;;  %v4274_v8 = vmul.f32 %v6354_v23, %v11238_v63  ;;  %v4273_v39 = vmul.f32 %v6354_v23, %v11239_v36  ;;  %v11245_v36 = vld [vmem:[#allocation110_spill] sm:$0xff] }
 0x8fe   : > { %4657 = vmatmul.mubr.bf16.gmra.mrb[160].mxu1 %v3191_v42  ;;  %v4272_v35 = vmul.f32 %v6356_v57, %v11240_v44  ;;  %v4271_v22 = vmul.f32 %v6356_v57, %v11241_v30 }
 0x8ff   : > { %v3048_v59 = vpop.xlane.xlu0 %3047 }
 0x900   : > { %6365 = vrcp.f32 %v3048_v59  ;;  %v3045_v52 = vpop.xlane.xlu1 %3044  ;;  %v4320_v4 = vpack.c.bf16 %v4274_v8, %v4272_v35  ;;  %v4319_v24 = vpack.c.bf16 %v4273_v39, %v4271_v22  ;;  %v6358_v16 = vpop.eup %6357 }
 0x901   : > { %6367 = vrcp.f32 %v3045_v52  ;;  %v6360_v62 = vpop.eup %6359  ;;  %v3150_v58 = vmul.f32 %v6358_v16, %v9658_v14  ;;  %v3149_v27 = vmul.f32 %v6358_v16, %v11242_v13  ;;  %v11248_v16 = vld [vmem:[#allocation112_spill] sm:$0xff] }
 0x902   : > { %4495 = vmatprep.mubr.bf16.mxu0 %v4320_v4  ;;  %v3148_v0 = vmul.f32 %v6360_v62, %v9664_v17  ;;  %v3147_v56 = vmul.f32 %v6360_v62, %v11243_v47 }
 0x903   : > { %v4176_v41 = vpop.xlane.xlu0 %4175  ;;  %4496 = vmatmul.mubr.bf16.gmra.mrb[128].mxu0 %v4319_v24 }
 0x904   : > { %6369 = vrcp.f32 %v4176_v41  ;;  %v4173_v20 = vpop.xlane.xlu1 %4172  ;;  %v3194_v21 = vpack.c.bf16 %v3150_v58, %v3148_v0  ;;  %v3193_v28 = vpack.c.bf16 %v3149_v27, %v3147_v56  ;;  %v11249_v58 = vld [vmem:[#allocation29_spill] sm:$0xff]  ;;  %v11251_v41 = vld [vmem:[#allocation94_spill] sm:$0xff] }
 0x905   : > { %v6362_v46 = vpop.eup %6361  ;;  %6371 = vrcp.f32 %v4173_v20 }
 0x906   : > { %v6364_v7 = vpop.eup %6363  ;;  %v4278_v9 = vmul.f32 %v6362_v46, %v9690_v50  ;;  %v4277_v32 = vmul.f32 %v6362_v46, %v11244_v2  ;;  %4664 = vmatprep.mubr.bf16.mxu1 %v3194_v21 }
 0x907   : > { %v4276_v5 = vmul.f32 %v6364_v7, %v9702_v54  ;;  %v4275_v29 = vmul.f32 %v6364_v7, %v9699_v61  ;;  %4665 = vmatmul.mubr.bf16.gmra.mrb[164].mxu1 %v3193_v28  ;;  %v11246_v54 = vld [vmem:[#allocation111_spill] sm:$0xff]  ;;  %v11247_v61 = vld [vmem:[#allocation93_spill] sm:$0xff] }
 0x908   : > { %v3054_v14 = vpop.xlane.xlu0 %3053  ;;  %v3051_v17 = vpop.xlane.xlu1 %3050 }
 0x909   : > { %6373 = vrcp.f32 %v3054_v14  ;;  %v4322_v42 = vpack.c.bf16 %v4278_v9, %v4276_v5  ;;  %v4321_v23 = vpack.c.bf16 %v4277_v32, %v4275_v29  ;;  %v11252_v9 = vld [vmem:[#allocation95_spill] sm:$0xff]  ;;  %v11253_v14 = vld [vmem:[#allocation36_spill] sm:$0xff] }
 0x90a   : > { %6375 = vrcp.f32 %v3051_v17  ;;  %v6366_v57 = vpop.eup %6365 }
 0x90b   : > { %v6368_v63 = vpop.eup %6367  ;;  %4503 = vmatprep.mubr.bf16.mxu0 %v4322_v42  ;;  %v3154_v50 = vmul.f32 %v6366_v57, %v9722_v55  ;;  %v3153_v39 = vmul.f32 %v6366_v57, %v11245_v36  ;;  %v11250_v55 = vld [vmem:[#allocation37_spill] sm:$0xff] }
 0x90c   : > { %v4182_v8 = vpop.xlane.xlu0 %4181  ;;  %v4179_v44 = vpop.xlane.xlu1 %4178  ;;  %4504 = vmatmul.mubr.bf16.gmra.mrb[132].mxu0 %v4321_v23  ;;  %v3152_v35 = vmul.f32 %v6368_v63, %v11246_v54  ;;  %v3151_v30 = vmul.f32 %v6368_v63, %v11247_v61  ;;  %v11254_v63 = vld [vmem:[#allocation44_spill] sm:$0xff] }
 0x90d   : > { %6377 = vrcp.f32 %v4182_v8 }
 0x90e   : > { %6379 = vrcp.f32 %v4179_v44  ;;  %v6370_v22 = vpop.eup %6369  ;;  %v3196_v59 = vpack.c.bf16 %v3154_v50, %v3152_v35  ;;  %v3195_v52 = vpack.c.bf16 %v3153_v39, %v3151_v30  ;;  %v11255_v50 = vld [vmem:[#allocation12_spill] sm:$0xff]  ;;  %v11257_v44 = vld [vmem:[#allocation43_spill] sm:$0xff] }
 0x90f   : > { %v6372_v4 = vpop.eup %6371  ;;  %v4282_v62 = vmul.f32 %v6370_v22, %v11248_v16  ;;  %v4281_v13 = vmul.f32 %v6370_v22, %v11249_v58 }
 0x910   : > { %4672 = vmatprep.mubr.bf16.mxu1 %v3196_v59  ;;  %v4280_v27 = vmul.f32 %v6372_v4, %v11250_v55  ;;  %v4279_v0 = vmul.f32 %v6372_v4, %v11251_v41 }
 0x911   : > { %v3060_v24 = vpop.xlane.xlu0 %3059  ;;  %4673 = vmatmul.mubr.bf16.gmra.mrb[168].mxu1 %v3195_v52  ;;  %v11258_v52 = vld [vmem:[#allocation8_spill] sm:$0xff] }
 0x912   : > { %6381 = vrcp.f32 %v3060_v24  ;;  %v4324_v20 = vpack.c.bf16 %v4282_v62, %v4280_v27  ;;  %v4323_v46 = vpack.c.bf16 %v4281_v13, %v4279_v0  ;;  %v11259_v62 = vld [vmem:[#allocation96_spill] sm:$0xff]  ;;  %v11260_v13 = vld [vmem:[#allocation45_spill] sm:$0xff] }
 0x913   : > { %v3057_v47 = vpop.xlane.xlu1 %3056  ;;  %v6374_v56 = vpop.eup %6373 }
 0x914   : > { %6383 = vrcp.f32 %v3057_v47  ;;  %v6376_v21 = vpop.eup %6375  ;;  %v3158_v7 = vmul.f32 %v6374_v56, %v9777_v12  ;;  %v3157_v2 = vmul.f32 %v6374_v56, %v11252_v9  ;;  %4511 = vmatprep.mubr.bf16.mxu0 %v4324_v20  ;;  %v11256_v12 = vld [vmem:[#allocation46_spill] sm:$0xff]  ;;  %v11261_v56 = vld [vmem:[#allocation61_spill] sm:$0xff] }
 0x915   : > { %v4188_v28 = vpop.xlane.xlu0 %4187  ;;  %v3156_v32 = vmul.f32 %v6376_v21, %v9784_v43  ;;  %v3155_v5 = vmul.f32 %v6376_v21, %v11253_v14  ;;  %4512 = vmatmul.mubr.bf16.gmra.mrb[136].mxu0 %v4323_v46  ;;  %v11262_v46 = vld [vmem:[#allocation48_spill] sm:$0xff] }
 0x916   : > { %6385 = vrcp.f32 %v4188_v28 }
 0x917   : > { %v4185_v29 = vpop.xlane.xlu1 %4184  ;;  %v6378_v17 = vpop.eup %6377  ;;  %v3198_v42 = vpack.c.bf16 %v3158_v7, %v3156_v32  ;;  %v3197_v23 = vpack.c.bf16 %v3157_v2, %v3155_v5 }
 0x918   : > { %6387 = vrcp.f32 %v4185_v29  ;;  %v6380_v57 = vpop.eup %6379  ;;  %v4286_v8 = vmul.f32 %v6378_v17, %v11254_v63  ;;  %v4285_v36 = vmul.f32 %v6378_v17, %v11255_v50  ;;  %v11263_v17 = vld [vmem:[#allocation51_spill] sm:$0xff] }
 0x919   : > { %4680 = vmatprep.mubr.bf16.mxu1 %v3198_v42  ;;  %v4284_v39 = vmul.f32 %v6380_v57, %v11256_v12  ;;  %v4283_v54 = vmul.f32 %v6380_v57, %v11257_v44 }
 0x91a   : > { %4681 = vmatmul.mubr.bf16.gmra.mrb[172].mxu1 %v3197_v23 }
 0x91b   : > { %v4326_v61 = vpack.c.bf16 %v4286_v8, %v4284_v39  ;;  %v4325_v30 = vpack.c.bf16 %v4285_v36, %v4283_v54 }
 0x91c   : > { %v3066_v35 = vpop.xlane.xlu0 %3065  ;;  %v6382_v43 = vpop.eup %6381 }
 0x91d   : > { %6389 = vrcp.f32 %v3066_v35  ;;  %v3162_v59 = vmul.f32 %v6382_v43, %v9839_v10  ;;  %v3161_v4 = vmul.f32 %v6382_v43, %v11258_v52  ;;  %4519 = vmatprep.mubr.bf16.mxu0 %v4326_v61 }
 0x91e   : > { %v3063_v22 = vpop.xlane.xlu1 %3062  ;;  %v6384_v24 = vpop.eup %6383  ;;  %4520 = vmatmul.mubr.bf16.gmra.mrb[140].mxu0 %v4325_v30 }
 0x91f   : > { %6391 = vrcp.f32 %v3063_v22  ;;  %v3160_v58 = vmul.f32 %v6384_v24, %v11259_v62  ;;  %v3159_v55 = vmul.f32 %v6384_v24, %v11260_v13  ;;  %v11264_v62 = vld [vmem:[#allocation56_spill] sm:$0xff]  ;;  %v11265_v13 = vld [vmem:[#allocation113_spill] sm:$0xff] }
 0x920   : > { %v4194_v16 = vpop.xlane.xlu0 %4193  ;;  %v6386_v27 = vpop.eup %6385 }
 0x921   : > { %6393 = vrcp.f32 %v4194_v16  ;;  %v3200_v0 = vpack.c.bf16 %v3162_v59, %v3160_v58  ;;  %v3199_v47 = vpack.c.bf16 %v3161_v4, %v3159_v55  ;;  %v4290_v20 = vmul.f32 %v6386_v27, %v11261_v56 }
 0x922   : > { %v4191_v41 = vpop.xlane.xlu1 %4190  ;;  %v4289_v10 = vmul.f32 %v6386_v27, %v11262_v46  ;;  %v6388_v21 = vpop.eup %6387  ;;  %v11267_v27 = vld [vmem:[#allocation97_spill] sm:$0xff] }
 0x923   : > { %6395 = vrcp.f32 %v4191_v41  ;;  %4688 = vmatprep.mubr.bf16.mxu1 %v3200_v0  ;;  %v4288_v28 = vmul.f32 %v6388_v21, %v9871_v26  ;;  %v4287_v7 = vmul.f32 %v6388_v21, %v9863_v49 }
 0x924   : > { %4689 = vmatmul.mubr.bf16.gmra.mrb[176].mxu1 %v3199_v47 }
 0x925   : > { %v3072_v9 = vpop.xlane.xlu0 %3071  ;;  %v4328_v32 = vpack.c.bf16 %v4290_v20, %v4288_v28  ;;  %v4327_v14 = vpack.c.bf16 %v4289_v10, %v4287_v7 }
 0x926   : > { %6397 = vrcp.f32 %v3072_v9  ;;  %v3069_v2 = vpop.xlane.xlu1 %3068 }
 0x927   : > { %v6390_v5 = vpop.eup %6389  ;;  %6399 = vrcp.f32 %v3069_v2  ;;  %4527 = vmatprep.mubr.bf16.mxu0 %v4328_v32 }
 0x928   : > { %v3166_v29 = vmul.f32 %v6390_v5, %v9897_v1  ;;  %v3165_v42 = vmul.f32 %v6390_v5, %v11263_v17  ;;  %4528 = vmatmul.mubr.bf16.gmra.mrb[144].mxu0 %v4327_v14 }
 0x929   : > { %v6392_v23 = vpop.eup %6391  ;;  %v4200_v57 = vpop.xlane.xlu0 %4199 }
 0x92a   : > { %6401 = vrcp.f32 %v4200_v57  ;;  %v4197_v26 = vpop.xlane.xlu1 %4196  ;;  %v3164_v49 = vmul.f32 %v6392_v23, %v9906_v38  ;;  %v3163_v63 = vmul.f32 %v6392_v23, %v9901_v6 }
 0x92b   : > { %v6394_v8 = vpop.eup %6393  ;;  %6403 = vrcp.f32 %v4197_v26 }
 0x92c   : > { %v3202_v50 = vpack.c.bf16 %v3166_v29, %v3164_v49  ;;  %v3201_v36 = vpack.c.bf16 %v3165_v42, %v3163_v63  ;;  %v4294_v12 = vmul.f32 %v6394_v8, %v9912_v31  ;;  %v4293_v39 = vmul.f32 %v6394_v8, %v9909_v19 }
 0x92d   : > { %v6396_v1 = vpop.eup %6395  ;;  %v3078_v44 = vpop.xlane.xlu0 %3077 }
 0x92e   : > { %6405 = vrcp.f32 %v3078_v44  ;;  %v3075_v54 = vpop.xlane.xlu1 %3074  ;;  %4696 = vmatprep.mubr.bf16.mxu1 %v3202_v50  ;;  %v4292_v35 = vmul.f32 %v6396_v1, %v9916_v33  ;;  %v4291_v43 = vmul.f32 %v6396_v1, %v9914_v51 }
 0x92f   : > { %6407 = vrcp.f32 %v3075_v54  ;;  %4697 = vmatmul.mubr.bf16.gmra.mrb[180].mxu1 %v3201_v36  ;;  %v11269_v36 = vld [vmem:[#allocation6_spill] sm:$0xff] }
 0x930   : > { %v6398_v6 = vpop.eup %6397  ;;  %v4330_v38 = vpack.c.bf16 %v4294_v12, %v4292_v35  ;;  %v4329_v61 = vpack.c.bf16 %v4293_v39, %v4291_v43 }
 0x931   : > { %v6400_v30 = vpop.eup %6399  ;;  %v4206_v22 = vpop.xlane.xlu0 %4205  ;;  %v3170_v31 = vmul.f32 %v6398_v6, %v9939_v3  ;;  %v3169_v19 = vmul.f32 %v6398_v6, %v9936_v37  ;;  %v11266_v3 = vld [vmem:[#allocation54_spill] sm:$0xff] }
 0x932   : > { %6409 = vrcp.f32 %v4206_v22  ;;  %4535 = vmatprep.mubr.bf16.mxu0 %v4330_v38  ;;  %v4203_v59 = vpop.xlane.xlu1 %4202  ;;  %v3168_v52 = vmul.f32 %v6400_v30, %v9948_v34  ;;  %v3167_v33 = vmul.f32 %v6400_v30, %v9946_v15 }
 0x933   : > { %6411 = vrcp.f32 %v4203_v59  ;;  %4536 = vmatmul.mubr.bf16.gmra.mrb[148].mxu0 %v4329_v61 }
 0x934   : > { %v6402_v51 = vpop.eup %6401  ;;  %v3204_v4 = vpack.c.bf16 %v3170_v31, %v3168_v52  ;;  %v3203_v24 = vpack.c.bf16 %v3169_v19, %v3167_v33 }
 0x935   : > { %v6404_v16 = vpop.eup %6403  ;;  %v4298_v58 = vmul.f32 %v6402_v51, %v11264_v62  ;;  %v4297_v55 = vmul.f32 %v6402_v51, %v11265_v13 }
 0x936   : > { %4704 = vmatprep.mubr.bf16.mxu1 %v3204_v4  ;;  %v4296_v37 = vmul.f32 %v6404_v16, %v11266_v3  ;;  %v4295_v41 = vmul.f32 %v6404_v16, %v11267_v27 }
 0x937   : > { %4705 = vmatmul.mubr.bf16.gmra.mrb[184].mxu1 %v3203_v24 }
 0x938   : > { %v6406_v0 = vpop.eup %6405  ;;  %v4332_v34 = vpack.c.bf16 %v4298_v58, %v4296_v37  ;;  %v4331_v47 = vpack.c.bf16 %v4297_v55, %v4295_v41 }
 0x939   : > { %v6408_v15 = vpop.eup %6407  ;;  %v3174_v56 = vmul.f32 %v6406_v0, %v9975_v18  ;;  %v3173_v20 = vmul.f32 %v6406_v0, %v9972_v11 }
 0x93a   : > { %4543 = vmatprep.mubr.bf16.mxu0 %v4332_v34  ;;  %v3172_v46 = vmul.f32 %v6408_v15, %v9988_v53  ;;  %v3171_v10 = vmul.f32 %v6408_v15, %v9986_v60 }
 0x93b   : > { %4544 = vmatmul.mubr.bf16.gmra.mrb[152].mxu0 %v4331_v47 }
 0x93c   : > { %v6410_v21 = vpop.eup %6409  ;;  %v3206_v28 = vpack.c.bf16 %v3174_v56, %v3172_v46  ;;  %v3205_v7 = vpack.c.bf16 %v3173_v20, %v3171_v10 }
 0x93d   : > { %v6412_v9 = vpop.eup %6411  ;;  %v4302_v2 = vmul.f32 %v6410_v21, %v9997_v48  ;;  %v4301_v32 = vmul.f32 %v6410_v21, %v9979_v25  ;;  %v11268_v25 = vld [vmem:[#allocation5_spill] sm:$0xff] }
 0x93e   : > { %4712 = vmatprep.mubr.bf16.mxu1 %v3206_v28  ;;  %v4300_v14 = vmul.f32 %v6412_v9, %v9992_v40  ;;  %v4299_v18 = vmul.f32 %v6412_v9, %v9990_v45  ;;  %v4755_v49 = vsub.s32 2, %v11268_v25 }
 0x93f   : > { %4713 = vmatmul.mubr.bf16.gmra.mrb[188].mxu1 %v3205_v7 }
 0x940   : > { %v4334_v11 = vpack.c.bf16 %v4302_v2, %v4300_v14  ;;  %v4333_v5 = vpack.c.bf16 %v4301_v32, %v4299_v18  ;;  %v10131_v12 = vrot.slane %v11269_v36, %v4755_v49 }
 0x942   : > { %4551 = vmatprep.mubr.bf16.mxu0 %v4334_v11 }
 0x943   : > { %4552 = vmatmul.mubr.bf16.gmra.mrb[156].mxu0 %v4333_v5 }
 0x973   : > { %v5644_v53 = vpop.f32.mrb[128].mxu1 }
 0x974   : > { %v5645_v60 = vpop.f32.mrb[129].mxu1 }
 0x975   : > { %v5646_v29 = vadd.f32 %v5645_v60, %v5644_v53  ;;  %v5647_v17 = vpop.f32.mrb[130].mxu1 }
 0x976   : > { %v5648_v42 = vpop.f32.mrb[131].mxu1 }
 0x977   : > { %v5649_v23 = vadd.f32 %v5648_v42, %v5647_v17 }
 0x981   : > { %v5532_v57 = vpop.f32.mrb[96].mxu0 }
 0x982   : > { %v5533_v48 = vpop.f32.mrb[97].mxu0 }
 0x983   : > { %v5534_v26 = vadd.f32 %v5533_v48, %v5532_v57  ;;  %v5535_v63 = vpop.f32.mrb[98].mxu0 }
 0x984   : > { %v5536_v40 = vpop.f32.mrb[99].mxu0 }
 0x985   : > { %v4595_v8 = vadd.f32 %v5646_v29, %v5534_v26  ;;  %v5537_v45 = vadd.f32 %v5536_v40, %v5535_v63  ;;  %v6023_v40 = vld [vmem:[%s10163_s30 + $0x4] ss:$8 sps:$4 sm:$0xff]  }
 0x986   : > { %4861 = vmatprep.mubr.bf16.mxu0 %v6023_v40 }
 0x987   : > { %v4721_v50 = vmul.f32 0.5, %v4595_v8  ;;  %v4598_v39 = vadd.f32 %v5649_v23, %v5537_v45  ;;  %v5650_v1 = vpop.f32.mrb[132].mxu1 }
 0x988   : > { %v5651_v44 = vpop.f32.mrb[133].mxu1 }
 0x989   : > { %v4722_v54 = vmul.f32 0.5, %v4598_v39  ;;  %v5652_v35 = vadd.f32 %v5651_v44, %v5650_v1  ;;  %v5653_v43 = vpop.f32.mrb[134].mxu1  ;;  %v10134_v38 = vadd.f32 %v10131_v12, %v4721_v50 }
 0x98a   : > { %v5654_v6 = vpop.f32.mrb[135].mxu1 }
 0x98b   : > { %v10137_v61 = vadd.f32 %v10131_v12, %v4722_v54  ;;  %v5655_v30 = vadd.f32 %v5654_v6, %v5653_v43 }
 0x98c   : > { %v5538_v22 = vpop.f32.mrb[100].mxu0 }
 0x98d   : > { %v4793_v31 = vpack.c.bf16 %v10137_v61, %v10134_v38  ;;  %v5539_v19 = vpop.f32.mrb[101].mxu0 }
 0x98e   : > { %v5540_v59 = vadd.f32 %v5539_v19, %v5538_v22  ;;  %v5541_v52 = vpop.f32.mrb[102].mxu0 }
 0x98f   : > { %v5542_v33 = vpop.f32.mrb[103].mxu0 }
 0x990   : > { %v4603_v51 = vadd.f32 %v5652_v35, %v5540_v59  ;;  %v5543_v4 = vadd.f32 %v5542_v33, %v5541_v52 }
 0x991   : > { %v5656_v24 = vpop.f32.mrb[136].mxu1 }
 0x992   : > { %v4723_v16 = vmul.f32 0.5, %v4603_v51  ;;  %v4606_v62 = vadd.f32 %v5655_v30, %v5543_v4  ;;  %v5657_v58 = vpop.f32.mrb[137].mxu1 }
 0x993   : > { %v5658_v13 = vadd.f32 %v5657_v58, %v5656_v24  ;;  %v5659_v55 = vpop.f32.mrb[138].mxu1 }
 0x994   : > { %v4724_v3 = vmul.f32 0.5, %v4606_v62  ;;  %v5660_v37 = vpop.f32.mrb[139].mxu1  ;;  %v10142_v41 = vadd.f32 %v10131_v12, %v4723_v16 }
 0x995   : > { %v5661_v27 = vadd.f32 %v5660_v37, %v5659_v55 }
 0x996   : > { %v10145_v0 = vadd.f32 %v10131_v12, %v4724_v3  ;;  %v5544_v34 = vpop.f32.mrb[104].mxu0 }
 0x997   : > { %v5545_v47 = vpop.f32.mrb[105].mxu0 }
 0x998   : > { %v4794_v15 = vpack.c.bf16 %v10145_v0, %v10142_v41  ;;  %v5546_v56 = vadd.f32 %v5545_v47, %v5544_v34  ;;  %v5547_v20 = vpop.f32.mrb[106].mxu0 }
 0x999   : > { %v5548_v46 = vpop.f32.mrb[107].mxu0 }
 0x99a   : > { %v4611_v10 = vadd.f32 %v5658_v13, %v5546_v56  ;;  %v5549_v21 = vadd.f32 %v5548_v46, %v5547_v20 }
 0x99b   : > { %v5662_v28 = vpop.f32.mrb[140].mxu1 }
 0x99c   : > { %v4725_v7 = vmul.f32 0.5, %v4611_v10  ;;  %v4614_v9 = vadd.f32 %v5661_v27, %v5549_v21  ;;  %v5663_v2 = vpop.f32.mrb[141].mxu1 }
 0x99d   : > { %v5664_v32 = vadd.f32 %v5663_v2, %v5662_v28  ;;  %v5665_v14 = vpop.f32.mrb[142].mxu1 }
 0x99e   : > { %v4726_v18 = vmul.f32 0.5, %v4614_v9  ;;  %v5666_v11 = vpop.f32.mrb[143].mxu1  ;;  %v10150_v53 = vadd.f32 %v10131_v12, %v4725_v7 }
 0x99f   : > { %v5667_v5 = vadd.f32 %v5666_v11, %v5665_v14 }
 0x9a0   : > { %v10153_v60 = vadd.f32 %v10131_v12, %v4726_v18 }
 0x9a1   : > { %v5550_v29 = vpop.f32.mrb[108].mxu0 }
 0x9a2   : > { %v5551_v17 = vpop.f32.mrb[109].mxu0  ;;  %v4795_v42 = vpack.c.bf16 %v10153_v60, %v10150_v53 }
 0x9a3   : > { %v5552_v23 = vadd.f32 %v5551_v17, %v5550_v29  ;;  %v5553_v57 = vpop.f32.mrb[110].mxu0 }
 0x9a4   : > { %v5554_v48 = vpop.f32.mrb[111].mxu0 }
 0x9a5   : > { %v4619_v26 = vadd.f32 %v5664_v32, %v5552_v23  ;;  %v5555_v49 = vadd.f32 %v5554_v48, %v5553_v57  ;;  %v5668_v63 = vpop.f32.mrb[144].mxu1 }
 0x9a6   : > { %v5669_v8 = vpop.f32.mrb[145].mxu1 }
 0x9a7   : > { %v4727_v45 = vmul.f32 0.5, %v4619_v26  ;;  %v4622_v50 = vadd.f32 %v5667_v5, %v5555_v49  ;;  %v5670_v39 = vadd.f32 %v5669_v8, %v5668_v63  ;;  %v5671_v1 = vpop.f32.mrb[146].mxu1 }
 0x9a8   : > { %v5672_v44 = vpop.f32.mrb[147].mxu1 }
 0x9a9   : > { %v4728_v54 = vmul.f32 0.5, %v4622_v50  ;;  %v5673_v35 = vadd.f32 %v5672_v44, %v5671_v1  ;;  %v10167_v6 = vadd.f32 %v10131_v12, %v4727_v45 }
 0x9aa   : > { %v5556_v43 = vpop.f32.mrb[112].mxu0 }
 0x9ab   : > { %v10170_v30 = vadd.f32 %v10131_v12, %v4728_v54  ;;  %v5557_v22 = vpop.f32.mrb[113].mxu0 }
 0x9ac   : > { %v5558_v19 = vadd.f32 %v5557_v22, %v5556_v43  ;;  %v5559_v59 = vpop.f32.mrb[114].mxu0 }
 0x9ad   : > { %v4796_v52 = vpack.c.bf16 %v10170_v30, %v10167_v6  ;;  %v5560_v33 = vpop.f32.mrb[115].mxu0 }
 0x9ae   : > { %v4627_v51 = vadd.f32 %v5670_v39, %v5558_v19  ;;  %v5561_v4 = vadd.f32 %v5560_v33, %v5559_v59  ;;  %v5674_v24 = vpop.f32.mrb[148].mxu1 }
 0x9af   : > { %v5675_v16 = vpop.f32.mrb[149].mxu1 }
 0x9b0   : > { %v4729_v62 = vmul.f32 0.5, %v4627_v51  ;;  %v4630_v58 = vadd.f32 %v5673_v35, %v5561_v4  ;;  %v5676_v13 = vadd.f32 %v5675_v16, %v5674_v24  ;;  %v5677_v55 = vpop.f32.mrb[150].mxu1 }
 0x9b1   : > { %v5678_v3 = vpop.f32.mrb[151].mxu1 }
 0x9b2   : > { %v4730_v37 = vmul.f32 0.5, %v4630_v58  ;;  %v5679_v27 = vadd.f32 %v5678_v3, %v5677_v55  ;;  %v10175_v47 = vadd.f32 %v10131_v12, %v4729_v62 }
 0x9b3   : > { %v5562_v34 = vpop.f32.mrb[116].mxu0 }
 0x9b4   : > { %v10178_v56 = vadd.f32 %v10131_v12, %v4730_v37  ;;  %v5563_v20 = vpop.f32.mrb[117].mxu0 }
 0x9b5   : > { %v5564_v46 = vadd.f32 %v5563_v20, %v5562_v34  ;;  %v5565_v10 = vpop.f32.mrb[118].mxu0 }
 0x9b6   : > { %v4797_v21 = vpack.c.bf16 %v10178_v56, %v10175_v47  ;;  %v5566_v28 = vpop.f32.mrb[119].mxu0 }
 0x9b7   : > { %v4635_v7 = vadd.f32 %v5676_v13, %v5564_v46  ;;  %v5567_v9 = vadd.f32 %v5566_v28, %v5565_v10  ;;  %v5680_v2 = vpop.f32.mrb[152].mxu1 }
 0x9b8   : > { %v5681_v32 = vpop.f32.mrb[153].mxu1 }
 0x9b9   : > { %v4731_v14 = vmul.f32 0.5, %v4635_v7  ;;  %v4638_v18 = vadd.f32 %v5679_v27, %v5567_v9  ;;  %v5682_v11 = vadd.f32 %v5681_v32, %v5680_v2  ;;  %v5683_v5 = vpop.f32.mrb[154].mxu1 }
 0x9ba   : > { %v5684_v29 = vpop.f32.mrb[155].mxu1 }
 0x9bb   : > { %v4732_v17 = vmul.f32 0.5, %v4638_v18  ;;  %v5685_v23 = vadd.f32 %v5684_v29, %v5683_v5  ;;  %v10183_v48 = vadd.f32 %v10131_v12, %v4731_v14 }
 0x9bc   : > { %v5568_v57 = vpop.f32.mrb[120].mxu0 }
 0x9bd   : > { %v10186_v26 = vadd.f32 %v10131_v12, %v4732_v17  ;;  %v5569_v49 = vpop.f32.mrb[121].mxu0 }
 0x9be   : > { %v5570_v63 = vadd.f32 %v5569_v49, %v5568_v57  ;;  %v5571_v40 = vpop.f32.mrb[122].mxu0 }
 0x9bf   : > { %v4798_v8 = vpack.c.bf16 %v10186_v26, %v10183_v48  ;;  %v5572_v45 = vpop.f32.mrb[123].mxu0 }
 0x9c0   : > { %v4643_v50 = vadd.f32 %v5682_v11, %v5570_v63  ;;  %v5573_v39 = vadd.f32 %v5572_v45, %v5571_v40 }
 0x9c2   : > { %v4733_v1 = vmul.f32 0.5, %v4643_v50  ;;  %v4646_v44 = vadd.f32 %v5685_v23, %v5573_v39  ;;  %v5686_v54 = vpop.f32.mrb[156].mxu1 }
 0x9c3   : > { %v5687_v43 = vpop.f32.mrb[157].mxu1 }
 0x9c4   : > { %v4734_v35 = vmul.f32 0.5, %v4646_v44  ;;  %v5688_v22 = vadd.f32 %v5687_v43, %v5686_v54  ;;  %v5689_v19 = vpop.f32.mrb[158].mxu1  ;;  %v10191_v59 = vadd.f32 %v10131_v12, %v4733_v1 }
 0x9c5   : > { %v5690_v51 = vpop.f32.mrb[159].mxu1 }
 0x9c6   : > { %v10194_v33 = vadd.f32 %v10131_v12, %v4734_v35  ;;  %v5691_v4 = vadd.f32 %v5690_v51, %v5689_v19 }
 0x9c8   : > { %v4799_v24 = vpack.c.bf16 %v10194_v33, %v10191_v59  ;;  %v6027_v59 = vld [vmem:[%s10280_s3 + $0x24] sm:$0xff]  }
 0x9c9   : > { %v5574_v16 = vpop.f32.mrb[124].mxu0 }
 0x9ca   : > { %v5575_v62 = vpop.f32.mrb[125].mxu0 }
 0x9cb   : > { %v5576_v58 = vadd.f32 %v5575_v62, %v5574_v16  ;;  %v5577_v13 = vpop.f32.mrb[126].mxu0 }
 0x9cc   : > { %v5578_v55 = vpop.f32.mrb[127].mxu0 }
 0x9cd   : > { %v4651_v3 = vadd.f32 %v5688_v22, %v5576_v58  ;;  %v5579_v37 = vadd.f32 %v5578_v55, %v5577_v13 }
 0x9cf   : > { %v4735_v27 = vmul.f32 0.5, %v4651_v3  ;;  %v4654_v34 = vadd.f32 %v5691_v4, %v5579_v37 }
 0x9d1   : > { %v5692_v20 = vpop.f32.mrb[160].mxu1  ;;  %v4736_v46 = vmul.f32 0.5, %v4654_v34  ;;  %v10199_v9 = vadd.f32 %v10131_v12, %v4735_v27 }
 0x9d2   : > { %v5693_v10 = vpop.f32.mrb[161].mxu1 }
 0x9d3   : > { %v5694_v28 = vadd.f32 %v5693_v10, %v5692_v20  ;;  %v5695_v7 = vpop.f32.mrb[162].mxu1  ;;  %v10202_v2 = vadd.f32 %v10131_v12, %v4736_v46 }
 0x9d4   : > { %v5696_v32 = vpop.f32.mrb[163].mxu1 }
 0x9d5   : > { %v5697_v14 = vadd.f32 %v5696_v32, %v5695_v7  ;;  %v4800_v18 = vpack.c.bf16 %v10202_v2, %v10199_v9 }
 0x9d6   : > { %v5580_v11 = vpop.f32.mrb[128].mxu0 }
 0x9d7   : > { %v5581_v5 = vpop.f32.mrb[129].mxu0 }
 0x9d8   : > { %v5582_v29 = vadd.f32 %v5581_v5, %v5580_v11  ;;  %v5583_v17 = vpop.f32.mrb[130].mxu0 }
 0x9d9   : > { %v5584_v23 = vpop.f32.mrb[131].mxu0 }
 0x9da   : > { %v4659_v57 = vadd.f32 %v5694_v28, %v5582_v29  ;;  %v5585_v49 = vadd.f32 %v5584_v23, %v5583_v17  ;;  %v5698_v63 = vpop.f32.mrb[164].mxu1 }
 0x9db   : > { %v5699_v50 = vpop.f32.mrb[165].mxu1 }
 0x9dc   : > { %v4737_v40 = vmul.f32 0.5, %v4659_v57  ;;  %v4662_v45 = vadd.f32 %v5697_v14, %v5585_v49  ;;  %v5700_v39 = vadd.f32 %v5699_v50, %v5698_v63  ;;  %v5701_v1 = vpop.f32.mrb[166].mxu1 }
 0x9dd   : > { %v5702_v54 = vpop.f32.mrb[167].mxu1 }
 0x9de   : > { %v4738_v44 = vmul.f32 0.5, %v4662_v45  ;;  %v5703_v35 = vadd.f32 %v5702_v54, %v5701_v1  ;;  %v4773_v22 = vadd.f32 %v10131_v12, %v4737_v40 }
 0x9df   : > { %v5586_v43 = vpop.f32.mrb[132].mxu0 }
 0x9e0   : > { %v4774_v19 = vadd.f32 %v10131_v12, %v4738_v44  ;;  %v5587_v51 = vpop.f32.mrb[133].mxu0 }
 0x9e1   : > { %v5588_v4 = vadd.f32 %v5587_v51, %v5586_v43  ;;  %v5589_v16 = vpop.f32.mrb[134].mxu0 }
 0x9e2   : > { %v5590_v62 = vpop.f32.mrb[135].mxu0  ;;  %v4801_v58 = vpack.c.bf16 %v4774_v19, %v4773_v22 }
 0x9e3   : > { %v4667_v13 = vadd.f32 %v5700_v39, %v5588_v4  ;;  %v5591_v55 = vadd.f32 %v5590_v62, %v5589_v16 }
 0x9e4   : > { %v5704_v3 = vpop.f32.mrb[168].mxu1  ;;  %5740 = vmatprep.subr.bf16.mxu0 %v4801_v58 }
 0x9e5   : > { %v4739_v37 = vmul.f32 0.5, %v4667_v13  ;;  %v4670_v27 = vadd.f32 %v5703_v35, %v5591_v55  ;;  %v5705_v34 = vpop.f32.mrb[169].mxu1  ;;  %5741 = vmatpush3.bf16.msra.mxu0 %v4793_v31 }
 0x9e6   : > { %v5706_v20 = vadd.f32 %v5705_v34, %v5704_v3  ;;  %v5707_v46 = vpop.f32.mrb[170].mxu1 }
 0x9e7   : > { %v4740_v10 = vmul.f32 0.5, %v4670_v27  ;;  %v5708_v28 = vpop.f32.mrb[171].mxu1  ;;  %v4775_v14 = vadd.f32 %v10131_v12, %v4739_v37 }
 0x9e8   : > { %v5709_v7 = vadd.f32 %v5708_v28, %v5707_v46  ;;  %v5592_v32 = vpop.f32.mrb[136].mxu0 }
 0x9e9   : > { %v4776_v11 = vadd.f32 %v10131_v12, %v4740_v10  ;;  %v5593_v5 = vpop.f32.mrb[137].mxu0 }
 0x9ea   : > { %v5594_v29 = vadd.f32 %v5593_v5, %v5592_v32  ;;  %v5595_v17 = vpop.f32.mrb[138].mxu0 }
 0x9eb   : > { %v5596_v23 = vpop.f32.mrb[139].mxu0  ;;  %v4802_v57 = vpack.c.bf16 %v4776_v11, %v4775_v14 }
 0x9ec   : > { %v4675_v49 = vadd.f32 %v5706_v20, %v5594_v29  ;;  %v5597_v63 = vadd.f32 %v5596_v23, %v5595_v17 }
 0x9ed   : > { %v5710_v40 = vpop.f32.mrb[172].mxu1  ;;  %5742 = vmatprep.subr.bf16.mxu0 %v4802_v57 }
 0x9ee   : > { %v5711_v38 = vpop.f32.mrb[173].mxu1  ;;  %v4741_v61 = vmul.f32 0.5, %v4675_v49  ;;  %v4678_v31 = vadd.f32 %v5709_v7, %v5597_v63  ;;  %5743 = vmatpush3.bf16.msra.mxu0 %v4794_v15 }
 0x9ef   : > { %v5712_v45 = vadd.f32 %v5711_v38, %v5710_v40  ;;  %v5713_v50 = vpop.f32.mrb[174].mxu1 }
 0x9f0   : > { %v5714_v39 = vpop.f32.mrb[175].mxu1  ;;  %v4742_v1 = vmul.f32 0.5, %v4678_v31  ;;  %v4777_v43 = vadd.f32 %v10131_v12, %v4741_v61 }
 0x9f1   : > { %v5715_v44 = vadd.f32 %v5714_v39, %v5713_v50  ;;  %v5598_v54 = vpop.f32.mrb[140].mxu0 }
 0x9f2   : > { %v5599_v35 = vpop.f32.mrb[141].mxu0  ;;  %v4778_v22 = vadd.f32 %v10131_v12, %v4742_v1 }
 0x9f3   : > { %v5600_v19 = vadd.f32 %v5599_v35, %v5598_v54  ;;  %v5601_v51 = vpop.f32.mrb[142].mxu0 }
 0x9f4   : > { %v5602_v4 = vpop.f32.mrb[143].mxu0  ;;  %v4803_v58 = vpack.c.bf16 %v4778_v22, %v4777_v43 }
 0x9f5   : > { %v4683_v16 = vadd.f32 %v5712_v45, %v5600_v19  ;;  %v5603_v62 = vadd.f32 %v5602_v4, %v5601_v51 }
 0x9f6   : > { %5744 = vmatprep.subr.bf16.mxu0 %v4803_v58 }
 0x9f7   : > { %v5716_v13 = vpop.f32.mrb[176].mxu1  ;;  %v4743_v55 = vmul.f32 0.5, %v4683_v16  ;;  %v4686_v3 = vadd.f32 %v5715_v44, %v5603_v62  ;;  %5745 = vmatpush3.bf16.msra.mxu0 %v4795_v42 }
 0x9f8   : > { %v5717_v41 = vpop.f32.mrb[177].mxu1 }
 0x9f9   : > { %v5718_v0 = vadd.f32 %v5717_v41, %v5716_v13  ;;  %v5719_v15 = vpop.f32.mrb[178].mxu1  ;;  %v4744_v37 = vmul.f32 0.5, %v4686_v3  ;;  %v4779_v46 = vadd.f32 %v10131_v12, %v4743_v55 }
 0x9fa   : > { %v5720_v27 = vpop.f32.mrb[179].mxu1 }
 0x9fb   : > { %v5721_v34 = vadd.f32 %v5720_v27, %v5719_v15  ;;  %v5604_v20 = vpop.f32.mrb[144].mxu0  ;;  %v4780_v10 = vadd.f32 %v10131_v12, %v4744_v37 }
 0x9fc   : > { %v5605_v28 = vpop.f32.mrb[145].mxu0 }
 0x9fd   : > { %v5606_v7 = vadd.f32 %v5605_v28, %v5604_v20  ;;  %v5607_v32 = vpop.f32.mrb[146].mxu0  ;;  %v4804_v11 = vpack.c.bf16 %v4780_v10, %v4779_v46 }
 0x9fe   : > { %v5608_v14 = vpop.f32.mrb[147].mxu0 }
 0x9ff   : > { %v4691_v5 = vadd.f32 %v5718_v0, %v5606_v7  ;;  %v5609_v29 = vadd.f32 %v5608_v14, %v5607_v32  ;;  %5746 = vmatprep.subr.bf16.mxu0 %v4804_v11 }
 0xa00   : > { %5747 = vmatpush3.bf16.msra.mxu0 %v4796_v52 }
 0xa01   : > { %v4745_v17 = vmul.f32 0.5, %v4691_v5  ;;  %v4694_v23 = vadd.f32 %v5721_v34, %v5609_v29 }
 0xa02   : > { %v5722_v53 = vpop.f32.mrb[180].mxu1 }
 0xa03   : > { %v5723_v60 = vpop.f32.mrb[181].mxu1  ;;  %v4746_v42 = vmul.f32 0.5, %v4694_v23  ;;  %v4781_v40 = vadd.f32 %v10131_v12, %v4745_v17 }
 0xa04   : > { %v5724_v57 = vadd.f32 %v5723_v60, %v5722_v53  ;;  %v5725_v49 = vpop.f32.mrb[182].mxu1 }
 0xa05   : > { %v5726_v63 = vpop.f32.mrb[183].mxu1  ;;  %v4782_v38 = vadd.f32 %v10131_v12, %v4746_v42 }
 0xa06   : > { %v5727_v61 = vadd.f32 %v5726_v63, %v5725_v49  ;;  %v5610_v31 = vpop.f32.mrb[148].mxu0 }
 0xa07   : > { %v5611_v45 = vpop.f32.mrb[149].mxu0  ;;  %v4805_v1 = vpack.c.bf16 %v4782_v38, %v4781_v40  ;;  %v6021_v40 = vld [vmem:[%s10163_s30] ss:$8 sps:$4 sm:$0xff]   ;;  %v6024_v38 = vld [vmem:[%s10163_s30 + $0x14] ss:$8 sps:$4 sm:$0xff]  }
 0xa08   : > { %v5612_v50 = vadd.f32 %v5611_v45, %v5610_v31  ;;  %v5613_v39 = vpop.f32.mrb[150].mxu0 }
 0xa09   : > { %v5614_v44 = vpop.f32.mrb[151].mxu0  ;;  %5748 = vmatprep.subr.bf16.mxu0 %v4805_v1 }
 0xa0a   : > { %v4699_v54 = vadd.f32 %v5724_v57, %v5612_v50  ;;  %v5615_v35 = vadd.f32 %v5614_v44, %v5613_v39  ;;  %v5728_v6 = vpop.f32.mrb[184].mxu1  ;;  %5749 = vmatpush3.bf16.msra.mxu0 %v4797_v21 }
 0xa0b   : > { %v5729_v30 = vpop.f32.mrb[185].mxu1 }
 0xa0c   : > { %v4747_v52 = vmul.f32 0.5, %v4699_v54  ;;  %v4702_v43 = vadd.f32 %v5727_v61, %v5615_v35  ;;  %v5730_v22 = vadd.f32 %v5729_v30, %v5728_v6  ;;  %v5731_v19 = vpop.f32.mrb[186].mxu1  ;;  %v6026_v61 = vld [vmem:[%s10163_s30 + $0x10] ss:$8 sps:$4 sm:$0xff]   ;;  %v4882_v30 = vsub.s32 3, %v11268_v25 }
 0xa0d   : > { %v5732_v51 = vpop.f32.mrb[187].mxu1 }
 0xa0e   : > { %v4748_v4 = vmul.f32 0.5, %v4702_v43  ;;  %v5733_v16 = vadd.f32 %v5732_v51, %v5731_v19  ;;  %v5616_v62 = vpop.f32.mrb[152].mxu0  ;;  %v4783_v13 = vadd.f32 %v10131_v12, %v4747_v52  ;;  %v4883_v52 = vrot.slane %v11269_v36, %v4882_v30 }
 0xa0f   : > { %v5617_v58 = vpop.f32.mrb[153].mxu0 }
 0xa10   : > { %v4784_v55 = vadd.f32 %v10131_v12, %v4748_v4  ;;  %v5618_v3 = vadd.f32 %v5617_v58, %v5616_v62  ;;  %v5619_v41 = vpop.f32.mrb[154].mxu0 }
 0xa11   : > { %v5620_v0 = vpop.f32.mrb[155].mxu0 }
 0xa12   : > { %v4707_v15 = vadd.f32 %v5730_v22, %v5618_v3  ;;  %v5621_v37 = vadd.f32 %v5620_v0, %v5619_v41  ;;  %v5734_v47 = vpop.f32.mrb[188].mxu1  ;;  %v4806_v56 = vpack.c.bf16 %v4784_v55, %v4783_v13 }
 0xa13   : > { %v5735_v21 = vpop.f32.mrb[189].mxu1 }
 0xa14   : > { %v4749_v27 = vmul.f32 0.5, %v4707_v15  ;;  %v4710_v34 = vadd.f32 %v5733_v16, %v5621_v37  ;;  %v5736_v20 = vadd.f32 %v5735_v21, %v5734_v47  ;;  %v5737_v46 = vpop.f32.mrb[190].mxu1  ;;  %5750 = vmatprep.subr.bf16.mxu0 %v4806_v56 }
 0xa15   : > { %v5738_v10 = vpop.f32.mrb[191].mxu1  ;;  %5751 = vmatpush3.bf16.msra.mxu0 %v4798_v8 }
 0xa16   : > { %v4750_v28 = vmul.f32 0.5, %v4710_v34  ;;  %v5739_v7 = vadd.f32 %v5738_v10, %v5737_v46  ;;  %v5622_v32 = vpop.f32.mrb[156].mxu0  ;;  %v4785_v11 = vadd.f32 %v10131_v12, %v4749_v27 }
 0xa17   : > { %v5623_v14 = vpop.f32.mrb[157].mxu0 }
 0xa18   : > { %v4786_v5 = vadd.f32 %v10131_v12, %v4750_v28  ;;  %v5624_v29 = vadd.f32 %v5623_v14, %v5622_v32  ;;  %v5625_v17 = vpop.f32.mrb[158].mxu0 }
 0xa19   : > { %v5626_v23 = vpop.f32.mrb[159].mxu0 }
 0xa1a   : > { %v4715_v53 = vadd.f32 %v5736_v20, %v5624_v29  ;;  %v5627_v60 = vadd.f32 %v5626_v23, %v5625_v17  ;;  %v4807_v42 = vpack.c.bf16 %v4786_v5, %v4785_v11 }
 0xa1c   : > { %v4751_v57 = vmul.f32 0.5, %v4715_v53  ;;  %v4718_v48 = vadd.f32 %v5739_v7, %v5627_v60  ;;  %5752 = vmatprep.subr.bf16.mxu0 %v4807_v42 }
 0xa1d   : > { %5753 = vmatpush3.bf16.msra.mxu0 %v4799_v24 }
 0xa1e   : > { %v4752_v26 = vmul.f32 0.5, %v4718_v48  ;;  %v4787_v8 = vadd.f32 %v10131_v12, %v4751_v57 }
 0xa20   : > { %v4788_v49 = vadd.f32 %v10131_v12, %v4752_v26  ;;  %v6028_v12 = vld [vmem:[%s10280_s3 + $0x2c] sm:$0xff]  }
 0xa22   : > { %v4808_v63 = vpack.c.bf16 %v4788_v49, %v4787_v8 }
 0xa24   : > { %5754 = vmatprep.subr.bf16.mxu0 %v4808_v63 }
 0xa25   : > { %5755 = vmatpush3.bf16.msra.mxu0 %v4800_v18 }
 0xa26   : > { %5878 = vmatprep.subr.bf16.mxu0 %v6027_v59 }
 0xa28   : > { %4862 = vmatmul.mubr.bf16.vlgmr.msra.gmra.mrb[160].mxu0 %v6021_v40 }
 0xa29   : > { %4869 = vmatprep.mubr.bf16.mxu0 %v6024_v38  ;;  %5879 = vmatpush3.bf16.msra.mxu0 %v6027_v59 }
 0xa2a   : > { %5880 = vmatprep.subr.bf16.mxu0 %v6028_v12 }
 0xa2d   : > { %5881 = vmatpush3.bf16.msra.mxu0 %v6028_v12 }
 0xa30   : > { %4870 = vmatmul.mubr.bf16.gmra.mrb[164].mxu0 %v6026_v61 }
 0xafb   : > { %v5756_v33 = vpop.f32.mrb[160].mxu0 }
 0xafc   : > { %v5757_v24 = vpop.f32.mrb[161].mxu0 }
 0xafd   : > { %v5758_v9 = vadd.f32 %v5757_v24, %v5756_v33  ;;  %v5759_v2 = vpop.f32.mrb[162].mxu0 }
 0xafe   : > { %v5760_v18 = vpop.f32.mrb[163].mxu0 }
 0xaff   : > { %v5761_v31 = vadd.f32 %v5760_v18, %v5759_v2 }
 0xb01   : > { %v4878_v45 = vpack.c.bf16 %v5761_v31, %v5758_v9 }
 0xb03   : > { %v5762_v50 = vpop.f32.mrb[164].mxu0  ;;  %5882 = vmatprep.mubr.msk.bf16.mxu0 %vm11270_vm14, %v4878_v45 }
 0xb04   : > { %v5763_v39 = vpop.f32.mrb[165].mxu0 }
 0xb05   : > { %v5764_v1 = vadd.f32 %v5763_v39, %v5762_v50  ;;  %v5765_v44 = vpop.f32.mrb[166].mxu0 }
 0xb06   : > { %v5766_v54 = vpop.f32.mrb[167].mxu0 }
 0xb07   : > { %v5767_v35 = vadd.f32 %v5766_v54, %v5765_v44 }
 0xb09   : > { %v4879_v6 = vpack.c.bf16 %v5767_v35, %v5764_v1 }
 0xb0b   : > { %5883 = vmatmul.mubr.msk.bf16.vlgmr.msra.gmra.mrb[168].mxu0 %vm11271_vm1, %v4879_v6 }
 0xbde   : > { %v5884_v43 = vpop.f32.mrb[168].mxu0 }
 0xbdf   : > { %v4945_v22 = vadd.f32 %v5884_v43, %v4883_v52  ;;  %v4936_v19 = vpop.f32.mrb[169].mxu0 }
 0xbe0   : > { %v4937_v51 = vadd.f32 %v4936_v19, %v4883_v52  ;;  %v5885_v4 = vpop.f32.mrb[170].mxu0 }
 0xbe1   : > { %4954 = vst.msk [vmem:[%s257_s12 + $0x10] sm:$0xff] %vm4951_vm9, %v4945_v22  ;;  %v4948_v16 = vadd.f32 %v5885_v4, %v4883_v52  ;;  %v4939_v62 = vpop.f32.mrb[171].mxu0 }
 0xbe2   : > { %4952 = vst.msk [vmem:[%s257_s12] sm:$0xff] %vm4951_vm9, %v4937_v51  ;;  %v4940_v58 = vadd.f32 %v4939_v62, %v4883_v52 }
 0xbe3   : > { %4955 = vst.msk [vmem:[%s257_s12 + $0x18] sm:$0xff] %vm4951_vm9, %v4948_v16 }
 0xbe4   : > { %4953 = vst.msk [vmem:[%s257_s12 + $0x8] sm:$0xff] %vm4951_vm9, %v4940_v58 }
 0xbe5 PF: > { %p14_p7 = scmp.ge.s32.totalorder %s6568_s20, 4   ;;  %s11272_s15 = smov %s6501_s16 }
 0xbe6   : > { %s11273_s16 = smov %s6505_s17  ;;  %s11274_s17 = smov %s6578_s23 }
 0xbe7   : > { %s11275_s18 = smov %s6568_s20  ;;  %16 = sbr.rel (!%p14_p7) target bundleno = 3 (0x3), region = 82 }
 0xbee   :  { %4977 = vsyncpa [#allocation3], 1 }
 0xbef   :  { %4979 = vsyncpa [#allocation3 + $0x1], 1 }

</bundles_post_ra>
